<compile_context>
chip_gen: v6e
topology: v6e:2x2x1
jax: 0.10.0
libtpu: 0.0.40
codegen_flags: <defaults>
</compile_context>

<pallas_src>
import jax
import jax.numpy as jnp
from jax import lax
from jax.experimental import pallas as pl
from jax.experimental.pallas import tpu as pltpu

# ----------------------------- model config (small) -------------------------
EMB_DIM = 100            # hardcoded by firstconv kernel_size=(3, 100)
VOCAB = 20
FIRST_CONV_CH = 8
GROWTH = 4
DOWN_BLOCKS = (2, 2)
UP_BLOCKS = (2, 2)
BOTTLENECK_LAYERS = 2
N_CLASSES = 4

# bf16 operands + f32 accumulation for all conv matmuls.
MATMUL_DTYPE = jnp.bfloat16


# ----------------------------- parameter init --------------------------------
def _normal(key, shape, scale=0.1):
    return scale * jax.random.normal(key, shape, jnp.float32)


def init_bn(key, c):
    k1, k2, k3, k4 = jax.random.split(key, 4)
    gamma = 1.0 + 0.1 * jax.random.normal(k1, (c,), jnp.float32)
    beta = 0.1 * jax.random.normal(k2, (c,), jnp.float32)
    rmean = 0.1 * jax.random.normal(k3, (c,), jnp.float32)
    rvar = 1.0 + 0.1 * jax.random.uniform(k4, (c,), jnp.float32)
    eps = 1e-5
    scale = gamma / jnp.sqrt(rvar + eps)
    shift = beta - rmean * scale
    return scale, shift


def init_dense_layer(key, cin, growth):
    kb, kw, kbias = jax.random.split(key, 3)
    scale, shift = init_bn(kb, cin)
    return dict(scale=scale, shift=shift,
                w=_normal(kw, (11, cin, growth)),          # conv (11,1), pad (5,0)
                b=_normal(kbias, (growth,), 0.05))


def init_transition_down(key, c):
    kb, kw, kbias = jax.random.split(key, 3)
    scale, shift = init_bn(kb, c)
    return dict(scale=scale, shift=shift,
                w=_normal(kw, (1, c, c)),                  # 1x1 conv
                b=_normal(kbias, (c,), 0.05))


def init_transition_up(key, cin, cout):
    kw, kbias = jax.random.split(key)
    return dict(w=_normal(kw, (3, cin, cout)),             # convT (3,1), stride 2
                b=_normal(kbias, (cout,), 0.05))


def build_params(key):
    keys = iter(jax.random.split(key, 64))
    params = {}
    params['emb'] = _normal(next(keys), (VOCAB, EMB_DIM), 1.0)
    params['firstconv'] = dict(w=_normal(next(keys), (3, EMB_DIM, FIRST_CONV_CH)),
                               b=_normal(next(keys), (FIRST_CONV_CH,), 0.05))
    cur = FIRST_CONV_CH
    skip_counts = []
    params['down_dense'] = []
    params['down_trans'] = []
    for nb in DOWN_BLOCKS:
        layers = []
        for _ in range(nb):
            layers.append(init_dense_layer(next(keys), cur, GROWTH))
            cur += GROWTH
        params['down_dense'].append(layers)
        skip_counts.insert(0, cur)
        params['down_trans'].append(init_transition_down(next(keys), cur))
    layers = []
    c = cur
    for _ in range(BOTTLENECK_LAYERS):
        layers.append(init_dense_layer(next(keys), c, GROWTH))
        c += GROWTH
    params['bottleneck'] = layers
    prev = GROWTH * BOTTLENECK_LAYERS

    params['up_trans'] = []
    params['up_dense'] = []
    for i in range(len(UP_BLOCKS) - 1):
        params['up_trans'].append(init_transition_up(next(keys), prev, prev))
        c = prev + skip_counts[i]
        layers = []
        for _ in range(UP_BLOCKS[i]):
            layers.append(init_dense_layer(next(keys), c, GROWTH))
            c += GROWTH
        params['up_dense'].append(layers)
        prev = GROWTH * UP_BLOCKS[i]
    params['up_trans'].append(init_transition_up(next(keys), prev, prev))
    c = prev + skip_counts[-1]
    layers = []
    for _ in range(UP_BLOCKS[-1]):
        layers.append(init_dense_layer(next(keys), c, GROWTH))
        c += GROWTH
    params['up_dense'].append(layers)
    cur = c
    params['finalconv'] = dict(w=_normal(next(keys), (1, cur, N_CLASSES)),
                               b=_normal(next(keys), (N_CLASSES,), 0.05))
    return params


# ----------------------------- channel bookkeeping ---------------------------
def _channel_plan():
    cs_down = []
    cur = FIRST_CONV_CH
    for nb in DOWN_BLOCKS:
        cur += GROWTH * nb
        cs_down.append(cur)                      # skip / down-slab channels per level
    c_bottle = cs_down[-1] + GROWTH * BOTTLENECK_LAYERS
    prev = GROWTH * BOTTLENECK_LAYERS
    cs_up = []
    for i, nb in enumerate(UP_BLOCKS):
        skip_c = cs_down[len(DOWN_BLOCKS) - 1 - i]
        cs_up.append(prev + skip_c + GROWTH * nb)
        prev = GROWTH * nb
    return cs_down, c_bottle, cs_up


def _prep_kernel_params(params):
    """Reshape params into the 2-D layouts the fused kernel consumes."""
    mm = MATMUL_DTYPE

    def conv(p):
        k, cin, cout = p['w'].shape
        return dict(w=p['w'].reshape(k * cin, cout).astype(mm),
                    b=p['b'].reshape(1, -1))

    def dense(p):
        d = conv(p)
        d['scale'] = p['scale'].reshape(1, -1)
        d['shift'] = p['shift'].reshape(1, -1)
        return d

    def trans_up(p):
        _, cin, cout = p['w'].shape
        w_all = jnp.transpose(p['w'], (1, 0, 2)).reshape(cin, 3 * cout)
        return dict(w=w_all.astype(mm), b=p['b'].reshape(1, -1))

    return dict(
        emb=params['emb'],
        firstconv=conv(params['firstconv']),
        down_dense=[[dense(l) for l in blk] for blk in params['down_dense']],
        down_trans=[dense(p) for p in params['down_trans']],
        bottleneck=[dense(l) for l in params['bottleneck']],
        up_trans=[trans_up(p) for p in params['up_trans']],
        up_dense=[[dense(l) for l in blk] for blk in params['up_dense']],
        finalconv=conv(params['finalconv']),
    )


# ----------------------------- in-kernel building blocks ---------------------
def _bn_relu(x, scale, shift):
    # eval-mode BatchNorm folded into scale/shift, then ReLU (VPU, f32)
    return jnp.maximum(x * scale + shift, 0.0)


def _conv1d_same(x, w_ref, b_ref, col_ref):
    """'Same'-padded 1-D conv along rows as a single im2col matmul.

    x: (H, Cin) f32 value.  w_ref: (K*Cin, Cout) matmul-dtype weight.
    col_ref: f32 VMEM scratch used to build the (H, K*Cin) patch matrix; the
    zero padding is written straight into the scratch (no jnp.pad / HBM copy).
    """
    h, cin = x.shape
    kc, cout = w_ref.shape
    assert kc % cin == 0
    k_taps = kc // cin
    b = b_ref[...]
    if k_taps == 1:                                         # 1x1 conv
        return jnp.dot(x.astype(MATMUL_DTYPE), w_ref[...],
                       preferred_element_type=jnp.float32) + b
    pad = (k_taps - 1) // 2
    for k in range(k_taps):
        s = k - pad                                         # row shift of this tap
        n_valid = max(0, h - abs(s))
        lo_d, lo_s = max(0, -s), max(0, s)
        if n_valid > 0:
            col_ref[lo_d:lo_d + n_valid, k * cin:(k + 1) * cin] = \
                x[lo_s:lo_s + n_valid, :]
        if s < 0:                                           # zero top boundary rows
            z = min(-s, h)
            col_ref[0:z, k * cin:(k + 1) * cin] = jnp.zeros((z, cin), jnp.float32)
        elif s > 0:                                         # zero bottom boundary rows
            z = min(s, h)
            col_ref[h - z:h, k * cin:(k + 1) * cin] = jnp.zeros((z, cin), jnp.float32)
    col = col_ref[0:h, 0:kc].astype(MATMUL_DTYPE)
    return jnp.dot(col, w_ref[...], preferred_element_type=jnp.float32) + b


def _dense_layer(p, x, col_ref):
    # BN(eval) -> ReLU -> Conv2d((11,1), pad (5,0)) -> Dropout2d (identity)
    y = _bn_relu(x, p['scale'][...], p['shift'][...])
    return _conv1d_same(y, p['w'], p['b'], col_ref)


def _maxpool2(y):
    """MaxPool2d((2,1)): pairwise max of adjacent rows via 0/1 gather matmuls
    (stays on MXU/VPU; no strided slices or sublane reshapes needed)."""
    h, _ = y.shape
    h2 = h // 2
    i = lax.broadcasted_iota(jnp.int32, (h2, h), 0)
    j = lax.broadcasted_iota(jnp.int32, (h2, h), 1)
    g_even = jnp.where(j == 2 * i, 1.0, 0.0)
    g_odd = jnp.where(j == 2 * i + 1, 1.0, 0.0)
    even = jnp.dot(g_even, y, preferred_element_type=jnp.float32)
    odd = jnp.dot(g_odd, y, preferred_element_type=jnp.float32)
    return jnp.maximum(even, odd)


def _conv_transpose_up(x, w_ref, b_ref, out_rows):
    """ConvTranspose2d((3,1), stride 2) along rows fused with center_crop.

    x: (h, Cin).  w_ref: (Cin, 3*Cout) (tap-major columns).  Returns the
    center-cropped (out_rows, Cout) result.  The stride-2 interleave and the
    crop are expressed with 0/1 scatter matmuls, so no strided stores or
    reshapes are required.  full[j] = sum_{i,k: j == 2i+k} x[i] @ W_k + b.
    """
    h, _ = x.shape
    cout = w_ref.shape[1] // 3
    prod = jnp.dot(x.astype(MATMUL_DTYPE), w_ref[...],
                   preferred_element_type=jnp.float32)          # (h, 3*Cout)
    start = (2 * h + 1 - out_rows) // 2                         # center_crop offset
    r = lax.broadcasted_iota(jnp.int32, (out_rows, h), 0) + start
    i = lax.broadcasted_iota(jnp.int32, (out_rows, h), 1)
    out = jnp.zeros((out_rows, cout), jnp.float32)
    for k in range(3):
        g = jnp.where(r == 2 * i + k, 1.0, 0.0)                 # (out_rows, h)
        out = out + jnp.dot(g, prod[:, k * cout:(k + 1) * cout],
                            preferred_element_type=jnp.float32)
    return out + b_ref[...]


# ----------------------------- fused forward ----------------------------------
def fcdensenet_forward(params, tokens):
    """Full FCDenseNet forward as one fused pallas_call (grid over batch)."""
    B, H = tokens.shape
    levels = len(DOWN_BLOCKS)
    assert H % (2 ** levels) == 0, "H must be divisible by 2**len(DOWN_BLOCKS)"

    cs_down, c_bottle, cs_up = _channel_plan()
    hs = [H // (2 ** l) for l in range(levels + 1)]             # seq length per level
    for i in range(len(UP_BLOCKS)):                             # crop must fit the skip
        assert 2 * hs[levels - i] + 1 >= hs[levels - 1 - i]

    kparams = _prep_kernel_params(params)
    flat, treedef = jax.tree_util.tree_flatten(kparams)
    n_params = len(flat)

    # im2col scratch wide enough for the widest conv patch matrix (K*Cin)
    col_w = max(l.shape[0] for l in flat)
    col_w = ((col_w + 127) // 128) * 128

    def kernel(tok_ref, *refs):
        kp = jax.tree_util.tree_unflatten(treedef, refs[:n_params])
        out_ref = refs[n_params]
        scr = refs[n_params + 1:]
        col_ref = scr[0]
        down_slabs = list(scr[1:1 + levels])
        bottle_slab = scr[1 + levels]
        up_slabs = list(scr[2 + levels:2 + levels + len(UP_BLOCKS)])

        # ---- embedding lookup as a one-hot matmul (table is VMEM resident) ----
        tok = tok_ref[0]                                        # (H, 1) int32
        onehot = jnp.where(tok == lax.broadcasted_iota(jnp.int32, (H, VOCAB), 1),
                           1.0, 0.0)                            # (H, VOCAB) f32
        x = jnp.dot(onehot, kp['emb'][...],
                    preferred_element_type=jnp.float32)         # (H, EMB_DIM)

        # ---- firstconv: Conv2d(1, C0, (3, EMB_DIM), pad (1, 0)) ----
        down_slabs[0][0:H, 0:FIRST_CONV_CH] = _conv1d_same(
            x, kp['firstconv']['w'], kp['firstconv']['b'], col_ref)

        # ---- down path: dense blocks (growth into the slab) + transition down ----
        cur_c = FIRST_CONV_CH
        for lvl in range(levels):
            slab, h = down_slabs[lvl], hs[lvl]
            for lp in kp['down_dense'][lvl]:
                o = _dense_layer(lp, slab[0:h, 0:cur_c], col_ref)
                slab[0:h, cur_c:cur_c + GROWTH] = o
                cur_c += GROWTH
            # TransitionDown: BN -> ReLU -> 1x1 conv -> (dropout) -> MaxPool(2,1)
            tp = kp['down_trans'][lvl]
            y = _bn_relu(slab[0:h, 0:cur_c], tp['scale'][...], tp['shift'][...])
            y = _conv1d_same(y, tp['w'], tp['b'], col_ref)
            pooled = _maxpool2(y)
            nxt = down_slabs[lvl + 1] if lvl + 1 < levels else bottle_slab
            nxt[0:h // 2, 0:cur_c] = pooled

        # ---- bottleneck (upsample=True: block output is the new features only) ----
        hb = hs[-1]
        new0 = cur_c
        for lp in kp['bottleneck']:
            o = _dense_layer(lp, bottle_slab[0:hb, 0:cur_c], col_ref)
            bottle_slab[0:hb, cur_c:cur_c + GROWTH] = o
            cur_c += GROWTH
        prev_c = GROWTH * BOTTLENECK_LAYERS
        up_in = bottle_slab[0:hb, new0:new0 + prev_c]

        # ---- up path: transition up (convT + crop + skip concat) + dense block ----
        final_in = None
        for i in range(len(UP_BLOCKS)):
            skip_lvl = levels - 1 - i
            sh = hs[skip_lvl]
            skip_c = cs_down[skip_lvl]
            uslab = up_slabs[i]
            up = _conv_transpose_up(up_in, kp['up_trans'][i]['w'],
                                    kp['up_trans'][i]['b'], sh)
            uslab[0:sh, 0:prev_c] = up
            uslab[0:sh, prev_c:prev_c + skip_c] = \
                down_slabs[skip_lvl][0:sh, 0:skip_c]
            cc = prev_c + skip_c
            new0 = cc
            for lp in kp['up_dense'][i]:
                o = _dense_layer(lp, uslab[0:sh, 0:cc], col_ref)
                uslab[0:sh, cc:cc + GROWTH] = o
                cc += GROWTH
            if i < len(UP_BLOCKS) - 1:                          # upsample=True
                prev_c = GROWTH * len(kp['up_dense'][i])
                up_in = uslab[0:sh, new0:new0 + prev_c]
            else:                                               # last: full concat
                final_in = uslab[0:sh, 0:cc]

        # ---- final 1x1 conv + log-softmax over classes ----
        logits = _conv1d_same(final_in, kp['finalconv']['w'],
                              kp['finalconv']['b'], col_ref)
        m = jnp.max(logits, axis=-1, keepdims=True)
        s = logits - m
        out_ref[0] = s - jnp.log(jnp.sum(jnp.exp(s), axis=-1, keepdims=True))

    in_specs = [pl.BlockSpec((1, H, 1), lambda b: (b, 0, 0))]
    for leaf in flat:
        in_specs.append(pl.BlockSpec(leaf.shape,
                                     lambda b, nd=leaf.ndim: (0,) * nd))

    scratch = [pltpu.VMEM((H, col_w), jnp.float32)]             # im2col scratch
    for lvl in range(levels):
        scratch.append(pltpu.VMEM((hs[lvl], cs_down[lvl]), jnp.float32))
    scratch.append(pltpu.VMEM((hs[-1], c_bottle), jnp.float32))
    for i in range(len(UP_BLOCKS)):
        scratch.append(pltpu.VMEM((hs[levels - 1 - i], cs_up[i]), jnp.float32))

    return pl.pallas_call(
        kernel,
        out_shape=jax.ShapeDtypeStruct((B, H, N_CLASSES), jnp.float32),
        grid=(B,),                                              # batch -> programs
        in_specs=in_specs,
        out_specs=pl.BlockSpec((1, H, N_CLASSES), lambda b: (b, 0, 0)),
        scratch_shapes=scratch,
        compiler_params=pltpu.CompilerParams(
            dimension_semantics=("parallel",)),                 # v7x: 1 TC per batch
    )(tokens.reshape(B, H, 1), *flat)


# ----------------------------- pure-JAX reference -----------------------------
def _mm(a, b):
    return jnp.dot(a.astype(MATMUL_DTYPE), b.astype(MATMUL_DTYPE),
                   preferred_element_type=jnp.float32)


def _ref_conv1d(x, w, b):
    B, H, Cin = x.shape
    K, _, Cout = w.shape
    P = (K - 1) // 2
    xp = jnp.pad(x, ((0, 0), (P, P), (0, 0)))
    cols = jnp.concatenate([xp[:, k:k + H, :] for k in range(K)], axis=-1)
    out = _mm(cols.reshape(B * H, K * Cin), w.reshape(K * Cin, Cout))
    return out.reshape(B, H, Cout) + b


def _ref_bn_relu(x, scale, shift):
    return jnp.maximum(x * scale + shift, 0.0)


def _ref_dense_layer(p, x):
    return _ref_conv1d(_ref_bn_relu(x, p['scale'], p['shift']), p['w'], p['b'])


def _ref_dense_block(layers, x, upsample):
    feats = []
    for p in layers:
        o = _ref_dense_layer(p, x)
        x = jnp.concatenate([x, o], axis=-1)
        feats.append(o)
    return jnp.concatenate(feats, axis=-1) if upsample else x


def _ref_transition_down(p, x):
    y = _ref_bn_relu(x, p['scale'], p['shift'])
    y = _ref_conv1d(y, p['w'], p['b'])
    B, H, C = y.shape
    return jnp.max(y.reshape(B, H // 2, 2, C), axis=2)


def _ref_transition_up(p, x, skip):
    B, h, Cin = x.shape
    Cout = p['w'].shape[2]
    full = jnp.zeros((B, 2 * h + 1, Cout), jnp.float32)
    for k in range(3):
        tap = _mm(x.reshape(B * h, Cin), p['w'][k]).reshape(B, h, Cout)
        full = full.at[:, k:k + 2 * h:2, :].add(tap)
    full = full + p['b']
    sh = skip.shape[1]
    start = (full.shape[1] - sh) // 2
    return jnp.concatenate([full[:, start:start + sh, :], skip], axis=-1)


def _reference_forward(params, tokens):
    x = params['emb'][tokens]
    out = _ref_conv1d(x, params['firstconv']['w'], params['firstconv']['b'])
    skips = []
    for i in range(len(DOWN_BLOCKS)):
        out = _ref_dense_block(params['down_dense'][i], out, False)
        skips.append(out)
        out = _ref_transition_down(params['down_trans'][i], out)
    out = _ref_dense_block(params['bottleneck'], out, True)
    for i in range(len(UP_BLOCKS)):
        skip = skips.pop()
        out = _ref_transition_up(params['up_trans'][i], out, skip)
        out = _ref_dense_block(params['up_dense'][i], out, i < len(UP_BLOCKS) - 1)
    out = _ref_conv1d(out, params['finalconv']['w'], params['finalconv']['b'])
    return jax.nn.log_softmax(out, axis=-1)


# ----------------------------- main -------------------------------------------
if __name__ == "__main__":
    key = jax.random.PRNGKey(0)
    pkey, dkey = jax.random.split(key)
    params = build_params(pkey)

    B, H = 2, 16                                   # H divisible by 2**len(DOWN_BLOCKS)
    tokens = jax.random.randint(dkey, (B, H), 0, VOCAB, dtype=jnp.int32)

    forward = jax.jit(fcdensenet_forward)
    out = jax.block_until_ready(forward(params, tokens))

    assert out.shape == (B, H, N_CLASSES), out.shape
    assert bool(jnp.all(jnp.isfinite(out)))
    # log-softmax rows should (log-)sum to ~1
    assert bool(jnp.allclose(jnp.sum(jnp.exp(out), axis=-1), 1.0, atol=1e-4))

    # cross-check the fused kernel against a pure-JAX/XLA reference of the model
    ref = jax.block_until_ready(jax.jit(_reference_forward)(params, tokens))
    assert bool(jnp.allclose(out, ref, atol=5e-2, rtol=5e-2)), \
        float(jnp.max(jnp.abs(out - ref)))

    print("KERNEL_OK")
</pallas_src>

<mosaic_0001>
module attributes {stable_mosaic.version = 11 : i64} {
  func.func @kernel(%arg0: i32, %arg1: memref<1x16x1xi32, #tpu.memory_space<vmem>>, %arg2: memref<1x4xf32, #tpu.memory_space<vmem>>, %arg3: memref<1x24xf32, #tpu.memory_space<vmem>>, %arg4: memref<1x24xf32, #tpu.memory_space<vmem>>, %arg5: memref<264x4xbf16, #tpu.memory_space<vmem>>, %arg6: memref<1x4xf32, #tpu.memory_space<vmem>>, %arg7: memref<1x28xf32, #tpu.memory_space<vmem>>, %arg8: memref<1x28xf32, #tpu.memory_space<vmem>>, %arg9: memref<308x4xbf16, #tpu.memory_space<vmem>>, %arg10: memref<1x4xf32, #tpu.memory_space<vmem>>, %arg11: memref<1x8xf32, #tpu.memory_space<vmem>>, %arg12: memref<1x8xf32, #tpu.memory_space<vmem>>, %arg13: memref<88x4xbf16, #tpu.memory_space<vmem>>, %arg14: memref<1x4xf32, #tpu.memory_space<vmem>>, %arg15: memref<1x12xf32, #tpu.memory_space<vmem>>, %arg16: memref<1x12xf32, #tpu.memory_space<vmem>>, %arg17: memref<132x4xbf16, #tpu.memory_space<vmem>>, %arg18: memref<1x4xf32, #tpu.memory_space<vmem>>, %arg19: memref<1x16xf32, #tpu.memory_space<vmem>>, %arg20: memref<1x16xf32, #tpu.memory_space<vmem>>, %arg21: memref<176x4xbf16, #tpu.memory_space<vmem>>, %arg22: memref<1x4xf32, #tpu.memory_space<vmem>>, %arg23: memref<1x20xf32, #tpu.memory_space<vmem>>, %arg24: memref<1x20xf32, #tpu.memory_space<vmem>>, %arg25: memref<220x4xbf16, #tpu.memory_space<vmem>>, %arg26: memref<1x16xf32, #tpu.memory_space<vmem>>, %arg27: memref<1x16xf32, #tpu.memory_space<vmem>>, %arg28: memref<1x16xf32, #tpu.memory_space<vmem>>, %arg29: memref<16x16xbf16, #tpu.memory_space<vmem>>, %arg30: memref<1x24xf32, #tpu.memory_space<vmem>>, %arg31: memref<1x24xf32, #tpu.memory_space<vmem>>, %arg32: memref<1x24xf32, #tpu.memory_space<vmem>>, %arg33: memref<24x24xbf16, #tpu.memory_space<vmem>>, %arg34: memref<20x100xf32, #tpu.memory_space<vmem>>, %arg35: memref<1x4xf32, #tpu.memory_space<vmem>>, %arg36: memref<32x4xbf16, #tpu.memory_space<vmem>>, %arg37: memref<1x8xf32, #tpu.memory_space<vmem>>, %arg38: memref<300x8xbf16, #tpu.memory_space<vmem>>, %arg39: memref<1x4xf32, #tpu.memory_space<vmem>>, %arg40: memref<1x32xf32, #tpu.memory_space<vmem>>, %arg41: memref<1x32xf32, #tpu.memory_space<vmem>>, %arg42: memref<352x4xbf16, #tpu.memory_space<vmem>>, %arg43: memref<1x4xf32, #tpu.memory_space<vmem>>, %arg44: memref<1x36xf32, #tpu.memory_space<vmem>>, %arg45: memref<1x36xf32, #tpu.memory_space<vmem>>, %arg46: memref<396x4xbf16, #tpu.memory_space<vmem>>, %arg47: memref<1x4xf32, #tpu.memory_space<vmem>>, %arg48: memref<1x24xf32, #tpu.memory_space<vmem>>, %arg49: memref<1x24xf32, #tpu.memory_space<vmem>>, %arg50: memref<264x4xbf16, #tpu.memory_space<vmem>>, %arg51: memref<1x4xf32, #tpu.memory_space<vmem>>, %arg52: memref<1x28xf32, #tpu.memory_space<vmem>>, %arg53: memref<1x28xf32, #tpu.memory_space<vmem>>, %arg54: memref<308x4xbf16, #tpu.memory_space<vmem>>, %arg55: memref<1x8xf32, #tpu.memory_space<vmem>>, %arg56: memref<8x24xbf16, #tpu.memory_space<vmem>>, %arg57: memref<1x8xf32, #tpu.memory_space<vmem>>, %arg58: memref<8x24xbf16, #tpu.memory_space<vmem>>, %arg59: memref<1x16x4xf32, #tpu.memory_space<vmem>>, %arg60: memref<16x512xf32, #tpu.memory_space<vmem>>, %arg61: memref<16x16xf32, #tpu.memory_space<vmem>>, %arg62: memref<8x24xf32, #tpu.memory_space<vmem>>, %arg63: memref<4x32xf32, #tpu.memory_space<vmem>>, %arg64: memref<8x40xf32, #tpu.memory_space<vmem>>, %arg65: memref<16x32xf32, #tpu.memory_space<vmem>>) attributes {dimension_semantics = [#tpu.dimension_semantics<parallel>], iteration_bounds = array<i64: 2>, scalar_prefetch = 0 : i64, scratch_operands = 6 : i64, tpu.core_type = #tpu.core_type<tc>, window_params = [{transform_indices = @transform_0, window_bounds = array<i64: 1, 16, 1>}, {pipeline_mode = #tpu.pipeline_mode<synchronous>, transform_indices = @transform_1, window_bounds = array<i64: 1, 4>}, {pipeline_mode = #tpu.pipeline_mode<synchronous>, transform_indices = @transform_2, window_bounds = array<i64: 1, 24>}, {pipeline_mode = #tpu.pipeline_mode<synchronous>, transform_indices = @transform_3, window_bounds = array<i64: 1, 24>}, {pipeline_mode = #tpu.pipeline_mode<synchronous>, transform_indices = @transform_4, window_bounds = array<i64: 264, 4>}, {pipeline_mode = #tpu.pipeline_mode<synchronous>, transform_indices = @transform_5, window_bounds = array<i64: 1, 4>}, {pipeline_mode = #tpu.pipeline_mode<synchronous>, transform_indices = @transform_6, window_bounds = array<i64: 1, 28>}, {pipeline_mode = #tpu.pipeline_mode<synchronous>, transform_indices = @transform_7, window_bounds = array<i64: 1, 28>}, {pipeline_mode = #tpu.pipeline_mode<synchronous>, transform_indices = @transform_8, window_bounds = array<i64: 308, 4>}, {pipeline_mode = #tpu.pipeline_mode<synchronous>, transform_indices = @transform_9, window_bounds = array<i64: 1, 4>}, {pipeline_mode = #tpu.pipeline_mode<synchronous>, transform_indices = @transform_10, window_bounds = array<i64: 1, 8>}, {pipeline_mode = #tpu.pipeline_mode<synchronous>, transform_indices = @transform_11, window_bounds = array<i64: 1, 8>}, {pipeline_mode = #tpu.pipeline_mode<synchronous>, transform_indices = @transform_12, window_bounds = array<i64: 88, 4>}, {pipeline_mode = #tpu.pipeline_mode<synchronous>, transform_indices = @transform_13, window_bounds = array<i64: 1, 4>}, {pipeline_mode = #tpu.pipeline_mode<synchronous>, transform_indices = @transform_14, window_bounds = array<i64: 1, 12>}, {pipeline_mode = #tpu.pipeline_mode<synchronous>, transform_indices = @transform_15, window_bounds = array<i64: 1, 12>}, {pipeline_mode = #tpu.pipeline_mode<synchronous>, transform_indices = @transform_16, window_bounds = array<i64: 132, 4>}, {pipeline_mode = #tpu.pipeline_mode<synchronous>, transform_indices = @transform_17, window_bounds = array<i64: 1, 4>}, {pipeline_mode = #tpu.pipeline_mode<synchronous>, transform_indices = @transform_18, window_bounds = array<i64: 1, 16>}, {pipeline_mode = #tpu.pipeline_mode<synchronous>, transform_indices = @transform_19, window_bounds = array<i64: 1, 16>}, {pipeline_mode = #tpu.pipeline_mode<synchronous>, transform_indices = @transform_20, window_bounds = array<i64: 176, 4>}, {pipeline_mode = #tpu.pipeline_mode<synchronous>, transform_indices = @transform_21, window_bounds = array<i64: 1, 4>}, {pipeline_mode = #tpu.pipeline_mode<synchronous>, transform_indices = @transform_22, window_bounds = array<i64: 1, 20>}, {pipeline_mode = #tpu.pipeline_mode<synchronous>, transform_indices = @transform_23, window_bounds = array<i64: 1, 20>}, {pipeline_mode = #tpu.pipeline_mode<synchronous>, transform_indices = @transform_24, window_bounds = array<i64: 220, 4>}, {pipeline_mode = #tpu.pipeline_mode<synchronous>, transform_indices = @transform_25, window_bounds = array<i64: 1, 16>}, {pipeline_mode = #tpu.pipeline_mode<synchronous>, transform_indices = @transform_26, window_bounds = array<i64: 1, 16>}, {pipeline_mode = #tpu.pipeline_mode<synchronous>, transform_indices = @transform_27, window_bounds = array<i64: 1, 16>}, {pipeline_mode = #tpu.pipeline_mode<synchronous>, transform_indices = @transform_28, window_bounds = array<i64: 16, 16>}, {pipeline_mode = #tpu.pipeline_mode<synchronous>, transform_indices = @transform_29, window_bounds = array<i64: 1, 24>}, {pipeline_mode = #tpu.pipeline_mode<synchronous>, transform_indices = @transform_30, window_bounds = array<i64: 1, 24>}, {pipeline_mode = #tpu.pipeline_mode<synchronous>, transform_indices = @transform_31, window_bounds = array<i64: 1, 24>}, {pipeline_mode = #tpu.pipeline_mode<synchronous>, transform_indices = @transform_32, window_bounds = array<i64: 24, 24>}, {pipeline_mode = #tpu.pipeline_mode<synchronous>, transform_indices = @transform_33, window_bounds = array<i64: 20, 100>}, {pipeline_mode = #tpu.pipeline_mode<synchronous>, transform_indices = @transform_34, window_bounds = array<i64: 1, 4>}, {pipeline_mode = #tpu.pipeline_mode<synchronous>, transform_indices = @transform_35, window_bounds = array<i64: 32, 4>}, {pipeline_mode = #tpu.pipeline_mode<synchronous>, transform_indices = @transform_36, window_bounds = array<i64: 1, 8>}, {pipeline_mode = #tpu.pipeline_mode<synchronous>, transform_indices = @transform_37, window_bounds = array<i64: 300, 8>}, {pipeline_mode = #tpu.pipeline_mode<synchronous>, transform_indices = @transform_38, window_bounds = array<i64: 1, 4>}, {pipeline_mode = #tpu.pipeline_mode<synchronous>, transform_indices = @transform_39, window_bounds = array<i64: 1, 32>}, {pipeline_mode = #tpu.pipeline_mode<synchronous>, transform_indices = @transform_40, window_bounds = array<i64: 1, 32>}, {pipeline_mode = #tpu.pipeline_mode<synchronous>, transform_indices = @transform_41, window_bounds = array<i64: 352, 4>}, {pipeline_mode = #tpu.pipeline_mode<synchronous>, transform_indices = @transform_42, window_bounds = array<i64: 1, 4>}, {pipeline_mode = #tpu.pipeline_mode<synchronous>, transform_indices = @transform_43, window_bounds = array<i64: 1, 36>}, {pipeline_mode = #tpu.pipeline_mode<synchronous>, transform_indices = @transform_44, window_bounds = array<i64: 1, 36>}, {pipeline_mode = #tpu.pipeline_mode<synchronous>, transform_indices = @transform_45, window_bounds = array<i64: 396, 4>}, {pipeline_mode = #tpu.pipeline_mode<synchronous>, transform_indices = @transform_46, window_bounds = array<i64: 1, 4>}, {pipeline_mode = #tpu.pipeline_mode<synchronous>, transform_indices = @transform_47, window_bounds = array<i64: 1, 24>}, {pipeline_mode = #tpu.pipeline_mode<synchronous>, transform_indices = @transform_48, window_bounds = array<i64: 1, 24>}, {pipeline_mode = #tpu.pipeline_mode<synchronous>, transform_indices = @transform_49, window_bounds = array<i64: 264, 4>}, {pipeline_mode = #tpu.pipeline_mode<synchronous>, transform_indices = @transform_50, window_bounds = array<i64: 1, 4>}, {pipeline_mode = #tpu.pipeline_mode<synchronous>, transform_indices = @transform_51, window_bounds = array<i64: 1, 28>}, {pipeline_mode = #tpu.pipeline_mode<synchronous>, transform_indices = @transform_52, window_bounds = array<i64: 1, 28>}, {pipeline_mode = #tpu.pipeline_mode<synchronous>, transform_indices = @transform_53, window_bounds = array<i64: 308, 4>}, {pipeline_mode = #tpu.pipeline_mode<synchronous>, transform_indices = @transform_54, window_bounds = array<i64: 1, 8>}, {pipeline_mode = #tpu.pipeline_mode<synchronous>, transform_indices = @transform_55, window_bounds = array<i64: 8, 24>}, {pipeline_mode = #tpu.pipeline_mode<synchronous>, transform_indices = @transform_56, window_bounds = array<i64: 1, 8>}, {pipeline_mode = #tpu.pipeline_mode<synchronous>, transform_indices = @transform_57, window_bounds = array<i64: 8, 24>}, {transform_indices = @transform_58, window_bounds = array<i64: 1, 16, 4>}]} {
    %c0 = arith.constant 0 : index
    %c0_0 = arith.constant 0 : index
    %c0_1 = arith.constant 0 : index
    %0 = vector.load %arg1[%c0, %c0_0, %c0_1] : memref<1x16x1xi32, #tpu.memory_space<vmem>>, vector<1x16x1xi32>
    %1 = vector.shape_cast %0 : vector<1x16x1xi32> to vector<16x1xi32>
    %2 = tpu.iota {dimensions = array<i32: 1>} : vector<16x20xi32>
    %3 = vector.broadcast %1 : vector<16x1xi32> to vector<16x20xi32>
    %4 = arith.cmpi eq, %3, %2 : vector<16x20xi32>
    %cst = arith.constant 1.000000e+00 : f32
    %cst_2 = arith.constant 0.000000e+00 : f32
    %5 = vector.broadcast %cst : f32 to vector<16x20xf32>
    %6 = vector.broadcast %cst_2 : f32 to vector<16x20xf32>
    %7 = arith.select %4, %5, %6 : vector<16x20xi1>, vector<16x20xf32>
    %c0_3 = arith.constant 0 : index
    %c0_4 = arith.constant 0 : index
    %8 = vector.load %arg34[%c0_3, %c0_4] : memref<20x100xf32, #tpu.memory_space<vmem>>, vector<20x100xf32>
    %cst_5 = arith.constant dense<0.000000e+00> : vector<16x100xf32>
    %9 = tpu.matmul %7, %8, %cst_5 {dimension_numbers = #tpu.dot_dimension_numbers<[1], [0], [0], [1], [0, 0, 1, 1], [], []>} : vector<16x20xf32>, vector<20x100xf32>, vector<16x100xf32> -> vector<16x100xf32>
    %c0_6 = arith.constant 0 : index
    %c0_7 = arith.constant 0 : index
    %10 = vector.load %arg37[%c0_6, %c0_7] : memref<1x8xf32, #tpu.memory_space<vmem>>, vector<1x8xf32>
    %11 = vector.extract_strided_slice %9 {offsets = [0, 0], sizes = [15, 100], strides = [1, 1]} : vector<16x100xf32> to vector<15x100xf32>
    %c1 = arith.constant 1 : index
    %c0_8 = arith.constant 0 : index
    %12 = vector.load %arg60[%c1, %c0_8] : memref<16x512xf32, #tpu.memory_space<vmem>>, vector<15x100xf32>
    tpu.vector_store %arg60[%c1, %c0_8], %11 {strides = array<i32>} : memref<16x512xf32, #tpu.memory_space<vmem>>, vector<15x100xf32>,
    %cst_9 = arith.constant 0.000000e+00 : f32
    %13 = vector.broadcast %cst_9 : f32 to vector<1x100xf32>
    %c0_10 = arith.constant 0 : index
    %c0_11 = arith.constant 0 : index
    %14 = vector.load %arg60[%c0_10, %c0_11] : memref<16x512xf32, #tpu.memory_space<vmem>>, vector<1x100xf32>
    tpu.vector_store %arg60[%c0_10, %c0_11], %13 {strides = array<i32>} : memref<16x512xf32, #tpu.memory_space<vmem>>, vector<1x100xf32>,
    %c0_12 = arith.constant 0 : index
    %c100 = arith.constant 100 : index
    %15 = vector.load %arg60[%c0_12, %c100] : memref<16x512xf32, #tpu.memory_space<vmem>>, vector<16x100xf32>
    tpu.vector_store %arg60[%c0_12, %c100], %9 {strides = array<i32>} : memref<16x512xf32, #tpu.memory_space<vmem>>, vector<16x100xf32>,
    %16 = vector.extract_strided_slice %9 {offsets = [1, 0], sizes = [15, 100], strides = [1, 1]} : vector<16x100xf32> to vector<15x100xf32>
    %c0_13 = arith.constant 0 : index
    %c200 = arith.constant 200 : index
    %17 = vector.load %arg60[%c0_13, %c200] : memref<16x512xf32, #tpu.memory_space<vmem>>, vector<15x100xf32>
    tpu.vector_store %arg60[%c0_13, %c200], %16 {strides = array<i32>} : memref<16x512xf32, #tpu.memory_space<vmem>>, vector<15x100xf32>,
    %cst_14 = arith.constant 0.000000e+00 : f32
    %18 = vector.broadcast %cst_14 : f32 to vector<1x100xf32>
    %c15 = arith.constant 15 : index
    %c200_15 = arith.constant 200 : index
    %19 = vector.load %arg60[%c15, %c200_15] : memref<16x512xf32, #tpu.memory_space<vmem>>, vector<1x100xf32>
    tpu.vector_store %arg60[%c15, %c200_15], %18 {strides = array<i32>} : memref<16x512xf32, #tpu.memory_space<vmem>>, vector<1x100xf32>,
    %c0_16 = arith.constant 0 : index
    %c0_17 = arith.constant 0 : index
    %20 = vector.load %arg60[%c0_16, %c0_17] : memref<16x512xf32, #tpu.memory_space<vmem>>, vector<16x300xf32>
    %21 = arith.truncf %20 : vector<16x300xf32> to vector<16x300xbf16>
    %c0_18 = arith.constant 0 : index
    %c0_19 = arith.constant 0 : index
    %22 = vector.load %arg38[%c0_18, %c0_19] : memref<300x8xbf16, #tpu.memory_space<vmem>>, vector<300x8xbf16>
    %cst_20 = arith.constant dense<0.000000e+00> : vector<16x8xf32>
    %23 = tpu.matmul %21, %22, %cst_20 {dimension_numbers = #tpu.dot_dimension_numbers<[1], [0], [0], [1], [0, 0, 1, 1], [], []>} : vector<16x300xbf16>, vector<300x8xbf16>, vector<16x8xf32> -> vector<16x8xf32>
    %24 = vector.broadcast %10 : vector<1x8xf32> to vector<16x8xf32>
    %25 = arith.addf %23, %24 : vector<16x8xf32>
    %c0_21 = arith.constant 0 : index
    %c0_22 = arith.constant 0 : index
    %26 = vector.load %arg61[%c0_21, %c0_22] : memref<16x16xf32, #tpu.memory_space<vmem>>, vector<16x8xf32>
    tpu.vector_store %arg61[%c0_21, %c0_22], %25 {strides = array<i32>} : memref<16x16xf32, #tpu.memory_space<vmem>>, vector<16x8xf32>,
    %c0_23 = arith.constant 0 : index
    %c0_24 = arith.constant 0 : index
    %27 = vector.load %arg61[%c0_23, %c0_24] : memref<16x16xf32, #tpu.memory_space<vmem>>, vector<16x8xf32>
    %c0_25 = arith.constant 0 : index
    %c0_26 = arith.constant 0 : index
    %28 = vector.load %arg11[%c0_25, %c0_26] : memref<1x8xf32, #tpu.memory_space<vmem>>, vector<1x8xf32>
    %c0_27 = arith.constant 0 : index
    %c0_28 = arith.constant 0 : index
    %29 = vector.load %arg12[%c0_27, %c0_28] : memref<1x8xf32, #tpu.memory_space<vmem>>, vector<1x8xf32>
    %30 = vector.broadcast %28 : vector<1x8xf32> to vector<16x8xf32>
    %31 = arith.mulf %27, %30 : vector<16x8xf32>
    %32 = vector.broadcast %29 : vector<1x8xf32> to vector<16x8xf32>
    %33 = arith.addf %31, %32 : vector<16x8xf32>
    %cst_29 = arith.constant 0.000000e+00 : f32
    %34 = vector.broadcast %cst_29 : f32 to vector<16x8xf32>
    %35 = arith.maximumf %33, %34 : vector<16x8xf32>
    %c0_30 = arith.constant 0 : index
    %c0_31 = arith.constant 0 : index
    %36 = vector.load %arg10[%c0_30, %c0_31] : memref<1x4xf32, #tpu.memory_space<vmem>>, vector<1x4xf32>
    %37 = vector.extract_strided_slice %35 {offsets = [0, 0], sizes = [11, 8], strides = [1, 1]} : vector<16x8xf32> to vector<11x8xf32>
    %c5 = arith.constant 5 : index
    %c0_32 = arith.constant 0 : index
    %38 = vector.load %arg60[%c5, %c0_32] : memref<16x512xf32, #tpu.memory_space<vmem>>, vector<11x8xf32>
    tpu.vector_store %arg60[%c5, %c0_32], %37 {strides = array<i32>} : memref<16x512xf32, #tpu.memory_space<vmem>>, vector<11x8xf32>,
    %cst_33 = arith.constant 0.000000e+00 : f32
    %39 = vector.broadcast %cst_33 : f32 to vector<5x8xf32>
    %c0_34 = arith.constant 0 : index
    %c0_35 = arith.constant 0 : index
    %40 = vector.load %arg60[%c0_34, %c0_35] : memref<16x512xf32, #tpu.memory_space<vmem>>, vector<5x8xf32>
    tpu.vector_store %arg60[%c0_34, %c0_35], %39 {strides = array<i32>} : memref<16x512xf32, #tpu.memory_space<vmem>>, vector<5x8xf32>,
    %41 = vector.extract_strided_slice %35 {offsets = [0, 0], sizes = [12, 8], strides = [1, 1]} : vector<16x8xf32> to vector<12x8xf32>
    %c4 = arith.constant 4 : index
    %c8 = arith.constant 8 : index
    %42 = vector.load %arg60[%c4, %c8] : memref<16x512xf32, #tpu.memory_space<vmem>>, vector<12x8xf32>
    tpu.vector_store %arg60[%c4, %c8], %41 {strides = array<i32>} : memref<16x512xf32, #tpu.memory_space<vmem>>, vector<12x8xf32>,
    %cst_36 = arith.constant 0.000000e+00 : f32
    %43 = vector.broadcast %cst_36 : f32 to vector<4x8xf32>
    %c0_37 = arith.constant 0 : index
    %c8_38 = arith.constant 8 : index
    %44 = vector.load %arg60[%c0_37, %c8_38] : memref<16x512xf32, #tpu.memory_space<vmem>>, vector<4x8xf32>
    tpu.vector_store %arg60[%c0_37, %c8_38], %43 {strides = array<i32>} : memref<16x512xf32, #tpu.memory_space<vmem>>, vector<4x8xf32>,
    %45 = vector.extract_strided_slice %35 {offsets = [0, 0], sizes = [13, 8], strides = [1, 1]} : vector<16x8xf32> to vector<13x8xf32>
    %c3 = arith.constant 3 : index
    %c16 = arith.constant 16 : index
    %46 = vector.load %arg60[%c3, %c16] : memref<16x512xf32, #tpu.memory_space<vmem>>, vector<13x8xf32>
    tpu.vector_store %arg60[%c3, %c16], %45 {strides = array<i32>} : memref<16x512xf32, #tpu.memory_space<vmem>>, vector<13x8xf32>,
    %cst_39 = arith.constant 0.000000e+00 : f32
    %47 = vector.broadcast %cst_39 : f32 to vector<3x8xf32>
    %c0_40 = arith.constant 0 : index
    %c16_41 = arith.constant 16 : index
    %48 = vector.load %arg60[%c0_40, %c16_41] : memref<16x512xf32, #tpu.memory_space<vmem>>, vector<3x8xf32>
    tpu.vector_store %arg60[%c0_40, %c16_41], %47 {strides = array<i32>} : memref<16x512xf32, #tpu.memory_space<vmem>>, vector<3x8xf32>,
    %49 = vector.extract_strided_slice %35 {offsets = [0, 0], sizes = [14, 8], strides = [1, 1]} : vector<16x8xf32> to vector<14x8xf32>
    %c2 = arith.constant 2 : index
    %c24 = arith.constant 24 : index
    %50 = vector.load %arg60[%c2, %c24] : memref<16x512xf32, #tpu.memory_space<vmem>>, vector<14x8xf32>
    tpu.vector_store %arg60[%c2, %c24], %49 {strides = array<i32>} : memref<16x512xf32, #tpu.memory_space<vmem>>, vector<14x8xf32>,
    %cst_42 = arith.constant 0.000000e+00 : f32
    %51 = vector.broadcast %cst_42 : f32 to vector<2x8xf32>
    %c0_43 = arith.constant 0 : index
    %c24_44 = arith.constant 24 : index
    %52 = vector.load %arg60[%c0_43, %c24_44] : memref<16x512xf32, #tpu.memory_space<vmem>>, vector<2x8xf32>
    tpu.vector_store %arg60[%c0_43, %c24_44], %51 {strides = array<i32>} : memref<16x512xf32, #tpu.memory_space<vmem>>, vector<2x8xf32>,
    %53 = vector.extract_strided_slice %35 {offsets = [0, 0], sizes = [15, 8], strides = [1, 1]} : vector<16x8xf32> to vector<15x8xf32>
    %c1_45 = arith.constant 1 : index
    %c32 = arith.constant 32 : index
    %54 = vector.load %arg60[%c1_45, %c32] : memref<16x512xf32, #tpu.memory_space<vmem>>, vector<15x8xf32>
    tpu.vector_store %arg60[%c1_45, %c32], %53 {strides = array<i32>} : memref<16x512xf32, #tpu.memory_space<vmem>>, vector<15x8xf32>,
    %cst_46 = arith.constant 0.000000e+00 : f32
    %55 = vector.broadcast %cst_46 : f32 to vector<1x8xf32>
    %c0_47 = arith.constant 0 : index
    %c32_48 = arith.constant 32 : index
    %56 = vector.load %arg60[%c0_47, %c32_48] : memref<16x512xf32, #tpu.memory_space<vmem>>, vector<1x8xf32>
    tpu.vector_store %arg60[%c0_47, %c32_48], %55 {strides = array<i32>} : memref<16x512xf32, #tpu.memory_space<vmem>>, vector<1x8xf32>,
    %c0_49 = arith.constant 0 : index
    %c40 = arith.constant 40 : index
    %57 = vector.load %arg60[%c0_49, %c40] : memref<16x512xf32, #tpu.memory_space<vmem>>, vector<16x8xf32>
    tpu.vector_store %arg60[%c0_49, %c40], %35 {strides = array<i32>} : memref<16x512xf32, #tpu.memory_space<vmem>>, vector<16x8xf32>,
    %58 = vector.extract_strided_slice %35 {offsets = [1, 0], sizes = [15, 8], strides = [1, 1]} : vector<16x8xf32> to vector<15x8xf32>
    %c0_50 = arith.constant 0 : index
    %c48 = arith.constant 48 : index
    %59 = vector.load %arg60[%c0_50, %c48] : memref<16x512xf32, #tpu.memory_space<vmem>>, vector<15x8xf32>
    tpu.vector_store %arg60[%c0_50, %c48], %58 {strides = array<i32>} : memref<16x512xf32, #tpu.memory_space<vmem>>, vector<15x8xf32>,
    %cst_51 = arith.constant 0.000000e+00 : f32
    %60 = vector.broadcast %cst_51 : f32 to vector<1x8xf32>
    %c15_52 = arith.constant 15 : index
    %c48_53 = arith.constant 48 : index
    %61 = vector.load %arg60[%c15_52, %c48_53] : memref<16x512xf32, #tpu.memory_space<vmem>>, vector<1x8xf32>
    tpu.vector_store %arg60[%c15_52, %c48_53], %60 {strides = array<i32>} : memref<16x512xf32, #tpu.memory_space<vmem>>, vector<1x8xf32>,
    %62 = vector.extract_strided_slice %35 {offsets = [2, 0], sizes = [14, 8], strides = [1, 1]} : vector<16x8xf32> to vector<14x8xf32>
    %c0_54 = arith.constant 0 : index
    %c56 = arith.constant 56 : index
    %63 = vector.load %arg60[%c0_54, %c56] : memref<16x512xf32, #tpu.memory_space<vmem>>, vector<14x8xf32>
    tpu.vector_store %arg60[%c0_54, %c56], %62 {strides = array<i32>} : memref<16x512xf32, #tpu.memory_space<vmem>>, vector<14x8xf32>,
    %cst_55 = arith.constant 0.000000e+00 : f32
    %64 = vector.broadcast %cst_55 : f32 to vector<2x8xf32>
    %c14 = arith.constant 14 : index
    %c56_56 = arith.constant 56 : index
    %65 = vector.load %arg60[%c14, %c56_56] : memref<16x512xf32, #tpu.memory_space<vmem>>, vector<2x8xf32>
    tpu.vector_store %arg60[%c14, %c56_56], %64 {strides = array<i32>} : memref<16x512xf32, #tpu.memory_space<vmem>>, vector<2x8xf32>,
    %66 = vector.extract_strided_slice %35 {offsets = [3, 0], sizes = [13, 8], strides = [1, 1]} : vector<16x8xf32> to vector<13x8xf32>
    %c0_57 = arith.constant 0 : index
    %c64 = arith.constant 64 : index
    %67 = vector.load %arg60[%c0_57, %c64] : memref<16x512xf32, #tpu.memory_space<vmem>>, vector<13x8xf32>
    tpu.vector_store %arg60[%c0_57, %c64], %66 {strides = array<i32>} : memref<16x512xf32, #tpu.memory_space<vmem>>, vector<13x8xf32>,
    %cst_58 = arith.constant 0.000000e+00 : f32
    %68 = vector.broadcast %cst_58 : f32 to vector<3x8xf32>
    %c13 = arith.constant 13 : index
    %c64_59 = arith.constant 64 : index
    %69 = vector.load %arg60[%c13, %c64_59] : memref<16x512xf32, #tpu.memory_space<vmem>>, vector<3x8xf32>
    tpu.vector_store %arg60[%c13, %c64_59], %68 {strides = array<i32>} : memref<16x512xf32, #tpu.memory_space<vmem>>, vector<3x8xf32>,
    %70 = vector.extract_strided_slice %35 {offsets = [4, 0], sizes = [12, 8], strides = [1, 1]} : vector<16x8xf32> to vector<12x8xf32>
    %c0_60 = arith.constant 0 : index
    %c72 = arith.constant 72 : index
    %71 = vector.load %arg60[%c0_60, %c72] : memref<16x512xf32, #tpu.memory_space<vmem>>, vector<12x8xf32>
    tpu.vector_store %arg60[%c0_60, %c72], %70 {strides = array<i32>} : memref<16x512xf32, #tpu.memory_space<vmem>>, vector<12x8xf32>,
    %cst_61 = arith.constant 0.000000e+00 : f32
    %72 = vector.broadcast %cst_61 : f32 to vector<4x8xf32>
    %c12 = arith.constant 12 : index
    %c72_62 = arith.constant 72 : index
    %73 = vector.load %arg60[%c12, %c72_62] : memref<16x512xf32, #tpu.memory_space<vmem>>, vector<4x8xf32>
    tpu.vector_store %arg60[%c12, %c72_62], %72 {strides = array<i32>} : memref<16x512xf32, #tpu.memory_space<vmem>>, vector<4x8xf32>,
    %74 = vector.extract_strided_slice %35 {offsets = [5, 0], sizes = [11, 8], strides = [1, 1]} : vector<16x8xf32> to vector<11x8xf32>
    %c0_63 = arith.constant 0 : index
    %c80 = arith.constant 80 : index
    %75 = vector.load %arg60[%c0_63, %c80] : memref<16x512xf32, #tpu.memory_space<vmem>>, vector<11x8xf32>
    tpu.vector_store %arg60[%c0_63, %c80], %74 {strides = array<i32>} : memref<16x512xf32, #tpu.memory_space<vmem>>, vector<11x8xf32>,
    %cst_64 = arith.constant 0.000000e+00 : f32
    %76 = vector.broadcast %cst_64 : f32 to vector<5x8xf32>
    %c11 = arith.constant 11 : index
    %c80_65 = arith.constant 80 : index
    %77 = vector.load %arg60[%c11, %c80_65] : memref<16x512xf32, #tpu.memory_space<vmem>>, vector<5x8xf32>
    tpu.vector_store %arg60[%c11, %c80_65], %76 {strides = array<i32>} : memref<16x512xf32, #tpu.memory_space<vmem>>, vector<5x8xf32>,
    %c0_66 = arith.constant 0 : index
    %c0_67 = arith.constant 0 : index
    %78 = vector.load %arg60[%c0_66, %c0_67] : memref<16x512xf32, #tpu.memory_space<vmem>>, vector<16x88xf32>
    %79 = arith.truncf %78 : vector<16x88xf32> to vector<16x88xbf16>
    %c0_68 = arith.constant 0 : index
    %c0_69 = arith.constant 0 : index
    %80 = vector.load %arg13[%c0_68, %c0_69] : memref<88x4xbf16, #tpu.memory_space<vmem>>, vector<88x4xbf16>
    %cst_70 = arith.constant dense<0.000000e+00> : vector<16x4xf32>
    %81 = tpu.matmul %79, %80, %cst_70 {dimension_numbers = #tpu.dot_dimension_numbers<[1], [0], [0], [1], [0, 0, 1, 1], [], []>} : vector<16x88xbf16>, vector<88x4xbf16>, vector<16x4xf32> -> vector<16x4xf32>
    %82 = vector.broadcast %36 : vector<1x4xf32> to vector<16x4xf32>
    %83 = arith.addf %81, %82 : vector<16x4xf32>
    %c0_71 = arith.constant 0 : index
    %c8_72 = arith.constant 8 : index
    %84 = vector.load %arg61[%c0_71, %c8_72] : memref<16x16xf32, #tpu.memory_space<vmem>>, vector<16x4xf32>
    tpu.vector_store %arg61[%c0_71, %c8_72], %83 {strides = array<i32>} : memref<16x16xf32, #tpu.memory_space<vmem>>, vector<16x4xf32>,
    %c0_73 = arith.constant 0 : index
    %c0_74 = arith.constant 0 : index
    %85 = vector.load %arg61[%c0_73, %c0_74] : memref<16x16xf32, #tpu.memory_space<vmem>>, vector<16x12xf32>
    %c0_75 = arith.constant 0 : index
    %c0_76 = arith.constant 0 : index
    %86 = vector.load %arg15[%c0_75, %c0_76] : memref<1x12xf32, #tpu.memory_space<vmem>>, vector<1x12xf32>
    %c0_77 = arith.constant 0 : index
    %c0_78 = arith.constant 0 : index
    %87 = vector.load %arg16[%c0_77, %c0_78] : memref<1x12xf32, #tpu.memory_space<vmem>>, vector<1x12xf32>
    %88 = vector.broadcast %86 : vector<1x12xf32> to vector<16x12xf32>
    %89 = arith.mulf %85, %88 : vector<16x12xf32>
    %90 = vector.broadcast %87 : vector<1x12xf32> to vector<16x12xf32>
    %91 = arith.addf %89, %90 : vector<16x12xf32>
    %cst_79 = arith.constant 0.000000e+00 : f32
    %92 = vector.broadcast %cst_79 : f32 to vector<16x12xf32>
    %93 = arith.maximumf %91, %92 : vector<16x12xf32>
    %c0_80 = arith.constant 0 : index
    %c0_81 = arith.constant 0 : index
    %94 = vector.load %arg14[%c0_80, %c0_81] : memref<1x4xf32, #tpu.memory_space<vmem>>, vector<1x4xf32>
    %95 = vector.extract_strided_slice %93 {offsets = [0, 0], sizes = [11, 12], strides = [1, 1]} : vector<16x12xf32> to vector<11x12xf32>
    %c5_82 = arith.constant 5 : index
    %c0_83 = arith.constant 0 : index
    %96 = vector.load %arg60[%c5_82, %c0_83] : memref<16x512xf32, #tpu.memory_space<vmem>>, vector<11x12xf32>
    tpu.vector_store %arg60[%c5_82, %c0_83], %95 {strides = array<i32>} : memref<16x512xf32, #tpu.memory_space<vmem>>, vector<11x12xf32>,
    %cst_84 = arith.constant 0.000000e+00 : f32
    %97 = vector.broadcast %cst_84 : f32 to vector<5x12xf32>
    %c0_85 = arith.constant 0 : index
    %c0_86 = arith.constant 0 : index
    %98 = vector.load %arg60[%c0_85, %c0_86] : memref<16x512xf32, #tpu.memory_space<vmem>>, vector<5x12xf32>
    tpu.vector_store %arg60[%c0_85, %c0_86], %97 {strides = array<i32>} : memref<16x512xf32, #tpu.memory_space<vmem>>, vector<5x12xf32>,
    %99 = vector.extract_strided_slice %93 {offsets = [0, 0], sizes = [12, 12], strides = [1, 1]} : vector<16x12xf32> to vector<12x12xf32>
    %c4_87 = arith.constant 4 : index
    %c12_88 = arith.constant 12 : index
    %100 = vector.load %arg60[%c4_87, %c12_88] : memref<16x512xf32, #tpu.memory_space<vmem>>, vector<12x12xf32>
    tpu.vector_store %arg60[%c4_87, %c12_88], %99 {strides = array<i32>} : memref<16x512xf32, #tpu.memory_space<vmem>>, vector<12x12xf32>,
    %cst_89 = arith.constant 0.000000e+00 : f32
    %101 = vector.broadcast %cst_89 : f32 to vector<4x12xf32>
    %c0_90 = arith.constant 0 : index
    %c12_91 = arith.constant 12 : index
    %102 = vector.load %arg60[%c0_90, %c12_91] : memref<16x512xf32, #tpu.memory_space<vmem>>, vector<4x12xf32>
    tpu.vector_store %arg60[%c0_90, %c12_91], %101 {strides = array<i32>} : memref<16x512xf32, #tpu.memory_space<vmem>>, vector<4x12xf32>,
    %103 = vector.extract_strided_slice %93 {offsets = [0, 0], sizes = [13, 12], strides = [1, 1]} : vector<16x12xf32> to vector<13x12xf32>
    %c3_92 = arith.constant 3 : index
    %c24_93 = arith.constant 24 : index
    %104 = vector.load %arg60[%c3_92, %c24_93] : memref<16x512xf32, #tpu.memory_space<vmem>>, vector<13x12xf32>
    tpu.vector_store %arg60[%c3_92, %c24_93], %103 {strides = array<i32>} : memref<16x512xf32, #tpu.memory_space<vmem>>, vector<13x12xf32>,
    %cst_94 = arith.constant 0.000000e+00 : f32
    %105 = vector.broadcast %cst_94 : f32 to vector<3x12xf32>
    %c0_95 = arith.constant 0 : index
    %c24_96 = arith.constant 24 : index
    %106 = vector.load %arg60[%c0_95, %c24_96] : memref<16x512xf32, #tpu.memory_space<vmem>>, vector<3x12xf32>
    tpu.vector_store %arg60[%c0_95, %c24_96], %105 {strides = array<i32>} : memref<16x512xf32, #tpu.memory_space<vmem>>, vector<3x12xf32>,
    %107 = vector.extract_strided_slice %93 {offsets = [0, 0], sizes = [14, 12], strides = [1, 1]} : vector<16x12xf32> to vector<14x12xf32>
    %c2_97 = arith.constant 2 : index
    %c36 = arith.constant 36 : index
    %108 = vector.load %arg60[%c2_97, %c36] : memref<16x512xf32, #tpu.memory_space<vmem>>, vector<14x12xf32>
    tpu.vector_store %arg60[%c2_97, %c36], %107 {strides = array<i32>} : memref<16x512xf32, #tpu.memory_space<vmem>>, vector<14x12xf32>,
    %cst_98 = arith.constant 0.000000e+00 : f32
    %109 = vector.broadcast %cst_98 : f32 to vector<2x12xf32>
    %c0_99 = arith.constant 0 : index
    %c36_100 = arith.constant 36 : index
    %110 = vector.load %arg60[%c0_99, %c36_100] : memref<16x512xf32, #tpu.memory_space<vmem>>, vector<2x12xf32>
    tpu.vector_store %arg60[%c0_99, %c36_100], %109 {strides = array<i32>} : memref<16x512xf32, #tpu.memory_space<vmem>>, vector<2x12xf32>,
    %111 = vector.extract_strided_slice %93 {offsets = [0, 0], sizes = [15, 12], strides = [1, 1]} : vector<16x12xf32> to vector<15x12xf32>
    %c1_101 = arith.constant 1 : index
    %c48_102 = arith.constant 48 : index
    %112 = vector.load %arg60[%c1_101, %c48_102] : memref<16x512xf32, #tpu.memory_space<vmem>>, vector<15x12xf32>
    tpu.vector_store %arg60[%c1_101, %c48_102], %111 {strides = array<i32>} : memref<16x512xf32, #tpu.memory_space<vmem>>, vector<15x12xf32>,
    %cst_103 = arith.constant 0.000000e+00 : f32
    %113 = vector.broadcast %cst_103 : f32 to vector<1x12xf32>
    %c0_104 = arith.constant 0 : index
    %c48_105 = arith.constant 48 : index
    %114 = vector.load %arg60[%c0_104, %c48_105] : memref<16x512xf32, #tpu.memory_space<vmem>>, vector<1x12xf32>
    tpu.vector_store %arg60[%c0_104, %c48_105], %113 {strides = array<i32>} : memref<16x512xf32, #tpu.memory_space<vmem>>, vector<1x12xf32>,
    %c0_106 = arith.constant 0 : index
    %c60 = arith.constant 60 : index
    %115 = vector.load %arg60[%c0_106, %c60] : memref<16x512xf32, #tpu.memory_space<vmem>>, vector<16x12xf32>
    tpu.vector_store %arg60[%c0_106, %c60], %93 {strides = array<i32>} : memref<16x512xf32, #tpu.memory_space<vmem>>, vector<16x12xf32>,
    %116 = vector.extract_strided_slice %93 {offsets = [1, 0], sizes = [15, 12], strides = [1, 1]} : vector<16x12xf32> to vector<15x12xf32>
    %c0_107 = arith.constant 0 : index
    %c72_108 = arith.constant 72 : index
    %117 = vector.load %arg60[%c0_107, %c72_108] : memref<16x512xf32, #tpu.memory_space<vmem>>, vector<15x12xf32>
    tpu.vector_store %arg60[%c0_107, %c72_108], %116 {strides = array<i32>} : memref<16x512xf32, #tpu.memory_space<vmem>>, vector<15x12xf32>,
    %cst_109 = arith.constant 0.000000e+00 : f32
    %118 = vector.broadcast %cst_109 : f32 to vector<1x12xf32>
    %c15_110 = arith.constant 15 : index
    %c72_111 = arith.constant 72 : index
    %119 = vector.load %arg60[%c15_110, %c72_111] : memref<16x512xf32, #tpu.memory_space<vmem>>, vector<1x12xf32>
    tpu.vector_store %arg60[%c15_110, %c72_111], %118 {strides = array<i32>} : memref<16x512xf32, #tpu.memory_space<vmem>>, vector<1x12xf32>,
    %120 = vector.extract_strided_slice %93 {offsets = [2, 0], sizes = [14, 12], strides = [1, 1]} : vector<16x12xf32> to vector<14x12xf32>
    %c0_112 = arith.constant 0 : index
    %c84 = arith.constant 84 : index
    %121 = vector.load %arg60[%c0_112, %c84] : memref<16x512xf32, #tpu.memory_space<vmem>>, vector<14x12xf32>
    tpu.vector_store %arg60[%c0_112, %c84], %120 {strides = array<i32>} : memref<16x512xf32, #tpu.memory_space<vmem>>, vector<14x12xf32>,
    %cst_113 = arith.constant 0.000000e+00 : f32
    %122 = vector.broadcast %cst_113 : f32 to vector<2x12xf32>
    %c14_114 = arith.constant 14 : index
    %c84_115 = arith.constant 84 : index
    %123 = vector.load %arg60[%c14_114, %c84_115] : memref<16x512xf32, #tpu.memory_space<vmem>>, vector<2x12xf32>
    tpu.vector_store %arg60[%c14_114, %c84_115], %122 {strides = array<i32>} : memref<16x512xf32, #tpu.memory_space<vmem>>, vector<2x12xf32>,
    %124 = vector.extract_strided_slice %93 {offsets = [3, 0], sizes = [13, 12], strides = [1, 1]} : vector<16x12xf32> to vector<13x12xf32>
    %c0_116 = arith.constant 0 : index
    %c96 = arith.constant 96 : index
    %125 = vector.load %arg60[%c0_116, %c96] : memref<16x512xf32, #tpu.memory_space<vmem>>, vector<13x12xf32>
    tpu.vector_store %arg60[%c0_116, %c96], %124 {strides = array<i32>} : memref<16x512xf32, #tpu.memory_space<vmem>>, vector<13x12xf32>,
    %cst_117 = arith.constant 0.000000e+00 : f32
    %126 = vector.broadcast %cst_117 : f32 to vector<3x12xf32>
    %c13_118 = arith.constant 13 : index
    %c96_119 = arith.constant 96 : index
    %127 = vector.load %arg60[%c13_118, %c96_119] : memref<16x512xf32, #tpu.memory_space<vmem>>, vector<3x12xf32>
    tpu.vector_store %arg60[%c13_118, %c96_119], %126 {strides = array<i32>} : memref<16x512xf32, #tpu.memory_space<vmem>>, vector<3x12xf32>,
    %128 = vector.extract_strided_slice %93 {offsets = [4, 0], sizes = [12, 12], strides = [1, 1]} : vector<16x12xf32> to vector<12x12xf32>
    %c0_120 = arith.constant 0 : index
    %c108 = arith.constant 108 : index
    %129 = vector.load %arg60[%c0_120, %c108] : memref<16x512xf32, #tpu.memory_space<vmem>>, vector<12x12xf32>
    tpu.vector_store %arg60[%c0_120, %c108], %128 {strides = array<i32>} : memref<16x512xf32, #tpu.memory_space<vmem>>, vector<12x12xf32>,
    %cst_121 = arith.constant 0.000000e+00 : f32
    %130 = vector.broadcast %cst_121 : f32 to vector<4x12xf32>
    %c12_122 = arith.constant 12 : index
    %c108_123 = arith.constant 108 : index
    %131 = vector.load %arg60[%c12_122, %c108_123] : memref<16x512xf32, #tpu.memory_space<vmem>>, vector<4x12xf32>
    tpu.vector_store %arg60[%c12_122, %c108_123], %130 {strides = array<i32>} : memref<16x512xf32, #tpu.memory_space<vmem>>, vector<4x12xf32>,
    %132 = vector.extract_strided_slice %93 {offsets = [5, 0], sizes = [11, 12], strides = [1, 1]} : vector<16x12xf32> to vector<11x12xf32>
    %c0_124 = arith.constant 0 : index
    %c120 = arith.constant 120 : index
    %133 = vector.load %arg60[%c0_124, %c120] : memref<16x512xf32, #tpu.memory_space<vmem>>, vector<11x12xf32>
    tpu.vector_store %arg60[%c0_124, %c120], %132 {strides = array<i32>} : memref<16x512xf32, #tpu.memory_space<vmem>>, vector<11x12xf32>,
    %cst_125 = arith.constant 0.000000e+00 : f32
    %134 = vector.broadcast %cst_125 : f32 to vector<5x12xf32>
    %c11_126 = arith.constant 11 : index
    %c120_127 = arith.constant 120 : index
    %135 = vector.load %arg60[%c11_126, %c120_127] : memref<16x512xf32, #tpu.memory_space<vmem>>, vector<5x12xf32>
    tpu.vector_store %arg60[%c11_126, %c120_127], %134 {strides = array<i32>} : memref<16x512xf32, #tpu.memory_space<vmem>>, vector<5x12xf32>,
    %c0_128 = arith.constant 0 : index
    %c0_129 = arith.constant 0 : index
    %136 = vector.load %arg60[%c0_128, %c0_129] : memref<16x512xf32, #tpu.memory_space<vmem>>, vector<16x132xf32>
    %137 = arith.truncf %136 : vector<16x132xf32> to vector<16x132xbf16>
    %c0_130 = arith.constant 0 : index
    %c0_131 = arith.constant 0 : index
    %138 = vector.load %arg17[%c0_130, %c0_131] : memref<132x4xbf16, #tpu.memory_space<vmem>>, vector<132x4xbf16>
    %cst_132 = arith.constant dense<0.000000e+00> : vector<16x4xf32>
    %139 = tpu.matmul %137, %138, %cst_132 {dimension_numbers = #tpu.dot_dimension_numbers<[1], [0], [0], [1], [0, 0, 1, 1], [], []>} : vector<16x132xbf16>, vector<132x4xbf16>, vector<16x4xf32> -> vector<16x4xf32>
    %140 = vector.broadcast %94 : vector<1x4xf32> to vector<16x4xf32>
    %141 = arith.addf %139, %140 : vector<16x4xf32>
    %c0_133 = arith.constant 0 : index
    %c12_134 = arith.constant 12 : index
    %142 = vector.load %arg61[%c0_133, %c12_134] : memref<16x16xf32, #tpu.memory_space<vmem>>, vector<16x4xf32>
    tpu.vector_store %arg61[%c0_133, %c12_134], %141 {strides = array<i32>} : memref<16x16xf32, #tpu.memory_space<vmem>>, vector<16x4xf32>,
    %c0_135 = arith.constant 0 : index
    %c0_136 = arith.constant 0 : index
    %143 = vector.load %arg61[%c0_135, %c0_136] : memref<16x16xf32, #tpu.memory_space<vmem>>, vector<16x16xf32>
    %c0_137 = arith.constant 0 : index
    %c0_138 = arith.constant 0 : index
    %144 = vector.load %arg27[%c0_137, %c0_138] : memref<1x16xf32, #tpu.memory_space<vmem>>, vector<1x16xf32>
    %c0_139 = arith.constant 0 : index
    %c0_140 = arith.constant 0 : index
    %145 = vector.load %arg28[%c0_139, %c0_140] : memref<1x16xf32, #tpu.memory_space<vmem>>, vector<1x16xf32>
    %146 = vector.broadcast %144 : vector<1x16xf32> to vector<16x16xf32>
    %147 = arith.mulf %143, %146 : vector<16x16xf32>
    %148 = vector.broadcast %145 : vector<1x16xf32> to vector<16x16xf32>
    %149 = arith.addf %147, %148 : vector<16x16xf32>
    %cst_141 = arith.constant 0.000000e+00 : f32
    %150 = vector.broadcast %cst_141 : f32 to vector<16x16xf32>
    %151 = arith.maximumf %149, %150 : vector<16x16xf32>
    %c0_142 = arith.constant 0 : index
    %c0_143 = arith.constant 0 : index
    %152 = vector.load %arg26[%c0_142, %c0_143] : memref<1x16xf32, #tpu.memory_space<vmem>>, vector<1x16xf32>
    %153 = arith.truncf %151 : vector<16x16xf32> to vector<16x16xbf16>
    %c0_144 = arith.constant 0 : index
    %c0_145 = arith.constant 0 : index
    %154 = vector.load %arg29[%c0_144, %c0_145] : memref<16x16xbf16, #tpu.memory_space<vmem>>, vector<16x16xbf16>
    %cst_146 = arith.constant dense<0.000000e+00> : vector<16x16xf32>
    %155 = tpu.matmul %153, %154, %cst_146 {dimension_numbers = #tpu.dot_dimension_numbers<[1], [0], [0], [1], [0, 0, 1, 1], [], []>} : vector<16x16xbf16>, vector<16x16xbf16>, vector<16x16xf32> -> vector<16x16xf32>
    %156 = vector.broadcast %152 : vector<1x16xf32> to vector<16x16xf32>
    %157 = arith.addf %155, %156 : vector<16x16xf32>
    %158 = tpu.iota {dimensions = array<i32: 0>} : vector<8x16xi32>
    %159 = tpu.iota {dimensions = array<i32: 1>} : vector<8x16xi32>
    %c2_i32 = arith.constant 2 : i32
    %160 = vector.broadcast %c2_i32 : i32 to vector<8x16xi32>
    %161 = arith.muli %160, %158 : vector<8x16xi32>
    %162 = arith.cmpi eq, %159, %161 : vector<8x16xi32>
    %cst_147 = arith.constant 1.000000e+00 : f32
    %cst_148 = arith.constant 0.000000e+00 : f32
    %163 = vector.broadcast %cst_147 : f32 to vector<8x16xf32>
    %164 = vector.broadcast %cst_148 : f32 to vector<8x16xf32>
    %165 = arith.select %162, %163, %164 : vector<8x16xi1>, vector<8x16xf32>
    %c2_i32_149 = arith.constant 2 : i32
    %166 = vector.broadcast %c2_i32_149 : i32 to vector<8x16xi32>
    %167 = arith.muli %166, %158 : vector<8x16xi32>
    %c1_i32 = arith.constant 1 : i32
    %168 = vector.broadcast %c1_i32 : i32 to vector<8x16xi32>
    %169 = arith.addi %167, %168 : vector<8x16xi32>
    %170 = arith.cmpi eq, %159, %169 : vector<8x16xi32>
    %cst_150 = arith.constant 1.000000e+00 : f32
    %cst_151 = arith.constant 0.000000e+00 : f32
    %171 = vector.broadcast %cst_150 : f32 to vector<8x16xf32>
    %172 = vector.broadcast %cst_151 : f32 to vector<8x16xf32>
    %173 = arith.select %170, %171, %172 : vector<8x16xi1>, vector<8x16xf32>
    %cst_152 = arith.constant dense<0.000000e+00> : vector<8x16xf32>
    %174 = tpu.matmul %165, %157, %cst_152 {dimension_numbers = #tpu.dot_dimension_numbers<[1], [0], [0], [1], [0, 0, 1, 1], [], []>} : vector<8x16xf32>, vector<16x16xf32>, vector<8x16xf32> -> vector<8x16xf32>
    %cst_153 = arith.constant dense<0.000000e+00> : vector<8x16xf32>
    %175 = tpu.matmul %173, %157, %cst_153 {dimension_numbers = #tpu.dot_dimension_numbers<[1], [0], [0], [1], [0, 0, 1, 1], [], []>} : vector<8x16xf32>, vector<16x16xf32>, vector<8x16xf32> -> vector<8x16xf32>
    %176 = arith.maximumf %174, %175 : vector<8x16xf32>
    %c0_154 = arith.constant 0 : index
    %c0_155 = arith.constant 0 : index
    %177 = vector.load %arg62[%c0_154, %c0_155] : memref<8x24xf32, #tpu.memory_space<vmem>>, vector<8x16xf32>
    tpu.vector_store %arg62[%c0_154, %c0_155], %176 {strides = array<i32>} : memref<8x24xf32, #tpu.memory_space<vmem>>, vector<8x16xf32>,
    %c0_156 = arith.constant 0 : index
    %c0_157 = arith.constant 0 : index
    %178 = vector.load %arg62[%c0_156, %c0_157] : memref<8x24xf32, #tpu.memory_space<vmem>>, vector<8x16xf32>
    %c0_158 = arith.constant 0 : index
    %c0_159 = arith.constant 0 : index
    %179 = vector.load %arg19[%c0_158, %c0_159] : memref<1x16xf32, #tpu.memory_space<vmem>>, vector<1x16xf32>
    %c0_160 = arith.constant 0 : index
    %c0_161 = arith.constant 0 : index
    %180 = vector.load %arg20[%c0_160, %c0_161] : memref<1x16xf32, #tpu.memory_space<vmem>>, vector<1x16xf32>
    %181 = vector.broadcast %179 : vector<1x16xf32> to vector<8x16xf32>
    %182 = arith.mulf %178, %181 : vector<8x16xf32>
    %183 = vector.broadcast %180 : vector<1x16xf32> to vector<8x16xf32>
    %184 = arith.addf %182, %183 : vector<8x16xf32>
    %cst_162 = arith.constant 0.000000e+00 : f32
    %185 = vector.broadcast %cst_162 : f32 to vector<8x16xf32>
    %186 = arith.maximumf %184, %185 : vector<8x16xf32>
    %c0_163 = arith.constant 0 : index
    %c0_164 = arith.constant 0 : index
    %187 = vector.load %arg18[%c0_163, %c0_164] : memref<1x4xf32, #tpu.memory_space<vmem>>, vector<1x4xf32>
    %188 = vector.extract_strided_slice %186 {offsets = [0, 0], sizes = [3, 16], strides = [1, 1]} : vector<8x16xf32> to vector<3x16xf32>
    %c5_165 = arith.constant 5 : index
    %c0_166 = arith.constant 0 : index
    %189 = vector.load %arg60[%c5_165, %c0_166] : memref<16x512xf32, #tpu.memory_space<vmem>>, vector<3x16xf32>
    tpu.vector_store %arg60[%c5_165, %c0_166], %188 {strides = array<i32>} : memref<16x512xf32, #tpu.memory_space<vmem>>, vector<3x16xf32>,
    %cst_167 = arith.constant 0.000000e+00 : f32
    %190 = vector.broadcast %cst_167 : f32 to vector<5x16xf32>
    %c0_168 = arith.constant 0 : index
    %c0_169 = arith.constant 0 : index
    %191 = vector.load %arg60[%c0_168, %c0_169] : memref<16x512xf32, #tpu.memory_space<vmem>>, vector<5x16xf32>
    tpu.vector_store %arg60[%c0_168, %c0_169], %190 {strides = array<i32>} : memref<16x512xf32, #tpu.memory_space<vmem>>, vector<5x16xf32>,
    %192 = vector.extract_strided_slice %186 {offsets = [0, 0], sizes = [4, 16], strides = [1, 1]} : vector<8x16xf32> to vector<4x16xf32>
    %c4_170 = arith.constant 4 : index
    %c16_171 = arith.constant 16 : index
    %193 = vector.load %arg60[%c4_170, %c16_171] : memref<16x512xf32, #tpu.memory_space<vmem>>, vector<4x16xf32>
    tpu.vector_store %arg60[%c4_170, %c16_171], %192 {strides = array<i32>} : memref<16x512xf32, #tpu.memory_space<vmem>>, vector<4x16xf32>,
    %cst_172 = arith.constant 0.000000e+00 : f32
    %194 = vector.broadcast %cst_172 : f32 to vector<4x16xf32>
    %c0_173 = arith.constant 0 : index
    %c16_174 = arith.constant 16 : index
    %195 = vector.load %arg60[%c0_173, %c16_174] : memref<16x512xf32, #tpu.memory_space<vmem>>, vector<4x16xf32>
    tpu.vector_store %arg60[%c0_173, %c16_174], %194 {strides = array<i32>} : memref<16x512xf32, #tpu.memory_space<vmem>>, vector<4x16xf32>,
    %196 = vector.extract_strided_slice %186 {offsets = [0, 0], sizes = [5, 16], strides = [1, 1]} : vector<8x16xf32> to vector<5x16xf32>
    %c3_175 = arith.constant 3 : index
    %c32_176 = arith.constant 32 : index
    %197 = vector.load %arg60[%c3_175, %c32_176] : memref<16x512xf32, #tpu.memory_space<vmem>>, vector<5x16xf32>
    tpu.vector_store %arg60[%c3_175, %c32_176], %196 {strides = array<i32>} : memref<16x512xf32, #tpu.memory_space<vmem>>, vector<5x16xf32>,
    %cst_177 = arith.constant 0.000000e+00 : f32
    %198 = vector.broadcast %cst_177 : f32 to vector<3x16xf32>
    %c0_178 = arith.constant 0 : index
    %c32_179 = arith.constant 32 : index
    %199 = vector.load %arg60[%c0_178, %c32_179] : memref<16x512xf32, #tpu.memory_space<vmem>>, vector<3x16xf32>
    tpu.vector_store %arg60[%c0_178, %c32_179], %198 {strides = array<i32>} : memref<16x512xf32, #tpu.memory_space<vmem>>, vector<3x16xf32>,
    %200 = vector.extract_strided_slice %186 {offsets = [0, 0], sizes = [6, 16], strides = [1, 1]} : vector<8x16xf32> to vector<6x16xf32>
    %c2_180 = arith.constant 2 : index
    %c48_181 = arith.constant 48 : index
    %201 = vector.load %arg60[%c2_180, %c48_181] : memref<16x512xf32, #tpu.memory_space<vmem>>, vector<6x16xf32>
    tpu.vector_store %arg60[%c2_180, %c48_181], %200 {strides = array<i32>} : memref<16x512xf32, #tpu.memory_space<vmem>>, vector<6x16xf32>,
    %cst_182 = arith.constant 0.000000e+00 : f32
    %202 = vector.broadcast %cst_182 : f32 to vector<2x16xf32>
    %c0_183 = arith.constant 0 : index
    %c48_184 = arith.constant 48 : index
    %203 = vector.load %arg60[%c0_183, %c48_184] : memref<16x512xf32, #tpu.memory_space<vmem>>, vector<2x16xf32>
    tpu.vector_store %arg60[%c0_183, %c48_184], %202 {strides = array<i32>} : memref<16x512xf32, #tpu.memory_space<vmem>>, vector<2x16xf32>,
    %204 = vector.extract_strided_slice %186 {offsets = [0, 0], sizes = [7, 16], strides = [1, 1]} : vector<8x16xf32> to vector<7x16xf32>
    %c1_185 = arith.constant 1 : index
    %c64_186 = arith.constant 64 : index
    %205 = vector.load %arg60[%c1_185, %c64_186] : memref<16x512xf32, #tpu.memory_space<vmem>>, vector<7x16xf32>
    tpu.vector_store %arg60[%c1_185, %c64_186], %204 {strides = array<i32>} : memref<16x512xf32, #tpu.memory_space<vmem>>, vector<7x16xf32>,
    %cst_187 = arith.constant 0.000000e+00 : f32
    %206 = vector.broadcast %cst_187 : f32 to vector<1x16xf32>
    %c0_188 = arith.constant 0 : index
    %c64_189 = arith.constant 64 : index
    %207 = vector.load %arg60[%c0_188, %c64_189] : memref<16x512xf32, #tpu.memory_space<vmem>>, vector<1x16xf32>
    tpu.vector_store %arg60[%c0_188, %c64_189], %206 {strides = array<i32>} : memref<16x512xf32, #tpu.memory_space<vmem>>, vector<1x16xf32>,
    %c0_190 = arith.constant 0 : index
    %c80_191 = arith.constant 80 : index
    %208 = vector.load %arg60[%c0_190, %c80_191] : memref<16x512xf32, #tpu.memory_space<vmem>>, vector<8x16xf32>
    tpu.vector_store %arg60[%c0_190, %c80_191], %186 {strides = array<i32>} : memref<16x512xf32, #tpu.memory_space<vmem>>, vector<8x16xf32>,
    %209 = vector.extract_strided_slice %186 {offsets = [1, 0], sizes = [7, 16], strides = [1, 1]} : vector<8x16xf32> to vector<7x16xf32>
    %c0_192 = arith.constant 0 : index
    %c96_193 = arith.constant 96 : index
    %210 = vector.load %arg60[%c0_192, %c96_193] : memref<16x512xf32, #tpu.memory_space<vmem>>, vector<7x16xf32>
    tpu.vector_store %arg60[%c0_192, %c96_193], %209 {strides = array<i32>} : memref<16x512xf32, #tpu.memory_space<vmem>>, vector<7x16xf32>,
    %cst_194 = arith.constant 0.000000e+00 : f32
    %211 = vector.broadcast %cst_194 : f32 to vector<1x16xf32>
    %c7 = arith.constant 7 : index
    %c96_195 = arith.constant 96 : index
    %212 = vector.load %arg60[%c7, %c96_195] : memref<16x512xf32, #tpu.memory_space<vmem>>, vector<1x16xf32>
    tpu.vector_store %arg60[%c7, %c96_195], %211 {strides = array<i32>} : memref<16x512xf32, #tpu.memory_space<vmem>>, vector<1x16xf32>,
    %213 = vector.extract_strided_slice %186 {offsets = [2, 0], sizes = [6, 16], strides = [1, 1]} : vector<8x16xf32> to vector<6x16xf32>
    %c0_196 = arith.constant 0 : index
    %c112 = arith.constant 112 : index
    %214 = vector.load %arg60[%c0_196, %c112] : memref<16x512xf32, #tpu.memory_space<vmem>>, vector<6x16xf32>
    tpu.vector_store %arg60[%c0_196, %c112], %213 {strides = array<i32>} : memref<16x512xf32, #tpu.memory_space<vmem>>, vector<6x16xf32>,
    %cst_197 = arith.constant 0.000000e+00 : f32
    %215 = vector.broadcast %cst_197 : f32 to vector<2x16xf32>
    %c6 = arith.constant 6 : index
    %c112_198 = arith.constant 112 : index
    %216 = vector.load %arg60[%c6, %c112_198] : memref<16x512xf32, #tpu.memory_space<vmem>>, vector<2x16xf32>
    tpu.vector_store %arg60[%c6, %c112_198], %215 {strides = array<i32>} : memref<16x512xf32, #tpu.memory_space<vmem>>, vector<2x16xf32>,
    %217 = vector.extract_strided_slice %186 {offsets = [3, 0], sizes = [5, 16], strides = [1, 1]} : vector<8x16xf32> to vector<5x16xf32>
    %c0_199 = arith.constant 0 : index
    %c128 = arith.constant 128 : index
    %218 = vector.load %arg60[%c0_199, %c128] : memref<16x512xf32, #tpu.memory_space<vmem>>, vector<5x16xf32>
    tpu.vector_store %arg60[%c0_199, %c128], %217 {strides = array<i32>} : memref<16x512xf32, #tpu.memory_space<vmem>>, vector<5x16xf32>,
    %cst_200 = arith.constant 0.000000e+00 : f32
    %219 = vector.broadcast %cst_200 : f32 to vector<3x16xf32>
    %c5_201 = arith.constant 5 : index
    %c128_202 = arith.constant 128 : index
    %220 = vector.load %arg60[%c5_201, %c128_202] : memref<16x512xf32, #tpu.memory_space<vmem>>, vector<3x16xf32>
    tpu.vector_store %arg60[%c5_201, %c128_202], %219 {strides = array<i32>} : memref<16x512xf32, #tpu.memory_space<vmem>>, vector<3x16xf32>,
    %221 = vector.extract_strided_slice %186 {offsets = [4, 0], sizes = [4, 16], strides = [1, 1]} : vector<8x16xf32> to vector<4x16xf32>
    %c0_203 = arith.constant 0 : index
    %c144 = arith.constant 144 : index
    %222 = vector.load %arg60[%c0_203, %c144] : memref<16x512xf32, #tpu.memory_space<vmem>>, vector<4x16xf32>
    tpu.vector_store %arg60[%c0_203, %c144], %221 {strides = array<i32>} : memref<16x512xf32, #tpu.memory_space<vmem>>, vector<4x16xf32>,
    %cst_204 = arith.constant 0.000000e+00 : f32
    %223 = vector.broadcast %cst_204 : f32 to vector<4x16xf32>
    %c4_205 = arith.constant 4 : index
    %c144_206 = arith.constant 144 : index
    %224 = vector.load %arg60[%c4_205, %c144_206] : memref<16x512xf32, #tpu.memory_space<vmem>>, vector<4x16xf32>
    tpu.vector_store %arg60[%c4_205, %c144_206], %223 {strides = array<i32>} : memref<16x512xf32, #tpu.memory_space<vmem>>, vector<4x16xf32>,
    %225 = vector.extract_strided_slice %186 {offsets = [5, 0], sizes = [3, 16], strides = [1, 1]} : vector<8x16xf32> to vector<3x16xf32>
    %c0_207 = arith.constant 0 : index
    %c160 = arith.constant 160 : index
    %226 = vector.load %arg60[%c0_207, %c160] : memref<16x512xf32, #tpu.memory_space<vmem>>, vector<3x16xf32>
    tpu.vector_store %arg60[%c0_207, %c160], %225 {strides = array<i32>} : memref<16x512xf32, #tpu.memory_space<vmem>>, vector<3x16xf32>,
    %cst_208 = arith.constant 0.000000e+00 : f32
    %227 = vector.broadcast %cst_208 : f32 to vector<5x16xf32>
    %c3_209 = arith.constant 3 : index
    %c160_210 = arith.constant 160 : index
    %228 = vector.load %arg60[%c3_209, %c160_210] : memref<16x512xf32, #tpu.memory_space<vmem>>, vector<5x16xf32>
    tpu.vector_store %arg60[%c3_209, %c160_210], %227 {strides = array<i32>} : memref<16x512xf32, #tpu.memory_space<vmem>>, vector<5x16xf32>,
    %c0_211 = arith.constant 0 : index
    %c0_212 = arith.constant 0 : index
    %229 = vector.load %arg60[%c0_211, %c0_212] : memref<16x512xf32, #tpu.memory_space<vmem>>, vector<8x176xf32>
    %230 = arith.truncf %229 : vector<8x176xf32> to vector<8x176xbf16>
    %c0_213 = arith.constant 0 : index
    %c0_214 = arith.constant 0 : index
    %231 = vector.load %arg21[%c0_213, %c0_214] : memref<176x4xbf16, #tpu.memory_space<vmem>>, vector<176x4xbf16>
    %cst_215 = arith.constant dense<0.000000e+00> : vector<8x4xf32>
    %232 = tpu.matmul %230, %231, %cst_215 {dimension_numbers = #tpu.dot_dimension_numbers<[1], [0], [0], [1], [0, 0, 1, 1], [], []>} : vector<8x176xbf16>, vector<176x4xbf16>, vector<8x4xf32> -> vector<8x4xf32>
    %233 = vector.broadcast %187 : vector<1x4xf32> to vector<8x4xf32>
    %234 = arith.addf %232, %233 : vector<8x4xf32>
    %c0_216 = arith.constant 0 : index
    %c16_217 = arith.constant 16 : index
    %235 = vector.load %arg62[%c0_216, %c16_217] : memref<8x24xf32, #tpu.memory_space<vmem>>, vector<8x4xf32>
    tpu.vector_store %arg62[%c0_216, %c16_217], %234 {strides = array<i32>} : memref<8x24xf32, #tpu.memory_space<vmem>>, vector<8x4xf32>,
    %c0_218 = arith.constant 0 : index
    %c0_219 = arith.constant 0 : index
    %236 = vector.load %arg62[%c0_218, %c0_219] : memref<8x24xf32, #tpu.memory_space<vmem>>, vector<8x20xf32>
    %c0_220 = arith.constant 0 : index
    %c0_221 = arith.constant 0 : index
    %237 = vector.load %arg23[%c0_220, %c0_221] : memref<1x20xf32, #tpu.memory_space<vmem>>, vector<1x20xf32>
    %c0_222 = arith.constant 0 : index
    %c0_223 = arith.constant 0 : index
    %238 = vector.load %arg24[%c0_222, %c0_223] : memref<1x20xf32, #tpu.memory_space<vmem>>, vector<1x20xf32>
    %239 = vector.broadcast %237 : vector<1x20xf32> to vector<8x20xf32>
    %240 = arith.mulf %236, %239 : vector<8x20xf32>
    %241 = vector.broadcast %238 : vector<1x20xf32> to vector<8x20xf32>
    %242 = arith.addf %240, %241 : vector<8x20xf32>
    %cst_224 = arith.constant 0.000000e+00 : f32
    %243 = vector.broadcast %cst_224 : f32 to vector<8x20xf32>
    %244 = arith.maximumf %242, %243 : vector<8x20xf32>
    %c0_225 = arith.constant 0 : index
    %c0_226 = arith.constant 0 : index
    %245 = vector.load %arg22[%c0_225, %c0_226] : memref<1x4xf32, #tpu.memory_space<vmem>>, vector<1x4xf32>
    %246 = vector.extract_strided_slice %244 {offsets = [0, 0], sizes = [3, 20], strides = [1, 1]} : vector<8x20xf32> to vector<3x20xf32>
    %c5_227 = arith.constant 5 : index
    %c0_228 = arith.constant 0 : index
    %247 = vector.load %arg60[%c5_227, %c0_228] : memref<16x512xf32, #tpu.memory_space<vmem>>, vector<3x20xf32>
    tpu.vector_store %arg60[%c5_227, %c0_228], %246 {strides = array<i32>} : memref<16x512xf32, #tpu.memory_space<vmem>>, vector<3x20xf32>,
    %cst_229 = arith.constant 0.000000e+00 : f32
    %248 = vector.broadcast %cst_229 : f32 to vector<5x20xf32>
    %c0_230 = arith.constant 0 : index
    %c0_231 = arith.constant 0 : index
    %249 = vector.load %arg60[%c0_230, %c0_231] : memref<16x512xf32, #tpu.memory_space<vmem>>, vector<5x20xf32>
    tpu.vector_store %arg60[%c0_230, %c0_231], %248 {strides = array<i32>} : memref<16x512xf32, #tpu.memory_space<vmem>>, vector<5x20xf32>,
    %250 = vector.extract_strided_slice %244 {offsets = [0, 0], sizes = [4, 20], strides = [1, 1]} : vector<8x20xf32> to vector<4x20xf32>
    %c4_232 = arith.constant 4 : index
    %c20 = arith.constant 20 : index
    %251 = vector.load %arg60[%c4_232, %c20] : memref<16x512xf32, #tpu.memory_space<vmem>>, vector<4x20xf32>
    tpu.vector_store %arg60[%c4_232, %c20], %250 {strides = array<i32>} : memref<16x512xf32, #tpu.memory_space<vmem>>, vector<4x20xf32>,
    %cst_233 = arith.constant 0.000000e+00 : f32
    %252 = vector.broadcast %cst_233 : f32 to vector<4x20xf32>
    %c0_234 = arith.constant 0 : index
    %c20_235 = arith.constant 20 : index
    %253 = vector.load %arg60[%c0_234, %c20_235] : memref<16x512xf32, #tpu.memory_space<vmem>>, vector<4x20xf32>
    tpu.vector_store %arg60[%c0_234, %c20_235], %252 {strides = array<i32>} : memref<16x512xf32, #tpu.memory_space<vmem>>, vector<4x20xf32>,
    %254 = vector.extract_strided_slice %244 {offsets = [0, 0], sizes = [5, 20], strides = [1, 1]} : vector<8x20xf32> to vector<5x20xf32>
    %c3_236 = arith.constant 3 : index
    %c40_237 = arith.constant 40 : index
    %255 = vector.load %arg60[%c3_236, %c40_237] : memref<16x512xf32, #tpu.memory_space<vmem>>, vector<5x20xf32>
    tpu.vector_store %arg60[%c3_236, %c40_237], %254 {strides = array<i32>} : memref<16x512xf32, #tpu.memory_space<vmem>>, vector<5x20xf32>,
    %cst_238 = arith.constant 0.000000e+00 : f32
    %256 = vector.broadcast %cst_238 : f32 to vector<3x20xf32>
    %c0_239 = arith.constant 0 : index
    %c40_240 = arith.constant 40 : index
    %257 = vector.load %arg60[%c0_239, %c40_240] : memref<16x512xf32, #tpu.memory_space<vmem>>, vector<3x20xf32>
    tpu.vector_store %arg60[%c0_239, %c40_240], %256 {strides = array<i32>} : memref<16x512xf32, #tpu.memory_space<vmem>>, vector<3x20xf32>,
    %258 = vector.extract_strided_slice %244 {offsets = [0, 0], sizes = [6, 20], strides = [1, 1]} : vector<8x20xf32> to vector<6x20xf32>
    %c2_241 = arith.constant 2 : index
    %c60_242 = arith.constant 60 : index
    %259 = vector.load %arg60[%c2_241, %c60_242] : memref<16x512xf32, #tpu.memory_space<vmem>>, vector<6x20xf32>
    tpu.vector_store %arg60[%c2_241, %c60_242], %258 {strides = array<i32>} : memref<16x512xf32, #tpu.memory_space<vmem>>, vector<6x20xf32>,
    %cst_243 = arith.constant 0.000000e+00 : f32
    %260 = vector.broadcast %cst_243 : f32 to vector<2x20xf32>
    %c0_244 = arith.constant 0 : index
    %c60_245 = arith.constant 60 : index
    %261 = vector.load %arg60[%c0_244, %c60_245] : memref<16x512xf32, #tpu.memory_space<vmem>>, vector<2x20xf32>
    tpu.vector_store %arg60[%c0_244, %c60_245], %260 {strides = array<i32>} : memref<16x512xf32, #tpu.memory_space<vmem>>, vector<2x20xf32>,
    %262 = vector.extract_strided_slice %244 {offsets = [0, 0], sizes = [7, 20], strides = [1, 1]} : vector<8x20xf32> to vector<7x20xf32>
    %c1_246 = arith.constant 1 : index
    %c80_247 = arith.constant 80 : index
    %263 = vector.load %arg60[%c1_246, %c80_247] : memref<16x512xf32, #tpu.memory_space<vmem>>, vector<7x20xf32>
    tpu.vector_store %arg60[%c1_246, %c80_247], %262 {strides = array<i32>} : memref<16x512xf32, #tpu.memory_space<vmem>>, vector<7x20xf32>,
    %cst_248 = arith.constant 0.000000e+00 : f32
    %264 = vector.broadcast %cst_248 : f32 to vector<1x20xf32>
    %c0_249 = arith.constant 0 : index
    %c80_250 = arith.constant 80 : index
    %265 = vector.load %arg60[%c0_249, %c80_250] : memref<16x512xf32, #tpu.memory_space<vmem>>, vector<1x20xf32>
    tpu.vector_store %arg60[%c0_249, %c80_250], %264 {strides = array<i32>} : memref<16x512xf32, #tpu.memory_space<vmem>>, vector<1x20xf32>,
    %c0_251 = arith.constant 0 : index
    %c100_252 = arith.constant 100 : index
    %266 = vector.load %arg60[%c0_251, %c100_252] : memref<16x512xf32, #tpu.memory_space<vmem>>, vector<8x20xf32>
    tpu.vector_store %arg60[%c0_251, %c100_252], %244 {strides = array<i32>} : memref<16x512xf32, #tpu.memory_space<vmem>>, vector<8x20xf32>,
    %267 = vector.extract_strided_slice %244 {offsets = [1, 0], sizes = [7, 20], strides = [1, 1]} : vector<8x20xf32> to vector<7x20xf32>
    %c0_253 = arith.constant 0 : index
    %c120_254 = arith.constant 120 : index
    %268 = vector.load %arg60[%c0_253, %c120_254] : memref<16x512xf32, #tpu.memory_space<vmem>>, vector<7x20xf32>
    tpu.vector_store %arg60[%c0_253, %c120_254], %267 {strides = array<i32>} : memref<16x512xf32, #tpu.memory_space<vmem>>, vector<7x20xf32>,
    %cst_255 = arith.constant 0.000000e+00 : f32
    %269 = vector.broadcast %cst_255 : f32 to vector<1x20xf32>
    %c7_256 = arith.constant 7 : index
    %c120_257 = arith.constant 120 : index
    %270 = vector.load %arg60[%c7_256, %c120_257] : memref<16x512xf32, #tpu.memory_space<vmem>>, vector<1x20xf32>
    tpu.vector_store %arg60[%c7_256, %c120_257], %269 {strides = array<i32>} : memref<16x512xf32, #tpu.memory_space<vmem>>, vector<1x20xf32>,
    %271 = vector.extract_strided_slice %244 {offsets = [2, 0], sizes = [6, 20], strides = [1, 1]} : vector<8x20xf32> to vector<6x20xf32>
    %c0_258 = arith.constant 0 : index
    %c140 = arith.constant 140 : index
    %272 = vector.load %arg60[%c0_258, %c140] : memref<16x512xf32, #tpu.memory_space<vmem>>, vector<6x20xf32>
    tpu.vector_store %arg60[%c0_258, %c140], %271 {strides = array<i32>} : memref<16x512xf32, #tpu.memory_space<vmem>>, vector<6x20xf32>,
    %cst_259 = arith.constant 0.000000e+00 : f32
    %273 = vector.broadcast %cst_259 : f32 to vector<2x20xf32>
    %c6_260 = arith.constant 6 : index
    %c140_261 = arith.constant 140 : index
    %274 = vector.load %arg60[%c6_260, %c140_261] : memref<16x512xf32, #tpu.memory_space<vmem>>, vector<2x20xf32>
    tpu.vector_store %arg60[%c6_260, %c140_261], %273 {strides = array<i32>} : memref<16x512xf32, #tpu.memory_space<vmem>>, vector<2x20xf32>,
    %275 = vector.extract_strided_slice %244 {offsets = [3, 0], sizes = [5, 20], strides = [1, 1]} : vector<8x20xf32> to vector<5x20xf32>
    %c0_262 = arith.constant 0 : index
    %c160_263 = arith.constant 160 : index
    %276 = vector.load %arg60[%c0_262, %c160_263] : memref<16x512xf32, #tpu.memory_space<vmem>>, vector<5x20xf32>
    tpu.vector_store %arg60[%c0_262, %c160_263], %275 {strides = array<i32>} : memref<16x512xf32, #tpu.memory_space<vmem>>, vector<5x20xf32>,
    %cst_264 = arith.constant 0.000000e+00 : f32
    %277 = vector.broadcast %cst_264 : f32 to vector<3x20xf32>
    %c5_265 = arith.constant 5 : index
    %c160_266 = arith.constant 160 : index
    %278 = vector.load %arg60[%c5_265, %c160_266] : memref<16x512xf32, #tpu.memory_space<vmem>>, vector<3x20xf32>
    tpu.vector_store %arg60[%c5_265, %c160_266], %277 {strides = array<i32>} : memref<16x512xf32, #tpu.memory_space<vmem>>, vector<3x20xf32>,
    %279 = vector.extract_strided_slice %244 {offsets = [4, 0], sizes = [4, 20], strides = [1, 1]} : vector<8x20xf32> to vector<4x20xf32>
    %c0_267 = arith.constant 0 : index
    %c180 = arith.constant 180 : index
    %280 = vector.load %arg60[%c0_267, %c180] : memref<16x512xf32, #tpu.memory_space<vmem>>, vector<4x20xf32>
    tpu.vector_store %arg60[%c0_267, %c180], %279 {strides = array<i32>} : memref<16x512xf32, #tpu.memory_space<vmem>>, vector<4x20xf32>,
    %cst_268 = arith.constant 0.000000e+00 : f32
    %281 = vector.broadcast %cst_268 : f32 to vector<4x20xf32>
    %c4_269 = arith.constant 4 : index
    %c180_270 = arith.constant 180 : index
    %282 = vector.load %arg60[%c4_269, %c180_270] : memref<16x512xf32, #tpu.memory_space<vmem>>, vector<4x20xf32>
    tpu.vector_store %arg60[%c4_269, %c180_270], %281 {strides = array<i32>} : memref<16x512xf32, #tpu.memory_space<vmem>>, vector<4x20xf32>,
    %283 = vector.extract_strided_slice %244 {offsets = [5, 0], sizes = [3, 20], strides = [1, 1]} : vector<8x20xf32> to vector<3x20xf32>
    %c0_271 = arith.constant 0 : index
    %c200_272 = arith.constant 200 : index
    %284 = vector.load %arg60[%c0_271, %c200_272] : memref<16x512xf32, #tpu.memory_space<vmem>>, vector<3x20xf32>
    tpu.vector_store %arg60[%c0_271, %c200_272], %283 {strides = array<i32>} : memref<16x512xf32, #tpu.memory_space<vmem>>, vector<3x20xf32>,
    %cst_273 = arith.constant 0.000000e+00 : f32
    %285 = vector.broadcast %cst_273 : f32 to vector<5x20xf32>
    %c3_274 = arith.constant 3 : index
    %c200_275 = arith.constant 200 : index
    %286 = vector.load %arg60[%c3_274, %c200_275] : memref<16x512xf32, #tpu.memory_space<vmem>>, vector<5x20xf32>
    tpu.vector_store %arg60[%c3_274, %c200_275], %285 {strides = array<i32>} : memref<16x512xf32, #tpu.memory_space<vmem>>, vector<5x20xf32>,
    %c0_276 = arith.constant 0 : index
    %c0_277 = arith.constant 0 : index
    %287 = vector.load %arg60[%c0_276, %c0_277] : memref<16x512xf32, #tpu.memory_space<vmem>>, vector<8x220xf32>
    %288 = arith.truncf %287 : vector<8x220xf32> to vector<8x220xbf16>
    %c0_278 = arith.constant 0 : index
    %c0_279 = arith.constant 0 : index
    %289 = vector.load %arg25[%c0_278, %c0_279] : memref<220x4xbf16, #tpu.memory_space<vmem>>, vector<220x4xbf16>
    %cst_280 = arith.constant dense<0.000000e+00> : vector<8x4xf32>
    %290 = tpu.matmul %288, %289, %cst_280 {dimension_numbers = #tpu.dot_dimension_numbers<[1], [0], [0], [1], [0, 0, 1, 1], [], []>} : vector<8x220xbf16>, vector<220x4xbf16>, vector<8x4xf32> -> vector<8x4xf32>
    %291 = vector.broadcast %245 : vector<1x4xf32> to vector<8x4xf32>
    %292 = arith.addf %290, %291 : vector<8x4xf32>
    %c0_281 = arith.constant 0 : index
    %c20_282 = arith.constant 20 : index
    %293 = vector.load %arg62[%c0_281, %c20_282] : memref<8x24xf32, #tpu.memory_space<vmem>>, vector<8x4xf32>
    tpu.vector_store %arg62[%c0_281, %c20_282], %292 {strides = array<i32>} : memref<8x24xf32, #tpu.memory_space<vmem>>, vector<8x4xf32>,
    %c0_283 = arith.constant 0 : index
    %c0_284 = arith.constant 0 : index
    %294 = vector.load %arg62[%c0_283, %c0_284] : memref<8x24xf32, #tpu.memory_space<vmem>>, vector<8x24xf32>
    %c0_285 = arith.constant 0 : index
    %c0_286 = arith.constant 0 : index
    %295 = vector.load %arg31[%c0_285, %c0_286] : memref<1x24xf32, #tpu.memory_space<vmem>>, vector<1x24xf32>
    %c0_287 = arith.constant 0 : index
    %c0_288 = arith.constant 0 : index
    %296 = vector.load %arg32[%c0_287, %c0_288] : memref<1x24xf32, #tpu.memory_space<vmem>>, vector<1x24xf32>
    %297 = vector.broadcast %295 : vector<1x24xf32> to vector<8x24xf32>
    %298 = arith.mulf %294, %297 : vector<8x24xf32>
    %299 = vector.broadcast %296 : vector<1x24xf32> to vector<8x24xf32>
    %300 = arith.addf %298, %299 : vector<8x24xf32>
    %cst_289 = arith.constant 0.000000e+00 : f32
    %301 = vector.broadcast %cst_289 : f32 to vector<8x24xf32>
    %302 = arith.maximumf %300, %301 : vector<8x24xf32>
    %c0_290 = arith.constant 0 : index
    %c0_291 = arith.constant 0 : index
    %303 = vector.load %arg30[%c0_290, %c0_291] : memref<1x24xf32, #tpu.memory_space<vmem>>, vector<1x24xf32>
    %304 = arith.truncf %302 : vector<8x24xf32> to vector<8x24xbf16>
    %c0_292 = arith.constant 0 : index
    %c0_293 = arith.constant 0 : index
    %305 = vector.load %arg33[%c0_292, %c0_293] : memref<24x24xbf16, #tpu.memory_space<vmem>>, vector<24x24xbf16>
    %cst_294 = arith.constant dense<0.000000e+00> : vector<8x24xf32>
    %306 = tpu.matmul %304, %305, %cst_294 {dimension_numbers = #tpu.dot_dimension_numbers<[1], [0], [0], [1], [0, 0, 1, 1], [], []>} : vector<8x24xbf16>, vector<24x24xbf16>, vector<8x24xf32> -> vector<8x24xf32>
    %307 = vector.broadcast %303 : vector<1x24xf32> to vector<8x24xf32>
    %308 = arith.addf %306, %307 : vector<8x24xf32>
    %309 = tpu.iota {dimensions = array<i32: 0>} : vector<4x8xi32>
    %310 = tpu.iota {dimensions = array<i32: 1>} : vector<4x8xi32>
    %c2_i32_295 = arith.constant 2 : i32
    %311 = vector.broadcast %c2_i32_295 : i32 to vector<4x8xi32>
    %312 = arith.muli %311, %309 : vector<4x8xi32>
    %313 = arith.cmpi eq, %310, %312 : vector<4x8xi32>
    %cst_296 = arith.constant 1.000000e+00 : f32
    %cst_297 = arith.constant 0.000000e+00 : f32
    %314 = vector.broadcast %cst_296 : f32 to vector<4x8xf32>
    %315 = vector.broadcast %cst_297 : f32 to vector<4x8xf32>
    %316 = arith.select %313, %314, %315 : vector<4x8xi1>, vector<4x8xf32>
    %c2_i32_298 = arith.constant 2 : i32
    %317 = vector.broadcast %c2_i32_298 : i32 to vector<4x8xi32>
    %318 = arith.muli %317, %309 : vector<4x8xi32>
    %c1_i32_299 = arith.constant 1 : i32
    %319 = vector.broadcast %c1_i32_299 : i32 to vector<4x8xi32>
    %320 = arith.addi %318, %319 : vector<4x8xi32>
    %321 = arith.cmpi eq, %310, %320 : vector<4x8xi32>
    %cst_300 = arith.constant 1.000000e+00 : f32
    %cst_301 = arith.constant 0.000000e+00 : f32
    %322 = vector.broadcast %cst_300 : f32 to vector<4x8xf32>
    %323 = vector.broadcast %cst_301 : f32 to vector<4x8xf32>
    %324 = arith.select %321, %322, %323 : vector<4x8xi1>, vector<4x8xf32>
    %cst_302 = arith.constant dense<0.000000e+00> : vector<4x24xf32>
    %325 = tpu.matmul %316, %308, %cst_302 {dimension_numbers = #tpu.dot_dimension_numbers<[1], [0], [0], [1], [0, 0, 1, 1], [], []>} : vector<4x8xf32>, vector<8x24xf32>, vector<4x24xf32> -> vector<4x24xf32>
    %cst_303 = arith.constant dense<0.000000e+00> : vector<4x24xf32>
    %326 = tpu.matmul %324, %308, %cst_303 {dimension_numbers = #tpu.dot_dimension_numbers<[1], [0], [0], [1], [0, 0, 1, 1], [], []>} : vector<4x8xf32>, vector<8x24xf32>, vector<4x24xf32> -> vector<4x24xf32>
    %327 = arith.maximumf %325, %326 : vector<4x24xf32>
    %c0_304 = arith.constant 0 : index
    %c0_305 = arith.constant 0 : index
    %328 = vector.load %arg63[%c0_304, %c0_305] : memref<4x32xf32, #tpu.memory_space<vmem>>, vector<4x24xf32>
    tpu.vector_store %arg63[%c0_304, %c0_305], %327 {strides = array<i32>} : memref<4x32xf32, #tpu.memory_space<vmem>>, vector<4x24xf32>,
    %c0_306 = arith.constant 0 : index
    %c0_307 = arith.constant 0 : index
    %329 = vector.load %arg63[%c0_306, %c0_307] : memref<4x32xf32, #tpu.memory_space<vmem>>, vector<4x24xf32>
    %c0_308 = arith.constant 0 : index
    %c0_309 = arith.constant 0 : index
    %330 = vector.load %arg3[%c0_308, %c0_309] : memref<1x24xf32, #tpu.memory_space<vmem>>, vector<1x24xf32>
    %c0_310 = arith.constant 0 : index
    %c0_311 = arith.constant 0 : index
    %331 = vector.load %arg4[%c0_310, %c0_311] : memref<1x24xf32, #tpu.memory_space<vmem>>, vector<1x24xf32>
    %332 = vector.broadcast %330 : vector<1x24xf32> to vector<4x24xf32>
    %333 = arith.mulf %329, %332 : vector<4x24xf32>
    %334 = vector.broadcast %331 : vector<1x24xf32> to vector<4x24xf32>
    %335 = arith.addf %333, %334 : vector<4x24xf32>
    %cst_312 = arith.constant 0.000000e+00 : f32
    %336 = vector.broadcast %cst_312 : f32 to vector<4x24xf32>
    %337 = arith.maximumf %335, %336 : vector<4x24xf32>
    %c0_313 = arith.constant 0 : index
    %c0_314 = arith.constant 0 : index
    %338 = vector.load %arg2[%c0_313, %c0_314] : memref<1x4xf32, #tpu.memory_space<vmem>>, vector<1x4xf32>
    %cst_315 = arith.constant 0.000000e+00 : f32
    %339 = vector.broadcast %cst_315 : f32 to vector<4x24xf32>
    %c0_316 = arith.constant 0 : index
    %c0_317 = arith.constant 0 : index
    %340 = vector.load %arg60[%c0_316, %c0_317] : memref<16x512xf32, #tpu.memory_space<vmem>>, vector<4x24xf32>
    tpu.vector_store %arg60[%c0_316, %c0_317], %339 {strides = array<i32>} : memref<16x512xf32, #tpu.memory_space<vmem>>, vector<4x24xf32>,
    %cst_318 = arith.constant 0.000000e+00 : f32
    %341 = vector.broadcast %cst_318 : f32 to vector<4x24xf32>
    %c0_319 = arith.constant 0 : index
    %c24_320 = arith.constant 24 : index
    %342 = vector.load %arg60[%c0_319, %c24_320] : memref<16x512xf32, #tpu.memory_space<vmem>>, vector<4x24xf32>
    tpu.vector_store %arg60[%c0_319, %c24_320], %341 {strides = array<i32>} : memref<16x512xf32, #tpu.memory_space<vmem>>, vector<4x24xf32>,
    %343 = vector.extract_strided_slice %337 {offsets = [0, 0], sizes = [1, 24], strides = [1, 1]} : vector<4x24xf32> to vector<1x24xf32>
    %c3_321 = arith.constant 3 : index
    %c48_322 = arith.constant 48 : index
    %344 = vector.load %arg60[%c3_321, %c48_322] : memref<16x512xf32, #tpu.memory_space<vmem>>, vector<1x24xf32>
    tpu.vector_store %arg60[%c3_321, %c48_322], %343 {strides = array<i32>} : memref<16x512xf32, #tpu.memory_space<vmem>>, vector<1x24xf32>,
    %cst_323 = arith.constant 0.000000e+00 : f32
    %345 = vector.broadcast %cst_323 : f32 to vector<3x24xf32>
    %c0_324 = arith.constant 0 : index
    %c48_325 = arith.constant 48 : index
    %346 = vector.load %arg60[%c0_324, %c48_325] : memref<16x512xf32, #tpu.memory_space<vmem>>, vector<3x24xf32>
    tpu.vector_store %arg60[%c0_324, %c48_325], %345 {strides = array<i32>} : memref<16x512xf32, #tpu.memory_space<vmem>>, vector<3x24xf32>,
    %347 = vector.extract_strided_slice %337 {offsets = [0, 0], sizes = [2, 24], strides = [1, 1]} : vector<4x24xf32> to vector<2x24xf32>
    %c2_326 = arith.constant 2 : index
    %c72_327 = arith.constant 72 : index
    %348 = vector.load %arg60[%c2_326, %c72_327] : memref<16x512xf32, #tpu.memory_space<vmem>>, vector<2x24xf32>
    tpu.vector_store %arg60[%c2_326, %c72_327], %347 {strides = array<i32>} : memref<16x512xf32, #tpu.memory_space<vmem>>, vector<2x24xf32>,
    %cst_328 = arith.constant 0.000000e+00 : f32
    %349 = vector.broadcast %cst_328 : f32 to vector<2x24xf32>
    %c0_329 = arith.constant 0 : index
    %c72_330 = arith.constant 72 : index
    %350 = vector.load %arg60[%c0_329, %c72_330] : memref<16x512xf32, #tpu.memory_space<vmem>>, vector<2x24xf32>
    tpu.vector_store %arg60[%c0_329, %c72_330], %349 {strides = array<i32>} : memref<16x512xf32, #tpu.memory_space<vmem>>, vector<2x24xf32>,
    %351 = vector.extract_strided_slice %337 {offsets = [0, 0], sizes = [3, 24], strides = [1, 1]} : vector<4x24xf32> to vector<3x24xf32>
    %c1_331 = arith.constant 1 : index
    %c96_332 = arith.constant 96 : index
    %352 = vector.load %arg60[%c1_331, %c96_332] : memref<16x512xf32, #tpu.memory_space<vmem>>, vector<3x24xf32>
    tpu.vector_store %arg60[%c1_331, %c96_332], %351 {strides = array<i32>} : memref<16x512xf32, #tpu.memory_space<vmem>>, vector<3x24xf32>,
    %cst_333 = arith.constant 0.000000e+00 : f32
    %353 = vector.broadcast %cst_333 : f32 to vector<1x24xf32>
    %c0_334 = arith.constant 0 : index
    %c96_335 = arith.constant 96 : index
    %354 = vector.load %arg60[%c0_334, %c96_335] : memref<16x512xf32, #tpu.memory_space<vmem>>, vector<1x24xf32>
    tpu.vector_store %arg60[%c0_334, %c96_335], %353 {strides = array<i32>} : memref<16x512xf32, #tpu.memory_space<vmem>>, vector<1x24xf32>,
    %c0_336 = arith.constant 0 : index
    %c120_337 = arith.constant 120 : index
    %355 = vector.load %arg60[%c0_336, %c120_337] : memref<16x512xf32, #tpu.memory_space<vmem>>, vector<4x24xf32>
    tpu.vector_store %arg60[%c0_336, %c120_337], %337 {strides = array<i32>} : memref<16x512xf32, #tpu.memory_space<vmem>>, vector<4x24xf32>,
    %356 = vector.extract_strided_slice %337 {offsets = [1, 0], sizes = [3, 24], strides = [1, 1]} : vector<4x24xf32> to vector<3x24xf32>
    %c0_338 = arith.constant 0 : index
    %c144_339 = arith.constant 144 : index
    %357 = vector.load %arg60[%c0_338, %c144_339] : memref<16x512xf32, #tpu.memory_space<vmem>>, vector<3x24xf32>
    tpu.vector_store %arg60[%c0_338, %c144_339], %356 {strides = array<i32>} : memref<16x512xf32, #tpu.memory_space<vmem>>, vector<3x24xf32>,
    %cst_340 = arith.constant 0.000000e+00 : f32
    %358 = vector.broadcast %cst_340 : f32 to vector<1x24xf32>
    %c3_341 = arith.constant 3 : index
    %c144_342 = arith.constant 144 : index
    %359 = vector.load %arg60[%c3_341, %c144_342] : memref<16x512xf32, #tpu.memory_space<vmem>>, vector<1x24xf32>
    tpu.vector_store %arg60[%c3_341, %c144_342], %358 {strides = array<i32>} : memref<16x512xf32, #tpu.memory_space<vmem>>, vector<1x24xf32>,
    %360 = vector.extract_strided_slice %337 {offsets = [2, 0], sizes = [2, 24], strides = [1, 1]} : vector<4x24xf32> to vector<2x24xf32>
    %c0_343 = arith.constant 0 : index
    %c168 = arith.constant 168 : index
    %361 = vector.load %arg60[%c0_343, %c168] : memref<16x512xf32, #tpu.memory_space<vmem>>, vector<2x24xf32>
    tpu.vector_store %arg60[%c0_343, %c168], %360 {strides = array<i32>} : memref<16x512xf32, #tpu.memory_space<vmem>>, vector<2x24xf32>,
    %cst_344 = arith.constant 0.000000e+00 : f32
    %362 = vector.broadcast %cst_344 : f32 to vector<2x24xf32>
    %c2_345 = arith.constant 2 : index
    %c168_346 = arith.constant 168 : index
    %363 = vector.load %arg60[%c2_345, %c168_346] : memref<16x512xf32, #tpu.memory_space<vmem>>, vector<2x24xf32>
    tpu.vector_store %arg60[%c2_345, %c168_346], %362 {strides = array<i32>} : memref<16x512xf32, #tpu.memory_space<vmem>>, vector<2x24xf32>,
    %364 = vector.extract_strided_slice %337 {offsets = [3, 0], sizes = [1, 24], strides = [1, 1]} : vector<4x24xf32> to vector<1x24xf32>
    %c0_347 = arith.constant 0 : index
    %c192 = arith.constant 192 : index
    %365 = vector.load %arg60[%c0_347, %c192] : memref<16x512xf32, #tpu.memory_space<vmem>>, vector<1x24xf32>
    tpu.vector_store %arg60[%c0_347, %c192], %364 {strides = array<i32>} : memref<16x512xf32, #tpu.memory_space<vmem>>, vector<1x24xf32>,
    %cst_348 = arith.constant 0.000000e+00 : f32
    %366 = vector.broadcast %cst_348 : f32 to vector<3x24xf32>
    %c1_349 = arith.constant 1 : index
    %c192_350 = arith.constant 192 : index
    %367 = vector.load %arg60[%c1_349, %c192_350] : memref<16x512xf32, #tpu.memory_space<vmem>>, vector<3x24xf32>
    tpu.vector_store %arg60[%c1_349, %c192_350], %366 {strides = array<i32>} : memref<16x512xf32, #tpu.memory_space<vmem>>, vector<3x24xf32>,
    %cst_351 = arith.constant 0.000000e+00 : f32
    %368 = vector.broadcast %cst_351 : f32 to vector<4x24xf32>
    %c0_352 = arith.constant 0 : index
    %c216 = arith.constant 216 : index
    %369 = vector.load %arg60[%c0_352, %c216] : memref<16x512xf32, #tpu.memory_space<vmem>>, vector<4x24xf32>
    tpu.vector_store %arg60[%c0_352, %c216], %368 {strides = array<i32>} : memref<16x512xf32, #tpu.memory_space<vmem>>, vector<4x24xf32>,
    %cst_353 = arith.constant 0.000000e+00 : f32
    %370 = vector.broadcast %cst_353 : f32 to vector<4x24xf32>
    %c0_354 = arith.constant 0 : index
    %c240 = arith.constant 240 : index
    %371 = vector.load %arg60[%c0_354, %c240] : memref<16x512xf32, #tpu.memory_space<vmem>>, vector<4x24xf32>
    tpu.vector_store %arg60[%c0_354, %c240], %370 {strides = array<i32>} : memref<16x512xf32, #tpu.memory_space<vmem>>, vector<4x24xf32>,
    %c0_355 = arith.constant 0 : index
    %c0_356 = arith.constant 0 : index
    %372 = vector.load %arg60[%c0_355, %c0_356] : memref<16x512xf32, #tpu.memory_space<vmem>>, vector<4x264xf32>
    %373 = arith.truncf %372 : vector<4x264xf32> to vector<4x264xbf16>
    %c0_357 = arith.constant 0 : index
    %c0_358 = arith.constant 0 : index
    %374 = vector.load %arg5[%c0_357, %c0_358] : memref<264x4xbf16, #tpu.memory_space<vmem>>, vector<264x4xbf16>
    %cst_359 = arith.constant dense<0.000000e+00> : vector<4x4xf32>
    %375 = tpu.matmul %373, %374, %cst_359 {dimension_numbers = #tpu.dot_dimension_numbers<[1], [0], [0], [1], [0, 0, 1, 1], [], []>} : vector<4x264xbf16>, vector<264x4xbf16>, vector<4x4xf32> -> vector<4x4xf32>
    %376 = vector.broadcast %338 : vector<1x4xf32> to vector<4x4xf32>
    %377 = arith.addf %375, %376 : vector<4x4xf32>
    %c0_360 = arith.constant 0 : index
    %c24_361 = arith.constant 24 : index
    %378 = vector.load %arg63[%c0_360, %c24_361] : memref<4x32xf32, #tpu.memory_space<vmem>>, vector<4x4xf32>
    tpu.vector_store %arg63[%c0_360, %c24_361], %377 {strides = array<i32>} : memref<4x32xf32, #tpu.memory_space<vmem>>, vector<4x4xf32>,
    %c0_362 = arith.constant 0 : index
    %c0_363 = arith.constant 0 : index
    %379 = vector.load %arg63[%c0_362, %c0_363] : memref<4x32xf32, #tpu.memory_space<vmem>>, vector<4x28xf32>
    %c0_364 = arith.constant 0 : index
    %c0_365 = arith.constant 0 : index
    %380 = vector.load %arg7[%c0_364, %c0_365] : memref<1x28xf32, #tpu.memory_space<vmem>>, vector<1x28xf32>
    %c0_366 = arith.constant 0 : index
    %c0_367 = arith.constant 0 : index
    %381 = vector.load %arg8[%c0_366, %c0_367] : memref<1x28xf32, #tpu.memory_space<vmem>>, vector<1x28xf32>
    %382 = vector.broadcast %380 : vector<1x28xf32> to vector<4x28xf32>
    %383 = arith.mulf %379, %382 : vector<4x28xf32>
    %384 = vector.broadcast %381 : vector<1x28xf32> to vector<4x28xf32>
    %385 = arith.addf %383, %384 : vector<4x28xf32>
    %cst_368 = arith.constant 0.000000e+00 : f32
    %386 = vector.broadcast %cst_368 : f32 to vector<4x28xf32>
    %387 = arith.maximumf %385, %386 : vector<4x28xf32>
    %c0_369 = arith.constant 0 : index
    %c0_370 = arith.constant 0 : index
    %388 = vector.load %arg6[%c0_369, %c0_370] : memref<1x4xf32, #tpu.memory_space<vmem>>, vector<1x4xf32>
    %cst_371 = arith.constant 0.000000e+00 : f32
    %389 = vector.broadcast %cst_371 : f32 to vector<4x28xf32>
    %c0_372 = arith.constant 0 : index
    %c0_373 = arith.constant 0 : index
    %390 = vector.load %arg60[%c0_372, %c0_373] : memref<16x512xf32, #tpu.memory_space<vmem>>, vector<4x28xf32>
    tpu.vector_store %arg60[%c0_372, %c0_373], %389 {strides = array<i32>} : memref<16x512xf32, #tpu.memory_space<vmem>>, vector<4x28xf32>,
    %cst_374 = arith.constant 0.000000e+00 : f32
    %391 = vector.broadcast %cst_374 : f32 to vector<4x28xf32>
    %c0_375 = arith.constant 0 : index
    %c28 = arith.constant 28 : index
    %392 = vector.load %arg60[%c0_375, %c28] : memref<16x512xf32, #tpu.memory_space<vmem>>, vector<4x28xf32>
    tpu.vector_store %arg60[%c0_375, %c28], %391 {strides = array<i32>} : memref<16x512xf32, #tpu.memory_space<vmem>>, vector<4x28xf32>,
    %393 = vector.extract_strided_slice %387 {offsets = [0, 0], sizes = [1, 28], strides = [1, 1]} : vector<4x28xf32> to vector<1x28xf32>
    %c3_376 = arith.constant 3 : index
    %c56_377 = arith.constant 56 : index
    %394 = vector.load %arg60[%c3_376, %c56_377] : memref<16x512xf32, #tpu.memory_space<vmem>>, vector<1x28xf32>
    tpu.vector_store %arg60[%c3_376, %c56_377], %393 {strides = array<i32>} : memref<16x512xf32, #tpu.memory_space<vmem>>, vector<1x28xf32>,
    %cst_378 = arith.constant 0.000000e+00 : f32
    %395 = vector.broadcast %cst_378 : f32 to vector<3x28xf32>
    %c0_379 = arith.constant 0 : index
    %c56_380 = arith.constant 56 : index
    %396 = vector.load %arg60[%c0_379, %c56_380] : memref<16x512xf32, #tpu.memory_space<vmem>>, vector<3x28xf32>
    tpu.vector_store %arg60[%c0_379, %c56_380], %395 {strides = array<i32>} : memref<16x512xf32, #tpu.memory_space<vmem>>, vector<3x28xf32>,
    %397 = vector.extract_strided_slice %387 {offsets = [0, 0], sizes = [2, 28], strides = [1, 1]} : vector<4x28xf32> to vector<2x28xf32>
    %c2_381 = arith.constant 2 : index
    %c84_382 = arith.constant 84 : index
    %398 = vector.load %arg60[%c2_381, %c84_382] : memref<16x512xf32, #tpu.memory_space<vmem>>, vector<2x28xf32>
    tpu.vector_store %arg60[%c2_381, %c84_382], %397 {strides = array<i32>} : memref<16x512xf32, #tpu.memory_space<vmem>>, vector<2x28xf32>,
    %cst_383 = arith.constant 0.000000e+00 : f32
    %399 = vector.broadcast %cst_383 : f32 to vector<2x28xf32>
    %c0_384 = arith.constant 0 : index
    %c84_385 = arith.constant 84 : index
    %400 = vector.load %arg60[%c0_384, %c84_385] : memref<16x512xf32, #tpu.memory_space<vmem>>, vector<2x28xf32>
    tpu.vector_store %arg60[%c0_384, %c84_385], %399 {strides = array<i32>} : memref<16x512xf32, #tpu.memory_space<vmem>>, vector<2x28xf32>,
    %401 = vector.extract_strided_slice %387 {offsets = [0, 0], sizes = [3, 28], strides = [1, 1]} : vector<4x28xf32> to vector<3x28xf32>
    %c1_386 = arith.constant 1 : index
    %c112_387 = arith.constant 112 : index
    %402 = vector.load %arg60[%c1_386, %c112_387] : memref<16x512xf32, #tpu.memory_space<vmem>>, vector<3x28xf32>
    tpu.vector_store %arg60[%c1_386, %c112_387], %401 {strides = array<i32>} : memref<16x512xf32, #tpu.memory_space<vmem>>, vector<3x28xf32>,
    %cst_388 = arith.constant 0.000000e+00 : f32
    %403 = vector.broadcast %cst_388 : f32 to vector<1x28xf32>
    %c0_389 = arith.constant 0 : index
    %c112_390 = arith.constant 112 : index
    %404 = vector.load %arg60[%c0_389, %c112_390] : memref<16x512xf32, #tpu.memory_space<vmem>>, vector<1x28xf32>
    tpu.vector_store %arg60[%c0_389, %c112_390], %403 {strides = array<i32>} : memref<16x512xf32, #tpu.memory_space<vmem>>, vector<1x28xf32>,
    %c0_391 = arith.constant 0 : index
    %c140_392 = arith.constant 140 : index
    %405 = vector.load %arg60[%c0_391, %c140_392] : memref<16x512xf32, #tpu.memory_space<vmem>>, vector<4x28xf32>
    tpu.vector_store %arg60[%c0_391, %c140_392], %387 {strides = array<i32>} : memref<16x512xf32, #tpu.memory_space<vmem>>, vector<4x28xf32>,
    %406 = vector.extract_strided_slice %387 {offsets = [1, 0], sizes = [3, 28], strides = [1, 1]} : vector<4x28xf32> to vector<3x28xf32>
    %c0_393 = arith.constant 0 : index
    %c168_394 = arith.constant 168 : index
    %407 = vector.load %arg60[%c0_393, %c168_394] : memref<16x512xf32, #tpu.memory_space<vmem>>, vector<3x28xf32>
    tpu.vector_store %arg60[%c0_393, %c168_394], %406 {strides = array<i32>} : memref<16x512xf32, #tpu.memory_space<vmem>>, vector<3x28xf32>,
    %cst_395 = arith.constant 0.000000e+00 : f32
    %408 = vector.broadcast %cst_395 : f32 to vector<1x28xf32>
    %c3_396 = arith.constant 3 : index
    %c168_397 = arith.constant 168 : index
    %409 = vector.load %arg60[%c3_396, %c168_397] : memref<16x512xf32, #tpu.memory_space<vmem>>, vector<1x28xf32>
    tpu.vector_store %arg60[%c3_396, %c168_397], %408 {strides = array<i32>} : memref<16x512xf32, #tpu.memory_space<vmem>>, vector<1x28xf32>,
    %410 = vector.extract_strided_slice %387 {offsets = [2, 0], sizes = [2, 28], strides = [1, 1]} : vector<4x28xf32> to vector<2x28xf32>
    %c0_398 = arith.constant 0 : index
    %c196 = arith.constant 196 : index
    %411 = vector.load %arg60[%c0_398, %c196] : memref<16x512xf32, #tpu.memory_space<vmem>>, vector<2x28xf32>
    tpu.vector_store %arg60[%c0_398, %c196], %410 {strides = array<i32>} : memref<16x512xf32, #tpu.memory_space<vmem>>, vector<2x28xf32>,
    %cst_399 = arith.constant 0.000000e+00 : f32
    %412 = vector.broadcast %cst_399 : f32 to vector<2x28xf32>
    %c2_400 = arith.constant 2 : index
    %c196_401 = arith.constant 196 : index
    %413 = vector.load %arg60[%c2_400, %c196_401] : memref<16x512xf32, #tpu.memory_space<vmem>>, vector<2x28xf32>
    tpu.vector_store %arg60[%c2_400, %c196_401], %412 {strides = array<i32>} : memref<16x512xf32, #tpu.memory_space<vmem>>, vector<2x28xf32>,
    %414 = vector.extract_strided_slice %387 {offsets = [3, 0], sizes = [1, 28], strides = [1, 1]} : vector<4x28xf32> to vector<1x28xf32>
    %c0_402 = arith.constant 0 : index
    %c224 = arith.constant 224 : index
    %415 = vector.load %arg60[%c0_402, %c224] : memref<16x512xf32, #tpu.memory_space<vmem>>, vector<1x28xf32>
    tpu.vector_store %arg60[%c0_402, %c224], %414 {strides = array<i32>} : memref<16x512xf32, #tpu.memory_space<vmem>>, vector<1x28xf32>,
    %cst_403 = arith.constant 0.000000e+00 : f32
    %416 = vector.broadcast %cst_403 : f32 to vector<3x28xf32>
    %c1_404 = arith.constant 1 : index
    %c224_405 = arith.constant 224 : index
    %417 = vector.load %arg60[%c1_404, %c224_405] : memref<16x512xf32, #tpu.memory_space<vmem>>, vector<3x28xf32>
    tpu.vector_store %arg60[%c1_404, %c224_405], %416 {strides = array<i32>} : memref<16x512xf32, #tpu.memory_space<vmem>>, vector<3x28xf32>,
    %cst_406 = arith.constant 0.000000e+00 : f32
    %418 = vector.broadcast %cst_406 : f32 to vector<4x28xf32>
    %c0_407 = arith.constant 0 : index
    %c252 = arith.constant 252 : index
    %419 = vector.load %arg60[%c0_407, %c252] : memref<16x512xf32, #tpu.memory_space<vmem>>, vector<4x28xf32>
    tpu.vector_store %arg60[%c0_407, %c252], %418 {strides = array<i32>} : memref<16x512xf32, #tpu.memory_space<vmem>>, vector<4x28xf32>,
    %cst_408 = arith.constant 0.000000e+00 : f32
    %420 = vector.broadcast %cst_408 : f32 to vector<4x28xf32>
    %c0_409 = arith.constant 0 : index
    %c280 = arith.constant 280 : index
    %421 = vector.load %arg60[%c0_409, %c280] : memref<16x512xf32, #tpu.memory_space<vmem>>, vector<4x28xf32>
    tpu.vector_store %arg60[%c0_409, %c280], %420 {strides = array<i32>} : memref<16x512xf32, #tpu.memory_space<vmem>>, vector<4x28xf32>,
    %c0_410 = arith.constant 0 : index
    %c0_411 = arith.constant 0 : index
    %422 = vector.load %arg60[%c0_410, %c0_411] : memref<16x512xf32, #tpu.memory_space<vmem>>, vector<4x308xf32>
    %423 = arith.truncf %422 : vector<4x308xf32> to vector<4x308xbf16>
    %c0_412 = arith.constant 0 : index
    %c0_413 = arith.constant 0 : index
    %424 = vector.load %arg9[%c0_412, %c0_413] : memref<308x4xbf16, #tpu.memory_space<vmem>>, vector<308x4xbf16>
    %cst_414 = arith.constant dense<0.000000e+00> : vector<4x4xf32>
    %425 = tpu.matmul %423, %424, %cst_414 {dimension_numbers = #tpu.dot_dimension_numbers<[1], [0], [0], [1], [0, 0, 1, 1], [], []>} : vector<4x308xbf16>, vector<308x4xbf16>, vector<4x4xf32> -> vector<4x4xf32>
    %426 = vector.broadcast %388 : vector<1x4xf32> to vector<4x4xf32>
    %427 = arith.addf %425, %426 : vector<4x4xf32>
    %c0_415 = arith.constant 0 : index
    %c28_416 = arith.constant 28 : index
    %428 = vector.load %arg63[%c0_415, %c28_416] : memref<4x32xf32, #tpu.memory_space<vmem>>, vector<4x4xf32>
    tpu.vector_store %arg63[%c0_415, %c28_416], %427 {strides = array<i32>} : memref<4x32xf32, #tpu.memory_space<vmem>>, vector<4x4xf32>,
    %c0_417 = arith.constant 0 : index
    %c24_418 = arith.constant 24 : index
    %429 = vector.load %arg63[%c0_417, %c24_418] : memref<4x32xf32, #tpu.memory_space<vmem>>, vector<4x8xf32>
    %430 = arith.truncf %429 : vector<4x8xf32> to vector<4x8xbf16>
    %c0_419 = arith.constant 0 : index
    %c0_420 = arith.constant 0 : index
    %431 = vector.load %arg56[%c0_419, %c0_420] : memref<8x24xbf16, #tpu.memory_space<vmem>>, vector<8x24xbf16>
    %cst_421 = arith.constant dense<0.000000e+00> : vector<4x24xf32>
    %432 = tpu.matmul %430, %431, %cst_421 {dimension_numbers = #tpu.dot_dimension_numbers<[1], [0], [0], [1], [0, 0, 1, 1], [], []>} : vector<4x8xbf16>, vector<8x24xbf16>, vector<4x24xf32> -> vector<4x24xf32>
    %433 = tpu.iota {dimensions = array<i32: 0>} : vector<8x4xi32>
    %c0_i32 = arith.constant 0 : i32
    %434 = vector.broadcast %c0_i32 : i32 to vector<8x4xi32>
    %435 = arith.addi %433, %434 : vector<8x4xi32>
    %436 = tpu.iota {dimensions = array<i32: 1>} : vector<8x4xi32>
    %cst_422 = arith.constant 0.000000e+00 : f32
    %437 = vector.broadcast %cst_422 : f32 to vector<8x8xf32>
    %c2_i32_423 = arith.constant 2 : i32
    %438 = vector.broadcast %c2_i32_423 : i32 to vector<8x4xi32>
    %439 = arith.muli %438, %436 : vector<8x4xi32>
    %c0_i32_424 = arith.constant 0 : i32
    %440 = vector.broadcast %c0_i32_424 : i32 to vector<8x4xi32>
    %441 = arith.addi %439, %440 : vector<8x4xi32>
    %442 = arith.cmpi eq, %435, %441 : vector<8x4xi32>
    %cst_425 = arith.constant 1.000000e+00 : f32
    %cst_426 = arith.constant 0.000000e+00 : f32
    %443 = vector.broadcast %cst_425 : f32 to vector<8x4xf32>
    %444 = vector.broadcast %cst_426 : f32 to vector<8x4xf32>
    %445 = arith.select %442, %443, %444 : vector<8x4xi1>, vector<8x4xf32>
    %446 = vector.extract_strided_slice %432 {offsets = [0, 0], sizes = [4, 8], strides = [1, 1]} : vector<4x24xf32> to vector<4x8xf32>
    %cst_427 = arith.constant dense<0.000000e+00> : vector<8x8xf32>
    %447 = tpu.matmul %445, %446, %cst_427 {dimension_numbers = #tpu.dot_dimension_numbers<[1], [0], [0], [1], [0, 0, 1, 1], [], []>} : vector<8x4xf32>, vector<4x8xf32>, vector<8x8xf32> -> vector<8x8xf32>
    %448 = arith.addf %437, %447 : vector<8x8xf32>
    %c2_i32_428 = arith.constant 2 : i32
    %449 = vector.broadcast %c2_i32_428 : i32 to vector<8x4xi32>
    %450 = arith.muli %449, %436 : vector<8x4xi32>
    %c1_i32_429 = arith.constant 1 : i32
    %451 = vector.broadcast %c1_i32_429 : i32 to vector<8x4xi32>
    %452 = arith.addi %450, %451 : vector<8x4xi32>
    %453 = arith.cmpi eq, %435, %452 : vector<8x4xi32>
    %cst_430 = arith.constant 1.000000e+00 : f32
    %cst_431 = arith.constant 0.000000e+00 : f32
    %454 = vector.broadcast %cst_430 : f32 to vector<8x4xf32>
    %455 = vector.broadcast %cst_431 : f32 to vector<8x4xf32>
    %456 = arith.select %453, %454, %455 : vector<8x4xi1>, vector<8x4xf32>
    %457 = vector.extract_strided_slice %432 {offsets = [0, 8], sizes = [4, 8], strides = [1, 1]} : vector<4x24xf32> to vector<4x8xf32>
    %cst_432 = arith.constant dense<0.000000e+00> : vector<8x8xf32>
    %458 = tpu.matmul %456, %457, %cst_432 {dimension_numbers = #tpu.dot_dimension_numbers<[1], [0], [0], [1], [0, 0, 1, 1], [], []>} : vector<8x4xf32>, vector<4x8xf32>, vector<8x8xf32> -> vector<8x8xf32>
    %459 = arith.addf %448, %458 : vector<8x8xf32>
    %c2_i32_433 = arith.constant 2 : i32
    %460 = vector.broadcast %c2_i32_433 : i32 to vector<8x4xi32>
    %461 = arith.muli %460, %436 : vector<8x4xi32>
    %c2_i32_434 = arith.constant 2 : i32
    %462 = vector.broadcast %c2_i32_434 : i32 to vector<8x4xi32>
    %463 = arith.addi %461, %462 : vector<8x4xi32>
    %464 = arith.cmpi eq, %435, %463 : vector<8x4xi32>
    %cst_435 = arith.constant 1.000000e+00 : f32
    %cst_436 = arith.constant 0.000000e+00 : f32
    %465 = vector.broadcast %cst_435 : f32 to vector<8x4xf32>
    %466 = vector.broadcast %cst_436 : f32 to vector<8x4xf32>
    %467 = arith.select %464, %465, %466 : vector<8x4xi1>, vector<8x4xf32>
    %468 = vector.extract_strided_slice %432 {offsets = [0, 16], sizes = [4, 8], strides = [1, 1]} : vector<4x24xf32> to vector<4x8xf32>
    %cst_437 = arith.constant dense<0.000000e+00> : vector<8x8xf32>
    %469 = tpu.matmul %467, %468, %cst_437 {dimension_numbers = #tpu.dot_dimension_numbers<[1], [0], [0], [1], [0, 0, 1, 1], [], []>} : vector<8x4xf32>, vector<4x8xf32>, vector<8x8xf32> -> vector<8x8xf32>
    %470 = arith.addf %459, %469 : vector<8x8xf32>
    %c0_438 = arith.constant 0 : index
    %c0_439 = arith.constant 0 : index
    %471 = vector.load %arg55[%c0_438, %c0_439] : memref<1x8xf32, #tpu.memory_space<vmem>>, vector<1x8xf32>
    %472 = vector.broadcast %471 : vector<1x8xf32> to vector<8x8xf32>
    %473 = arith.addf %470, %472 : vector<8x8xf32>
    %c0_440 = arith.constant 0 : index
    %c0_441 = arith.constant 0 : index
    %474 = vector.load %arg64[%c0_440, %c0_441] : memref<8x40xf32, #tpu.memory_space<vmem>>, vector<8x8xf32>
    tpu.vector_store %arg64[%c0_440, %c0_441], %473 {strides = array<i32>} : memref<8x40xf32, #tpu.memory_space<vmem>>, vector<8x8xf32>,
    %c0_442 = arith.constant 0 : index
    %c0_443 = arith.constant 0 : index
    %475 = vector.load %arg62[%c0_442, %c0_443] : memref<8x24xf32, #tpu.memory_space<vmem>>, vector<8x24xf32>
    %c0_444 = arith.constant 0 : index
    %c8_445 = arith.constant 8 : index
    %476 = vector.load %arg64[%c0_444, %c8_445] : memref<8x40xf32, #tpu.memory_space<vmem>>, vector<8x24xf32>
    tpu.vector_store %arg64[%c0_444, %c8_445], %475 {strides = array<i32>} : memref<8x40xf32, #tpu.memory_space<vmem>>, vector<8x24xf32>,
    %c0_446 = arith.constant 0 : index
    %c0_447 = arith.constant 0 : index
    %477 = vector.load %arg64[%c0_446, %c0_447] : memref<8x40xf32, #tpu.memory_space<vmem>>, vector<8x32xf32>
    %c0_448 = arith.constant 0 : index
    %c0_449 = arith.constant 0 : index
    %478 = vector.load %arg40[%c0_448, %c0_449] : memref<1x32xf32, #tpu.memory_space<vmem>>, vector<1x32xf32>
    %c0_450 = arith.constant 0 : index
    %c0_451 = arith.constant 0 : index
    %479 = vector.load %arg41[%c0_450, %c0_451] : memref<1x32xf32, #tpu.memory_space<vmem>>, vector<1x32xf32>
    %480 = vector.broadcast %478 : vector<1x32xf32> to vector<8x32xf32>
    %481 = arith.mulf %477, %480 : vector<8x32xf32>
    %482 = vector.broadcast %479 : vector<1x32xf32> to vector<8x32xf32>
    %483 = arith.addf %481, %482 : vector<8x32xf32>
    %cst_452 = arith.constant 0.000000e+00 : f32
    %484 = vector.broadcast %cst_452 : f32 to vector<8x32xf32>
    %485 = arith.maximumf %483, %484 : vector<8x32xf32>
    %c0_453 = arith.constant 0 : index
    %c0_454 = arith.constant 0 : index
    %486 = vector.load %arg39[%c0_453, %c0_454] : memref<1x4xf32, #tpu.memory_space<vmem>>, vector<1x4xf32>
    %487 = vector.extract_strided_slice %485 {offsets = [0, 0], sizes = [3, 32], strides = [1, 1]} : vector<8x32xf32> to vector<3x32xf32>
    %c5_455 = arith.constant 5 : index
    %c0_456 = arith.constant 0 : index
    %488 = vector.load %arg60[%c5_455, %c0_456] : memref<16x512xf32, #tpu.memory_space<vmem>>, vector<3x32xf32>
    tpu.vector_store %arg60[%c5_455, %c0_456], %487 {strides = array<i32>} : memref<16x512xf32, #tpu.memory_space<vmem>>, vector<3x32xf32>,
    %cst_457 = arith.constant 0.000000e+00 : f32
    %489 = vector.broadcast %cst_457 : f32 to vector<5x32xf32>
    %c0_458 = arith.constant 0 : index
    %c0_459 = arith.constant 0 : index
    %490 = vector.load %arg60[%c0_458, %c0_459] : memref<16x512xf32, #tpu.memory_space<vmem>>, vector<5x32xf32>
    tpu.vector_store %arg60[%c0_458, %c0_459], %489 {strides = array<i32>} : memref<16x512xf32, #tpu.memory_space<vmem>>, vector<5x32xf32>,
    %491 = vector.extract_strided_slice %485 {offsets = [0, 0], sizes = [4, 32], strides = [1, 1]} : vector<8x32xf32> to vector<4x32xf32>
    %c4_460 = arith.constant 4 : index
    %c32_461 = arith.constant 32 : index
    %492 = vector.load %arg60[%c4_460, %c32_461] : memref<16x512xf32, #tpu.memory_space<vmem>>, vector<4x32xf32>
    tpu.vector_store %arg60[%c4_460, %c32_461], %491 {strides = array<i32>} : memref<16x512xf32, #tpu.memory_space<vmem>>, vector<4x32xf32>,
    %cst_462 = arith.constant 0.000000e+00 : f32
    %493 = vector.broadcast %cst_462 : f32 to vector<4x32xf32>
    %c0_463 = arith.constant 0 : index
    %c32_464 = arith.constant 32 : index
    %494 = vector.load %arg60[%c0_463, %c32_464] : memref<16x512xf32, #tpu.memory_space<vmem>>, vector<4x32xf32>
    tpu.vector_store %arg60[%c0_463, %c32_464], %493 {strides = array<i32>} : memref<16x512xf32, #tpu.memory_space<vmem>>, vector<4x32xf32>,
    %495 = vector.extract_strided_slice %485 {offsets = [0, 0], sizes = [5, 32], strides = [1, 1]} : vector<8x32xf32> to vector<5x32xf32>
    %c3_465 = arith.constant 3 : index
    %c64_466 = arith.constant 64 : index
    %496 = vector.load %arg60[%c3_465, %c64_466] : memref<16x512xf32, #tpu.memory_space<vmem>>, vector<5x32xf32>
    tpu.vector_store %arg60[%c3_465, %c64_466], %495 {strides = array<i32>} : memref<16x512xf32, #tpu.memory_space<vmem>>, vector<5x32xf32>,
    %cst_467 = arith.constant 0.000000e+00 : f32
    %497 = vector.broadcast %cst_467 : f32 to vector<3x32xf32>
    %c0_468 = arith.constant 0 : index
    %c64_469 = arith.constant 64 : index
    %498 = vector.load %arg60[%c0_468, %c64_469] : memref<16x512xf32, #tpu.memory_space<vmem>>, vector<3x32xf32>
    tpu.vector_store %arg60[%c0_468, %c64_469], %497 {strides = array<i32>} : memref<16x512xf32, #tpu.memory_space<vmem>>, vector<3x32xf32>,
    %499 = vector.extract_strided_slice %485 {offsets = [0, 0], sizes = [6, 32], strides = [1, 1]} : vector<8x32xf32> to vector<6x32xf32>
    %c2_470 = arith.constant 2 : index
    %c96_471 = arith.constant 96 : index
    %500 = vector.load %arg60[%c2_470, %c96_471] : memref<16x512xf32, #tpu.memory_space<vmem>>, vector<6x32xf32>
    tpu.vector_store %arg60[%c2_470, %c96_471], %499 {strides = array<i32>} : memref<16x512xf32, #tpu.memory_space<vmem>>, vector<6x32xf32>,
    %cst_472 = arith.constant 0.000000e+00 : f32
    %501 = vector.broadcast %cst_472 : f32 to vector<2x32xf32>
    %c0_473 = arith.constant 0 : index
    %c96_474 = arith.constant 96 : index
    %502 = vector.load %arg60[%c0_473, %c96_474] : memref<16x512xf32, #tpu.memory_space<vmem>>, vector<2x32xf32>
    tpu.vector_store %arg60[%c0_473, %c96_474], %501 {strides = array<i32>} : memref<16x512xf32, #tpu.memory_space<vmem>>, vector<2x32xf32>,
    %503 = vector.extract_strided_slice %485 {offsets = [0, 0], sizes = [7, 32], strides = [1, 1]} : vector<8x32xf32> to vector<7x32xf32>
    %c1_475 = arith.constant 1 : index
    %c128_476 = arith.constant 128 : index
    %504 = vector.load %arg60[%c1_475, %c128_476] : memref<16x512xf32, #tpu.memory_space<vmem>>, vector<7x32xf32>
    tpu.vector_store %arg60[%c1_475, %c128_476], %503 {strides = array<i32>} : memref<16x512xf32, #tpu.memory_space<vmem>>, vector<7x32xf32>,
    %cst_477 = arith.constant 0.000000e+00 : f32
    %505 = vector.broadcast %cst_477 : f32 to vector<1x32xf32>
    %c0_478 = arith.constant 0 : index
    %c128_479 = arith.constant 128 : index
    %506 = vector.load %arg60[%c0_478, %c128_479] : memref<16x512xf32, #tpu.memory_space<vmem>>, vector<1x32xf32>
    tpu.vector_store %arg60[%c0_478, %c128_479], %505 {strides = array<i32>} : memref<16x512xf32, #tpu.memory_space<vmem>>, vector<1x32xf32>,
    %c0_480 = arith.constant 0 : index
    %c160_481 = arith.constant 160 : index
    %507 = vector.load %arg60[%c0_480, %c160_481] : memref<16x512xf32, #tpu.memory_space<vmem>>, vector<8x32xf32>
    tpu.vector_store %arg60[%c0_480, %c160_481], %485 {strides = array<i32>} : memref<16x512xf32, #tpu.memory_space<vmem>>, vector<8x32xf32>,
    %508 = vector.extract_strided_slice %485 {offsets = [1, 0], sizes = [7, 32], strides = [1, 1]} : vector<8x32xf32> to vector<7x32xf32>
    %c0_482 = arith.constant 0 : index
    %c192_483 = arith.constant 192 : index
    %509 = vector.load %arg60[%c0_482, %c192_483] : memref<16x512xf32, #tpu.memory_space<vmem>>, vector<7x32xf32>
    tpu.vector_store %arg60[%c0_482, %c192_483], %508 {strides = array<i32>} : memref<16x512xf32, #tpu.memory_space<vmem>>, vector<7x32xf32>,
    %cst_484 = arith.constant 0.000000e+00 : f32
    %510 = vector.broadcast %cst_484 : f32 to vector<1x32xf32>
    %c7_485 = arith.constant 7 : index
    %c192_486 = arith.constant 192 : index
    %511 = vector.load %arg60[%c7_485, %c192_486] : memref<16x512xf32, #tpu.memory_space<vmem>>, vector<1x32xf32>
    tpu.vector_store %arg60[%c7_485, %c192_486], %510 {strides = array<i32>} : memref<16x512xf32, #tpu.memory_space<vmem>>, vector<1x32xf32>,
    %512 = vector.extract_strided_slice %485 {offsets = [2, 0], sizes = [6, 32], strides = [1, 1]} : vector<8x32xf32> to vector<6x32xf32>
    %c0_487 = arith.constant 0 : index
    %c224_488 = arith.constant 224 : index
    %513 = vector.load %arg60[%c0_487, %c224_488] : memref<16x512xf32, #tpu.memory_space<vmem>>, vector<6x32xf32>
    tpu.vector_store %arg60[%c0_487, %c224_488], %512 {strides = array<i32>} : memref<16x512xf32, #tpu.memory_space<vmem>>, vector<6x32xf32>,
    %cst_489 = arith.constant 0.000000e+00 : f32
    %514 = vector.broadcast %cst_489 : f32 to vector<2x32xf32>
    %c6_490 = arith.constant 6 : index
    %c224_491 = arith.constant 224 : index
    %515 = vector.load %arg60[%c6_490, %c224_491] : memref<16x512xf32, #tpu.memory_space<vmem>>, vector<2x32xf32>
    tpu.vector_store %arg60[%c6_490, %c224_491], %514 {strides = array<i32>} : memref<16x512xf32, #tpu.memory_space<vmem>>, vector<2x32xf32>,
    %516 = vector.extract_strided_slice %485 {offsets = [3, 0], sizes = [5, 32], strides = [1, 1]} : vector<8x32xf32> to vector<5x32xf32>
    %c0_492 = arith.constant 0 : index
    %c256 = arith.constant 256 : index
    %517 = vector.load %arg60[%c0_492, %c256] : memref<16x512xf32, #tpu.memory_space<vmem>>, vector<5x32xf32>
    tpu.vector_store %arg60[%c0_492, %c256], %516 {strides = array<i32>} : memref<16x512xf32, #tpu.memory_space<vmem>>, vector<5x32xf32>,
    %cst_493 = arith.constant 0.000000e+00 : f32
    %518 = vector.broadcast %cst_493 : f32 to vector<3x32xf32>
    %c5_494 = arith.constant 5 : index
    %c256_495 = arith.constant 256 : index
    %519 = vector.load %arg60[%c5_494, %c256_495] : memref<16x512xf32, #tpu.memory_space<vmem>>, vector<3x32xf32>
    tpu.vector_store %arg60[%c5_494, %c256_495], %518 {strides = array<i32>} : memref<16x512xf32, #tpu.memory_space<vmem>>, vector<3x32xf32>,
    %520 = vector.extract_strided_slice %485 {offsets = [4, 0], sizes = [4, 32], strides = [1, 1]} : vector<8x32xf32> to vector<4x32xf32>
    %c0_496 = arith.constant 0 : index
    %c288 = arith.constant 288 : index
    %521 = vector.load %arg60[%c0_496, %c288] : memref<16x512xf32, #tpu.memory_space<vmem>>, vector<4x32xf32>
    tpu.vector_store %arg60[%c0_496, %c288], %520 {strides = array<i32>} : memref<16x512xf32, #tpu.memory_space<vmem>>, vector<4x32xf32>,
    %cst_497 = arith.constant 0.000000e+00 : f32
    %522 = vector.broadcast %cst_497 : f32 to vector<4x32xf32>
    %c4_498 = arith.constant 4 : index
    %c288_499 = arith.constant 288 : index
    %523 = vector.load %arg60[%c4_498, %c288_499] : memref<16x512xf32, #tpu.memory_space<vmem>>, vector<4x32xf32>
    tpu.vector_store %arg60[%c4_498, %c288_499], %522 {strides = array<i32>} : memref<16x512xf32, #tpu.memory_space<vmem>>, vector<4x32xf32>,
    %524 = vector.extract_strided_slice %485 {offsets = [5, 0], sizes = [3, 32], strides = [1, 1]} : vector<8x32xf32> to vector<3x32xf32>
    %c0_500 = arith.constant 0 : index
    %c320 = arith.constant 320 : index
    %525 = vector.load %arg60[%c0_500, %c320] : memref<16x512xf32, #tpu.memory_space<vmem>>, vector<3x32xf32>
    tpu.vector_store %arg60[%c0_500, %c320], %524 {strides = array<i32>} : memref<16x512xf32, #tpu.memory_space<vmem>>, vector<3x32xf32>,
    %cst_501 = arith.constant 0.000000e+00 : f32
    %526 = vector.broadcast %cst_501 : f32 to vector<5x32xf32>
    %c3_502 = arith.constant 3 : index
    %c320_503 = arith.constant 320 : index
    %527 = vector.load %arg60[%c3_502, %c320_503] : memref<16x512xf32, #tpu.memory_space<vmem>>, vector<5x32xf32>
    tpu.vector_store %arg60[%c3_502, %c320_503], %526 {strides = array<i32>} : memref<16x512xf32, #tpu.memory_space<vmem>>, vector<5x32xf32>,
    %c0_504 = arith.constant 0 : index
    %c0_505 = arith.constant 0 : index
    %528 = vector.load %arg60[%c0_504, %c0_505] : memref<16x512xf32, #tpu.memory_space<vmem>>, vector<8x352xf32>
    %529 = arith.truncf %528 : vector<8x352xf32> to vector<8x352xbf16>
    %c0_506 = arith.constant 0 : index
    %c0_507 = arith.constant 0 : index
    %530 = vector.load %arg42[%c0_506, %c0_507] : memref<352x4xbf16, #tpu.memory_space<vmem>>, vector<352x4xbf16>
    %cst_508 = arith.constant dense<0.000000e+00> : vector<8x4xf32>
    %531 = tpu.matmul %529, %530, %cst_508 {dimension_numbers = #tpu.dot_dimension_numbers<[1], [0], [0], [1], [0, 0, 1, 1], [], []>} : vector<8x352xbf16>, vector<352x4xbf16>, vector<8x4xf32> -> vector<8x4xf32>
    %532 = vector.broadcast %486 : vector<1x4xf32> to vector<8x4xf32>
    %533 = arith.addf %531, %532 : vector<8x4xf32>
    %c0_509 = arith.constant 0 : index
    %c32_510 = arith.constant 32 : index
    %534 = vector.load %arg64[%c0_509, %c32_510] : memref<8x40xf32, #tpu.memory_space<vmem>>, vector<8x4xf32>
    tpu.vector_store %arg64[%c0_509, %c32_510], %533 {strides = array<i32>} : memref<8x40xf32, #tpu.memory_space<vmem>>, vector<8x4xf32>,
    %c0_511 = arith.constant 0 : index
    %c0_512 = arith.constant 0 : index
    %535 = vector.load %arg64[%c0_511, %c0_512] : memref<8x40xf32, #tpu.memory_space<vmem>>, vector<8x36xf32>
    %c0_513 = arith.constant 0 : index
    %c0_514 = arith.constant 0 : index
    %536 = vector.load %arg44[%c0_513, %c0_514] : memref<1x36xf32, #tpu.memory_space<vmem>>, vector<1x36xf32>
    %c0_515 = arith.constant 0 : index
    %c0_516 = arith.constant 0 : index
    %537 = vector.load %arg45[%c0_515, %c0_516] : memref<1x36xf32, #tpu.memory_space<vmem>>, vector<1x36xf32>
    %538 = vector.broadcast %536 : vector<1x36xf32> to vector<8x36xf32>
    %539 = arith.mulf %535, %538 : vector<8x36xf32>
    %540 = vector.broadcast %537 : vector<1x36xf32> to vector<8x36xf32>
    %541 = arith.addf %539, %540 : vector<8x36xf32>
    %cst_517 = arith.constant 0.000000e+00 : f32
    %542 = vector.broadcast %cst_517 : f32 to vector<8x36xf32>
    %543 = arith.maximumf %541, %542 : vector<8x36xf32>
    %c0_518 = arith.constant 0 : index
    %c0_519 = arith.constant 0 : index
    %544 = vector.load %arg43[%c0_518, %c0_519] : memref<1x4xf32, #tpu.memory_space<vmem>>, vector<1x4xf32>
    %545 = vector.extract_strided_slice %543 {offsets = [0, 0], sizes = [3, 36], strides = [1, 1]} : vector<8x36xf32> to vector<3x36xf32>
    %c5_520 = arith.constant 5 : index
    %c0_521 = arith.constant 0 : index
    %546 = vector.load %arg60[%c5_520, %c0_521] : memref<16x512xf32, #tpu.memory_space<vmem>>, vector<3x36xf32>
    tpu.vector_store %arg60[%c5_520, %c0_521], %545 {strides = array<i32>} : memref<16x512xf32, #tpu.memory_space<vmem>>, vector<3x36xf32>,
    %cst_522 = arith.constant 0.000000e+00 : f32
    %547 = vector.broadcast %cst_522 : f32 to vector<5x36xf32>
    %c0_523 = arith.constant 0 : index
    %c0_524 = arith.constant 0 : index
    %548 = vector.load %arg60[%c0_523, %c0_524] : memref<16x512xf32, #tpu.memory_space<vmem>>, vector<5x36xf32>
    tpu.vector_store %arg60[%c0_523, %c0_524], %547 {strides = array<i32>} : memref<16x512xf32, #tpu.memory_space<vmem>>, vector<5x36xf32>,
    %549 = vector.extract_strided_slice %543 {offsets = [0, 0], sizes = [4, 36], strides = [1, 1]} : vector<8x36xf32> to vector<4x36xf32>
    %c4_525 = arith.constant 4 : index
    %c36_526 = arith.constant 36 : index
    %550 = vector.load %arg60[%c4_525, %c36_526] : memref<16x512xf32, #tpu.memory_space<vmem>>, vector<4x36xf32>
    tpu.vector_store %arg60[%c4_525, %c36_526], %549 {strides = array<i32>} : memref<16x512xf32, #tpu.memory_space<vmem>>, vector<4x36xf32>,
    %cst_527 = arith.constant 0.000000e+00 : f32
    %551 = vector.broadcast %cst_527 : f32 to vector<4x36xf32>
    %c0_528 = arith.constant 0 : index
    %c36_529 = arith.constant 36 : index
    %552 = vector.load %arg60[%c0_528, %c36_529] : memref<16x512xf32, #tpu.memory_space<vmem>>, vector<4x36xf32>
    tpu.vector_store %arg60[%c0_528, %c36_529], %551 {strides = array<i32>} : memref<16x512xf32, #tpu.memory_space<vmem>>, vector<4x36xf32>,
    %553 = vector.extract_strided_slice %543 {offsets = [0, 0], sizes = [5, 36], strides = [1, 1]} : vector<8x36xf32> to vector<5x36xf32>
    %c3_530 = arith.constant 3 : index
    %c72_531 = arith.constant 72 : index
    %554 = vector.load %arg60[%c3_530, %c72_531] : memref<16x512xf32, #tpu.memory_space<vmem>>, vector<5x36xf32>
    tpu.vector_store %arg60[%c3_530, %c72_531], %553 {strides = array<i32>} : memref<16x512xf32, #tpu.memory_space<vmem>>, vector<5x36xf32>,
    %cst_532 = arith.constant 0.000000e+00 : f32
    %555 = vector.broadcast %cst_532 : f32 to vector<3x36xf32>
    %c0_533 = arith.constant 0 : index
    %c72_534 = arith.constant 72 : index
    %556 = vector.load %arg60[%c0_533, %c72_534] : memref<16x512xf32, #tpu.memory_space<vmem>>, vector<3x36xf32>
    tpu.vector_store %arg60[%c0_533, %c72_534], %555 {strides = array<i32>} : memref<16x512xf32, #tpu.memory_space<vmem>>, vector<3x36xf32>,
    %557 = vector.extract_strided_slice %543 {offsets = [0, 0], sizes = [6, 36], strides = [1, 1]} : vector<8x36xf32> to vector<6x36xf32>
    %c2_535 = arith.constant 2 : index
    %c108_536 = arith.constant 108 : index
    %558 = vector.load %arg60[%c2_535, %c108_536] : memref<16x512xf32, #tpu.memory_space<vmem>>, vector<6x36xf32>
    tpu.vector_store %arg60[%c2_535, %c108_536], %557 {strides = array<i32>} : memref<16x512xf32, #tpu.memory_space<vmem>>, vector<6x36xf32>,
    %cst_537 = arith.constant 0.000000e+00 : f32
    %559 = vector.broadcast %cst_537 : f32 to vector<2x36xf32>
    %c0_538 = arith.constant 0 : index
    %c108_539 = arith.constant 108 : index
    %560 = vector.load %arg60[%c0_538, %c108_539] : memref<16x512xf32, #tpu.memory_space<vmem>>, vector<2x36xf32>
    tpu.vector_store %arg60[%c0_538, %c108_539], %559 {strides = array<i32>} : memref<16x512xf32, #tpu.memory_space<vmem>>, vector<2x36xf32>,
    %561 = vector.extract_strided_slice %543 {offsets = [0, 0], sizes = [7, 36], strides = [1, 1]} : vector<8x36xf32> to vector<7x36xf32>
    %c1_540 = arith.constant 1 : index
    %c144_541 = arith.constant 144 : index
    %562 = vector.load %arg60[%c1_540, %c144_541] : memref<16x512xf32, #tpu.memory_space<vmem>>, vector<7x36xf32>
    tpu.vector_store %arg60[%c1_540, %c144_541], %561 {strides = array<i32>} : memref<16x512xf32, #tpu.memory_space<vmem>>, vector<7x36xf32>,
    %cst_542 = arith.constant 0.000000e+00 : f32
    %563 = vector.broadcast %cst_542 : f32 to vector<1x36xf32>
    %c0_543 = arith.constant 0 : index
    %c144_544 = arith.constant 144 : index
    %564 = vector.load %arg60[%c0_543, %c144_544] : memref<16x512xf32, #tpu.memory_space<vmem>>, vector<1x36xf32>
    tpu.vector_store %arg60[%c0_543, %c144_544], %563 {strides = array<i32>} : memref<16x512xf32, #tpu.memory_space<vmem>>, vector<1x36xf32>,
    %c0_545 = arith.constant 0 : index
    %c180_546 = arith.constant 180 : index
    %565 = vector.load %arg60[%c0_545, %c180_546] : memref<16x512xf32, #tpu.memory_space<vmem>>, vector<8x36xf32>
    tpu.vector_store %arg60[%c0_545, %c180_546], %543 {strides = array<i32>} : memref<16x512xf32, #tpu.memory_space<vmem>>, vector<8x36xf32>,
    %566 = vector.extract_strided_slice %543 {offsets = [1, 0], sizes = [7, 36], strides = [1, 1]} : vector<8x36xf32> to vector<7x36xf32>
    %c0_547 = arith.constant 0 : index
    %c216_548 = arith.constant 216 : index
    %567 = vector.load %arg60[%c0_547, %c216_548] : memref<16x512xf32, #tpu.memory_space<vmem>>, vector<7x36xf32>
    tpu.vector_store %arg60[%c0_547, %c216_548], %566 {strides = array<i32>} : memref<16x512xf32, #tpu.memory_space<vmem>>, vector<7x36xf32>,
    %cst_549 = arith.constant 0.000000e+00 : f32
    %568 = vector.broadcast %cst_549 : f32 to vector<1x36xf32>
    %c7_550 = arith.constant 7 : index
    %c216_551 = arith.constant 216 : index
    %569 = vector.load %arg60[%c7_550, %c216_551] : memref<16x512xf32, #tpu.memory_space<vmem>>, vector<1x36xf32>
    tpu.vector_store %arg60[%c7_550, %c216_551], %568 {strides = array<i32>} : memref<16x512xf32, #tpu.memory_space<vmem>>, vector<1x36xf32>,
    %570 = vector.extract_strided_slice %543 {offsets = [2, 0], sizes = [6, 36], strides = [1, 1]} : vector<8x36xf32> to vector<6x36xf32>
    %c0_552 = arith.constant 0 : index
    %c252_553 = arith.constant 252 : index
    %571 = vector.load %arg60[%c0_552, %c252_553] : memref<16x512xf32, #tpu.memory_space<vmem>>, vector<6x36xf32>
    tpu.vector_store %arg60[%c0_552, %c252_553], %570 {strides = array<i32>} : memref<16x512xf32, #tpu.memory_space<vmem>>, vector<6x36xf32>,
    %cst_554 = arith.constant 0.000000e+00 : f32
    %572 = vector.broadcast %cst_554 : f32 to vector<2x36xf32>
    %c6_555 = arith.constant 6 : index
    %c252_556 = arith.constant 252 : index
    %573 = vector.load %arg60[%c6_555, %c252_556] : memref<16x512xf32, #tpu.memory_space<vmem>>, vector<2x36xf32>
    tpu.vector_store %arg60[%c6_555, %c252_556], %572 {strides = array<i32>} : memref<16x512xf32, #tpu.memory_space<vmem>>, vector<2x36xf32>,
    %574 = vector.extract_strided_slice %543 {offsets = [3, 0], sizes = [5, 36], strides = [1, 1]} : vector<8x36xf32> to vector<5x36xf32>
    %c0_557 = arith.constant 0 : index
    %c288_558 = arith.constant 288 : index
    %575 = vector.load %arg60[%c0_557, %c288_558] : memref<16x512xf32, #tpu.memory_space<vmem>>, vector<5x36xf32>
    tpu.vector_store %arg60[%c0_557, %c288_558], %574 {strides = array<i32>} : memref<16x512xf32, #tpu.memory_space<vmem>>, vector<5x36xf32>,
    %cst_559 = arith.constant 0.000000e+00 : f32
    %576 = vector.broadcast %cst_559 : f32 to vector<3x36xf32>
    %c5_560 = arith.constant 5 : index
    %c288_561 = arith.constant 288 : index
    %577 = vector.load %arg60[%c5_560, %c288_561] : memref<16x512xf32, #tpu.memory_space<vmem>>, vector<3x36xf32>
    tpu.vector_store %arg60[%c5_560, %c288_561], %576 {strides = array<i32>} : memref<16x512xf32, #tpu.memory_space<vmem>>, vector<3x36xf32>,
    %578 = vector.extract_strided_slice %543 {offsets = [4, 0], sizes = [4, 36], strides = [1, 1]} : vector<8x36xf32> to vector<4x36xf32>
    %c0_562 = arith.constant 0 : index
    %c324 = arith.constant 324 : index
    %579 = vector.load %arg60[%c0_562, %c324] : memref<16x512xf32, #tpu.memory_space<vmem>>, vector<4x36xf32>
    tpu.vector_store %arg60[%c0_562, %c324], %578 {strides = array<i32>} : memref<16x512xf32, #tpu.memory_space<vmem>>, vector<4x36xf32>,
    %cst_563 = arith.constant 0.000000e+00 : f32
    %580 = vector.broadcast %cst_563 : f32 to vector<4x36xf32>
    %c4_564 = arith.constant 4 : index
    %c324_565 = arith.constant 324 : index
    %581 = vector.load %arg60[%c4_564, %c324_565] : memref<16x512xf32, #tpu.memory_space<vmem>>, vector<4x36xf32>
    tpu.vector_store %arg60[%c4_564, %c324_565], %580 {strides = array<i32>} : memref<16x512xf32, #tpu.memory_space<vmem>>, vector<4x36xf32>,
    %582 = vector.extract_strided_slice %543 {offsets = [5, 0], sizes = [3, 36], strides = [1, 1]} : vector<8x36xf32> to vector<3x36xf32>
    %c0_566 = arith.constant 0 : index
    %c360 = arith.constant 360 : index
    %583 = vector.load %arg60[%c0_566, %c360] : memref<16x512xf32, #tpu.memory_space<vmem>>, vector<3x36xf32>
    tpu.vector_store %arg60[%c0_566, %c360], %582 {strides = array<i32>} : memref<16x512xf32, #tpu.memory_space<vmem>>, vector<3x36xf32>,
    %cst_567 = arith.constant 0.000000e+00 : f32
    %584 = vector.broadcast %cst_567 : f32 to vector<5x36xf32>
    %c3_568 = arith.constant 3 : index
    %c360_569 = arith.constant 360 : index
    %585 = vector.load %arg60[%c3_568, %c360_569] : memref<16x512xf32, #tpu.memory_space<vmem>>, vector<5x36xf32>
    tpu.vector_store %arg60[%c3_568, %c360_569], %584 {strides = array<i32>} : memref<16x512xf32, #tpu.memory_space<vmem>>, vector<5x36xf32>,
    %c0_570 = arith.constant 0 : index
    %c0_571 = arith.constant 0 : index
    %586 = vector.load %arg60[%c0_570, %c0_571] : memref<16x512xf32, #tpu.memory_space<vmem>>, vector<8x396xf32>
    %587 = arith.truncf %586 : vector<8x396xf32> to vector<8x396xbf16>
    %c0_572 = arith.constant 0 : index
    %c0_573 = arith.constant 0 : index
    %588 = vector.load %arg46[%c0_572, %c0_573] : memref<396x4xbf16, #tpu.memory_space<vmem>>, vector<396x4xbf16>
    %cst_574 = arith.constant dense<0.000000e+00> : vector<8x4xf32>
    %589 = tpu.matmul %587, %588, %cst_574 {dimension_numbers = #tpu.dot_dimension_numbers<[1], [0], [0], [1], [0, 0, 1, 1], [], []>} : vector<8x396xbf16>, vector<396x4xbf16>, vector<8x4xf32> -> vector<8x4xf32>
    %590 = vector.broadcast %544 : vector<1x4xf32> to vector<8x4xf32>
    %591 = arith.addf %589, %590 : vector<8x4xf32>
    %c0_575 = arith.constant 0 : index
    %c36_576 = arith.constant 36 : index
    %592 = vector.load %arg64[%c0_575, %c36_576] : memref<8x40xf32, #tpu.memory_space<vmem>>, vector<8x4xf32>
    tpu.vector_store %arg64[%c0_575, %c36_576], %591 {strides = array<i32>} : memref<8x40xf32, #tpu.memory_space<vmem>>, vector<8x4xf32>,
    %c0_577 = arith.constant 0 : index
    %c32_578 = arith.constant 32 : index
    %593 = vector.load %arg64[%c0_577, %c32_578] : memref<8x40xf32, #tpu.memory_space<vmem>>, vector<8x8xf32>
    %594 = arith.truncf %593 : vector<8x8xf32> to vector<8x8xbf16>
    %c0_579 = arith.constant 0 : index
    %c0_580 = arith.constant 0 : index
    %595 = vector.load %arg58[%c0_579, %c0_580] : memref<8x24xbf16, #tpu.memory_space<vmem>>, vector<8x24xbf16>
    %cst_581 = arith.constant dense<0.000000e+00> : vector<8x24xf32>
    %596 = tpu.matmul %594, %595, %cst_581 {dimension_numbers = #tpu.dot_dimension_numbers<[1], [0], [0], [1], [0, 0, 1, 1], [], []>} : vector<8x8xbf16>, vector<8x24xbf16>, vector<8x24xf32> -> vector<8x24xf32>
    %597 = tpu.iota {dimensions = array<i32: 0>} : vector<16x8xi32>
    %c0_i32_582 = arith.constant 0 : i32
    %598 = vector.broadcast %c0_i32_582 : i32 to vector<16x8xi32>
    %599 = arith.addi %597, %598 : vector<16x8xi32>
    %600 = tpu.iota {dimensions = array<i32: 1>} : vector<16x8xi32>
    %cst_583 = arith.constant 0.000000e+00 : f32
    %601 = vector.broadcast %cst_583 : f32 to vector<16x8xf32>
    %c2_i32_584 = arith.constant 2 : i32
    %602 = vector.broadcast %c2_i32_584 : i32 to vector<16x8xi32>
    %603 = arith.muli %602, %600 : vector<16x8xi32>
    %c0_i32_585 = arith.constant 0 : i32
    %604 = vector.broadcast %c0_i32_585 : i32 to vector<16x8xi32>
    %605 = arith.addi %603, %604 : vector<16x8xi32>
    %606 = arith.cmpi eq, %599, %605 : vector<16x8xi32>
    %cst_586 = arith.constant 1.000000e+00 : f32
    %cst_587 = arith.constant 0.000000e+00 : f32
    %607 = vector.broadcast %cst_586 : f32 to vector<16x8xf32>
    %608 = vector.broadcast %cst_587 : f32 to vector<16x8xf32>
    %609 = arith.select %606, %607, %608 : vector<16x8xi1>, vector<16x8xf32>
    %610 = vector.extract_strided_slice %596 {offsets = [0, 0], sizes = [8, 8], strides = [1, 1]} : vector<8x24xf32> to vector<8x8xf32>
    %cst_588 = arith.constant dense<0.000000e+00> : vector<16x8xf32>
    %611 = tpu.matmul %609, %610, %cst_588 {dimension_numbers = #tpu.dot_dimension_numbers<[1], [0], [0], [1], [0, 0, 1, 1], [], []>} : vector<16x8xf32>, vector<8x8xf32>, vector<16x8xf32> -> vector<16x8xf32>
    %612 = arith.addf %601, %611 : vector<16x8xf32>
    %c2_i32_589 = arith.constant 2 : i32
    %613 = vector.broadcast %c2_i32_589 : i32 to vector<16x8xi32>
    %614 = arith.muli %613, %600 : vector<16x8xi32>
    %c1_i32_590 = arith.constant 1 : i32
    %615 = vector.broadcast %c1_i32_590 : i32 to vector<16x8xi32>
    %616 = arith.addi %614, %615 : vector<16x8xi32>
    %617 = arith.cmpi eq, %599, %616 : vector<16x8xi32>
    %cst_591 = arith.constant 1.000000e+00 : f32
    %cst_592 = arith.constant 0.000000e+00 : f32
    %618 = vector.broadcast %cst_591 : f32 to vector<16x8xf32>
    %619 = vector.broadcast %cst_592 : f32 to vector<16x8xf32>
    %620 = arith.select %617, %618, %619 : vector<16x8xi1>, vector<16x8xf32>
    %621 = vector.extract_strided_slice %596 {offsets = [0, 8], sizes = [8, 8], strides = [1, 1]} : vector<8x24xf32> to vector<8x8xf32>
    %cst_593 = arith.constant dense<0.000000e+00> : vector<16x8xf32>
    %622 = tpu.matmul %620, %621, %cst_593 {dimension_numbers = #tpu.dot_dimension_numbers<[1], [0], [0], [1], [0, 0, 1, 1], [], []>} : vector<16x8xf32>, vector<8x8xf32>, vector<16x8xf32> -> vector<16x8xf32>
    %623 = arith.addf %612, %622 : vector<16x8xf32>
    %c2_i32_594 = arith.constant 2 : i32
    %624 = vector.broadcast %c2_i32_594 : i32 to vector<16x8xi32>
    %625 = arith.muli %624, %600 : vector<16x8xi32>
    %c2_i32_595 = arith.constant 2 : i32
    %626 = vector.broadcast %c2_i32_595 : i32 to vector<16x8xi32>
    %627 = arith.addi %625, %626 : vector<16x8xi32>
    %628 = arith.cmpi eq, %599, %627 : vector<16x8xi32>
    %cst_596 = arith.constant 1.000000e+00 : f32
    %cst_597 = arith.constant 0.000000e+00 : f32
    %629 = vector.broadcast %cst_596 : f32 to vector<16x8xf32>
    %630 = vector.broadcast %cst_597 : f32 to vector<16x8xf32>
    %631 = arith.select %628, %629, %630 : vector<16x8xi1>, vector<16x8xf32>
    %632 = vector.extract_strided_slice %596 {offsets = [0, 16], sizes = [8, 8], strides = [1, 1]} : vector<8x24xf32> to vector<8x8xf32>
    %cst_598 = arith.constant dense<0.000000e+00> : vector<16x8xf32>
    %633 = tpu.matmul %631, %632, %cst_598 {dimension_numbers = #tpu.dot_dimension_numbers<[1], [0], [0], [1], [0, 0, 1, 1], [], []>} : vector<16x8xf32>, vector<8x8xf32>, vector<16x8xf32> -> vector<16x8xf32>
    %634 = arith.addf %623, %633 : vector<16x8xf32>
    %c0_599 = arith.constant 0 : index
    %c0_600 = arith.constant 0 : index
    %635 = vector.load %arg57[%c0_599, %c0_600] : memref<1x8xf32, #tpu.memory_space<vmem>>, vector<1x8xf32>
    %636 = vector.broadcast %635 : vector<1x8xf32> to vector<16x8xf32>
    %637 = arith.addf %634, %636 : vector<16x8xf32>
    %c0_601 = arith.constant 0 : index
    %c0_602 = arith.constant 0 : index
    %638 = vector.load %arg65[%c0_601, %c0_602] : memref<16x32xf32, #tpu.memory_space<vmem>>, vector<16x8xf32>
    tpu.vector_store %arg65[%c0_601, %c0_602], %637 {strides = array<i32>} : memref<16x32xf32, #tpu.memory_space<vmem>>, vector<16x8xf32>,
    %c0_603 = arith.constant 0 : index
    %c0_604 = arith.constant 0 : index
    %639 = vector.load %arg61[%c0_603, %c0_604] : memref<16x16xf32, #tpu.memory_space<vmem>>, vector<16x16xf32>
    %c0_605 = arith.constant 0 : index
    %c8_606 = arith.constant 8 : index
    %640 = vector.load %arg65[%c0_605, %c8_606] : memref<16x32xf32, #tpu.memory_space<vmem>>, vector<16x16xf32>
    tpu.vector_store %arg65[%c0_605, %c8_606], %639 {strides = array<i32>} : memref<16x32xf32, #tpu.memory_space<vmem>>, vector<16x16xf32>,
    %c0_607 = arith.constant 0 : index
    %c0_608 = arith.constant 0 : index
    %641 = vector.load %arg65[%c0_607, %c0_608] : memref<16x32xf32, #tpu.memory_space<vmem>>, vector<16x24xf32>
    %c0_609 = arith.constant 0 : index
    %c0_610 = arith.constant 0 : index
    %642 = vector.load %arg48[%c0_609, %c0_610] : memref<1x24xf32, #tpu.memory_space<vmem>>, vector<1x24xf32>
    %c0_611 = arith.constant 0 : index
    %c0_612 = arith.constant 0 : index
    %643 = vector.load %arg49[%c0_611, %c0_612] : memref<1x24xf32, #tpu.memory_space<vmem>>, vector<1x24xf32>
    %644 = vector.broadcast %642 : vector<1x24xf32> to vector<16x24xf32>
    %645 = arith.mulf %641, %644 : vector<16x24xf32>
    %646 = vector.broadcast %643 : vector<1x24xf32> to vector<16x24xf32>
    %647 = arith.addf %645, %646 : vector<16x24xf32>
    %cst_613 = arith.constant 0.000000e+00 : f32
    %648 = vector.broadcast %cst_613 : f32 to vector<16x24xf32>
    %649 = arith.maximumf %647, %648 : vector<16x24xf32>
    %c0_614 = arith.constant 0 : index
    %c0_615 = arith.constant 0 : index
    %650 = vector.load %arg47[%c0_614, %c0_615] : memref<1x4xf32, #tpu.memory_space<vmem>>, vector<1x4xf32>
    %651 = vector.extract_strided_slice %649 {offsets = [0, 0], sizes = [11, 24], strides = [1, 1]} : vector<16x24xf32> to vector<11x24xf32>
    %c5_616 = arith.constant 5 : index
    %c0_617 = arith.constant 0 : index
    %652 = vector.load %arg60[%c5_616, %c0_617] : memref<16x512xf32, #tpu.memory_space<vmem>>, vector<11x24xf32>
    tpu.vector_store %arg60[%c5_616, %c0_617], %651 {strides = array<i32>} : memref<16x512xf32, #tpu.memory_space<vmem>>, vector<11x24xf32>,
    %cst_618 = arith.constant 0.000000e+00 : f32
    %653 = vector.broadcast %cst_618 : f32 to vector<5x24xf32>
    %c0_619 = arith.constant 0 : index
    %c0_620 = arith.constant 0 : index
    %654 = vector.load %arg60[%c0_619, %c0_620] : memref<16x512xf32, #tpu.memory_space<vmem>>, vector<5x24xf32>
    tpu.vector_store %arg60[%c0_619, %c0_620], %653 {strides = array<i32>} : memref<16x512xf32, #tpu.memory_space<vmem>>, vector<5x24xf32>,
    %655 = vector.extract_strided_slice %649 {offsets = [0, 0], sizes = [12, 24], strides = [1, 1]} : vector<16x24xf32> to vector<12x24xf32>
    %c4_621 = arith.constant 4 : index
    %c24_622 = arith.constant 24 : index
    %656 = vector.load %arg60[%c4_621, %c24_622] : memref<16x512xf32, #tpu.memory_space<vmem>>, vector<12x24xf32>
    tpu.vector_store %arg60[%c4_621, %c24_622], %655 {strides = array<i32>} : memref<16x512xf32, #tpu.memory_space<vmem>>, vector<12x24xf32>,
    %cst_623 = arith.constant 0.000000e+00 : f32
    %657 = vector.broadcast %cst_623 : f32 to vector<4x24xf32>
    %c0_624 = arith.constant 0 : index
    %c24_625 = arith.constant 24 : index
    %658 = vector.load %arg60[%c0_624, %c24_625] : memref<16x512xf32, #tpu.memory_space<vmem>>, vector<4x24xf32>
    tpu.vector_store %arg60[%c0_624, %c24_625], %657 {strides = array<i32>} : memref<16x512xf32, #tpu.memory_space<vmem>>, vector<4x24xf32>,
    %659 = vector.extract_strided_slice %649 {offsets = [0, 0], sizes = [13, 24], strides = [1, 1]} : vector<16x24xf32> to vector<13x24xf32>
    %c3_626 = arith.constant 3 : index
    %c48_627 = arith.constant 48 : index
    %660 = vector.load %arg60[%c3_626, %c48_627] : memref<16x512xf32, #tpu.memory_space<vmem>>, vector<13x24xf32>
    tpu.vector_store %arg60[%c3_626, %c48_627], %659 {strides = array<i32>} : memref<16x512xf32, #tpu.memory_space<vmem>>, vector<13x24xf32>,
    %cst_628 = arith.constant 0.000000e+00 : f32
    %661 = vector.broadcast %cst_628 : f32 to vector<3x24xf32>
    %c0_629 = arith.constant 0 : index
    %c48_630 = arith.constant 48 : index
    %662 = vector.load %arg60[%c0_629, %c48_630] : memref<16x512xf32, #tpu.memory_space<vmem>>, vector<3x24xf32>
    tpu.vector_store %arg60[%c0_629, %c48_630], %661 {strides = array<i32>} : memref<16x512xf32, #tpu.memory_space<vmem>>, vector<3x24xf32>,
    %663 = vector.extract_strided_slice %649 {offsets = [0, 0], sizes = [14, 24], strides = [1, 1]} : vector<16x24xf32> to vector<14x24xf32>
    %c2_631 = arith.constant 2 : index
    %c72_632 = arith.constant 72 : index
    %664 = vector.load %arg60[%c2_631, %c72_632] : memref<16x512xf32, #tpu.memory_space<vmem>>, vector<14x24xf32>
    tpu.vector_store %arg60[%c2_631, %c72_632], %663 {strides = array<i32>} : memref<16x512xf32, #tpu.memory_space<vmem>>, vector<14x24xf32>,
    %cst_633 = arith.constant 0.000000e+00 : f32
    %665 = vector.broadcast %cst_633 : f32 to vector<2x24xf32>
    %c0_634 = arith.constant 0 : index
    %c72_635 = arith.constant 72 : index
    %666 = vector.load %arg60[%c0_634, %c72_635] : memref<16x512xf32, #tpu.memory_space<vmem>>, vector<2x24xf32>
    tpu.vector_store %arg60[%c0_634, %c72_635], %665 {strides = array<i32>} : memref<16x512xf32, #tpu.memory_space<vmem>>, vector<2x24xf32>,
    %667 = vector.extract_strided_slice %649 {offsets = [0, 0], sizes = [15, 24], strides = [1, 1]} : vector<16x24xf32> to vector<15x24xf32>
    %c1_636 = arith.constant 1 : index
    %c96_637 = arith.constant 96 : index
    %668 = vector.load %arg60[%c1_636, %c96_637] : memref<16x512xf32, #tpu.memory_space<vmem>>, vector<15x24xf32>
    tpu.vector_store %arg60[%c1_636, %c96_637], %667 {strides = array<i32>} : memref<16x512xf32, #tpu.memory_space<vmem>>, vector<15x24xf32>,
    %cst_638 = arith.constant 0.000000e+00 : f32
    %669 = vector.broadcast %cst_638 : f32 to vector<1x24xf32>
    %c0_639 = arith.constant 0 : index
    %c96_640 = arith.constant 96 : index
    %670 = vector.load %arg60[%c0_639, %c96_640] : memref<16x512xf32, #tpu.memory_space<vmem>>, vector<1x24xf32>
    tpu.vector_store %arg60[%c0_639, %c96_640], %669 {strides = array<i32>} : memref<16x512xf32, #tpu.memory_space<vmem>>, vector<1x24xf32>,
    %c0_641 = arith.constant 0 : index
    %c120_642 = arith.constant 120 : index
    %671 = vector.load %arg60[%c0_641, %c120_642] : memref<16x512xf32, #tpu.memory_space<vmem>>, vector<16x24xf32>
    tpu.vector_store %arg60[%c0_641, %c120_642], %649 {strides = array<i32>} : memref<16x512xf32, #tpu.memory_space<vmem>>, vector<16x24xf32>,
    %672 = vector.extract_strided_slice %649 {offsets = [1, 0], sizes = [15, 24], strides = [1, 1]} : vector<16x24xf32> to vector<15x24xf32>
    %c0_643 = arith.constant 0 : index
    %c144_644 = arith.constant 144 : index
    %673 = vector.load %arg60[%c0_643, %c144_644] : memref<16x512xf32, #tpu.memory_space<vmem>>, vector<15x24xf32>
    tpu.vector_store %arg60[%c0_643, %c144_644], %672 {strides = array<i32>} : memref<16x512xf32, #tpu.memory_space<vmem>>, vector<15x24xf32>,
    %cst_645 = arith.constant 0.000000e+00 : f32
    %674 = vector.broadcast %cst_645 : f32 to vector<1x24xf32>
    %c15_646 = arith.constant 15 : index
    %c144_647 = arith.constant 144 : index
    %675 = vector.load %arg60[%c15_646, %c144_647] : memref<16x512xf32, #tpu.memory_space<vmem>>, vector<1x24xf32>
    tpu.vector_store %arg60[%c15_646, %c144_647], %674 {strides = array<i32>} : memref<16x512xf32, #tpu.memory_space<vmem>>, vector<1x24xf32>,
    %676 = vector.extract_strided_slice %649 {offsets = [2, 0], sizes = [14, 24], strides = [1, 1]} : vector<16x24xf32> to vector<14x24xf32>
    %c0_648 = arith.constant 0 : index
    %c168_649 = arith.constant 168 : index
    %677 = vector.load %arg60[%c0_648, %c168_649] : memref<16x512xf32, #tpu.memory_space<vmem>>, vector<14x24xf32>
    tpu.vector_store %arg60[%c0_648, %c168_649], %676 {strides = array<i32>} : memref<16x512xf32, #tpu.memory_space<vmem>>, vector<14x24xf32>,
    %cst_650 = arith.constant 0.000000e+00 : f32
    %678 = vector.broadcast %cst_650 : f32 to vector<2x24xf32>
    %c14_651 = arith.constant 14 : index
    %c168_652 = arith.constant 168 : index
    %679 = vector.load %arg60[%c14_651, %c168_652] : memref<16x512xf32, #tpu.memory_space<vmem>>, vector<2x24xf32>
    tpu.vector_store %arg60[%c14_651, %c168_652], %678 {strides = array<i32>} : memref<16x512xf32, #tpu.memory_space<vmem>>, vector<2x24xf32>,
    %680 = vector.extract_strided_slice %649 {offsets = [3, 0], sizes = [13, 24], strides = [1, 1]} : vector<16x24xf32> to vector<13x24xf32>
    %c0_653 = arith.constant 0 : index
    %c192_654 = arith.constant 192 : index
    %681 = vector.load %arg60[%c0_653, %c192_654] : memref<16x512xf32, #tpu.memory_space<vmem>>, vector<13x24xf32>
    tpu.vector_store %arg60[%c0_653, %c192_654], %680 {strides = array<i32>} : memref<16x512xf32, #tpu.memory_space<vmem>>, vector<13x24xf32>,
    %cst_655 = arith.constant 0.000000e+00 : f32
    %682 = vector.broadcast %cst_655 : f32 to vector<3x24xf32>
    %c13_656 = arith.constant 13 : index
    %c192_657 = arith.constant 192 : index
    %683 = vector.load %arg60[%c13_656, %c192_657] : memref<16x512xf32, #tpu.memory_space<vmem>>, vector<3x24xf32>
    tpu.vector_store %arg60[%c13_656, %c192_657], %682 {strides = array<i32>} : memref<16x512xf32, #tpu.memory_space<vmem>>, vector<3x24xf32>,
    %684 = vector.extract_strided_slice %649 {offsets = [4, 0], sizes = [12, 24], strides = [1, 1]} : vector<16x24xf32> to vector<12x24xf32>
    %c0_658 = arith.constant 0 : index
    %c216_659 = arith.constant 216 : index
    %685 = vector.load %arg60[%c0_658, %c216_659] : memref<16x512xf32, #tpu.memory_space<vmem>>, vector<12x24xf32>
    tpu.vector_store %arg60[%c0_658, %c216_659], %684 {strides = array<i32>} : memref<16x512xf32, #tpu.memory_space<vmem>>, vector<12x24xf32>,
    %cst_660 = arith.constant 0.000000e+00 : f32
    %686 = vector.broadcast %cst_660 : f32 to vector<4x24xf32>
    %c12_661 = arith.constant 12 : index
    %c216_662 = arith.constant 216 : index
    %687 = vector.load %arg60[%c12_661, %c216_662] : memref<16x512xf32, #tpu.memory_space<vmem>>, vector<4x24xf32>
    tpu.vector_store %arg60[%c12_661, %c216_662], %686 {strides = array<i32>} : memref<16x512xf32, #tpu.memory_space<vmem>>, vector<4x24xf32>,
    %688 = vector.extract_strided_slice %649 {offsets = [5, 0], sizes = [11, 24], strides = [1, 1]} : vector<16x24xf32> to vector<11x24xf32>
    %c0_663 = arith.constant 0 : index
    %c240_664 = arith.constant 240 : index
    %689 = vector.load %arg60[%c0_663, %c240_664] : memref<16x512xf32, #tpu.memory_space<vmem>>, vector<11x24xf32>
    tpu.vector_store %arg60[%c0_663, %c240_664], %688 {strides = array<i32>} : memref<16x512xf32, #tpu.memory_space<vmem>>, vector<11x24xf32>,
    %cst_665 = arith.constant 0.000000e+00 : f32
    %690 = vector.broadcast %cst_665 : f32 to vector<5x24xf32>
    %c11_666 = arith.constant 11 : index
    %c240_667 = arith.constant 240 : index
    %691 = vector.load %arg60[%c11_666, %c240_667] : memref<16x512xf32, #tpu.memory_space<vmem>>, vector<5x24xf32>
    tpu.vector_store %arg60[%c11_666, %c240_667], %690 {strides = array<i32>} : memref<16x512xf32, #tpu.memory_space<vmem>>, vector<5x24xf32>,
    %c0_668 = arith.constant 0 : index
    %c0_669 = arith.constant 0 : index
    %692 = vector.load %arg60[%c0_668, %c0_669] : memref<16x512xf32, #tpu.memory_space<vmem>>, vector<16x264xf32>
    %693 = arith.truncf %692 : vector<16x264xf32> to vector<16x264xbf16>
    %c0_670 = arith.constant 0 : index
    %c0_671 = arith.constant 0 : index
    %694 = vector.load %arg50[%c0_670, %c0_671] : memref<264x4xbf16, #tpu.memory_space<vmem>>, vector<264x4xbf16>
    %cst_672 = arith.constant dense<0.000000e+00> : vector<16x4xf32>
    %695 = tpu.matmul %693, %694, %cst_672 {dimension_numbers = #tpu.dot_dimension_numbers<[1], [0], [0], [1], [0, 0, 1, 1], [], []>} : vector<16x264xbf16>, vector<264x4xbf16>, vector<16x4xf32> -> vector<16x4xf32>
    %696 = vector.broadcast %650 : vector<1x4xf32> to vector<16x4xf32>
    %697 = arith.addf %695, %696 : vector<16x4xf32>
    %c0_673 = arith.constant 0 : index
    %c24_674 = arith.constant 24 : index
    %698 = vector.load %arg65[%c0_673, %c24_674] : memref<16x32xf32, #tpu.memory_space<vmem>>, vector<16x4xf32>
    tpu.vector_store %arg65[%c0_673, %c24_674], %697 {strides = array<i32>} : memref<16x32xf32, #tpu.memory_space<vmem>>, vector<16x4xf32>,
    %c0_675 = arith.constant 0 : index
    %c0_676 = arith.constant 0 : index
    %699 = vector.load %arg65[%c0_675, %c0_676] : memref<16x32xf32, #tpu.memory_space<vmem>>, vector<16x28xf32>
    %c0_677 = arith.constant 0 : index
    %c0_678 = arith.constant 0 : index
    %700 = vector.load %arg52[%c0_677, %c0_678] : memref<1x28xf32, #tpu.memory_space<vmem>>, vector<1x28xf32>
    %c0_679 = arith.constant 0 : index
    %c0_680 = arith.constant 0 : index
    %701 = vector.load %arg53[%c0_679, %c0_680] : memref<1x28xf32, #tpu.memory_space<vmem>>, vector<1x28xf32>
    %702 = vector.broadcast %700 : vector<1x28xf32> to vector<16x28xf32>
    %703 = arith.mulf %699, %702 : vector<16x28xf32>
    %704 = vector.broadcast %701 : vector<1x28xf32> to vector<16x28xf32>
    %705 = arith.addf %703, %704 : vector<16x28xf32>
    %cst_681 = arith.constant 0.000000e+00 : f32
    %706 = vector.broadcast %cst_681 : f32 to vector<16x28xf32>
    %707 = arith.maximumf %705, %706 : vector<16x28xf32>
    %c0_682 = arith.constant 0 : index
    %c0_683 = arith.constant 0 : index
    %708 = vector.load %arg51[%c0_682, %c0_683] : memref<1x4xf32, #tpu.memory_space<vmem>>, vector<1x4xf32>
    %709 = vector.extract_strided_slice %707 {offsets = [0, 0], sizes = [11, 28], strides = [1, 1]} : vector<16x28xf32> to vector<11x28xf32>
    %c5_684 = arith.constant 5 : index
    %c0_685 = arith.constant 0 : index
    %710 = vector.load %arg60[%c5_684, %c0_685] : memref<16x512xf32, #tpu.memory_space<vmem>>, vector<11x28xf32>
    tpu.vector_store %arg60[%c5_684, %c0_685], %709 {strides = array<i32>} : memref<16x512xf32, #tpu.memory_space<vmem>>, vector<11x28xf32>,
    %cst_686 = arith.constant 0.000000e+00 : f32
    %711 = vector.broadcast %cst_686 : f32 to vector<5x28xf32>
    %c0_687 = arith.constant 0 : index
    %c0_688 = arith.constant 0 : index
    %712 = vector.load %arg60[%c0_687, %c0_688] : memref<16x512xf32, #tpu.memory_space<vmem>>, vector<5x28xf32>
    tpu.vector_store %arg60[%c0_687, %c0_688], %711 {strides = array<i32>} : memref<16x512xf32, #tpu.memory_space<vmem>>, vector<5x28xf32>,
    %713 = vector.extract_strided_slice %707 {offsets = [0, 0], sizes = [12, 28], strides = [1, 1]} : vector<16x28xf32> to vector<12x28xf32>
    %c4_689 = arith.constant 4 : index
    %c28_690 = arith.constant 28 : index
    %714 = vector.load %arg60[%c4_689, %c28_690] : memref<16x512xf32, #tpu.memory_space<vmem>>, vector<12x28xf32>
    tpu.vector_store %arg60[%c4_689, %c28_690], %713 {strides = array<i32>} : memref<16x512xf32, #tpu.memory_space<vmem>>, vector<12x28xf32>,
    %cst_691 = arith.constant 0.000000e+00 : f32
    %715 = vector.broadcast %cst_691 : f32 to vector<4x28xf32>
    %c0_692 = arith.constant 0 : index
    %c28_693 = arith.constant 28 : index
    %716 = vector.load %arg60[%c0_692, %c28_693] : memref<16x512xf32, #tpu.memory_space<vmem>>, vector<4x28xf32>
    tpu.vector_store %arg60[%c0_692, %c28_693], %715 {strides = array<i32>} : memref<16x512xf32, #tpu.memory_space<vmem>>, vector<4x28xf32>,
    %717 = vector.extract_strided_slice %707 {offsets = [0, 0], sizes = [13, 28], strides = [1, 1]} : vector<16x28xf32> to vector<13x28xf32>
    %c3_694 = arith.constant 3 : index
    %c56_695 = arith.constant 56 : index
    %718 = vector.load %arg60[%c3_694, %c56_695] : memref<16x512xf32, #tpu.memory_space<vmem>>, vector<13x28xf32>
    tpu.vector_store %arg60[%c3_694, %c56_695], %717 {strides = array<i32>} : memref<16x512xf32, #tpu.memory_space<vmem>>, vector<13x28xf32>,
    %cst_696 = arith.constant 0.000000e+00 : f32
    %719 = vector.broadcast %cst_696 : f32 to vector<3x28xf32>
    %c0_697 = arith.constant 0 : index
    %c56_698 = arith.constant 56 : index
    %720 = vector.load %arg60[%c0_697, %c56_698] : memref<16x512xf32, #tpu.memory_space<vmem>>, vector<3x28xf32>
    tpu.vector_store %arg60[%c0_697, %c56_698], %719 {strides = array<i32>} : memref<16x512xf32, #tpu.memory_space<vmem>>, vector<3x28xf32>,
    %721 = vector.extract_strided_slice %707 {offsets = [0, 0], sizes = [14, 28], strides = [1, 1]} : vector<16x28xf32> to vector<14x28xf32>
    %c2_699 = arith.constant 2 : index
    %c84_700 = arith.constant 84 : index
    %722 = vector.load %arg60[%c2_699, %c84_700] : memref<16x512xf32, #tpu.memory_space<vmem>>, vector<14x28xf32>
    tpu.vector_store %arg60[%c2_699, %c84_700], %721 {strides = array<i32>} : memref<16x512xf32, #tpu.memory_space<vmem>>, vector<14x28xf32>,
    %cst_701 = arith.constant 0.000000e+00 : f32
    %723 = vector.broadcast %cst_701 : f32 to vector<2x28xf32>
    %c0_702 = arith.constant 0 : index
    %c84_703 = arith.constant 84 : index
    %724 = vector.load %arg60[%c0_702, %c84_703] : memref<16x512xf32, #tpu.memory_space<vmem>>, vector<2x28xf32>
    tpu.vector_store %arg60[%c0_702, %c84_703], %723 {strides = array<i32>} : memref<16x512xf32, #tpu.memory_space<vmem>>, vector<2x28xf32>,
    %725 = vector.extract_strided_slice %707 {offsets = [0, 0], sizes = [15, 28], strides = [1, 1]} : vector<16x28xf32> to vector<15x28xf32>
    %c1_704 = arith.constant 1 : index
    %c112_705 = arith.constant 112 : index
    %726 = vector.load %arg60[%c1_704, %c112_705] : memref<16x512xf32, #tpu.memory_space<vmem>>, vector<15x28xf32>
    tpu.vector_store %arg60[%c1_704, %c112_705], %725 {strides = array<i32>} : memref<16x512xf32, #tpu.memory_space<vmem>>, vector<15x28xf32>,
    %cst_706 = arith.constant 0.000000e+00 : f32
    %727 = vector.broadcast %cst_706 : f32 to vector<1x28xf32>
    %c0_707 = arith.constant 0 : index
    %c112_708 = arith.constant 112 : index
    %728 = vector.load %arg60[%c0_707, %c112_708] : memref<16x512xf32, #tpu.memory_space<vmem>>, vector<1x28xf32>
    tpu.vector_store %arg60[%c0_707, %c112_708], %727 {strides = array<i32>} : memref<16x512xf32, #tpu.memory_space<vmem>>, vector<1x28xf32>,
    %c0_709 = arith.constant 0 : index
    %c140_710 = arith.constant 140 : index
    %729 = vector.load %arg60[%c0_709, %c140_710] : memref<16x512xf32, #tpu.memory_space<vmem>>, vector<16x28xf32>
    tpu.vector_store %arg60[%c0_709, %c140_710], %707 {strides = array<i32>} : memref<16x512xf32, #tpu.memory_space<vmem>>, vector<16x28xf32>,
    %730 = vector.extract_strided_slice %707 {offsets = [1, 0], sizes = [15, 28], strides = [1, 1]} : vector<16x28xf32> to vector<15x28xf32>
    %c0_711 = arith.constant 0 : index
    %c168_712 = arith.constant 168 : index
    %731 = vector.load %arg60[%c0_711, %c168_712] : memref<16x512xf32, #tpu.memory_space<vmem>>, vector<15x28xf32>
    tpu.vector_store %arg60[%c0_711, %c168_712], %730 {strides = array<i32>} : memref<16x512xf32, #tpu.memory_space<vmem>>, vector<15x28xf32>,
    %cst_713 = arith.constant 0.000000e+00 : f32
    %732 = vector.broadcast %cst_713 : f32 to vector<1x28xf32>
    %c15_714 = arith.constant 15 : index
    %c168_715 = arith.constant 168 : index
    %733 = vector.load %arg60[%c15_714, %c168_715] : memref<16x512xf32, #tpu.memory_space<vmem>>, vector<1x28xf32>
    tpu.vector_store %arg60[%c15_714, %c168_715], %732 {strides = array<i32>} : memref<16x512xf32, #tpu.memory_space<vmem>>, vector<1x28xf32>,
    %734 = vector.extract_strided_slice %707 {offsets = [2, 0], sizes = [14, 28], strides = [1, 1]} : vector<16x28xf32> to vector<14x28xf32>
    %c0_716 = arith.constant 0 : index
    %c196_717 = arith.constant 196 : index
    %735 = vector.load %arg60[%c0_716, %c196_717] : memref<16x512xf32, #tpu.memory_space<vmem>>, vector<14x28xf32>
    tpu.vector_store %arg60[%c0_716, %c196_717], %734 {strides = array<i32>} : memref<16x512xf32, #tpu.memory_space<vmem>>, vector<14x28xf32>,
    %cst_718 = arith.constant 0.000000e+00 : f32
    %736 = vector.broadcast %cst_718 : f32 to vector<2x28xf32>
    %c14_719 = arith.constant 14 : index
    %c196_720 = arith.constant 196 : index
    %737 = vector.load %arg60[%c14_719, %c196_720] : memref<16x512xf32, #tpu.memory_space<vmem>>, vector<2x28xf32>
    tpu.vector_store %arg60[%c14_719, %c196_720], %736 {strides = array<i32>} : memref<16x512xf32, #tpu.memory_space<vmem>>, vector<2x28xf32>,
    %738 = vector.extract_strided_slice %707 {offsets = [3, 0], sizes = [13, 28], strides = [1, 1]} : vector<16x28xf32> to vector<13x28xf32>
    %c0_721 = arith.constant 0 : index
    %c224_722 = arith.constant 224 : index
    %739 = vector.load %arg60[%c0_721, %c224_722] : memref<16x512xf32, #tpu.memory_space<vmem>>, vector<13x28xf32>
    tpu.vector_store %arg60[%c0_721, %c224_722], %738 {strides = array<i32>} : memref<16x512xf32, #tpu.memory_space<vmem>>, vector<13x28xf32>,
    %cst_723 = arith.constant 0.000000e+00 : f32
    %740 = vector.broadcast %cst_723 : f32 to vector<3x28xf32>
    %c13_724 = arith.constant 13 : index
    %c224_725 = arith.constant 224 : index
    %741 = vector.load %arg60[%c13_724, %c224_725] : memref<16x512xf32, #tpu.memory_space<vmem>>, vector<3x28xf32>
    tpu.vector_store %arg60[%c13_724, %c224_725], %740 {strides = array<i32>} : memref<16x512xf32, #tpu.memory_space<vmem>>, vector<3x28xf32>,
    %742 = vector.extract_strided_slice %707 {offsets = [4, 0], sizes = [12, 28], strides = [1, 1]} : vector<16x28xf32> to vector<12x28xf32>
    %c0_726 = arith.constant 0 : index
    %c252_727 = arith.constant 252 : index
    %743 = vector.load %arg60[%c0_726, %c252_727] : memref<16x512xf32, #tpu.memory_space<vmem>>, vector<12x28xf32>
    tpu.vector_store %arg60[%c0_726, %c252_727], %742 {strides = array<i32>} : memref<16x512xf32, #tpu.memory_space<vmem>>, vector<12x28xf32>,
    %cst_728 = arith.constant 0.000000e+00 : f32
    %744 = vector.broadcast %cst_728 : f32 to vector<4x28xf32>
    %c12_729 = arith.constant 12 : index
    %c252_730 = arith.constant 252 : index
    %745 = vector.load %arg60[%c12_729, %c252_730] : memref<16x512xf32, #tpu.memory_space<vmem>>, vector<4x28xf32>
    tpu.vector_store %arg60[%c12_729, %c252_730], %744 {strides = array<i32>} : memref<16x512xf32, #tpu.memory_space<vmem>>, vector<4x28xf32>,
    %746 = vector.extract_strided_slice %707 {offsets = [5, 0], sizes = [11, 28], strides = [1, 1]} : vector<16x28xf32> to vector<11x28xf32>
    %c0_731 = arith.constant 0 : index
    %c280_732 = arith.constant 280 : index
    %747 = vector.load %arg60[%c0_731, %c280_732] : memref<16x512xf32, #tpu.memory_space<vmem>>, vector<11x28xf32>
    tpu.vector_store %arg60[%c0_731, %c280_732], %746 {strides = array<i32>} : memref<16x512xf32, #tpu.memory_space<vmem>>, vector<11x28xf32>,
    %cst_733 = arith.constant 0.000000e+00 : f32
    %748 = vector.broadcast %cst_733 : f32 to vector<5x28xf32>
    %c11_734 = arith.constant 11 : index
    %c280_735 = arith.constant 280 : index
    %749 = vector.load %arg60[%c11_734, %c280_735] : memref<16x512xf32, #tpu.memory_space<vmem>>, vector<5x28xf32>
    tpu.vector_store %arg60[%c11_734, %c280_735], %748 {strides = array<i32>} : memref<16x512xf32, #tpu.memory_space<vmem>>, vector<5x28xf32>,
    %c0_736 = arith.constant 0 : index
    %c0_737 = arith.constant 0 : index
    %750 = vector.load %arg60[%c0_736, %c0_737] : memref<16x512xf32, #tpu.memory_space<vmem>>, vector<16x308xf32>
    %751 = arith.truncf %750 : vector<16x308xf32> to vector<16x308xbf16>
    %c0_738 = arith.constant 0 : index
    %c0_739 = arith.constant 0 : index
    %752 = vector.load %arg54[%c0_738, %c0_739] : memref<308x4xbf16, #tpu.memory_space<vmem>>, vector<308x4xbf16>
    %cst_740 = arith.constant dense<0.000000e+00> : vector<16x4xf32>
    %753 = tpu.matmul %751, %752, %cst_740 {dimension_numbers = #tpu.dot_dimension_numbers<[1], [0], [0], [1], [0, 0, 1, 1], [], []>} : vector<16x308xbf16>, vector<308x4xbf16>, vector<16x4xf32> -> vector<16x4xf32>
    %754 = vector.broadcast %708 : vector<1x4xf32> to vector<16x4xf32>
    %755 = arith.addf %753, %754 : vector<16x4xf32>
    %c0_741 = arith.constant 0 : index
    %c28_742 = arith.constant 28 : index
    %756 = vector.load %arg65[%c0_741, %c28_742] : memref<16x32xf32, #tpu.memory_space<vmem>>, vector<16x4xf32>
    tpu.vector_store %arg65[%c0_741, %c28_742], %755 {strides = array<i32>} : memref<16x32xf32, #tpu.memory_space<vmem>>, vector<16x4xf32>,
    %c0_743 = arith.constant 0 : index
    %c0_744 = arith.constant 0 : index
    %757 = vector.load %arg65[%c0_743, %c0_744] : memref<16x32xf32, #tpu.memory_space<vmem>>, vector<16x32xf32>
    %c0_745 = arith.constant 0 : index
    %c0_746 = arith.constant 0 : index
    %758 = vector.load %arg35[%c0_745, %c0_746] : memref<1x4xf32, #tpu.memory_space<vmem>>, vector<1x4xf32>
    %759 = arith.truncf %757 : vector<16x32xf32> to vector<16x32xbf16>
    %c0_747 = arith.constant 0 : index
    %c0_748 = arith.constant 0 : index
    %760 = vector.load %arg36[%c0_747, %c0_748] : memref<32x4xbf16, #tpu.memory_space<vmem>>, vector<32x4xbf16>
    %cst_749 = arith.constant dense<0.000000e+00> : vector<16x4xf32>
    %761 = tpu.matmul %759, %760, %cst_749 {dimension_numbers = #tpu.dot_dimension_numbers<[1], [0], [0], [1], [0, 0, 1, 1], [], []>} : vector<16x32xbf16>, vector<32x4xbf16>, vector<16x4xf32> -> vector<16x4xf32>
    %762 = vector.broadcast %758 : vector<1x4xf32> to vector<16x4xf32>
    %763 = arith.addf %761, %762 : vector<16x4xf32>
    %cst_750 = arith.constant dense<0xFF800000> : vector<16xf32>
    %764 = vector.multi_reduction <maximumf>, %763, %cst_750 [1] : vector<16x4xf32> to vector<16xf32>
    %765 = vector.shape_cast %764 : vector<16xf32> to vector<16x1xf32>
    %766 = vector.broadcast %765 : vector<16x1xf32> to vector<16x4xf32>
    %767 = arith.subf %763, %766 : vector<16x4xf32>
    %768 = math.exp %767 : vector<16x4xf32>
    %cst_751 = arith.constant dense<0.000000e+00> : vector<16xf32>
    %769 = vector.multi_reduction <add>, %768, %cst_751 [1] : vector<16x4xf32> to vector<16xf32>
    %770 = vector.shape_cast %769 : vector<16xf32> to vector<16x1xf32>
    %771 = math.log %770 : vector<16x1xf32>
    %772 = vector.broadcast %771 : vector<16x1xf32> to vector<16x4xf32>
    %773 = arith.subf %767, %772 : vector<16x4xf32>
    %c0_752 = arith.constant 0 : index
    %c0_753 = arith.constant 0 : index
    %c0_754 = arith.constant 0 : index
    %774 = vector.load %arg59[%c0_752, %c0_753, %c0_754] : memref<1x16x4xf32, #tpu.memory_space<vmem>>, vector<1x16x4xf32>
    %775 = vector.shape_cast %774 : vector<1x16x4xf32> to vector<16x4xf32>
    %776 = vector.shape_cast %773 : vector<16x4xf32> to vector<1x16x4xf32>
    tpu.vector_store %arg59[%c0_752, %c0_753, %c0_754], %776 {strides = array<i32>} : memref<1x16x4xf32, #tpu.memory_space<vmem>>, vector<1x16x4xf32>,
    return
  }
  func.func @transform_0(%arg0: i32) -> (i32, i32, i32) {
    %c0_i32 = arith.constant 0 : i32
    %c0_i32_0 = arith.constant 0 : i32
    %c0_i32_1 = arith.constant 0 : i32
    return %arg0, %c0_i32, %c0_i32_0 : i32, i32, i32
  }
  func.func @transform_1(%arg0: i32) -> (i32, i32) {
    %c0_i32 = arith.constant 0 : i32
    %c0_i32_0 = arith.constant 0 : i32
    %c0_i32_1 = arith.constant 0 : i32
    return %c0_i32, %c0_i32_0 : i32, i32
  }
  func.func @transform_2(%arg0: i32) -> (i32, i32) {
    %c0_i32 = arith.constant 0 : i32
    %c0_i32_0 = arith.constant 0 : i32
    %c0_i32_1 = arith.constant 0 : i32
    return %c0_i32, %c0_i32_0 : i32, i32
  }
  func.func @transform_3(%arg0: i32) -> (i32, i32) {
    %c0_i32 = arith.constant 0 : i32
    %c0_i32_0 = arith.constant 0 : i32
    %c0_i32_1 = arith.constant 0 : i32
    return %c0_i32, %c0_i32_0 : i32, i32
  }
  func.func @transform_4(%arg0: i32) -> (i32, i32) {
    %c0_i32 = arith.constant 0 : i32
    %c0_i32_0 = arith.constant 0 : i32
    %c0_i32_1 = arith.constant 0 : i32
    return %c0_i32, %c0_i32_0 : i32, i32
  }
  func.func @transform_5(%arg0: i32) -> (i32, i32) {
    %c0_i32 = arith.constant 0 : i32
    %c0_i32_0 = arith.constant 0 : i32
    %c0_i32_1 = arith.constant 0 : i32
    return %c0_i32, %c0_i32_0 : i32, i32
  }
  func.func @transform_6(%arg0: i32) -> (i32, i32) {
    %c0_i32 = arith.constant 0 : i32
    %c0_i32_0 = arith.constant 0 : i32
    %c0_i32_1 = arith.constant 0 : i32
    return %c0_i32, %c0_i32_0 : i32, i32
  }
  func.func @transform_7(%arg0: i32) -> (i32, i32) {
    %c0_i32 = arith.constant 0 : i32
    %c0_i32_0 = arith.constant 0 : i32
    %c0_i32_1 = arith.constant 0 : i32
    return %c0_i32, %c0_i32_0 : i32, i32
  }
  func.func @transform_8(%arg0: i32) -> (i32, i32) {
    %c0_i32 = arith.constant 0 : i32
    %c0_i32_0 = arith.constant 0 : i32
    %c0_i32_1 = arith.constant 0 : i32
    return %c0_i32, %c0_i32_0 : i32, i32
  }
  func.func @transform_9(%arg0: i32) -> (i32, i32) {
    %c0_i32 = arith.constant 0 : i32
    %c0_i32_0 = arith.constant 0 : i32
    %c0_i32_1 = arith.constant 0 : i32
    return %c0_i32, %c0_i32_0 : i32, i32
  }
  func.func @transform_10(%arg0: i32) -> (i32, i32) {
    %c0_i32 = arith.constant 0 : i32
    %c0_i32_0 = arith.constant 0 : i32
    %c0_i32_1 = arith.constant 0 : i32
    return %c0_i32, %c0_i32_0 : i32, i32
  }
  func.func @transform_11(%arg0: i32) -> (i32, i32) {
    %c0_i32 = arith.constant 0 : i32
    %c0_i32_0 = arith.constant 0 : i32
    %c0_i32_1 = arith.constant 0 : i32
    return %c0_i32, %c0_i32_0 : i32, i32
  }
  func.func @transform_12(%arg0: i32) -> (i32, i32) {
    %c0_i32 = arith.constant 0 : i32
    %c0_i32_0 = arith.constant 0 : i32
    %c0_i32_1 = arith.constant 0 : i32
    return %c0_i32, %c0_i32_0 : i32, i32
  }
  func.func @transform_13(%arg0: i32) -> (i32, i32) {
    %c0_i32 = arith.constant 0 : i32
    %c0_i32_0 = arith.constant 0 : i32
    %c0_i32_1 = arith.constant 0 : i32
    return %c0_i32, %c0_i32_0 : i32, i32
  }
  func.func @transform_14(%arg0: i32) -> (i32, i32) {
    %c0_i32 = arith.constant 0 : i32
    %c0_i32_0 = arith.constant 0 : i32
    %c0_i32_1 = arith.constant 0 : i32
    return %c0_i32, %c0_i32_0 : i32, i32
  }
  func.func @transform_15(%arg0: i32) -> (i32, i32) {
    %c0_i32 = arith.constant 0 : i32
    %c0_i32_0 = arith.constant 0 : i32
    %c0_i32_1 = arith.constant 0 : i32
    return %c0_i32, %c0_i32_0 : i32, i32
  }
  func.func @transform_16(%arg0: i32) -> (i32, i32) {
    %c0_i32 = arith.constant 0 : i32
    %c0_i32_0 = arith.constant 0 : i32
    %c0_i32_1 = arith.constant 0 : i32
    return %c0_i32, %c0_i32_0 : i32, i32
  }
  func.func @transform_17(%arg0: i32) -> (i32, i32) {
    %c0_i32 = arith.constant 0 : i32
    %c0_i32_0 = arith.constant 0 : i32
    %c0_i32_1 = arith.constant 0 : i32
    return %c0_i32, %c0_i32_0 : i32, i32
  }
  func.func @transform_18(%arg0: i32) -> (i32, i32) {
    %c0_i32 = arith.constant 0 : i32
    %c0_i32_0 = arith.constant 0 : i32
    %c0_i32_1 = arith.constant 0 : i32
    return %c0_i32, %c0_i32_0 : i32, i32
  }
  func.func @transform_19(%arg0: i32) -> (i32, i32) {
    %c0_i32 = arith.constant 0 : i32
    %c0_i32_0 = arith.constant 0 : i32
    %c0_i32_1 = arith.constant 0 : i32
    return %c0_i32, %c0_i32_0 : i32, i32
  }
  func.func @transform_20(%arg0: i32) -> (i32, i32) {
    %c0_i32 = arith.constant 0 : i32
    %c0_i32_0 = arith.constant 0 : i32
    %c0_i32_1 = arith.constant 0 : i32
    return %c0_i32, %c0_i32_0 : i32, i32
  }
  func.func @transform_21(%arg0: i32) -> (i32, i32) {
    %c0_i32 = arith.constant 0 : i32
    %c0_i32_0 = arith.constant 0 : i32
    %c0_i32_1 = arith.constant 0 : i32
    return %c0_i32, %c0_i32_0 : i32, i32
  }
  func.func @transform_22(%arg0: i32) -> (i32, i32) {
    %c0_i32 = arith.constant 0 : i32
    %c0_i32_0 = arith.constant 0 : i32
    %c0_i32_1 = arith.constant 0 : i32
    return %c0_i32, %c0_i32_0 : i32, i32
  }
  func.func @transform_23(%arg0: i32) -> (i32, i32) {
    %c0_i32 = arith.constant 0 : i32
    %c0_i32_0 = arith.constant 0 : i32
    %c0_i32_1 = arith.constant 0 : i32
    return %c0_i32, %c0_i32_0 : i32, i32
  }
  func.func @transform_24(%arg0: i32) -> (i32, i32) {
    %c0_i32 = arith.constant 0 : i32
    %c0_i32_0 = arith.constant 0 : i32
    %c0_i32_1 = arith.constant 0 : i32
    return %c0_i32, %c0_i32_0 : i32, i32
  }
  func.func @transform_25(%arg0: i32) -> (i32, i32) {
    %c0_i32 = arith.constant 0 : i32
    %c0_i32_0 = arith.constant 0 : i32
    %c0_i32_1 = arith.constant 0 : i32
    return %c0_i32, %c0_i32_0 : i32, i32
  }
  func.func @transform_26(%arg0: i32) -> (i32, i32) {
    %c0_i32 = arith.constant 0 : i32
    %c0_i32_0 = arith.constant 0 : i32
    %c0_i32_1 = arith.constant 0 : i32
    return %c0_i32, %c0_i32_0 : i32, i32
  }
  func.func @transform_27(%arg0: i32) -> (i32, i32) {
    %c0_i32 = arith.constant 0 : i32
    %c0_i32_0 = arith.constant 0 : i32
    %c0_i32_1 = arith.constant 0 : i32
    return %c0_i32, %c0_i32_0 : i32, i32
  }
  func.func @transform_28(%arg0: i32) -> (i32, i32) {
    %c0_i32 = arith.constant 0 : i32
    %c0_i32_0 = arith.constant 0 : i32
    %c0_i32_1 = arith.constant 0 : i32
    return %c0_i32, %c0_i32_0 : i32, i32
  }
  func.func @transform_29(%arg0: i32) -> (i32, i32) {
    %c0_i32 = arith.constant 0 : i32
    %c0_i32_0 = arith.constant 0 : i32
    %c0_i32_1 = arith.constant 0 : i32
    return %c0_i32, %c0_i32_0 : i32, i32
  }
  func.func @transform_30(%arg0: i32) -> (i32, i32) {
    %c0_i32 = arith.constant 0 : i32
    %c0_i32_0 = arith.constant 0 : i32
    %c0_i32_1 = arith.constant 0 : i32
    return %c0_i32, %c0_i32_0 : i32, i32
  }
  func.func @transform_31(%arg0: i32) -> (i32, i32) {
    %c0_i32 = arith.constant 0 : i32
    %c0_i32_0 = arith.constant 0 : i32
    %c0_i32_1 = arith.constant 0 : i32
    return %c0_i32, %c0_i32_0 : i32, i32
  }
  func.func @transform_32(%arg0: i32) -> (i32, i32) {
    %c0_i32 = arith.constant 0 : i32
    %c0_i32_0 = arith.constant 0 : i32
    %c0_i32_1 = arith.constant 0 : i32
    return %c0_i32, %c0_i32_0 : i32, i32
  }
  func.func @transform_33(%arg0: i32) -> (i32, i32) {
    %c0_i32 = arith.constant 0 : i32
    %c0_i32_0 = arith.constant 0 : i32
    %c0_i32_1 = arith.constant 0 : i32
    return %c0_i32, %c0_i32_0 : i32, i32
  }
  func.func @transform_34(%arg0: i32) -> (i32, i32) {
    %c0_i32 = arith.constant 0 : i32
    %c0_i32_0 = arith.constant 0 : i32
    %c0_i32_1 = arith.constant 0 : i32
    return %c0_i32, %c0_i32_0 : i32, i32
  }
  func.func @transform_35(%arg0: i32) -> (i32, i32) {
    %c0_i32 = arith.constant 0 : i32
    %c0_i32_0 = arith.constant 0 : i32
    %c0_i32_1 = arith.constant 0 : i32
    return %c0_i32, %c0_i32_0 : i32, i32
  }
  func.func @transform_36(%arg0: i32) -> (i32, i32) {
    %c0_i32 = arith.constant 0 : i32
    %c0_i32_0 = arith.constant 0 : i32
    %c0_i32_1 = arith.constant 0 : i32
    return %c0_i32, %c0_i32_0 : i32, i32
  }
  func.func @transform_37(%arg0: i32) -> (i32, i32) {
    %c0_i32 = arith.constant 0 : i32
    %c0_i32_0 = arith.constant 0 : i32
    %c0_i32_1 = arith.constant 0 : i32
    return %c0_i32, %c0_i32_0 : i32, i32
  }
  func.func @transform_38(%arg0: i32) -> (i32, i32) {
    %c0_i32 = arith.constant 0 : i32
    %c0_i32_0 = arith.constant 0 : i32
    %c0_i32_1 = arith.constant 0 : i32
    return %c0_i32, %c0_i32_0 : i32, i32
  }
  func.func @transform_39(%arg0: i32) -> (i32, i32) {
    %c0_i32 = arith.constant 0 : i32
    %c0_i32_0 = arith.constant 0 : i32
    %c0_i32_1 = arith.constant 0 : i32
    return %c0_i32, %c0_i32_0 : i32, i32
  }
  func.func @transform_40(%arg0: i32) -> (i32, i32) {
    %c0_i32 = arith.constant 0 : i32
    %c0_i32_0 = arith.constant 0 : i32
    %c0_i32_1 = arith.constant 0 : i32
    return %c0_i32, %c0_i32_0 : i32, i32
  }
  func.func @transform_41(%arg0: i32) -> (i32, i32) {
    %c0_i32 = arith.constant 0 : i32
    %c0_i32_0 = arith.constant 0 : i32
    %c0_i32_1 = arith.constant 0 : i32
    return %c0_i32, %c0_i32_0 : i32, i32
  }
  func.func @transform_42(%arg0: i32) -> (i32, i32) {
    %c0_i32 = arith.constant 0 : i32
    %c0_i32_0 = arith.constant 0 : i32
    %c0_i32_1 = arith.constant 0 : i32
    return %c0_i32, %c0_i32_0 : i32, i32
  }
  func.func @transform_43(%arg0: i32) -> (i32, i32) {
    %c0_i32 = arith.constant 0 : i32
    %c0_i32_0 = arith.constant 0 : i32
    %c0_i32_1 = arith.constant 0 : i32
    return %c0_i32, %c0_i32_0 : i32, i32
  }
  func.func @transform_44(%arg0: i32) -> (i32, i32) {
    %c0_i32 = arith.constant 0 : i32
    %c0_i32_0 = arith.constant 0 : i32
    %c0_i32_1 = arith.constant 0 : i32
    return %c0_i32, %c0_i32_0 : i32, i32
  }
  func.func @transform_45(%arg0: i32) -> (i32, i32) {
    %c0_i32 = arith.constant 0 : i32
    %c0_i32_0 = arith.constant 0 : i32
    %c0_i32_1 = arith.constant 0 : i32
    return %c0_i32, %c0_i32_0 : i32, i32
  }
  func.func @transform_46(%arg0: i32) -> (i32, i32) {
    %c0_i32 = arith.constant 0 : i32
    %c0_i32_0 = arith.constant 0 : i32
    %c0_i32_1 = arith.constant 0 : i32
    return %c0_i32, %c0_i32_0 : i32, i32
  }
  func.func @transform_47(%arg0: i32) -> (i32, i32) {
    %c0_i32 = arith.constant 0 : i32
    %c0_i32_0 = arith.constant 0 : i32
    %c0_i32_1 = arith.constant 0 : i32
    return %c0_i32, %c0_i32_0 : i32, i32
  }
  func.func @transform_48(%arg0: i32) -> (i32, i32) {
    %c0_i32 = arith.constant 0 : i32
    %c0_i32_0 = arith.constant 0 : i32
    %c0_i32_1 = arith.constant 0 : i32
    return %c0_i32, %c0_i32_0 : i32, i32
  }
  func.func @transform_49(%arg0: i32) -> (i32, i32) {
    %c0_i32 = arith.constant 0 : i32
    %c0_i32_0 = arith.constant 0 : i32
    %c0_i32_1 = arith.constant 0 : i32
    return %c0_i32, %c0_i32_0 : i32, i32
  }
  func.func @transform_50(%arg0: i32) -> (i32, i32) {
    %c0_i32 = arith.constant 0 : i32
    %c0_i32_0 = arith.constant 0 : i32
    %c0_i32_1 = arith.constant 0 : i32
    return %c0_i32, %c0_i32_0 : i32, i32
  }
  func.func @transform_51(%arg0: i32) -> (i32, i32) {
    %c0_i32 = arith.constant 0 : i32
    %c0_i32_0 = arith.constant 0 : i32
    %c0_i32_1 = arith.constant 0 : i32
    return %c0_i32, %c0_i32_0 : i32, i32
  }
  func.func @transform_52(%arg0: i32) -> (i32, i32) {
    %c0_i32 = arith.constant 0 : i32
    %c0_i32_0 = arith.constant 0 : i32
    %c0_i32_1 = arith.constant 0 : i32
    return %c0_i32, %c0_i32_0 : i32, i32
  }
  func.func @transform_53(%arg0: i32) -> (i32, i32) {
    %c0_i32 = arith.constant 0 : i32
    %c0_i32_0 = arith.constant 0 : i32
    %c0_i32_1 = arith.constant 0 : i32
    return %c0_i32, %c0_i32_0 : i32, i32
  }
  func.func @transform_54(%arg0: i32) -> (i32, i32) {
    %c0_i32 = arith.constant 0 : i32
    %c0_i32_0 = arith.constant 0 : i32
    %c0_i32_1 = arith.constant 0 : i32
    return %c0_i32, %c0_i32_0 : i32, i32
  }
  func.func @transform_55(%arg0: i32) -> (i32, i32) {
    %c0_i32 = arith.constant 0 : i32
    %c0_i32_0 = arith.constant 0 : i32
    %c0_i32_1 = arith.constant 0 : i32
    return %c0_i32, %c0_i32_0 : i32, i32
  }
  func.func @transform_56(%arg0: i32) -> (i32, i32) {
    %c0_i32 = arith.constant 0 : i32
    %c0_i32_0 = arith.constant 0 : i32
    %c0_i32_1 = arith.constant 0 : i32
    return %c0_i32, %c0_i32_0 : i32, i32
  }
  func.func @transform_57(%arg0: i32) -> (i32, i32) {
    %c0_i32 = arith.constant 0 : i32
    %c0_i32_0 = arith.constant 0 : i32
    %c0_i32_1 = arith.constant 0 : i32
    return %c0_i32, %c0_i32_0 : i32, i32
  }
  func.func @transform_58(%arg0: i32) -> (i32, i32, i32) {
    %c0_i32 = arith.constant 0 : i32
    %c0_i32_0 = arith.constant 0 : i32
    %c0_i32_1 = arith.constant 0 : i32
    return %arg0, %c0_i32, %c0_i32_0 : i32, i32, i32
  }
}

</mosaic_0001>

<bundles_post_ra>
// kernel: fcdensenet_forward.1
= control target key start
LH: loop header
LB: loop body
LE: loop exit
PB: predicated region body
PF: predicated region fallthrough
CT: control target
= control target key end

     0   :  { %s7899_s6 = smov 1   ;;  %s7900_s10 = smov 2   ;;  %s9243_s0 = inlined_call_operand.smem [shape: u32[59], index: -1, kind: input, shape index: {}] }
   0x1   :  { %s7995_s5 = sld [smem:[%s9243_s0]]   ;;  %s7901_s14 = smov 3  }
   0x2   :  { %s8000_s9 = sld [smem:[%s9243_s0 + %s7899_s6]]   ;;  %s7902_s18 = smov 4  }
   0x3   :  { %s8005_s13 = sld [smem:[%s9243_s0 + %s7900_s10]]   ;;  %s7903_s22 = smov 5  }
   0x4   :  { %s8010_s17 = sld [smem:[%s9243_s0 + %s7901_s14]]   ;;  %s7904_s26 = smov 6  }
   0x5   :  { %s8015_s21 = sld [smem:[%s9243_s0 + %s7902_s18]]   ;;  %s7905_s30 = smov 7  }
   0x6   :  { %s8020_s25 = sld [smem:[%s9243_s0 + %s7903_s22]]   ;;  %s7906_s4 = smov 8  }
   0x7   :  { %9327 = sst [smem:[#allocation11_spill]] %s7995_s5  ;;  %s7907_s10 = smov 9  }
   0x8   :  { %9328 = sst [smem:[#allocation12_spill]] %s8000_s9  ;;  %s7908_s15 = smov 10  }
   0x9   :  { %9329 = sst [smem:[#allocation13_spill]] %s8005_s13  ;;  %s7909_s20 = smov 11  }
   0xa   :  { %9330 = sst [smem:[#allocation14_spill]] %s8010_s17  ;;  %s7911_s1 = smov 13  }
   0xb   :  { %9331 = sst [smem:[#allocation15_spill]] %s8015_s21  ;;  %s7912_s7 = smov 14  }
   0xc   :  { %9332 = sst [smem:[#allocation16_spill]] %s8020_s25  ;;  %s7914_s22 = smov 16  }
   0xd   :  { %s8025_s29 = sld [smem:[%s9243_s0 + %s7904_s26]]   ;;  %s7910_s26 = smov 12  }
   0xe   :  { %s8030_s3 = sld [smem:[%s9243_s0 + %s7905_s30]]   ;;  %s7915_s28 = smov 17  }
   0xf   :  { %s8035_s8 = sld [smem:[%s9243_s0 + %s7906_s4]]  }
  0x10   :  { %s8040_s14 = sld [smem:[%s9243_s0 + %s7907_s10]]  }
  0x11   :  { %s8045_s19 = sld [smem:[%s9243_s0 + %s7908_s15]]   ;;  %s7913_s15 = smov 15  }
  0x12   :  { %s8050_s24 = sld [smem:[%s9243_s0 + %s7909_s20]]  }
  0x13   :  { %9333 = sst [smem:[#allocation17_spill]] %s8025_s29 }
  0x14   :  { %9334 = sst [smem:[#allocation18_spill]] %s8030_s3 }
  0x15   :  { %9335 = sst [smem:[#allocation19_spill]] %s8035_s8 }
  0x16   :  { %9336 = sst [smem:[#allocation20_spill]] %s8040_s14 }
  0x17   :  { %s8055_s30 = sld [smem:[%s9243_s0 + %s7910_s26]]  }
  0x18   :  { %s8060_s6 = sld [smem:[%s9243_s0 + %s7911_s1]]  }
  0x19   :  { %s8065_s12 = sld [smem:[%s9243_s0 + %s7912_s7]]   ;;  %s7916_s7 = smov 18  }
  0x1a   :  { %s8070_s20 = sld [smem:[%s9243_s0 + %s7913_s15]]   ;;  %s7917_s15 = smov 19  }
  0x1b   :  { %s8075_s27 = sld [smem:[%s9243_s0 + %s7914_s22]]   ;;  %s7918_s22 = smov 20  }
  0x1c   :  { %s8080_s4 = sld [smem:[%s9243_s0 + %s7915_s28]]   ;;  %s7919_s28 = smov 21  }
  0x1d   :  { %s8085_s25 = sld [smem:[%s9243_s0 + %s7916_s7]]   ;;  %s7920_s7 = smov 22  }
  0x1e   :  { %9337 = sst [smem:[#allocation21_spill]] %s8060_s6 }
  0x1f   :  { %9338 = sst [smem:[#allocation22_spill]] %s8065_s12 }
  0x20   :  { %s8090_s3 = sld [smem:[%s9243_s0 + %s7917_s15]]   ;;  %s7921_s15 = smov 23  }
  0x21   :  { %s8095_s29 = sld [smem:[%s9243_s0 + %s7918_s22]]   ;;  %s7922_s22 = smov 24  }
  0x22   :  { %9339 = sst [smem:[#allocation23_spill]] %s8080_s4 }
  0x23   :  { %9340 = sst [smem:[#allocation24_spill]] %s8085_s25 }
  0x24   :  { %s8100_s8 = sld [smem:[%s9243_s0 + %s7919_s28]]   ;;  %s7923_s28 = smov 25  }
  0x25   :  { %s8105_s9 = sld [smem:[%s9243_s0 + %s7920_s7]]   ;;  %s7924_s7 = smov 26  }
  0x26   :  { %9341 = sst [smem:[#allocation25_spill]] %s8090_s3 }
  0x27   :  { %9342 = sst [smem:[#allocation26_spill]] %s8095_s29 }
  0x28   :  { %s8110_s17 = sld [smem:[%s9243_s0 + %s7921_s15]]   ;;  %s7925_s15 = smov 27  }
  0x29   :  { %s8115_s13 = sld [smem:[%s9243_s0 + %s7922_s22]]   ;;  %s7926_s22 = smov 28  }
  0x2a   :  { %9343 = sst [smem:[#allocation27_spill]] %s8100_s8 }
  0x2b   :  { %9344 = sst [smem:[#allocation28_spill]] %s8105_s9 }
  0x2c   :  { %s8120_s21 = sld [smem:[%s9243_s0 + %s7923_s28]]   ;;  %s7927_s28 = smov 29  }
  0x2d   :  { %s8125_s8 = sld [smem:[%s9243_s0 + %s7924_s7]]   ;;  %s7928_s7 = smov 30  }
  0x2e   :  { %9345 = sst [smem:[#allocation29_spill]] %s8110_s17 }
  0x2f   :  { %9346 = sst [smem:[#allocation30_spill]] %s8115_s13 }
  0x30   :  { %s8130_s17 = sld [smem:[%s9243_s0 + %s7925_s15]]   ;;  %s7929_s15 = smov 31  }
  0x31   :  { %s8135_s9 = sld [smem:[%s9243_s0 + %s7926_s22]]   ;;  %s7930_s22 = smov 32  }
  0x32   :  { %9347 = sst [smem:[#allocation31_spill]] %s8120_s21 }
  0x33   :  { %9348 = sst [smem:[#allocation32_spill]] %s8125_s8 }
  0x34   :  { %s8140_s13 = sld [smem:[%s9243_s0 + %s7927_s28]]   ;;  %s7931_s28 = smov 33  }
  0x35   :  { %s8145_s4 = sld [smem:[%s9243_s0 + %s7928_s7]]   ;;  %s7932_s7 = smov 34  }
  0x36   :  { %9349 = sst [smem:[#allocation33_spill]] %s8130_s17 }
  0x37   :  { %9350 = sst [smem:[#allocation34_spill]] %s8135_s9 }
  0x38   :  { %s8150_s3 = sld [smem:[%s9243_s0 + %s7929_s15]]   ;;  %s7933_s15 = smov 35  }
  0x39   :  { %s8155_s25 = sld [smem:[%s9243_s0 + %s7930_s22]]   ;;  %s7934_s22 = smov 36  }
  0x3a   :  { %9351 = sst [smem:[#allocation35_spill]] %s8140_s13 }
  0x3b   :  { %9352 = sst [smem:[#allocation36_spill]] %s8145_s4 }
  0x3c   :  { %s8160_s13 = sld [smem:[%s9243_s0 + %s7931_s28]]   ;;  %s7935_s28 = smov 37  }
  0x3d   :  { %s8165_s4 = sld [smem:[%s9243_s0 + %s7932_s7]]   ;;  %s7936_s7 = smov 38  }
  0x3e   :  { %9353 = sst [smem:[#allocation37_spill]] %s8150_s3 }
  0x3f   :  { %9354 = sst [smem:[#allocation38_spill]] %s8155_s25 }
  0x40   :  { %s8170_s3 = sld [smem:[%s9243_s0 + %s7933_s15]]   ;;  %s7937_s15 = smov 39  }
  0x41   :  { %s8175_s25 = sld [smem:[%s9243_s0 + %s7934_s22]]   ;;  %s7938_s22 = smov 40  }
  0x42   :  { %9355 = sst [smem:[#allocation39_spill]] %s8160_s13 }
  0x43   :  { %9356 = sst [smem:[#allocation40_spill]] %s8165_s4 }
  0x44   :  { %s8180_s29 = sld [smem:[%s9243_s0 + %s7935_s28]]   ;;  %s7939_s28 = smov 41  }
  0x45   :  { %s8185_s4 = sld [smem:[%s9243_s0 + %s7936_s7]]   ;;  %s7940_s7 = smov 42  }
  0x46   :  { %9357 = sst [smem:[#allocation41_spill]] %s8170_s3 }
  0x47   :  { %s8190_s3 = sld [smem:[%s9243_s0 + %s7937_s15]]   ;;  %s7941_s15 = smov 43  }
  0x48   :  { %s8195_s21 = sld [smem:[%s9243_s0 + %s7938_s22]]   ;;  %s7942_s22 = smov 44  }
  0x49   :  { %s8200_s17 = sld [smem:[%s9243_s0 + %s7939_s28]]   ;;  %s7943_s28 = smov 45  }
  0x4b   :  { %9358 = sst [smem:[#allocation42_spill]] %s8185_s4 }
  0x4c   :  { %s8205_s4 = sld [smem:[%s9243_s0 + %s7940_s7]]   ;;  %s7944_s7 = smov 46  }
  0x4d   :  { %9359 = sst [smem:[#allocation43_spill]] %s8190_s3 }
  0x4e   :  { %9360 = sst [smem:[#allocation44_spill]] %s8195_s21 }
  0x4f   :  { %9361 = sst [smem:[#allocation45_spill]] %s8200_s17 }
  0x50   :  { %s8210_s3 = sld [smem:[%s9243_s0 + %s7941_s15]]   ;;  %s7945_s15 = smov 47  }
  0x51   :  { %s8215_s21 = sld [smem:[%s9243_s0 + %s7942_s22]]   ;;  %s7946_s22 = smov 48  }
  0x52   :  { %9362 = sst [smem:[#allocation46_spill]] %s8205_s4 }
  0x53   :  { %s8220_s17 = sld [smem:[%s9243_s0 + %s7943_s28]]   ;;  %s7947_s28 = smov 49  }
  0x54   :  { %s8225_s4 = sld [smem:[%s9243_s0 + %s7944_s7]]   ;;  %s7948_s7 = smov 50  }
  0x56   :  { %9363 = sst [smem:[#allocation47_spill]] %s8210_s3 }
  0x57   :  { %9364 = sst [smem:[#allocation48_spill]] %s8215_s21 }
  0x58   :  { %s8230_s3 = sld [smem:[%s9243_s0 + %s7945_s15]]   ;;  %s7949_s15 = smov 51  }
  0x59   :  { %9365 = sst [smem:[#allocation49_spill]] %s8220_s17 }
  0x5a   :  { %9366 = sst [smem:[#allocation50_spill]] %s8225_s4 }
  0x5b   :  { %s8235_s21 = sld [smem:[%s9243_s0 + %s7946_s22]]   ;;  %s7950_s22 = smov 52  }
  0x5c   :  { %s8240_s17 = sld [smem:[%s9243_s0 + %s7947_s28]]   ;;  %s7951_s28 = smov 53  }
  0x5d   :  { %s8245_s4 = sld [smem:[%s9243_s0 + %s7948_s7]]   ;;  %s7952_s7 = smov 54  }
  0x5e   :  { %9367 = sst [smem:[#allocation51_spill]] %s8230_s3 }
  0x5f   :  { %s8250_s3 = sld [smem:[%s9243_s0 + %s7949_s15]]   ;;  %s7953_s15 = smov 55  }
  0x61   :  { %9368 = sst [smem:[#allocation52_spill]] %s8235_s21 }
  0x62   :  { %9369 = sst [smem:[#allocation53_spill]] %s8240_s17 }
  0x63   :  { %9370 = sst [smem:[#allocation54_spill]] %s8245_s4 }
  0x64   :  { %s8255_s21 = sld [smem:[%s9243_s0 + %s7950_s22]]   ;;  %s7954_s22 = smov 56  }
  0x65   :  { %9371 = sst [smem:[#allocation55_spill]] %s8250_s3 }
  0x66   :  { %s8260_s17 = sld [smem:[%s9243_s0 + %s7951_s28]]   ;;  %s7955_s28 = smov 57  }
  0x67   :  { %s8265_s4 = sld [smem:[%s9243_s0 + %s7952_s7]]   ;;  %s7956_s7 = smov 58  }
  0x68   :  { %s8270_s3 = sld [smem:[%s9243_s0 + %s7953_s15]]  }
  0x6a   :  { %9372 = sst [smem:[#allocation56_spill]] %s8255_s21 }
  0x6b   :  { %s8275_s21 = sld [smem:[%s9243_s0 + %s7954_s22]]  }
  0x6c   :  { %9373 = sst [smem:[#allocation57_spill]] %s8260_s17 }
  0x6d   :  { %9374 = sst [smem:[#allocation58_spill]] %s8265_s4 }
  0x6e   :  { %9375 = sst [smem:[#allocation59_spill]] %s8270_s3 }
  0x6f   :  { %s8280_s17 = sld [smem:[%s9243_s0 + %s7955_s28]]  }
  0x70   :  { %s8285_s4 = sld [smem:[%s9243_s0 + %s7956_s7]]  }
  0x71   :  { %122 = vsyncpa [#allocation9], 0  ;;  %s8287_s15 = smov 0  }
  0x72 LB: > { %s9376_s13 = sld [smem:[#allocation39_spill]]  ;;  %s6883_s16 = sadd.s32 4294967295, %s7897_s15   ;;  %s7897_s15 = sphi %s8287_s15, %s128_s15  }
  0x73   : > { %p6885_p0 = scmp.ge.s32.totalorder %s7897_s15, 1  ;;  %p1382_p1 = scmp.lt.s32.totalorder %s7897_s15, 3 }
  0x74   : > { %p7569_p3 = scmp.eq.s32.totalorder %s6883_s16, 0  ;;  %s7957_s0 = smov [#allocation8]  }
  0x75   : > { %p8295_p2 = pnand %p6885_p0, %p1382_p1  ;;  %s1560_s22 = sshll.u32 %s7957_s0, 4  ;;  %s1561_s22 = int_to_ptr.vmem [resolvable:$true] %s1560_s22 }
  0x76   : > { %s7872_s23 = scalar_lea.vmem %s1561_s22, 16  ;;  %s7879_s26 = scalar_lea.vmem %s1561_s22, 32 }
  0x77   : > { %p7565_p4 = pneg %p8295_p2  ;;  %p7873_p7 = scmp.ne.s32.totalorder %s1561_s22, %s7872_s23 }
  0x78   : > { %p7880_p10 = scmp.lt.s32.totalorder %s1561_s22, %s1561_s22  ;;  %p7881_p11 = scmp.lt.s32.totalorder %s7879_s26, %s7872_s23 }
  0x79   : > { %p7566_p5 = pnand %p7569_p3, %p7565_p4 }
  0x7a   : > { %p7882_p12 = por %p7881_p11, %p7880_p10 }
  0x7b   : > { %p7863_p6 = pneg %p7566_p5 }
  0x7d   : > { %p7875_p8 = pnand %p7873_p7, %p7863_p6 }
  0x7f   : > { %p7876_p9 = pneg %p7875_p8 }
  0x81   : > { %p7883_p13 = pnand %p7882_p12, %p7876_p9 }
  0x83   : > { %7886 = shalt.err (!%p7883_p13)
}
  0x84   : > { %7568 = dma.hbm_to_vmem [thread:$0]  (!%p7566_p5), %s8275_s21, 16, %s1561_s22, [#allocation9]  }
  0x85   : > { %1584 = sbr.rel (%p8295_p2) target bundleno = 8224 (0x2020), region = 252 }
  0x8a   : > { %7892 = dma.done.wait (%p7569_p3), [#allocation9], 16  }
  0x8b   : > { %7894 = vsyncadd (%p7569_p3), [#allocation9], 4294967280  ;;  %s9378_s5 = sld [smem:[#allocation11_spill]]  ;;  %p1718_p0 = scmp.lt.s32.totalorder %s6883_s16, 1  ;;  %v7958_v0 = vmov 0   ;;  %v1731_v1 = vlaneseq  ;;  %vm9261_vm0 = vcmask 1043456  }
  0x8c   : > { %7667 = vset.pattern.permute.xlu0 %v7958_v0  ;;  %v1745_v4 = vld [vmem:[%s9376_s13 + $0x10] sm:$0xf]  ;;  %v1744_v5 = vld [vmem:[%s9376_s13 + $0x8] sm:$0xff]  ;;  %v1743_v7 = vld [vmem:[%s9376_s13] sm:$0xff]  ;;  %v7959_v8 = vmov 0.0   ;;  %vm1746_vm1 = vcmask 162816  }
  0x8d   : > { %s9522_s16 = smov (!%p1718_p0, %s6883_s16), 1  ;;  %7386 = vmatprep.subr.msk.mxu0 %vm9261_vm0, %v1745_v4  ;;  %v8318_v6 = vand.u32 127, %v1731_v1  ;;  %v7668_v13 = vld [vmem:[%s8180_s29 + $0x78] sm:$0xff]   ;;  %v7670_v15 = vld [vmem:[%s8180_s29 + $0x70] sm:$0xff]   ;;  %v7672_v17 = vld [vmem:[%s8180_s29 + $0x68] sm:$0xff]   ;;  %vm1845_vm4 = vcmask 811008  }
  0x8e   : > { %s9254_s28 = sshll.u32 %s9522_s16, 4  ;;  %7387 = vmatpush3.msk.msra.mxu0 %vm9261_vm0, %v1745_v4  ;;  %v7669_v14 = vld [vmem:[%s8180_s29 + $0x38] sm:$0xff]   ;;  %7163 = vmatprep.subr.bf16.mxu1 %v7668_v13  ;;  %v7671_v16 = vld [vmem:[%s8180_s29 + $0x30] sm:$0xff]   ;;  %v7673_v18 = vld [vmem:[%s8180_s29 + $0x28] sm:$0xff]   ;;  %1846 = vst.msk [vmem:[#allocation2] sm:$0x1] %vm1845_vm4, %v7959_v8 }
  0x8f   : > { %7388 = vmatprep.subr.mxu0 %v1744_v5  ;;  %7164 = vmatpush3.bf16.msra.mxu1 %v7669_v14  ;;  %v7674_v19 = vld [vmem:[%s8180_s29 + $0x60] sm:$0xff]   ;;  %v7676_v21 = vld [vmem:[%s8180_s29 + $0x58] sm:$0xff]   ;;  %v7679_v23 = vld [vmem:[%s8180_s29 + $0x90] sm:$0x3f]   ;;  %vm9260_vm5 = vcmask 1045504   ;;  %vm1879_vm6 = vcmask 352256  }
  0x90   : > { %7389 = vmatpush3.msra.mxu0 %v1744_v5  ;;  %7165 = vmatprep.subr.bf16.mxu1 %v7670_v15  ;;  %v7675_v20 = vld [vmem:[%s8180_s29 + $0x20] sm:$0xff]   ;;  %v7677_v22 = vld [vmem:[%s8180_s29 + $0x18] sm:$0xff]   ;;  %v7678_v24 = vld [vmem:[%s8180_s29 + $0x50] sm:$0xff]   ;;  %v2052_v25 = vsel %vm9260_vm5, %v7679_v23, 0  ;;  %1880 = vst.msk [vmem:[#allocation2 + $0x37] sm:$0x1] %vm1879_vm6, %v7959_v8 }
  0x91   : > { %s1722_s1 = scalar_lea.vmem %s9378_s5, %s9254_s28  ;;  %7390 = vmatprep.subr.mxu0 %v1743_v7  ;;  %v7680_v26 = vld [vmem:[%s8180_s29 + $0x10] sm:$0xff]   ;;  %v7681_v27 = vld [vmem:[%s8180_s29 + $0x48] sm:$0xff]   ;;  %s9266_s2 = smov 100   ;;  %v7684_v31 = vld [vmem:[%s8180_s29 + $0x40] sm:$0xff]   ;;  %vm9257_vm7 = vcmask 1040384   ;;  %vm1841_vm8 = vcmask 818177  }
  0x92   : > { %v1729_v2 = vld [vmem:[%s1722_s1] sm:$0xff]  ;;  %v1730_v3 = vld [vmem:[%s1722_s1 + $0x8] sm:$0xff]  ;;  %7391 = vmatpush3.msra.mxu0 %v1743_v7  ;;  %vm9274_vm9 = vcmask 1046528   ;;  %vm1843_vm10 = vcmask 818176   ;;  %vm7961_vm11 = vmmov 0   ;;  %s9279_s7 = smov 72  }
  0x93   : > { %1734 = vperm.xlu0 %7667, %v1729_v2   ;;  %7395 = vmatprep.subr.bf16.mxu0 %v7959_v8  ;;  %v7682_v28 = vld [vmem:[%s8180_s29 + $0x88] sm:$0xff]   ;;  %v7685_v32 = vld [vmem:[%s8180_s29 + $0x80] sm:$0xff]   ;;  %vm1853_vm12 = vcmask 1048352   ;;  %vm1855_vm13 = vcmask 588800   ;;  %vm1877_vm14 = vcmask 1040960   ;;  %vm1869_vm15 = vcmask 1048128  }
  0x94   : > { %7166 = vmatpush3.bf16.msra.mxu1 %v7671_v16  ;;  %v7683_v29 = vld [vmem:[%s8180_s29 + $0x8] sm:$0xff]   ;;  %v7686_v34 = vld [vmem:[%s8180_s29] sm:$0xff]   ;;  %vm2173_vm4 = vcmask 61440   ;;  %vm3802_vm6 = vcmask 60416   ;;  %s9268_s10 = smov 40   ;;  %s9262_s11 = smov 8  }
  0x95   : > { %7167 = vmatprep.subr.bf16.mxu1 %v7672_v17  ;;  %v6897_v57 = vld [vmem:[%s8175_s25] ss:$0 sm:$0xff]  ;;  %s9302_s18 = smov 48   ;;  %s9287_s0 = smov 16  }
  0x96   : > { %s9264_s22 = smov 56   ;;  %s9277_s23 = smov 24  }
  0x97   : > { %1737 = vperm.xlu0 %7667, %v1730_v3   ;;  %s9285_s26 = smov 64   ;;  %s9294_s1 = smov 32  }
  0x98   : > { %7168 = vmatpush3.bf16.msra.mxu1 %v7673_v18  ;;  %s7971_s28 = smov 80   ;;  %s9379_s14 = sld [smem:[#allocation20_spill]] }
  0x99   : > { %7169 = vmatprep.subr.bf16.mxu1 %v7674_v19  ;;  %s9380_s12 = sld [smem:[#allocation22_spill]]  ;;  %s9323_s13 = smov 88  }
  0x9a   : > { %s9387_s9 = sld [smem:[#allocation34_spill]] }
  0x9b   : > { %s9388_s6 = sld [smem:[#allocation21_spill]] }
  0x9c   : > { %7170 = vmatpush3.bf16.msra.mxu1 %v7675_v20  ;;  %s9389_s8 = sld [smem:[#allocation32_spill]] }
  0x9d   : > { %7171 = vmatprep.subr.bf16.mxu1 %v7676_v21  ;;  %s9421_s5 = sld [smem:[#allocation19_spill]] }
  0x9e   : > { %s9431_s3 = sld [smem:[#allocation59_spill]] }
  0xa0   : > { %7172 = vmatpush3.bf16.msra.mxu1 %v7677_v22 }
  0xa1   : > { %7173 = vmatprep.subr.bf16.mxu1 %v7678_v24 }
  0xa4   : > { %7174 = vmatpush3.bf16.msra.mxu1 %v7680_v26 }
  0xa5   : > { %7175 = vmatprep.subr.bf16.mxu1 %v7681_v27  ;;  %v7687_v27 = vld [vmem:[%s8055_s30 + $0x28] ss:$0 sps:$4 sm:$0xff]  }
  0xa8   : > { %7176 = vmatpush3.bf16.msra.mxu1 %v7683_v29 }
  0xa9   : > { %7177 = vmatprep.subr.bf16.mxu1 %v7684_v31  ;;  %v7688_v31 = vld [vmem:[%s8055_s30 + $0x20] sm:$0xff]  }
  0xac   : > { %7178 = vmatpush3.bf16.msra.mxu1 %v7686_v34 }
  0xad   : > { %2687 = vmatprep.subr.bf16.mxu1 %v7958_v0 }
 0x10e   : > { %v1735_v9 = vpop.permute.xlu0 %1734 }
 0x10f   : > { %vm1739_vm2 = vcmp.eq.s32.totalorder %v1735_v9, %v8318_v6  ;;  %v6918_v9 = vld [vmem:[%s8045_s19] ss:$0 sm:$0xff] }
 0x110   : > { %v1741_v10 = vsel %vm1739_vm2, 1.0, %v7959_v8  ;;  %vm1873_vm2 = vcmask 1047104  }
 0x111   : > { %7392 = vmatprep.mubr.msk.f32.mxu0 %vm1746_vm1, %v1741_v10 }
 0x112   : > { %v1738_v11 = vpop.permute.xlu0 %1737 }
 0x113   : > { %vm1740_vm3 = vcmp.eq.s32.totalorder %v1738_v11, %v8318_v6  ;;  %v6919_v11 = vld [vmem:[%s8050_s24] ss:$0 sm:$0xff] }
 0x114   : > { %v1742_v12 = vsel %vm1740_vm3, 1.0, %v7959_v8  ;;  %vm1875_vm3 = vcmask 358400  }
 0x115   : > { %7393 = vmatmul.mubr.msk.f32.vlgmr.msra.gmra.mxu0 %vm1746_vm1, %v1742_v12  ;;  %vm1871_vm1 = vcmask 359424  }
 0x116   : > { %7396 = vmatpush3.bf16.msra.mxu0 %v2052_v25  ;;  %7401 = vmatprep.mubr.msk.bf16.mxu0 %vm7961_vm11, %v7959_v8 }
 0x117   : > { %7397 = vmatprep.subr.bf16.mxu0 %v7959_v8 }
 0x11a   : > { %7398 = vmatpush3.bf16.msra.mxu0 %v7682_v28  ;;  %v2370_v28 = vsel %vm9261_vm0, %v7687_v27, 0 }
 0x11b   : > { %7399 = vmatprep.subr.bf16.mxu0 %v7959_v8 }
 0x11e   : > { %7400 = vmatpush3.bf16.msra.mxu0 %v7685_v32 }
 0x11f   : > { %7405 = vmatprep.subr.bf16.mxu0 %v7959_v8 }
 0x1d5   : > { %v7394_v30 = vpop.f32.mrf.mxu0 }
 0x1d6   : > { %1849 = vrot.lane.b32.xlu1 %v7394_v30, %s9266_s2  ;;  %v1837_v35 = vrot.slane %v7394_v30, 7  ;;  %v1861_v36 = vrot.slane %v7394_v30, 1 }
 0x1d7   : > { %v1823_v33 = vpop.f32.mrf.mxu0 }
 0x1d8   : > { %v1836_v37 = vrot.slane %v1823_v33, 7  ;;  %v1860_v38 = vrot.slane %v1823_v33, 1 }
 0x1da   : > { %v1838_v39 = vsel %vm9257_vm7, %v1836_v37, %v1837_v35  ;;  %1842 = vst.msk [vmem:[#allocation2] sm:$0xfe] %vm1841_vm8, %v1836_v37  ;;  %1847 = vrot.lane.b32.xlu1 %v1823_v33, %s9266_s2  ;;  %v1862_v40 = vsel %vm9274_vm9, %v1860_v38, %v1861_v36  ;;  %vm9255_vm8 = vcmask 261125   ;;  %v7689_v37 = vld [vmem:[%s8055_s30 + $0x18] sm:$0xff]   ;;  %s9272_s2 = smov 36  }
 0x1db   : > { %1863 = vrot.lane.b32.xlu0 %v1862_v40, %s9279_s7  ;;  %1844 = vst.msk [vmem:[#allocation2 + $0x20] sm:$0xff] %vm1843_vm10, %v1838_v39  ;;  %vm5971_vm10 = vcmask 64515  }
 0x1de   : > { %1865 = vrot.lane.b32.xlu1 %v1861_v36, %s9279_s7 }
 0x248   : > { %v1850_v41 = vpop.permute.xlu1 %1849 }
 0x249   : > { %1857 = vst.msk [vmem:[#allocation2 + $0x20] sm:$0xff] %vm1853_vm12, %v1850_v41 }
 0x24a   : > { %1858 = vst.msk [vmem:[#allocation2 + $0x28] sm:$0xff] %vm1855_vm13, %v1850_v41  ;;  %v7690_v41 = vld [vmem:[%s8055_s30 + $0x10] sm:$0xff]  }
 0x24b   : > { %1878 = vst.msk [vmem:[#allocation2 + $0x2f] sm:$0x1] %vm1877_vm14, %v7959_v8  ;;  %vm2188_vm14 = vcmask 126016  }
 0x24c   : > { %v1848_v42 = vpop.permute.xlu1 %1847 }
 0x24d   : > { %1854 = vst.msk [vmem:[#allocation2] sm:$0xff] %vm1853_vm12, %v1848_v42  ;;  %v1864_v43 = vpop.permute.xlu0 %1863  ;;  %vm2599_vm12 = vcmask 31747  }
 0x24e   : > { %1856 = vst.msk [vmem:[#allocation2 + $0x8] sm:$0xff] %vm1855_vm13, %v1848_v42  ;;  %vm9256_vm13 = vcmask 64512  }
 0x24f   : > { %1870 = vst.msk [vmem:[#allocation2 + $0x8] sm:$0xff] %vm1869_vm15, %v1864_v43  ;;  %vm2204_vm15 = vcmask 190592  }
 0x250   : > { %1872 = vst.msk [vmem:[#allocation2 + $0x10] sm:$0xff] %vm1871_vm1, %v1864_v43  ;;  %v1866_v44 = vpop.permute.xlu1 %1865  ;;  %v1884_v52 = vld [vmem:[#allocation2 + $0x20] sm:$0xff] }
 0x251   : > { %1874 = vst.msk [vmem:[#allocation2 + $0x28] sm:$0x7f] %vm1873_vm2, %v1866_v44  ;;  %vm2220_vm2 = vcmask 255168  }
 0x252   : > { %1876 = vst.msk [vmem:[#allocation2 + $0x30] sm:$0x7f] %vm1875_vm3, %v1866_v44  ;;  %vm9275_vm3 = vcmask 1044480   ;;  %v7691_v44 = vld [vmem:[%s8055_s30 + $0x8] sm:$0xff]  }
 0x254   : > { %v1881_v45 = vld [vmem:[#allocation2] sm:$0xff] }
 0x255   : > { %2174 = vst.msk [vmem:[#allocation2] sm:$0x1f] %vm2173_vm4, %v7959_v8  ;;  %v1887_v53 = vpack.c.bf16 %v1884_v52, %v1881_v45  ;;  %vm2235_vm4 = vcmask 319744  }
 0x256   : > { %v1882_v48 = vld [vmem:[#allocation2 + $0x8] sm:$0xff]  ;;  %2189 = vst.msk [vmem:[#allocation2] sm:$0xf] %vm2188_vm14, %v7959_v8  ;;  %vm2200_vm14 = vcmask 195715  }
 0x257   : > { %v1883_v46 = vld [vmem:[#allocation2 + $0x10] sm:$0xff]  ;;  %2205 = vst.msk [vmem:[#allocation2] sm:$0x7] %vm2204_vm15, %v7959_v8  ;;  %vm2216_vm15 = vcmask 261314  }
 0x258   : > { %3803 = vst.msk [vmem:[#allocation2 + $0x10] sm:$0xf] %vm3802_vm6, %v7959_v8  ;;  %v1885_v49 = vld [vmem:[#allocation2 + $0x28] sm:$0xff]  ;;  %vm9259_vm6 = vcmask 1042432  }
 0x259   : > { %4771 = vst.msk [vmem:[#allocation2 + $0x10] sm:$0xe0] %vm9255_vm8, %v7959_v8  ;;  %v1886_v47 = vld [vmem:[#allocation2 + $0x30] sm:$0xff]  ;;  %v1888_v50 = vpack.c.bf16 %v1885_v49, %v1882_v48  ;;  %vm2186_vm8 = vcmask 130112  }
 0x25a   : > { %5972 = vst.msk [vmem:[#allocation2 + $0x30] sm:$0xf8] %vm5971_vm10, %v7959_v8  ;;  %v1889_v51 = vpack.c.bf16 %v1886_v47, %v1883_v46  ;;  %vm9258_vm10 = vcmask 1041408   ;;  %v7692_v46 = vld [vmem:[%s8055_s30] sm:$0xff]  }
 0x25b   : > { %2600 = vst.msk [vmem:[#allocation2 + $0x28] sm:$0xf8] %vm2599_vm12, %v7959_v8  ;;  %2086 = vmatprep.mubr.bf16.mxu1 %v1888_v50  ;;  %vm2184_vm12 = vcmask 130116  }
 0x25c   : > { %7402 = vmatmul.mubr.msk.bf16.vlgmr.msra.gmra.mxu0 %vm1871_vm1, %v1889_v51  ;;  %2087 = vmatmul.mubr.bf16.vlgmr.msra.gmra.mxu1 %v1887_v53  ;;  %vm2170_vm1 = vcmask 64517   ;;  %2221 = vst.msk [vmem:[#allocation2] sm:$0x3] %vm2220_vm2, %v7959_v8  ;;  %vm2243_vm2 = vcmask 392512  }
 0x25d   : > { %7417 = vmatprep.mubr.msk.bf16.mxu0 %vm7961_vm11, %v7959_v8  ;;  %2236 = vst.msk [vmem:[#allocation2] sm:$0x1] %vm2235_vm4, %v7959_v8  ;;  %7406 = vmatpush3.bf16.msra.mxu0 %v2370_v28  ;;  %vm2255_vm4 = vcmask 458112  }
 0x25e   : > { %7407 = vmatprep.subr.bf16.mxu0 %v7959_v8 }
 0x261   : > { %7408 = vmatpush3.bf16.msra.mxu0 %v7688_v31  ;;  %v7693_v31 = vld [vmem:[%s8075_s27 + $0x38] sm:$0xff]  }
 0x262   : > { %7409 = vmatprep.subr.bf16.mxu0 %v7959_v8  ;;  %2688 = vmatpush1.bf16.msra.mxu1 %v7693_v31 }
 0x263   : > { %2689 = vmatprep.subr.bf16.mxu1 %v7958_v0 }
 0x265   : > { %7410 = vmatpush3.bf16.msra.mxu0 %v7689_v37 }
 0x266   : > { %7411 = vmatprep.subr.bf16.mxu0 %v7959_v8 }
 0x269   : > { %7412 = vmatpush3.bf16.msra.mxu0 %v7690_v41  ;;  %v7696_v41 = vld [vmem:[%s8075_s27 + $0x20] sm:$0xff]  }
 0x26a   : > { %7413 = vmatprep.subr.bf16.mxu0 %v7959_v8 }
 0x26d   : > { %7414 = vmatpush3.bf16.msra.mxu0 %v7691_v44  ;;  %v7697_v44 = vld [vmem:[%s8075_s27 + $0x18] sm:$0xff]  }
 0x26e   : > { %7415 = vmatprep.subr.bf16.mxu0 %v7959_v8 }
 0x271   : > { %7416 = vmatpush3.bf16.msra.mxu0 %v7692_v46 }
 0x272   : > { %7421 = vmatprep.subr.bf16.mxu0 %v7959_v8 }
 0x31c   : > { %v2129_v54 = vpop.f32.mrf.mxu0  ;;  %v7179_v55 = vpop.f32.mrf.mxu1 }
 0x31e   : > { %v7403_v56 = vpop.f32.mrf.mxu0  ;;  %v7180_v58 = vpop.f32.mrf.mxu1 }
 0x31f   : > { %v7181_v59 = vadd.f32 %v7180_v58, %v7179_v55 }
 0x320   : > { %v2132_v60 = vpop.f32.mrf.mxu0  ;;  %v7182_v61 = vpop.f32.mrf.mxu1 }
 0x321   : > { %v2089_v62 = vadd.f32 %v7181_v59, %v6897_v57 }
 0x322   : > { %v7404_v63 = vpop.f32.mrf.mxu0  ;;  %v7183_v2 = vpop.f32.mrf.mxu1 }
 0x323   : > { %v2130_v3 = vadd.f32 %v2129_v54, %v2089_v62  ;;  %v7184_v4 = vadd.f32 %v7183_v2, %v7182_v61 }
 0x325   : > { %2137 = vst.msk [vmem:[#allocation3] sm:$0xff] %vm9256_vm13, %v2130_v3  ;;  %v2092_v5 = vadd.f32 %v7184_v4, %v6897_v57 }
 0x327   : > { %v2133_v7 = vadd.f32 %v2132_v60, %v2092_v5 }
 0x329   : > { %2138 = vst.msk [vmem:[#allocation3 + $0x8] sm:$0xff] %vm9256_vm13, %v2133_v7 }
 0x32c   : > { %v2139_v10 = vld [vmem:[#allocation3] sm:$0xff] }
 0x32d   : > { %v2149_v12 = vmul.f32 %v6918_v9, %v2139_v10  ;;  %v6920_v10 = vld [vmem:[%s9379_s14] ss:$0 sm:$0xff]  ;;  %s9454_s14 = smov 104  }
 0x32f   : > { %v2157_v13 = vadd.f32 %v6919_v11, %v2149_v12 }
 0x330   : > { %v2140_v14 = vld [vmem:[#allocation3 + $0x8] sm:$0xff] }
 0x331   : > { %v8379_v15 = vmax.f32 %v2157_v13, 0.0  ;;  %v2150_v16 = vmul.f32 %v6918_v9, %v2140_v14 }
 0x333   : > { %2237 = vrot.lane.b32.xlu0 %v8379_v15, %s9268_s10  ;;  %v2158_v17 = vadd.f32 %v6919_v11, %v2150_v16  ;;  %v2165_v18 = vrot.slane %v8379_v15, 3  ;;  %v2175_v20 = vrot.slane %v8379_v15, 4  ;;  %v2191_v23 = vrot.slane %v8379_v15, 5 }
 0x334   : > { %v2207_v26 = vrot.slane %v8379_v15, 6  ;;  %v2222_v29 = vrot.slane %v8379_v15, 7  ;;  %v2246_v32 = vrot.slane %v8379_v15, 1  ;;  %v2261_v36 = vrot.slane %v8379_v15, 2 }
 0x335   : > { %v8385_v19 = vmax.f32 %v2158_v17, 0.0  ;;  %2171 = vst.msk [vmem:[#allocation2] sm:$0xe0] %vm2170_vm1, %v2165_v18  ;;  %vm2231_vm1 = vcmask 326913  }
 0x337   : > { %2239 = vrot.lane.b32.xlu1 %v8385_v19, %s9268_s10  ;;  %2178 = vrot.lane.b32.xlu0 %v2175_v20, %s9262_s11  ;;  %v2166_v21 = vrot.slane %v8385_v19, 3  ;;  %v2247_v22 = vrot.slane %v8385_v19, 1  ;;  %v2262_v25 = vrot.slane %v8385_v19, 2  ;;  %v2176_v30 = vrot.slane %v8385_v19, 4  ;;  %s9283_s10 = smov 96  }
 0x338   : > { %v2192_v35 = vrot.slane %v8385_v19, 5  ;;  %v2208_v40 = vrot.slane %v8385_v19, 6  ;;  %v2223_v43 = vrot.slane %v8385_v19, 7  ;;  %v6928_v19 = vld [vmem:[%s9380_s12] ss:$0 sm:$0xff]  ;;  %s9442_s12 = sld [smem:[#allocation44_spill]] }
 0x339   : > { %v2167_v24 = vsel %vm9275_vm3, %v2165_v18, %v2166_v21  ;;  %v2248_v33 = vsel %vm9274_vm9, %v2246_v32, %v2247_v22  ;;  %v2177_v34 = vsel %vm9261_vm0, %v2175_v20, %v2176_v30  ;;  %v2263_v38 = vsel %vm9260_vm5, %v2261_v36, %v2262_v25  ;;  %v7694_v36 = vld [vmem:[%s8075_s27 + $0x30] sm:$0xff]  }
 0x33a   : > { %2172 = vst.msk [vmem:[#allocation2 + $0x20] sm:$0xff] %vm9256_vm13, %v2167_v24  ;;  %v2193_v39 = vsel %vm9259_vm6, %v2191_v23, %v2192_v35  ;;  %v2209_v42 = vsel %vm9258_vm10, %v2207_v26, %v2208_v40  ;;  %v2224_v45 = vsel %vm9257_vm7, %v2222_v29, %v2223_v43  ;;  %vm2202_vm13 = vcmask 195712   ;;  %2690 = vmatpush1.bf16.msra.mxu1 %v7694_v36  ;;  %v6941_v36 = vld [vmem:[%s9389_s8] ss:$0 sm:$0xff]  ;;  %s9305_s8 = smov 68  }
 0x33b   : > { %2251 = vrot.lane.b32.xlu1 %v2247_v22, %s9302_s18  ;;  %2194 = vrot.lane.b32.xlu0 %v2191_v23, %s9287_s0  ;;  %vm2294_vm7 = vcmask 654912   ;;  %vm2257_vm10 = vcmask 457088   ;;  %vm2259_vm6 = vcmask 450944   ;;  %vm2306_vm5 = vcmask 720512  }
 0x33c   : > { %vm2310_vm0 = vcmask 720515   ;;  %2691 = vmatprep.subr.bf16.mxu1 %v7958_v0 }
 0x33f   : > { %2266 = vrot.lane.b32.xlu1 %v2262_v25, %s9264_s22  ;;  %2210 = vrot.lane.b32.xlu0 %v2207_v26, %s9277_s23 }
 0x343   : > { %2278 = vrot.lane.b32.xlu1 %v2166_v21, %s9285_s26  ;;  %2225 = vrot.lane.b32.xlu0 %v2222_v29, %s9294_s1  ;;  %v6929_v21 = vld [vmem:[%s8070_s20] ss:$0 sm:$0xff] }
 0x347   : > { %2249 = vrot.lane.b32.xlu0 %v2248_v33, %s9302_s18  ;;  %2180 = vrot.lane.b32.xlu1 %v2177_v34, %s9262_s11 }
 0x34b   : > { %2264 = vrot.lane.b32.xlu0 %v2263_v38, %s9264_s22  ;;  %2196 = vrot.lane.b32.xlu1 %v2193_v39, %s9287_s0  ;;  %s9289_s22 = smov 12  }
 0x34f   : > { %2212 = vrot.lane.b32.xlu1 %v2209_v42, %s9277_s23  ;;  %2276 = vrot.lane.b32.xlu0 %v2167_v24, %s9285_s26 }
 0x353   : > { %2227 = vrot.lane.b32.xlu1 %v2224_v45, %s9294_s1  ;;  %2288 = vrot.lane.b32.xlu0 %v2177_v34, %s9279_s7 }
 0x357   : > { %2290 = vrot.lane.b32.xlu1 %v2176_v30, %s9279_s7  ;;  %2300 = vrot.lane.b32.xlu0 %v2193_v39, %s7971_s28  ;;  %v7695_v39 = vld [vmem:[%s8075_s27 + $0x28] sm:$0xff]  }
 0x358   : > { %2692 = vmatpush1.bf16.msra.mxu1 %v7695_v39 }
 0x359   : > { %2693 = vmatprep.subr.bf16.mxu1 %v7958_v0 }
 0x35b   : > { %2302 = vrot.lane.b32.xlu1 %v2192_v35, %s7971_s28 }
 0x35c   : > { %2694 = vmatpush1.bf16.msra.mxu1 %v7696_v41 }
 0x35d   : > { %2695 = vmatprep.subr.bf16.mxu1 %v7958_v0 }
 0x360   : > { %2696 = vmatpush1.bf16.msra.mxu1 %v7697_v44 }
 0x361   : > { %2697 = vmatprep.subr.bf16.mxu1 %v7958_v0 }
 0x3a5   : > { %v2238_v47 = vpop.permute.xlu0 %2237 }
 0x3a9   : > { %v2240_v48 = vpop.permute.xlu1 %2239  ;;  %v2179_v49 = vpop.permute.xlu0 %2178 }
 0x3aa   : > { %2185 = vst.msk [vmem:[#allocation2] sm:$0xf0] %vm2184_vm12, %v2179_v49  ;;  %vm2270_vm12 = vcmask 523712   ;;  %v7698_v49 = vld [vmem:[%s8075_s27 + $0x10] sm:$0xff]  }
 0x3ab   : > { %2698 = vmatpush1.bf16.msra.mxu1 %v7698_v49 }
 0x3ac   : > { %2699 = vmatprep.subr.bf16.mxu1 %v7958_v0 }
 0x3ad   : > { %v2252_v50 = vpop.permute.xlu1 %2251  ;;  %v2195_v51 = vpop.permute.xlu0 %2194 }
 0x3ae   : > { %2201 = vst.msk [vmem:[#allocation2] sm:$0xf8] %vm2200_vm14, %v2195_v51  ;;  %vm2218_vm14 = vcmask 261312  }
 0x3b1   : > { %v2267_v52 = vpop.permute.xlu1 %2266  ;;  %v2211_v53 = vpop.permute.xlu0 %2210 }
 0x3b2   : > { %2217 = vst.msk [vmem:[#allocation2] sm:$0xfc] %vm2216_vm15, %v2211_v53  ;;  %vm2282_vm15 = vcmask 589312   ;;  %v7699_v53 = vld [vmem:[%s8075_s27 + $0x8] sm:$0xff]  }
 0x3b3   : > { %2700 = vmatpush1.bf16.msra.mxu1 %v7699_v53 }
 0x3b4   : > { %2701 = vmatprep.subr.bf16.mxu1 %v7958_v0 }
 0x3b5   : > { %v2279_v54 = vpop.permute.xlu1 %2278  ;;  %v2226_v55 = vpop.permute.xlu0 %2225 }
 0x3b6   : > { %2232 = vst.msk [vmem:[#allocation2] sm:$0xfe] %vm2231_vm1, %v2226_v55  ;;  %vm2233_vm1 = vcmask 326912  }
 0x3b7   : > { %2244 = vst.msk [vmem:[#allocation2] sm:$0xff] %vm2243_vm2, %v2238_v47 }
 0x3b9   : > { %v2250_v56 = vpop.permute.xlu0 %2249  ;;  %v2181_v57 = vpop.permute.xlu1 %2180 }
 0x3ba   : > { %2256 = vst.msk [vmem:[#allocation2] sm:$0xff] %vm2255_vm4, %v2250_v56  ;;  %vm2274_vm4 = vcmask 523718   ;;  %v7700_v56 = vld [vmem:[%s8075_s27] sm:$0xff]  }
 0x3bb   : > { %2187 = vst.msk [vmem:[#allocation2 + $0x20] sm:$0xff] %vm2186_vm8, %v2181_v57  ;;  %vm2272_vm8 = vcmask 521664   ;;  %2702 = vmatpush1.bf16.msra.mxu1 %v7700_v56 }
 0x3bc   : > { %2717 = vmatprep.subr.bf16.mxu1 %v7958_v0 }
 0x3bd   : > { %v2265_v58 = vpop.permute.xlu0 %2264  ;;  %v2197_v59 = vpop.permute.xlu1 %2196 }
 0x3be   : > { %2271 = vst.msk [vmem:[#allocation2] sm:$0xff] %vm2270_vm12, %v2265_v58  ;;  %vm2284_vm12 = vcmask 586240   ;;  %v7701_v58 = vld [vmem:[%s8075_s27 + $0x40] ss:$0 sps:$4 sm:$0x33]  }
 0x3bf   : > { %2203 = vst.msk [vmem:[#allocation2 + $0x20] sm:$0xff] %vm2202_vm13, %v2197_v59  ;;  %vm2286_vm13 = vcmask 589317  }
 0x3c1   : > { %v2213_v60 = vpop.permute.xlu1 %2212  ;;  %v2277_v61 = vpop.permute.xlu0 %2276 }
 0x3c2   : > { %2219 = vst.msk [vmem:[#allocation2 + $0x20] sm:$0xff] %vm2218_vm14, %v2213_v60  ;;  %vm2296_vm14 = vcmask 650816  }
 0x3c3   : > { %2283 = vst.msk [vmem:[#allocation2] sm:$0xff] %vm2282_vm15, %v2277_v61  ;;  %vm2298_vm15 = vcmask 654916  }
 0x3c5   : > { %v2228_v62 = vpop.permute.xlu1 %2227  ;;  %v2289_v63 = vpop.permute.xlu0 %2288 }
 0x3c6   : > { %2234 = vst.msk [vmem:[#allocation2 + $0x20] sm:$0xff] %vm2233_vm1, %v2228_v62  ;;  %vm2503_vm1 = vcmask 386336  }
 0x3c7   : > { %2295 = vst.msk [vmem:[#allocation2] sm:$0xff] %vm2294_vm7, %v2289_v63  ;;  %vm2308_vm7 = vcmask 715392  }
 0x3c8   : > { %2245 = vst.msk [vmem:[#allocation2 + $0x20] sm:$0xff] %vm2243_vm2, %v2240_v48  ;;  %vm2365_vm2 = vcmask 719872  }
 0x3c9   : > { %2258 = vst.msk [vmem:[#allocation2 + $0x20] sm:$0x7f] %vm2257_vm10, %v2252_v50  ;;  %v2291_v2 = vpop.permute.xlu1 %2290  ;;  %v2301_v3 = vpop.permute.xlu0 %2300  ;;  %vm2473_vm10 = vcmask 191584  }
 0x3ca   : > { %2260 = vst.msk [vmem:[#allocation2 + $0x27] sm:$0x1] %vm2259_vm6, %v7959_v8  ;;  %vm2458_vm6 = vcmask 94208  }
 0x3cb   : > { %2275 = vst.msk [vmem:[#allocation2 + $0x20] sm:$0xc0] %vm2274_vm4, %v7959_v8  ;;  %vm2454_vm4 = vcmask 97285  }
 0x3cc   : > { %2273 = vst.msk [vmem:[#allocation2 + $0x20] sm:$0x3f] %vm2272_vm8, %v2267_v52  ;;  %vm2518_vm8 = vcmask 483712  }
 0x3cd   : > { %2285 = vst.msk [vmem:[#allocation2 + $0x20] sm:$0x1f] %vm2284_vm12, %v2279_v54  ;;  %v2303_v4 = vpop.permute.xlu1 %2302  ;;  %vm2456_vm12 = vcmask 97280  }
 0x3ce   : > { %2287 = vst.msk [vmem:[#allocation2 + $0x20] sm:$0xe0] %vm2286_vm13, %v7959_v8  ;;  %vm9381_vm13 = vcmask 1043456  }
 0x3cf   : > { %2307 = vst.msk [vmem:[#allocation2] sm:$0xff] %vm2306_vm5, %v2301_v3  ;;  %vm2488_vm5 = vcmask 288960  }
 0x3d0   : > { %2297 = vst.msk [vmem:[#allocation2 + $0x20] sm:$0xf] %vm2296_vm14, %v2291_v2  ;;  %vm9382_vm14 = vcmask 1045504  }
 0x3d1   : > { %2299 = vst.msk [vmem:[#allocation2 + $0x20] sm:$0xf0] %vm2298_vm15, %v7959_v8  ;;  %vm9383_vm15 = vcmask 1042432  }
 0x3d2   : > { %2311 = vst.msk [vmem:[#allocation2 + $0x20] sm:$0xf8] %vm2310_vm0, %v7959_v8  ;;  %vm2421_vm0 = vcmask 97344  }
 0x3d3   : > { %2309 = vst.msk [vmem:[#allocation2 + $0x20] sm:$0x7] %vm2308_vm7, %v2303_v4  ;;  %vm9384_vm7 = vcmask 1041408  }
 0x3d6   : > { %v2312_v5 = vld [vmem:[#allocation2] sm:$0xff] }
 0x3d7   : > { %2459 = vst.msk [vmem:[#allocation2] sm:$0x1f] %vm2458_vm6, %v7959_v8  ;;  %vm9385_vm6 = vcmask 1040384  }
 0x3d8   : > { %2474 = vst.msk [vmem:[#allocation2] sm:$0xf] %vm2473_vm10, %v7959_v8  ;;  %vm9386_vm10 = vmmov %vm9384_vm7 }
 0x3d9   : > { %2489 = vst.msk [vmem:[#allocation2] sm:$0x7] %vm2488_vm5, %v7959_v8  ;;  %v2685_v59 = vsel %vm9386_vm10, %v7701_v58, 0  ;;  %vm2499_vm5 = vcmask 392482   ;;  %vm2516_vm10 = vcmask 490880  }
 0x3da   : > { %v2313_v7 = vld [vmem:[#allocation2 + $0x20] sm:$0xff]  ;;  %2504 = vst.msk [vmem:[#allocation2] sm:$0x3] %vm2503_vm1, %v7959_v8  ;;  %2718 = vmatpush2.bf16.msra.mxu1 %v2685_v59  ;;  %vm2514_vm1 = vcmask 490881  }
 0x3db   : > { %v2314_v9 = vpack.c.bf16 %v2313_v7, %v2312_v5  ;;  %2519 = vst.msk [vmem:[#allocation2] sm:$0x1] %vm2518_vm8, %v7959_v8  ;;  %3443 = vmatprep.subr.bf16.mxu1 %v7958_v0  ;;  %vm2538_vm8 = vcmask 687680  }
 0x3dd   : > { %7418 = vmatmul.mubr.msk.bf16.vlgmr.msra.gmra.mxu0 %vm2365_vm2, %v2314_v9  ;;  %vm2469_vm2 = vcmask 195684  }
 0x3de   : > { %7423 = vmatprep.mubr.msk.bf16.mxu0 %vm7961_vm11, %v7959_v8 }
 0x49d   : > { %v2406_v11 = vpop.f32.mrf.mxu0 }
 0x49e   : > { %v2407_v12 = vadd.f32 %v6920_v10, %v2406_v11 }
 0x49f   : > { %v7419_v13 = vpop.f32.mrf.mxu0 }
 0x4a0   : > { %2415 = vrot.lane.b32.xlu0 %v2407_v12, %s9262_s11 }
 0x4a1   : > { %v2409_v14 = vpop.f32.mrf.mxu0 }
 0x4a2   : > { %v2410_v15 = vadd.f32 %v6920_v10, %v2409_v14 }
 0x4a3   : > { %v7420_v16 = vpop.f32.mrf.mxu0 }
 0x4a4   : > { %2417 = vrot.lane.b32.xlu1 %v2410_v15, %s9262_s11  ;;  %s9267_s11 = smov 60  }
 0x512   : > { %v2416_v17 = vpop.permute.xlu0 %2415 }
 0x513   : > { %2422 = vst.msk [vmem:[#allocation3] sm:$0xff] %vm2421_vm0, %v2416_v17 }
 0x516   : > { %v2418_v18 = vpop.permute.xlu1 %2417 }
 0x517   : > { %2423 = vst.msk [vmem:[#allocation3 + $0x8] sm:$0xff] %vm2421_vm0, %v2418_v18  ;;  %vm2484_vm0 = vcmask 294083  }
 0x51a   : > { %v2424_v20 = vld [vmem:[#allocation3] sm:$0xff] }
 0x51b   : > { %v2434_v22 = vmul.f32 %v6928_v19, %v2424_v20 }
 0x51d   : > { %v2442_v23 = vadd.f32 %v6929_v21, %v2434_v22 }
 0x51e   : > { %v2425_v24 = vld [vmem:[#allocation3 + $0x8] sm:$0xff] }
 0x51f   : > { %v8460_v25 = vmax.f32 %v2442_v23, 0.0  ;;  %v2435_v26 = vmul.f32 %v6928_v19, %v2425_v24 }
 0x521   : > { %2520 = vrot.lane.b32.xlu0 %v8460_v25, %s9267_s11  ;;  %v2443_v27 = vadd.f32 %v6929_v21, %v2435_v26  ;;  %v2449_v28 = vrot.slane %v8460_v25, 3  ;;  %v2460_v29 = vrot.slane %v8460_v25, 4  ;;  %v2475_v33 = vrot.slane %v8460_v25, 5  ;;  %v7702_v26 = vld [vmem:[%s9387_s9] sm:$0xff]   ;;  %s9428_s9 = smov 112  }
 0x522   : > { %v2490_v37 = vrot.slane %v8460_v25, 6  ;;  %v2505_v40 = vrot.slane %v8460_v25, 7  ;;  %v2529_v43 = vrot.slane %v8460_v25, 1  ;;  %v2544_v48 = vrot.slane %v8460_v25, 2  ;;  %7422 = vmatpush3.bf16.msra.mxu0 %v7702_v26 }
 0x523   : > { %v8467_v30 = vmax.f32 %v2443_v27, 0.0  ;;  %2455 = vst.msk [vmem:[#allocation2] sm:$0xe0] %vm2454_vm4, %v2449_v28  ;;  %vm2526_vm4 = vcmask 589280   ;;  %7427 = vmatprep.subr.mxu0 %v7959_v8  ;;  %v6930_v27 = vld [vmem:[%s9388_s6] ss:$0 sm:$0xff] }
 0x524   : > { %s9422_s6 = smov 24  }
 0x525   : > { %2463 = vrot.lane.b32.xlu0 %v2460_v29, %s9289_s22  ;;  %2522 = vrot.lane.b32.xlu1 %v8467_v30, %s9267_s11  ;;  %v2450_v32 = vrot.slane %v8467_v30, 3  ;;  %v2530_v34 = vrot.slane %v8467_v30, 1  ;;  %v2545_v38 = vrot.slane %v8467_v30, 2  ;;  %s9270_s11 = smov 84   ;;  %v2461_v42 = vrot.slane %v8467_v30, 4 }
 0x526   : > { %v2476_v47 = vrot.slane %v8467_v30, 5  ;;  %v2491_v52 = vrot.slane %v8467_v30, 6  ;;  %v2506_v55 = vrot.slane %v8467_v30, 7 }
 0x527   : > { %v2451_v35 = vsel %vm9275_vm3, %v2449_v28, %v2450_v32  ;;  %v2531_v45 = vsel %vm9274_vm9, %v2529_v43, %v2530_v34  ;;  %v2462_v46 = vsel %vm9381_vm13, %v2460_v29, %v2461_v42  ;;  %v2546_v50 = vsel %vm9382_vm14, %v2544_v48, %v2545_v38 }
 0x528   : > { %2457 = vst.msk [vmem:[#allocation2 + $0x20] sm:$0xff] %vm2456_vm12, %v2451_v35  ;;  %v2477_v51 = vsel %vm9383_vm15, %v2475_v33, %v2476_v47  ;;  %v2492_v54 = vsel %vm9384_vm7, %v2490_v37, %v2491_v52  ;;  %v2507_v57 = vsel %vm9385_vm6, %v2505_v40, %v2506_v55  ;;  %vm2471_vm13 = vcmask 195680  }
 0x529   : > { %2478 = vrot.lane.b32.xlu0 %v2475_v33, %s9277_s23  ;;  %2534 = vrot.lane.b32.xlu1 %v2530_v34, %s9279_s7  ;;  %vm2553_vm14 = vcmask 786080   ;;  %vm2486_vm15 = vcmask 294080   ;;  %vm2501_vm7 = vcmask 392480   ;;  %vm2565_vm6 = vcmask 884480  }
 0x52a   : > { %vm9320_vm9 = vcmask 31744   ;;  %vm2597_vm3 = vcmask 1048515  }
 0x52d   : > { %2493 = vrot.lane.b32.xlu0 %v2490_v37, %s9272_s2  ;;  %2549 = vrot.lane.b32.xlu1 %v2545_v38, %s9270_s11 }
 0x531   : > { %2508 = vrot.lane.b32.xlu0 %v2505_v40, %s9302_s18  ;;  %2561 = vrot.lane.b32.xlu1 %v2450_v32, %s9283_s10 }
 0x535   : > { %2532 = vrot.lane.b32.xlu0 %v2531_v45, %s9279_s7  ;;  %2465 = vrot.lane.b32.xlu1 %v2462_v46, %s9289_s22  ;;  %s9394_s7 = sld [smem:[#allocation25_spill]] }
 0x539   : > { %2547 = vrot.lane.b32.xlu0 %v2546_v50, %s9270_s11  ;;  %2480 = vrot.lane.b32.xlu1 %v2477_v51, %s9277_s23  ;;  %s9276_s11 = smov 108   ;;  %s9391_s23 = sld [smem:[#allocation31_spill]] }
 0x53d   : > { %2495 = vrot.lane.b32.xlu1 %v2492_v54, %s9272_s2  ;;  %2559 = vrot.lane.b32.xlu0 %v2451_v35, %s9283_s10  ;;  %s9291_s2 = smov 120  }
 0x541   : > { %2510 = vrot.lane.b32.xlu1 %v2507_v57, %s9302_s18  ;;  %2571 = vrot.lane.b32.xlu0 %v2462_v46, %s9276_s11 }
 0x545   : > { %2573 = vrot.lane.b32.xlu1 %v2461_v42, %s9276_s11  ;;  %2583 = vrot.lane.b32.xlu0 %v2477_v51, %s9291_s2  ;;  %s9390_s11 = sld [smem:[#allocation33_spill]]  ;;  %v6943_v51 = vld [vmem:[%s9391_s23] ss:$0 sm:$0xff] }
 0x546   : > { %s9393_s23 = sld [smem:[#allocation24_spill]] }
 0x549   : > { %2585 = vrot.lane.b32.xlu1 %v2476_v47, %s9291_s2  ;;  %v8554_v47 = vshrl.u32 %v1731_v1, 7 }
 0x54b   : > { %v6942_v39 = vld [vmem:[%s9390_s11] ss:$0 sm:$0xff]  ;;  %v2824_v49 = vmul.u32 2, %v8554_v47  ;;  %s9392_s11 = sld [smem:[#allocation26_spill]] }
 0x54d   : > { %v2827_v53 = vadd.s32 1, %v2824_v49 }
 0x551   : > { %v7703_v58 = vld [vmem:[%s9392_s11 + $0x38] sm:$0xff]   ;;  %v7704_v59 = vld [vmem:[%s9392_s11 + $0x30] sm:$0xff]  }
 0x593   : > { %v2521_v60 = vpop.permute.xlu0 %2520 }
 0x597   : > { %v2464_v61 = vpop.permute.xlu0 %2463  ;;  %v2523_v62 = vpop.permute.xlu1 %2522 }
 0x598   : > { %2470 = vst.msk [vmem:[#allocation2] sm:$0xf0] %vm2469_vm2, %v2464_v61  ;;  %vm2577_vm2 = vcmask 982880   ;;  %v7706_v61 = vld [vmem:[%s9392_s11 + $0x20] sm:$0xff]  }
 0x59b   : > { %v2479_v63 = vpop.permute.xlu0 %2478  ;;  %v2535_v2 = vpop.permute.xlu1 %2534 }
 0x59c   : > { %2485 = vst.msk [vmem:[#allocation2] sm:$0xf8] %vm2484_vm0, %v2479_v63  ;;  %vm2540_vm0 = vcmask 686656   ;;  %v7708_v63 = vld [vmem:[%s9392_s11 + $0x10] sm:$0xff]  }
 0x59f   : > { %v2494_v3 = vpop.permute.xlu0 %2493  ;;  %v2550_v4 = vpop.permute.xlu1 %2549 }
 0x5a0   : > { %2500 = vst.msk [vmem:[#allocation2] sm:$0xfc] %vm2499_vm5, %v2494_v3  ;;  %vm2542_vm5 = vcmask 680512  }
 0x5a3   : > { %v2509_v5 = vpop.permute.xlu0 %2508  ;;  %v2562_v7 = vpop.permute.xlu1 %2561 }
 0x5a4   : > { %2515 = vst.msk [vmem:[#allocation2] sm:$0xfe] %vm2514_vm1, %v2509_v5  ;;  %vm2557_vm1 = vcmask 786086  }
 0x5a5   : > { %2527 = vst.msk [vmem:[#allocation2] sm:$0xff] %vm2526_vm4, %v2521_v60  ;;  %v7705_v60 = vld [vmem:[%s9392_s11 + $0x28] sm:$0xff]  }
 0x5a7   : > { %v2533_v9 = vpop.permute.xlu0 %2532  ;;  %v2466_v10 = vpop.permute.xlu1 %2465 }
 0x5a8   : > { %2539 = vst.msk [vmem:[#allocation2] sm:$0xff] %vm2538_vm8, %v2533_v9  ;;  %vm2555_vm8 = vcmask 784032   ;;  %v7709_v9 = vld [vmem:[%s9392_s11 + $0x8] sm:$0xff]  }
 0x5a9   : > { %2472 = vst.msk [vmem:[#allocation2 + $0x20] sm:$0xff] %vm2471_vm13, %v2466_v10  ;;  %vm2567_vm13 = vcmask 881408   ;;  %v6948_v10 = vld [vmem:[%s9393_s23] ss:$0 sm:$0xff]  ;;  %s9395_s23 = sld [smem:[#allocation23_spill]] }
 0x5ab   : > { %v2548_v11 = vpop.permute.xlu0 %2547  ;;  %v2481_v12 = vpop.permute.xlu1 %2480 }
 0x5ac   : > { %2554 = vst.msk [vmem:[#allocation2] sm:$0xff] %vm2553_vm14, %v2548_v11  ;;  %vm2569_vm14 = vcmask 884485  }
 0x5ad   : > { %2487 = vst.msk [vmem:[#allocation2 + $0x20] sm:$0xff] %vm2486_vm15, %v2481_v12  ;;  %vm9297_vm15 = vcmask 1048512   ;;  %v6949_v12 = vld [vmem:[%s9394_s7] ss:$0 sm:$0xff]  ;;  %s9281_s7 = smov 112  }
 0x5af   : > { %v2496_v13 = vpop.permute.xlu1 %2495  ;;  %v2560_v14 = vpop.permute.xlu0 %2559 }
 0x5b0   : > { %2502 = vst.msk [vmem:[#allocation2 + $0x20] sm:$0xff] %vm2501_vm7, %v2496_v13  ;;  %vm2579_vm7 = vcmask 978784   ;;  %v7710_v13 = vld [vmem:[%s9392_s11] sm:$0xff]  }
 0x5b1   : > { %2566 = vst.msk [vmem:[#allocation2] sm:$0xff] %vm2565_vm6, %v2560_v14  ;;  %vm2581_vm6 = vcmask 982884  }
 0x5b3   : > { %v2511_v15 = vpop.permute.xlu1 %2510  ;;  %v2572_v16 = vpop.permute.xlu0 %2571 }
 0x5b4   : > { %2517 = vst.msk [vmem:[#allocation2 + $0x20] sm:$0xff] %vm2516_vm10, %v2511_v15  ;;  %vm2595_vm10 = vcmask 26624  }
 0x5b5   : > { %2578 = vst.msk [vmem:[#allocation2] sm:$0xff] %vm2577_vm2, %v2572_v16  ;;  %vm3000_vm2 = vcmask 130053   ;;  %v7711_v16 = vld [vmem:[%s9392_s11 + $0x50] sm:$0xff]  }
 0x5b6   : > { %2528 = vst.msk [vmem:[#allocation2 + $0x20] sm:$0xff] %vm2526_vm4, %v2523_v62  ;;  %vm2593_vm4 = vcmask 1043392   ;;  %v7707_v62 = vld [vmem:[%s9392_s11 + $0x18] sm:$0xff]  }
 0x5b7   : > { %2541 = vst.msk [vmem:[#allocation2 + $0x20] sm:$0x7f] %vm2540_vm0, %v2535_v2  ;;  %v2574_v17 = vpop.permute.xlu1 %2573  ;;  %v2584_v18 = vpop.permute.xlu0 %2583  ;;  %vm3002_vm0 = vcmask 126976  }
 0x5b8   : > { %2543 = vst.msk [vmem:[#allocation2 + $0x27] sm:$0x1] %vm2542_vm5, %v7959_v8  ;;  %vm9298_vm5 = vcmask 130048  }
 0x5b9   : > { %2558 = vst.msk [vmem:[#allocation2 + $0x20] sm:$0xc0] %vm2557_vm1, %v7959_v8  ;;  %vm2825_vm1 = vcmp.eq.s32.totalorder %v8318_v6, %v2824_v49 }
 0x5ba   : > { %2556 = vst.msk [vmem:[#allocation2 + $0x20] sm:$0x3f] %vm2555_vm8, %v2550_v4  ;;  %v8560_v57 = vsel %vm2825_vm1, 1.0, %v7959_v8  ;;  %vm2828_vm8 = vcmp.eq.s32.totalorder %v8318_v6, %v2827_v53  ;;  %vm3045_vm1 = vcmask 916224  }
 0x5bb   : > { %2568 = vst.msk [vmem:[#allocation2 + $0x20] sm:$0x1f] %vm2567_vm13, %v2562_v7  ;;  %v2586_v19 = vpop.permute.xlu1 %2585  ;;  %v8570_v1 = vsel %vm2828_vm8, 1.0, %v7959_v8  ;;  %vm3010_vm13 = vcmask 257152   ;;  %vm3047_vm8 = vcmask 910080  }
 0x5bc   : > { %2570 = vst.msk [vmem:[#allocation2 + $0x20] sm:$0xe0] %vm2569_vm14, %v7959_v8  ;;  %vm3018_vm14 = vcmask 387328  }
 0x5bd   : > { %2590 = vst.msk [vmem:[#allocation2] sm:$0xff] %vm9297_vm15, %v2584_v18  ;;  %vm3788_vm15 = vcmask 519490  }
 0x5be   : > { %2592 = vst.msk [vmem:[#allocation2 + $0x8] sm:$0xff] %vm9320_vm9, %v2584_v18 }
 0x5bf   : > { %2580 = vst.msk [vmem:[#allocation2 + $0x20] sm:$0xf] %vm2579_vm7, %v2574_v17  ;;  %vm3026_vm7 = vcmask 517504  }
 0x5c0   : > { %2582 = vst.msk [vmem:[#allocation2 + $0x20] sm:$0xf0] %vm2581_vm6, %v7959_v8  ;;  %vm3034_vm6 = vcmask 647680  }
 0x5c1   : > { %2598 = vst.msk [vmem:[#allocation2 + $0x20] sm:$0xf8] %vm2597_vm3, %v7959_v8  ;;  %vm2736_vm3 = vcmask 130144  }
 0x5c2   : > { %2594 = vst.msk [vmem:[#allocation2 + $0x20] sm:$0x7] %vm2593_vm4, %v2586_v19  ;;  %vm3008_vm4 = vcmask 261252  }
 0x5c3   : > { %2596 = vst.msk [vmem:[#allocation2 + $0x28] sm:$0x7] %vm2595_vm10, %v2586_v19  ;;  %vm3016_vm10 = vcmask 392451  }
 0x5c4   : > { %v2601_v20 = vld [vmem:[#allocation2] sm:$0xff] }
 0x5c5   : > { %v2602_v21 = vld [vmem:[#allocation2 + $0x8] sm:$0xff]  ;;  %3003 = vst.msk [vmem:[#allocation2] sm:$0x1f] %vm3002_vm0, %v7959_v8 }
 0x5c6   : > { %3058 = vst.msk [vmem:[#allocation2 + $0x8] sm:$0xe0] %vm3000_vm2, %v7959_v8 }
 0x5c7   : > { %3011 = vst.msk [vmem:[#allocation2] sm:$0xf] %vm3010_vm13, %v7959_v8 }
 0x5c8   : > { %3019 = vst.msk [vmem:[#allocation2] sm:$0x7] %vm3018_vm14, %v7959_v8 }
 0x5c9   : > { %v2603_v23 = vld [vmem:[#allocation2 + $0x20] sm:$0xff]  ;;  %3027 = vst.msk [vmem:[#allocation2] sm:$0x3] %vm3026_vm7, %v7959_v8  ;;  %vm3055_vm7 = vcmask 1048454  }
 0x5ca   : > { %v2604_v22 = vld [vmem:[#allocation2 + $0x28] sm:$0xff]  ;;  %v2605_v25 = vpack.c.bf16 %v2603_v23, %v2601_v20  ;;  %3035 = vst.msk [vmem:[#allocation2] sm:$0x1] %vm3034_vm6, %v7959_v8  ;;  %v7713_v23 = vld [vmem:[%s9392_s11 + $0x40] sm:$0xff]   ;;  %vm3053_vm6 = vcmask 1046400  }
 0x5cb   : > { %v2606_v24 = vpack.c.bf16 %v2604_v22, %v2602_v21  ;;  %v7712_v20 = vld [vmem:[%s9392_s11 + $0x48] sm:$0xff]   ;;  %s9440_s11 = sld [smem:[#allocation43_spill]] }
 0x5cd   : > { %6940 = vmatprep.mubr.msk.bf16.mxu1 %vm9320_vm9, %v2606_v24 }
 0x5ce   : > { %2720 = vmatmul.mubr.bf16.vlgmr.msra.gmra.mxu1 %v2605_v25 }
 0x68e   : > { %v2721_v28 = vpop.f32.mrf.mxu1 }
 0x68f   : > { %v2722_v29 = vadd.f32 %v6930_v27, %v2721_v28 }
 0x690   : > { %v2723_v30 = vpop.f32.mrf.mxu1 }
 0x691   : > { %2730 = vrot.lane.b32.xlu0 %v2722_v29, %s9289_s22 }
 0x692   : > { %v2724_v31 = vpop.f32.mrf.mxu1 }
 0x693   : > { %v2725_v32 = vadd.f32 %v6930_v27, %v2724_v31 }
 0x694   : > { %v2726_v33 = vpop.f32.mrf.mxu1 }
 0x695   : > { %2732 = vrot.lane.b32.xlu1 %v2725_v32, %s9289_s22 }
 0x703   : > { %v2731_v34 = vpop.permute.xlu0 %2730 }
 0x704   : > { %2737 = vst.msk [vmem:[#allocation3] sm:$0xff] %vm2736_vm3, %v2731_v34 }
 0x707   : > { %v2733_v35 = vpop.permute.xlu1 %2732 }
 0x708   : > { %2738 = vst.msk [vmem:[#allocation3 + $0x8] sm:$0xff] %vm2736_vm3, %v2733_v35  ;;  %vm3039_vm3 = vcmask 786048  }
 0x70b   : > { %v2739_v37 = vld [vmem:[#allocation3] sm:$0xff] }
 0x70c   : > { %v2749_v38 = vmul.f32 %v6941_v36, %v2739_v37 }
 0x70e   : > { %v2757_v42 = vadd.f32 %v6942_v39, %v2749_v38  ;;  %v6950_v38 = vld [vmem:[%s9395_s23] ss:$0 sm:$0xff]  ;;  %s9397_s23 = sld [smem:[#allocation28_spill]] }
 0x70f   : > { %v2740_v40 = vld [vmem:[#allocation3 + $0x8] sm:$0xff] }
 0x710   : > { %v2750_v41 = vmul.f32 %v6941_v36, %v2740_v40  ;;  %v2759_v44 = vmax.f32 %v2757_v42, 0.0 }
 0x712   : > { %v2758_v43 = vadd.f32 %v6942_v39, %v2750_v41 }
 0x714   : > { %v2760_v45 = vmax.f32 %v2758_v43, 0.0 }
 0x716   : > { %v2762_v46 = vpack.c.bf16 %v2760_v45, %v2759_v44 }
 0x718   : > { %7424 = vmatmul.mubr.msk.bf16.vlgmr.msra.gmra.mxu0 %vm9298_vm5, %v2762_v46 }
 0x719   : > { %7431 = vmatprep.mubr.msk.f32.mxu0 %vm7961_vm11, %v7959_v8 }
 0x7d8   : > { %v2815_v48 = vpop.f32.mrf.mxu0 }
 0x7d9   : > { %v2816_v56 = vadd.f32 %v6943_v51, %v2815_v48 }
 0x7da   : > { %v7425_v50 = vpop.f32.mrf.mxu0 }
 0x7dc   : > { %v2818_v52 = vpop.f32.mrf.mxu0 }
 0x7dd   : > { %v2819_v54 = vadd.f32 %v6943_v51, %v2818_v52 }
 0x7de   : > { %v7426_v55 = vpop.f32.mrf.mxu0 }
 0x7df   : > { %7428 = vmatpush3.msra.mxu0 %v2819_v54 }
 0x7e0   : > { %7429 = vmatprep.subr.mxu0 %v7959_v8 }
 0x7e1   : > { %7430 = vmatpush3.msra.mxu0 %v2816_v56 }
 0x7e2   : > { %7432 = vmatmul.mubr.msk.f32.vlgmr.msra.gmra.mxu0 %vm9298_vm5, %v8560_v57  ;;  %7434 = vmatprep.subr.mxu0 %v7959_v8 }
 0x7e3   : > { %7435 = vmatpush3.msra.mxu0 %v2819_v54  ;;  %7438 = vmatprep.mubr.msk.f32.mxu0 %vm7961_vm11, %v7959_v8  ;;  %v6963_v54 = vld [vmem:[%s9397_s23] ss:$0 sm:$0xff]  ;;  %s9400_s23 = smov 40  }
 0x7e4   : > { %7436 = vmatprep.subr.mxu0 %v7959_v8 }
 0x7e5   : > { %7437 = vmatpush3.msra.mxu0 %v2816_v56 }
 0x7e6   : > { %7439 = vmatmul.mubr.msk.f32.vlgmr.msra.gmra.mxu0 %vm9298_vm5, %v8570_v1  ;;  %3165 = vmatprep.subr.bf16.mxu0 %v7958_v0 }
 0x7e7   : > { %3166 = vmatpush1.bf16.msra.mxu0 %v7703_v58 }
 0x7e8   : > { %3167 = vmatprep.subr.bf16.mxu0 %v7958_v0 }
 0x7eb   : > { %3168 = vmatpush1.bf16.msra.mxu0 %v7704_v59 }
 0x7ec   : > { %3169 = vmatprep.subr.bf16.mxu0 %v7958_v0 }
 0x7ef   : > { %3170 = vmatpush1.bf16.msra.mxu0 %v7705_v60 }
 0x7f0   : > { %3171 = vmatprep.subr.bf16.mxu0 %v7958_v0 }
 0x7f3   : > { %3172 = vmatpush1.bf16.msra.mxu0 %v7706_v61 }
 0x7f4   : > { %3173 = vmatprep.subr.bf16.mxu0 %v7958_v0 }
 0x7f7   : > { %3174 = vmatpush1.bf16.msra.mxu0 %v7707_v62 }
 0x7f8   : > { %3175 = vmatprep.subr.bf16.mxu0 %v7958_v0 }
 0x7fb   : > { %3176 = vmatpush1.bf16.msra.mxu0 %v7708_v63 }
 0x7fc   : > { %3177 = vmatprep.subr.bf16.mxu0 %v7958_v0 }
 0x7ff   : > { %3178 = vmatpush1.bf16.msra.mxu0 %v7709_v9 }
 0x800   : > { %3179 = vmatprep.subr.bf16.mxu0 %v7958_v0 }
 0x803   : > { %3180 = vmatpush1.bf16.msra.mxu0 %v7710_v13 }
 0x804   : > { %3191 = vmatprep.subr.bf16.mxu0 %v7958_v0 }
 0x807   : > { %3192 = vmatpush2.bf16.msra.mxu0 %v7711_v16 }
 0x808   : > { %3193 = vmatprep.subr.bf16.mxu0 %v7958_v0 }
 0x80b   : > { %3194 = vmatpush2.bf16.msra.mxu0 %v7712_v20 }
 0x80c   : > { %3195 = vmatprep.subr.bf16.mxu0 %v7958_v0 }
 0x80f   : > { %3196 = vmatpush2.bf16.msra.mxu0 %v7713_v23 }
 0x810   : > { %7441 = vmatprep.subr.bf16.mxu0 %v7959_v8 }
 0x8a2   : > { %v2899_v2 = vpop.f32.mrf.mxu0 }
 0x8a4   : > { %v7433_v3 = vpop.f32.mrf.mxu0 }
 0x8a6   : > { %v2972_v4 = vpop.f32.mrf.mxu0 }
 0x8a7   : > { %v2976_v5 = vmax.f32 %v2899_v2, %v2972_v4 }
 0x8a8   : > { %v7440_v7 = vpop.f32.mrf.mxu0 }
 0x8a9   : > { %2977 = vst.msk [vmem:[#allocation4] sm:$0xff] %vm9298_vm5, %v2976_v5  ;;  %vm3786_vm5 = vcmask 517440  }
 0x8b0   : > { %v2978_v11 = vld [vmem:[#allocation4] sm:$0xff] }
 0x8b1   : > { %v2987_v14 = vmul.f32 %v6948_v10, %v2978_v11 }
 0x8b3   : > { %v2994_v15 = vadd.f32 %v6949_v12, %v2987_v14 }
 0x8b5   : > { %v2995_v17 = vmax.f32 %v2994_v15, 0.0 }
 0x8b7   : > { %3036 = vrot.lane.b32.xlu0 %v2995_v17, %s7971_s28  ;;  %v3012_v18 = vrot.slane %v2995_v17, 5  ;;  %v2998_v19 = vrot.slane %v2995_v17, 3  ;;  %v3004_v21 = vrot.slane %v2995_v17, 4  ;;  %v3028_v22 = vrot.slane %v2995_v17, 7 }
 0x8b8   : > { %v3020_v24 = vrot.slane %v2995_v17, 6  ;;  %v3041_v25 = vrot.slane %v2995_v17, 1  ;;  %v3049_v26 = vrot.slane %v2995_v17, 2 }
 0x8b9   : > { %3013 = vrot.lane.b32.xlu1 %v3012_v18, %s9294_s1  ;;  %3001 = vst.msk [vmem:[#allocation2] sm:$0xe0] %vm3000_vm2, %v2998_v19  ;;  %vm3024_vm2 = vcmask 523650  }
 0x8ba   : > { %3057 = vst.msk [vmem:[#allocation2 + $0x8] sm:$0x1f] %vm3002_vm0, %v2998_v19  ;;  %vm3032_vm0 = vcmask 654849  }
 0x8bb   : > { %3005 = vrot.lane.b32.xlu0 %v3004_v21, %s9287_s0  ;;  %3060 = vst.msk [vmem:[#allocation2 + $0x8] sm:$0xf0] %vm3008_vm4, %v7959_v8 }
 0x8bd   : > { %3029 = vrot.lane.b32.xlu1 %v3028_v22, %s9285_s26  ;;  %s9401_s26 = smov 60  }
 0x8bf   : > { %3021 = vrot.lane.b32.xlu0 %v3020_v24, %s9302_s18 }
 0x8c1   : > { %3042 = vrot.lane.b32.xlu1 %v3041_v25, %s9283_s10  ;;  %s9398_s10 = sld [smem:[#allocation29_spill]] }
 0x8c3   : > { %3050 = vrot.lane.b32.xlu0 %v3049_v26, %s9281_s7  ;;  %s9396_s7 = sld [smem:[#allocation30_spill]] }
 0x8c7   : > { %v6964_v58 = vld [vmem:[%s9398_s10] ss:$0 sm:$0xff]  ;;  %s7980_s10 = smov 20  }
 0x8c9   : > { %v7714_v44 = vld [vmem:[%s9396_s7 + $0x38] sm:$0xff]   ;;  %v7715_v45 = vld [vmem:[%s9396_s7 + $0x30] sm:$0xff]   ;;  %v7716_v46 = vld [vmem:[%s9396_s7 + $0x28] sm:$0xff]  }
 0x8ca   : > { %3444 = vmatpush1.bf16.msra.mxu1 %v7714_v44  ;;  %v7717_v48 = vld [vmem:[%s9396_s7 + $0x20] sm:$0xff]   ;;  %v7718_v49 = vld [vmem:[%s9396_s7 + $0x18] sm:$0xff]   ;;  %v7719_v50 = vld [vmem:[%s9396_s7 + $0x10] sm:$0xff]  }
 0x8cb   : > { %3445 = vmatprep.subr.bf16.mxu1 %v7958_v0  ;;  %v7720_v51 = vld [vmem:[%s9396_s7 + $0x8] sm:$0xff]   ;;  %v7721_v53 = vld [vmem:[%s9396_s7] sm:$0xff]   ;;  %v7724_v4 = vld [vmem:[%s9396_s7 + $0x58] sm:$0xff]  }
 0x8cc   : > { %v7722_v55 = vld [vmem:[%s9396_s7 + $0x68] sm:$0x3f]   ;;  %v7723_v62 = vld [vmem:[%s9396_s7 + $0x60] sm:$0xff]   ;;  %v7725_v10 = vld [vmem:[%s9396_s7 + $0x50] sm:$0xff]  }
 0x8cd   : > { %v7726_v12 = vld [vmem:[%s9396_s7 + $0x48] sm:$0xff]   ;;  %v7727_v14 = vld [vmem:[%s9396_s7 + $0x40] sm:$0xff]   ;;  %s9424_s7 = sld [smem:[#allocation18_spill]] }
 0x8ce   : > { %3446 = vmatpush1.bf16.msra.mxu1 %v7715_v45 }
 0x8cf   : > { %3447 = vmatprep.subr.bf16.mxu1 %v7958_v0 }
 0x8d2   : > { %3448 = vmatpush1.bf16.msra.mxu1 %v7716_v46 }
 0x8d3   : > { %3449 = vmatprep.subr.bf16.mxu1 %v7958_v0 }
 0x8d6   : > { %3450 = vmatpush1.bf16.msra.mxu1 %v7717_v48 }
 0x8d7   : > { %3451 = vmatprep.subr.bf16.mxu1 %v7958_v0 }
 0x8da   : > { %3452 = vmatpush1.bf16.msra.mxu1 %v7718_v49 }
 0x8db   : > { %3453 = vmatprep.subr.bf16.mxu1 %v7958_v0 }
 0x8de   : > { %3454 = vmatpush1.bf16.msra.mxu1 %v7719_v50 }
 0x8df   : > { %3455 = vmatprep.subr.bf16.mxu1 %v7958_v0 }
 0x8e2   : > { %3456 = vmatpush1.bf16.msra.mxu1 %v7720_v51 }
 0x8e3   : > { %3457 = vmatprep.subr.bf16.mxu1 %v7958_v0 }
 0x8e6   : > { %3458 = vmatpush1.bf16.msra.mxu1 %v7721_v53  ;;  %v8706_v53 = vld [vmem:[#allocation2 + $0x10] sm:$0xf] }
 0x8e7   : > { %3463 = vmatprep.subr.bf16.mxu1 %v7958_v0 }
 0x929   : > { %v3037_v27 = vpop.permute.xlu0 %3036 }
 0x92b   : > { %v3014_v28 = vpop.permute.xlu1 %3013 }
 0x92d   : > { %v3006_v29 = vpop.permute.xlu0 %3005 }
 0x92e   : > { %3009 = vst.msk [vmem:[#allocation2] sm:$0xf0] %vm3008_vm4, %v3006_v29  ;;  %vm9312_vm4 = vcmask 90112  }
 0x92f   : > { %3059 = vst.msk [vmem:[#allocation2 + $0x8] sm:$0xf] %vm3010_vm13, %v3006_v29  ;;  %v3030_v30 = vpop.permute.xlu1 %3029  ;;  %vm3161_vm13 = vcmask 392192  }
 0x930   : > { %3061 = vst.msk [vmem:[#allocation2 + $0x8] sm:$0x7] %vm3018_vm14, %v3014_v28  ;;  %vm3235_vm14 = vcmask 159744  }
 0x931   : > { %3062 = vst.msk [vmem:[#allocation2 + $0x8] sm:$0xf8] %vm3016_vm10, %v7959_v8  ;;  %3017 = vst.msk [vmem:[#allocation2] sm:$0xf8] %vm3016_vm10, %v3014_v28  ;;  %v3022_v31 = vpop.permute.xlu0 %3021  ;;  %vm3243_vm10 = vcmask 322720  }
 0x932   : > { %3025 = vst.msk [vmem:[#allocation2] sm:$0xfc] %vm3024_vm2, %v3022_v31  ;;  %vm3209_vm2 = vcmask 162944  }
 0x933   : > { %v3043_v32 = vpop.permute.xlu1 %3042  ;;  %3033 = vst.msk [vmem:[#allocation2] sm:$0xfe] %vm3032_vm0, %v3030_v30  ;;  %vm9399_vm0 = vcmask 1045504  }
 0x934   : > { %3040 = vst.msk [vmem:[#allocation2] sm:$0xff] %vm3039_vm3, %v3037_v27  ;;  %v3441_v59 = vsel %vm9399_vm0, %v7722_v55, 0  ;;  %vm3251_vm3 = vcmask 485696   ;;  %vm3299_vm0 = vcmask 425221  }
 0x935   : > { %3046 = vst.msk [vmem:[#allocation2] sm:$0x7f] %vm3045_vm1, %v3043_v32  ;;  %v3051_v33 = vpop.permute.xlu0 %3050  ;;  %3464 = vmatpush2.bf16.msra.mxu1 %v3441_v59  ;;  %vm3259_vm1 = vcmask 648672  }
 0x936   : > { %3048 = vst.msk [vmem:[#allocation2 + $0x7] sm:$0x1] %vm3047_vm8, %v7959_v8  ;;  %3465 = vmatprep.subr.bf16.mxu1 %v7958_v0  ;;  %vm3233_vm8 = vcmask 162821  }
 0x937   : > { %3056 = vst.msk [vmem:[#allocation2] sm:$0xc0] %vm3055_vm7, %v7959_v8  ;;  %vm3267_vm7 = vcmask 811648  }
 0x938   : > { %v3064_v34 = vld [vmem:[#allocation2 + $0x8] sm:$0xff]  ;;  %3054 = vst.msk [vmem:[#allocation2] sm:$0x3f] %vm3053_vm6, %v3051_v33  ;;  %vm3280_vm6 = vcmask 96256  }
 0x939   : > { %3285 = vst.msk [vmem:[#allocation2 + $0xf] sm:$0x1] %vm9312_vm4, %v7959_v8  ;;  %v3066_v35 = vpack.c.bf16 %v3064_v34, %v3064_v34  ;;  %3466 = vmatpush2.bf16.msra.mxu1 %v7723_v62 }
 0x93a   : > { %3467 = vmatprep.subr.bf16.mxu1 %v7958_v0 }
 0x93b   : > { %6962 = vmatprep.mubr.msk.bf16.mxu0 %vm3161_vm13, %v3066_v35  ;;  %vm3241_vm13 = vcmask 326820  }
 0x93d   : > { %3468 = vmatpush2.bf16.msra.mxu1 %v7724_v4 }
 0x93e   : > { %3469 = vmatprep.subr.bf16.mxu1 %v7958_v0 }
 0x93f   : > { %v3063_v36 = vld [vmem:[#allocation2] sm:$0xff] }
 0x940   : > { %3236 = vst.msk [vmem:[#allocation2] sm:$0x1f] %vm3235_vm14, %v7959_v8  ;;  %v3065_v37 = vpack.c.bf16 %v3063_v36, %v3063_v36  ;;  %vm3292_vm14 = vcmask 261222  }
 0x941   : > { %3244 = vst.msk [vmem:[#allocation2] sm:$0xf] %vm3243_vm10, %v7959_v8  ;;  %3470 = vmatpush2.bf16.msra.mxu1 %v7725_v10  ;;  %vm3290_vm10 = vcmask 259168  }
 0x942   : > { %3198 = vmatmul.mubr.bf16.vlgmr.msra.gmra.mxu0 %v3065_v37  ;;  %3252 = vst.msk [vmem:[#allocation2] sm:$0x7] %vm3251_vm3, %v7959_v8  ;;  %3471 = vmatprep.subr.bf16.mxu1 %v7958_v0  ;;  %vm3257_vm3 = vcmask 654818  }
 0x943   : > { %7445 = vmatprep.mubr.msk.bf16.mxu0 %vm7961_vm11, %v7959_v8  ;;  %3260 = vst.msk [vmem:[#allocation2] sm:$0x3] %vm3259_vm1, %v7959_v8  ;;  %vm3297_vm1 = vcmask 422144  }
 0x944   : > { %3268 = vst.msk [vmem:[#allocation2] sm:$0x1] %vm3267_vm7, %v7959_v8  ;;  %vm3265_vm7 = vcmask 818817  }
 0x945   : > { %3472 = vmatpush2.bf16.msra.mxu1 %v7726_v12 }
 0x946   : > { %3473 = vmatprep.subr.bf16.mxu1 %v7958_v0 }
 0x949   : > { %3474 = vmatpush2.bf16.msra.mxu1 %v7727_v14 }
 0xa02   : > { %v3199_v39 = vpop.f32.mrf.mxu0 }
 0xa03   : > { %v3200_v40 = vadd.f32 %v6950_v38, %v3199_v39 }
 0xa04   : > { %v3201_v41 = vpop.f32.mrf.mxu0 }
 0xa05   : > { %3206 = vrot.lane.b32.xlu1 %v3200_v40, %s9287_s0  ;;  %s9293_s0 = smov 52  }
 0xa06   : > { %v3202_v42 = vpop.f32.mrf.mxu0 }
 0xa08   : > { %v3203_v43 = vpop.f32.mrf.mxu0 }
 0xa77   : > { %v3207_v52 = vpop.permute.xlu1 %3206 }
 0xa78   : > { %3210 = vst.msk [vmem:[#allocation4] sm:$0xff] %vm3209_vm2, %v3207_v52  ;;  %vm3249_vm2 = vcmask 490819  }
 0xa7f   : > { %v3211_v56 = vld [vmem:[#allocation4] sm:$0xff] }
 0xa80   : > { %v3220_v60 = vmul.f32 %v6963_v54, %v3211_v56 }
 0xa82   : > { %v3227_v61 = vadd.f32 %v6964_v58, %v3220_v60 }
 0xa84   : > { %v3228_v63 = vmax.f32 %v3227_v61, 0.0 }
 0xa86   : > { %v3274_v2 = vrot.slane %v3228_v63, 1  ;;  %v3237_v3 = vrot.slane %v3228_v63, 4  ;;  %v3231_v5 = vrot.slane %v3228_v63, 3  ;;  %v3286_v7 = vrot.slane %v3228_v63, 2 }
 0xa87   : > { %v3245_v9 = vrot.slane %v3228_v63, 5  ;;  %v3253_v11 = vrot.slane %v3228_v63, 6  ;;  %v3261_v13 = vrot.slane %v3228_v63, 7 }
 0xa88   : > { %3275 = vrot.lane.b32.xlu1 %v3274_v2, %s9291_s2  ;;  %3238 = vrot.lane.b32.xlu0 %v3237_v3, %s7980_s10  ;;  %3234 = vst.msk [vmem:[#allocation2] sm:$0xe0] %vm3233_vm8, %v3231_v5  ;;  %s9403_s2 = smov 72   ;;  %vm3306_vm8 = vcmask 589220  }
 0xa8c   : > { %3287 = vrot.lane.b32.xlu1 %v3286_v7, %s9289_s22  ;;  %3246 = vrot.lane.b32.xlu0 %v3245_v9, %s9400_s23  ;;  %s9402_s22 = smov 100  }
 0xa90   : > { %3254 = vrot.lane.b32.xlu0 %v3253_v11, %s9401_s26  ;;  %3294 = vrot.lane.b32.xlu1 %v3231_v5, %s9294_s1  ;;  %s9407_s26 = sld [smem:[#allocation36_spill]] }
 0xa91   : > { %s9409_s1 = sld [smem:[#allocation35_spill]] }
 0xa94   : > { %3262 = vrot.lane.b32.xlu0 %v3261_v13, %s7971_s28  ;;  %3301 = vrot.lane.b32.xlu1 %v3237_v3, %s9293_s0  ;;  %s9404_s28 = sld [smem:[#allocation38_spill]] }
 0xa95   : > { %s9408_s0 = sld [smem:[#allocation37_spill]] }
 0xa96   : > { %v6981_v39 = vld [vmem:[%s9407_s26] ss:$0 sm:$0xff]  ;;  %s9416_s26 = smov 16  }
 0xa97   : > { %v6983_v46 = vld [vmem:[%s9409_s1] ss:$0 sm:$0xff]  ;;  %s9414_s1 = sld [smem:[#allocation14_spill]] }
 0xa98   : > { %3269 = vrot.lane.b32.xlu0 %v3228_v63, %s9402_s22  ;;  %3308 = vrot.lane.b32.xlu1 %v3245_v9, %s9403_s2  ;;  %s9405_s22 = sld [smem:[#allocation27_spill]] }
 0xa9a   : > { %v7728_v29 = vld [vmem:[%s9404_s28 + $0x8] ss:$0 sps:$4 sm:$0xff]   ;;  %v7729_v31 = vld [vmem:[%s9404_s28] sm:$0xff]  }
 0xa9b   : > { %v6982_v41 = vld [vmem:[%s9408_s0] ss:$0 sm:$0xff]  ;;  %s9413_s0 = sld [smem:[#allocation13_spill]] }
 0xa9d   : > { %v6990_v9 = vld [vmem:[%s9414_s1] ss:$0 sm:$0xff]  ;;  %s9419_s1 = smov 96  }
 0xa9e   : > { %v6965_v32 = vld [vmem:[%s9405_s22] ss:$0 sm:$0xff]  ;;  %s9415_s22 = smov 120  }
 0xaa1   : > { %v6989_v4 = vld [vmem:[%s9413_s0] ss:$0 sm:$0xff]  ;;  %s9418_s0 = smov 64  }
 0xafa   : > { %v3276_v15 = vpop.permute.xlu1 %3275  ;;  %v3239_v16 = vpop.permute.xlu0 %3238 }
 0xafb   : > { %3281 = vst.msk [vmem:[#allocation2 + $0x8] sm:$0x7f] %vm3280_vm6, %v3276_v15  ;;  %vm3304_vm6 = vcmask 585120  }
 0xafc   : > { %3242 = vst.msk [vmem:[#allocation2] sm:$0xf0] %vm3241_vm13, %v3239_v16  ;;  %vm3313_vm13 = vcmask 753219  }
 0xafd   : > { %3293 = vst.msk [vmem:[#allocation2 + $0x8] sm:$0xc0] %vm3292_vm14, %v7959_v8  ;;  %vm3272_vm14 = vcmask 982816  }
 0xafe   : > { %v3288_v17 = vpop.permute.xlu1 %3287  ;;  %v3247_v18 = vpop.permute.xlu0 %3246 }
 0xaff   : > { %3291 = vst.msk [vmem:[#allocation2 + $0x8] sm:$0x3f] %vm3290_vm10, %v3288_v17  ;;  %vm3311_vm10 = vcmask 748096  }
 0xb00   : > { %3250 = vst.msk [vmem:[#allocation2] sm:$0xf8] %vm3249_vm2, %v3247_v18  ;;  %vm3278_vm2 = vcmask 1047488  }
 0xb01   : > { %3300 = vst.msk [vmem:[#allocation2 + $0x8] sm:$0xe0] %vm3299_vm0, %v7959_v8  ;;  %vm3282_vm0 = vcmask 1041344  }
 0xb02   : > { %v3255_v19 = vpop.permute.xlu0 %3254  ;;  %v3295_v20 = vpop.permute.xlu1 %3294 }
 0xb03   : > { %3258 = vst.msk [vmem:[#allocation2] sm:$0xfc] %vm3257_vm3, %v3255_v19  ;;  %vm3436_vm3 = vcmask 752640  }
 0xb04   : > { %3298 = vst.msk [vmem:[#allocation2 + $0x8] sm:$0x1f] %vm3297_vm1, %v3295_v20  ;;  %vm9406_vm1 = vcmask 1043456  }
 0xb05   : > { %3307 = vst.msk [vmem:[#allocation2 + $0x8] sm:$0xf0] %vm3306_vm8, %v7959_v8  ;;  %v3532_v30 = vsel %vm9406_vm1, %v7728_v29, 0  ;;  %vm3487_vm8 = vcmask 195744   ;;  %vm9300_vm1 = vcmask 975616  }
 0xb06   : > { %v3263_v21 = vpop.permute.xlu0 %3262  ;;  %v3302_v22 = vpop.permute.xlu1 %3301  ;;  %7442 = vmatpush3.bf16.msra.mxu0 %v3532_v30 }
 0xb07   : > { %3266 = vst.msk [vmem:[#allocation2] sm:$0xfe] %vm3265_vm7, %v3263_v21  ;;  %7443 = vmatprep.subr.bf16.mxu0 %v7959_v8  ;;  %vm9299_vm7 = vcmask 195584  }
 0xb08   : > { %3305 = vst.msk [vmem:[#allocation2 + $0x8] sm:$0xf] %vm3304_vm6, %v3302_v22  ;;  %vm9411_vm6 = vcmask 64512  }
 0xb09   : > { %3314 = vst.msk [vmem:[#allocation2 + $0x8] sm:$0xf8] %vm3313_vm13, %v7959_v8  ;;  %vm9412_vm13 = vmmov %vm9411_vm6 }
 0xb0a   : > { %v3270_v23 = vpop.permute.xlu0 %3269  ;;  %v3309_v24 = vpop.permute.xlu1 %3308  ;;  %7444 = vmatpush3.bf16.msra.mxu0 %v7729_v31 }
 0xb0b   : > { %3273 = vst.msk [vmem:[#allocation2] sm:$0xff] %vm3272_vm14, %v3270_v23  ;;  %7449 = vmatprep.subr.mxu0 %v7959_v8  ;;  %vm9296_vm14 = vcmask 191488  }
 0xb0c   : > { %3312 = vst.msk [vmem:[#allocation2 + $0x8] sm:$0x7] %vm3311_vm10, %v3309_v24  ;;  %vm4122_vm10 = vcmask 421056  }
 0xb0d   : > { %3279 = vst.msk [vmem:[#allocation2] sm:$0x7f] %vm3278_vm2, %v3276_v15  ;;  %vm3741_vm2 = vcmask 388288  }
 0xb0e   : > { %3283 = vst.msk [vmem:[#allocation2 + $0x7] sm:$0x1] %vm3282_vm0, %v7959_v8  ;;  %vm3749_vm0 = vcmask 584064  }
 0xb0f   : > { %4121 = vst.msk [vmem:[#allocation2 + $0x10] sm:$0xf] %vm9296_vm14, %v7959_v8 }
 0xb10   : > { %4123 = vst.msk [vmem:[#allocation2 + $0x10] sm:$0xf] %vm4122_vm10, %v7959_v8  ;;  %vm3772_vm10 = vcmask 125952  }
 0xb13   : > { %v3316_v25 = vld [vmem:[#allocation2 + $0x8] sm:$0xff] }
 0xb14   : > { %v3318_v27 = vpack.c.bf16 %v3316_v25, %v3316_v25 }
 0xb15   : > { %v3315_v26 = vld [vmem:[#allocation2] sm:$0xff] }
 0xb16   : > { %v3317_v28 = vpack.c.bf16 %v3315_v26, %v3315_v26  ;;  %6980 = vmatprep.mubr.msk.bf16.mxu1 %vm3436_vm3, %v3318_v27  ;;  %3740 = vst.msk [vmem:[#allocation2] sm:$0xf] %vm9296_vm14, %v7959_v8  ;;  %vm9301_vm3 = vcmask 779840   ;;  %v3809_v26 = vpack.c.bf16 %v8706_v53, %v8706_v53  ;;  %v7747_v53 = vld [vmem:[%s9421_s5 + $0x78] sm:$0xff]  }
 0xb17   : > { %3742 = vst.msk [vmem:[#allocation2] sm:$0xf] %vm3741_vm2, %v7959_v8 }
 0xb18   : > { %3476 = vmatmul.mubr.bf16.vlgmr.msra.gmra.mxu1 %v3317_v28  ;;  %3750 = vst.msk [vmem:[#allocation2] sm:$0x7] %vm3749_vm0, %v7959_v8 }
 0xb19   : > { %3758 = vst.msk [vmem:[#allocation2] sm:$0x3] %vm9301_vm3, %v7959_v8  ;;  %vm9313_vm3 = vcmask 913088  }
 0xb1a   : > { %3766 = vst.msk [vmem:[#allocation2] sm:$0x1] %vm9300_vm1, %v7959_v8  ;;  %vm3755_vm1 = vcmask 781890  }
 0xbd8   : > { %v3477_v33 = vpop.f32.mrf.mxu1 }
 0xbd9   : > { %v3478_v34 = vadd.f32 %v6965_v32, %v3477_v33 }
 0xbda   : > { %v3479_v35 = vpop.f32.mrf.mxu1 }
 0xbdb   : > { %3484 = vrot.lane.b32.xlu0 %v3478_v34, %s7980_s10  ;;  %s9410_s10 = sld [smem:[#allocation15_spill]] }
 0xbdc   : > { %v3480_v36 = vpop.f32.mrf.mxu1 }
 0xbde   : > { %v3481_v37 = vpop.f32.mrf.mxu1 }
 0xbe1   : > { %v7731_v54 = vld [vmem:[%s9410_s10 + $0x38] sm:$0xff]   ;;  %v7732_v55 = vld [vmem:[%s9410_s10 + $0x70] sm:$0xff]   ;;  %v7734_v56 = vld [vmem:[%s9410_s10 + $0x68] sm:$0xff]  }
 0xbe2   : > { %v7735_v63 = vld [vmem:[%s9410_s10 + $0x28] sm:$0xff]   ;;  %v7736_v2 = vld [vmem:[%s9410_s10 + $0x60] sm:$0xff]   ;;  %v7738_v5 = vld [vmem:[%s9410_s10 + $0x58] sm:$0xff]  }
 0xbe3   : > { %v7737_v3 = vld [vmem:[%s9410_s10 + $0x20] sm:$0xff]   ;;  %v7739_v11 = vld [vmem:[%s9410_s10 + $0x18] sm:$0xff]   ;;  %v7740_v13 = vld [vmem:[%s9410_s10 + $0x50] sm:$0xff]  }
 0xbe4   : > { %v7741_v15 = vld [vmem:[%s9410_s10 + $0x10] sm:$0xff]   ;;  %v7742_v16 = vld [vmem:[%s9410_s10 + $0x48] sm:$0xff]   ;;  %v7744_v20 = vld [vmem:[%s9410_s10 + $0x40] sm:$0xff]  }
 0xbe5   : > { %v7743_v19 = vld [vmem:[%s9410_s10 + $0x8] sm:$0xff]   ;;  %v7746_v21 = vld [vmem:[%s9410_s10 + $0x80] ss:$0 sps:$4 sm:$0xff]  }
 0xbe6   : > { %v7745_v24 = vld [vmem:[%s9410_s10] sm:$0xff]  }
 0xc4d   : > { %v3485_v38 = vpop.permute.xlu0 %3484 }
 0xc4e   : > { %3488 = vst.msk [vmem:[#allocation4] sm:$0xff] %vm3487_vm8, %v3485_v38  ;;  %vm9417_vm8 = vcmask 1043456  }
 0xc4f   : > { %v3952_v25 = vsel %vm9417_vm8, %v7746_v21, 0  ;;  %vm3778_vm8 = vcmask 321664  }
 0xc55   : > { %v8688_v40 = vld [vmem:[#allocation4] sm:$0xff] }
 0xc56   : > { %v3498_v42 = vmul.f32 %v6981_v39, %v8688_v40 }
 0xc58   : > { %v3505_v43 = vadd.f32 %v6982_v41, %v3498_v42 }
 0xc5a   : > { %v3506_v44 = vmax.f32 %v3505_v43, 0.0 }
 0xc5c   : > { %v3508_v45 = vpack.c.bf16 %v3506_v44, %v3506_v44 }
 0xc5e   : > { %7446 = vmatmul.mubr.msk.bf16.vlgmr.msra.gmra.mxu0 %vm9299_vm7, %v3508_v45  ;;  %vm3796_vm7 = vcmask 716289  }
 0xc5f   : > { %7451 = vmatprep.mubr.msk.f32.mxu0 %vm7961_vm11, %v7959_v8 }
 0xd1e   : > { %v3568_v48 = vpop.f32.mrf.mxu0 }
 0xd1f   : > { %v3569_v49 = vadd.f32 %v6983_v46, %v3568_v48 }
 0xd20   : > { %v7447_v50 = vpop.f32.mrf.mxu0 }
 0xd21   : > { %7450 = vmatpush3.msra.mxu0 %v3569_v49 }
 0xd22   : > { %v3571_v51 = vpop.f32.mrf.mxu0  ;;  %7452 = vmatmul.mubr.msk.f32.vlgmr.msra.gmra.mxu0 %vm9411_vm6, %v8560_v57  ;;  %7454 = vmatprep.subr.mxu0 %v7959_v8  ;;  %v7730_v57 = vld [vmem:[%s9410_s10 + $0x78] sm:$0xff]  }
 0xd23   : > { %7455 = vmatpush3.msra.mxu0 %v3569_v49  ;;  %7456 = vmatprep.mubr.msk.f32.mxu0 %vm7961_vm11, %v7959_v8 }
 0xd24   : > { %v7448_v52 = vpop.f32.mrf.mxu0  ;;  %7459 = vmatprep.subr.bf16.mxu0 %v7959_v8  ;;  %7211 = vmatprep.subr.bf16.mxu1 %v7730_v57  ;;  %v7748_v57 = vld [vmem:[%s9421_s5 + $0x38] sm:$0xff]  }
 0xd25   : > { %7212 = vmatpush3.bf16.msra.mxu1 %v7731_v54  ;;  %v7749_v54 = vld [vmem:[%s9421_s5 + $0x70] sm:$0xff]  }
 0xd26   : > { %7457 = vmatmul.mubr.msk.f32.vlgmr.msra.gmra.mxu0 %vm9412_vm13, %v8570_v1  ;;  %v7733_v1 = vld [vmem:[%s9410_s10 + $0x30] sm:$0xff]   ;;  %7213 = vmatprep.subr.bf16.mxu1 %v7732_v55  ;;  %vm3747_vm13 = vcmask 582016   ;;  %s9316_s10 = smov 28  }
 0xd27   : > { %7461 = vmatprep.mubr.msk.bf16.mxu0 %vm7961_vm11, %v7959_v8  ;;  %7460 = vmatpush3.bf16.msra.mxu0 %v3952_v25  ;;  %v7750_v55 = vld [vmem:[%s9421_s5 + $0x30] sm:$0xff]  }
 0xd28   : > { %7235 = vmatprep.subr.bf16.mxu0 %v7747_v53 }
 0xd29   : > { %7214 = vmatpush3.bf16.msra.mxu1 %v7733_v1  ;;  %v7751_v1 = vld [vmem:[%s9421_s5 + $0x68] sm:$0xff]  }
 0xd2a   : > { %7215 = vmatprep.subr.bf16.mxu1 %v7734_v56  ;;  %7462 = vmatmul.mubr.msk.bf16.vlgmr.msra.gmra.mxu0 %vm9411_vm6, %v3809_v26  ;;  %vm3794_vm6 = vcmask 713216  }
 0xd2b   : > { %7236 = vmatpush3.bf16.msra.mxu0 %v7748_v57 }
 0xd2c   : > { %7237 = vmatprep.subr.bf16.mxu0 %v7749_v54 }
 0xd2d   : > { %7216 = vmatpush3.bf16.msra.mxu1 %v7735_v63  ;;  %v7011_v63 = vld [vmem:[%s9424_s7] ss:$0 sm:$0xff]  ;;  %s9426_s7 = smov 56  }
 0xd2e   : > { %7217 = vmatprep.subr.bf16.mxu1 %v7736_v2 }
 0xd2f   : > { %7238 = vmatpush3.bf16.msra.mxu0 %v7750_v55 }
 0xd30   : > { %7239 = vmatprep.subr.bf16.mxu0 %v7751_v1 }
 0xd31   : > { %7218 = vmatpush3.bf16.msra.mxu1 %v7737_v3  ;;  %v7757_v3 = vld [vmem:[%s9421_s5 + $0x98] ss:$0 sps:$4 sm:$0x33]  }
 0xd32   : > { %7219 = vmatprep.subr.bf16.mxu1 %v7738_v5  ;;  %v7756_v5 = vld [vmem:[%s9421_s5 + $0x18] sm:$0xff]  }
 0xd35   : > { %7220 = vmatpush3.bf16.msra.mxu1 %v7739_v11 }
 0xd36   : > { %7221 = vmatprep.subr.bf16.mxu1 %v7740_v13  ;;  %v7760_v13 = vld [vmem:[%s9421_s5 + $0x90] sm:$0xff]  }
 0xd39   : > { %7222 = vmatpush3.bf16.msra.mxu1 %v7741_v15 }
 0xd3a   : > { %7223 = vmatprep.subr.bf16.mxu1 %v7742_v16 }
 0xd3d   : > { %7224 = vmatpush3.bf16.msra.mxu1 %v7743_v19  ;;  %v7764_v19 = vld [vmem:[%s9421_s5 + $0x40] sm:$0xff]  }
 0xd3e   : > { %7225 = vmatprep.subr.bf16.mxu1 %v7744_v20 }
 0xd41   : > { %7226 = vmatpush3.bf16.msra.mxu1 %v7745_v24  ;;  %v4126_v24 = vld [vmem:[#allocation2 + $0x10] sm:$0xf] }
 0xd42   : > { %7465 = vmatprep.subr.bf16.mxu1 %v7959_v8  ;;  %v4129_v25 = vpack.c.bf16 %v4126_v24, %v4126_v24 }
 0xde2   : > { %v3642_v58 = vpop.f32.mrf.mxu0 }
 0xde4   : > { %v7453_v59 = vpop.f32.mrf.mxu0 }
 0xde5   : > { %v7753_v59 = vld [vmem:[%s9421_s5 + $0x60] sm:$0xff]  }
 0xde6   : > { %v3714_v60 = vpop.f32.mrf.mxu0 }
 0xde7   : > { %v3718_v61 = vmax.f32 %v3642_v58, %v3714_v60  ;;  %v7752_v58 = vld [vmem:[%s9421_s5 + $0x28] sm:$0xff]   ;;  %v7754_v60 = vld [vmem:[%s9421_s5 + $0x20] sm:$0xff]  }
 0xde8   : > { %v7458_v62 = vpop.f32.mrf.mxu0  ;;  %7240 = vmatpush3.bf16.msra.mxu0 %v7752_v58 }
 0xde9   : > { %3720 = vst.msk [vmem:[#allocation5] sm:$0xf] %vm9296_vm14, %v3718_v61  ;;  %vm3780_vm14 = vcmask 319616   ;;  %7241 = vmatprep.subr.bf16.mxu0 %v7753_v59  ;;  %v7755_v62 = vld [vmem:[%s9421_s5 + $0x58] sm:$0xff]  }
 0xdea   : > { %v4028_v39 = vpop.f32.mrf.mxu0 }
 0xdec   : > { %v7463_v41 = vpop.f32.mrf.mxu0  ;;  %7242 = vmatpush3.bf16.msra.mxu0 %v7754_v60 }
 0xded   : > { %7243 = vmatprep.subr.bf16.mxu0 %v7755_v62 }
 0xdee   : > { %v4031_v42 = vpop.f32.mrf.mxu0 }
 0xdf0   : > { %v3721_v7 = vld [vmem:[#allocation5] sm:$0xf]  ;;  %v7464_v43 = vpop.f32.mrf.mxu0  ;;  %7244 = vmatpush3.bf16.msra.mxu0 %v7756_v5 }
 0xdf1   : > { %v3730_v10 = vmul.f32 %v6989_v4, %v3721_v7 }
 0xdf3   : > { %v3737_v12 = vadd.f32 %v6990_v9, %v3730_v10  ;;  %v7758_v10 = vld [vmem:[%s9421_s5 + $0x50] sm:$0xff]  }
 0xdf4   : > { %7245 = vmatprep.subr.bf16.mxu0 %v7758_v10 }
 0xdf5   : > { %v3738_v14 = vmax.f32 %v3737_v12, 0.0  ;;  %v7759_v12 = vld [vmem:[%s9421_s5 + $0x10] sm:$0xff]  }
 0xdf6   : > { %7246 = vmatpush3.bf16.msra.mxu0 %v7759_v12 }
 0xdf7   : > { %3744 = vrot.lane.b32.xlu0 %v3738_v14, %s9302_s18  ;;  %3767 = vrot.lane.b32.xlu1 %v3738_v14, %s9415_s22  ;;  %v3782_v17 = vrot.slane %v3738_v14, 2  ;;  %v3774_v18 = vrot.slane %v3738_v14, 1  ;;  %v3790_v22 = vrot.slane %v3738_v14, 3  ;;  %v3751_v23 = vrot.slane %v3738_v14, 6  ;;  %s9420_s18 = sld [smem:[#allocation12_spill]] }
 0xdf8   : > { %v3759_v27 = vrot.slane %v3738_v14, 7  ;;  %v7761_v14 = vld [vmem:[%s9421_s5 + $0x48] sm:$0xff]  }
 0xdf9   : > { %7247 = vmatprep.subr.bf16.mxu0 %v7761_v14 }
 0xdfb   : > { %3783 = vrot.lane.b32.xlu1 %v3782_v17, %s9400_s23  ;;  %3775 = vrot.lane.b32.xlu0 %v3774_v18, %s9416_s26  ;;  %v7762_v17 = vld [vmem:[%s9421_s5 + $0x8] sm:$0xff]  }
 0xdfc   : > { %v7763_v18 = vld [vmem:[%s9421_s5 + $0x88] sm:$0xff]   ;;  %7248 = vmatpush3.bf16.msra.mxu0 %v7762_v17 }
 0xdfd   : > { %v6991_v45 = vld [vmem:[%s9420_s18] ss:$0 sm:$0xff]  ;;  %s9423_s18 = sld [smem:[#allocation17_spill]]  ;;  %7249 = vmatprep.subr.bf16.mxu0 %v7764_v19 }
 0xdff   : > { %3791 = vrot.lane.b32.xlu1 %v3790_v22, %s9418_s0  ;;  %3752 = vrot.lane.b32.xlu0 %v3751_v23, %s9403_s2  ;;  %v7765_v22 = vld [vmem:[%s9421_s5] sm:$0xff]  }
 0xe00   : > { %v7766_v23 = vld [vmem:[%s9421_s5 + $0x80] sm:$0xff]   ;;  %7250 = vmatpush3.bf16.msra.mxu0 %v7765_v22  ;;  %s9430_s5 = sld [smem:[#allocation16_spill]] }
 0xe01   : > { %7477 = vmatprep.subr.bf16.mxu0 %v7959_v8 }
 0xe03   : > { %3760 = vrot.lane.b32.xlu1 %v3759_v27, %s9419_s1  ;;  %v7010_v61 = vld [vmem:[%s9423_s18] ss:$0 sm:$0xff]  ;;  %s9427_s18 = smov 12  }
 0xe69   : > { %v3745_v28 = vpop.permute.xlu0 %3744  ;;  %v3768_v29 = vpop.permute.xlu1 %3767 }
 0xe6a   : > { %3748 = vst.msk [vmem:[#allocation2 + $0x3] sm:$0x1] %vm3747_vm13, %v3745_v28  ;;  %vm3800_vm13 = vcmask 1044352  }
 0xe6b   : > { %3773 = vst.msk [vmem:[#allocation2 + $0x8] sm:$0xf] %vm3772_vm10, %v3768_v29  ;;  %vm3763_vm10 = vcmask 978689  }
 0xe6c   : > { %3781 = vst.msk [vmem:[#allocation2 + $0xb] sm:$0x1] %vm3780_vm14, %v7959_v8 }
 0xe6d   : > { %v3784_v30 = vpop.permute.xlu1 %3783  ;;  %v3776_v31 = vpop.permute.xlu0 %3775 }
 0xe6e   : > { %3779 = vst.msk [vmem:[#allocation2 + $0x8] sm:$0x7] %vm3778_vm8, %v3776_v31  ;;  %vm3770_vm8 = vcmask 1044416  }
 0xe6f   : > { %3789 = vst.msk [vmem:[#allocation2 + $0x8] sm:$0xc] %vm3788_vm15, %v7959_v8  ;;  %vm4059_vm15 = vcmask 224256  }
 0xe70   : > { %3787 = vst.msk [vmem:[#allocation2 + $0x8] sm:$0x3] %vm3786_vm5, %v3784_v30  ;;  %vm9311_vm5 = vcmask 453856  }
 0xe71   : > { %3797 = vst.msk [vmem:[#allocation2 + $0x8] sm:$0xe] %vm3796_vm7, %v7959_v8  ;;  %v3792_v32 = vpop.permute.xlu1 %3791  ;;  %v3753_v33 = vpop.permute.xlu0 %3752  ;;  %vm4038_vm7 = vcmask 224448  }
 0xe72   : > { %3795 = vst.msk [vmem:[#allocation2 + $0x8] sm:$0x1] %vm3794_vm6, %v3792_v32  ;;  %vm9309_vm6 = vcmask 682432  }
 0xe73   : > { %3756 = vst.msk [vmem:[#allocation2] sm:$0xc] %vm3755_vm1, %v3753_v33  ;;  %vm9425_vm1 = vcmask 1041408  }
 0xe74   : > { %3799 = vst.msk [vmem:[#allocation2 + $0x8] sm:$0xf] %vm9313_vm3, %v7959_v8  ;;  %v4297_v7 = vsel %vm9425_vm1, %v7757_v3, 0  ;;  %vm4093_vm1 = vcmask 322656   ;;  %vm9325_vm3 = vcmask 1044448  }
 0xe75   : > { %3801 = vst.msk [vmem:[#allocation2 + $0x8] sm:$0xf] %vm3800_vm13, %v7959_v8  ;;  %v3761_v34 = vpop.permute.xlu1 %3760  ;;  %vm9308_vm13 = vcmask 911008  }
 0xe76   : > { %3764 = vst.msk [vmem:[#allocation2] sm:$0xe] %vm3763_vm10, %v3761_v34  ;;  %vm9307_vm10 = vcmask 1041280  }
 0xe77   : > { %3771 = vst.msk [vmem:[#allocation2] sm:$0xf] %vm3770_vm8, %v3768_v29  ;;  %vm9310_vm8 = vcmask 424960  }
 0xe7c   : > { %v3805_v35 = vld [vmem:[#allocation2 + $0x8] sm:$0xf] }
 0xe7d   : > { %v3808_v36 = vpack.c.bf16 %v3805_v35, %v3805_v35  ;;  %4089 = vst.msk [vmem:[#allocation2 + $0x8] sm:$0x1] %vm9312_vm4, %v7959_v8  ;;  %vm4117_vm4 = vcmask 1011457  }
 0xe7e   : > { %v3804_v37 = vld [vmem:[#allocation2] sm:$0xf] }
 0xe7f   : > { %3986 = vmatprep.mubr.bf16.mxu1 %v3808_v36  ;;  %v3807_v38 = vpack.c.bf16 %v3804_v37, %v3804_v37  ;;  %4060 = vst.msk [vmem:[#allocation2] sm:$0xf] %vm4059_vm15, %v7959_v8  ;;  %vm4067_vm15 = vcmask 680384  }
 0xe80   : > { %4062 = vst.msk [vmem:[#allocation2] sm:$0xf] %vm9311_vm5, %v7959_v8  ;;  %vm4115_vm5 = vcmask 1008384  }
 0xe81   : > { %3987 = vmatmul.mubr.bf16.vlgmr.msra.gmra.mxu1 %v3807_v38  ;;  %4070 = vst.msk [vmem:[#allocation2] sm:$0x7] %vm9309_vm6, %v7959_v8  ;;  %vm4107_vm6 = vcmask 779808  }
 0xe82   : > { %7473 = vmatprep.mubr.msk.bf16.mxu1 %vm7961_vm11, %v7959_v8  ;;  %7466 = vmatpush3.bf16.msra.mxu1 %v4297_v7  ;;  %4078 = vst.msk [vmem:[#allocation2] sm:$0x3] %vm9308_vm13, %v7959_v8  ;;  %vm4099_vm13 = vcmask 551232  }
 0xe83   : > { %7467 = vmatprep.subr.bf16.mxu1 %v7959_v8  ;;  %4088 = vst.msk [vmem:[#allocation2] sm:$0x1] %vm9307_vm10, %v7959_v8  ;;  %vm9326_vm10 = vcmask 549184  }
 0xe86   : > { %7468 = vmatpush3.bf16.msra.mxu1 %v7760_v13 }
 0xe87   : > { %7469 = vmatprep.subr.bf16.mxu1 %v7959_v8 }
 0xe8a   : > { %7470 = vmatpush3.bf16.msra.mxu1 %v7763_v18 }
 0xe8b   : > { %7471 = vmatprep.subr.bf16.mxu1 %v7959_v8 }
 0xe8e   : > { %7472 = vmatpush3.bf16.msra.mxu1 %v7766_v23 }
 0xe8f   : > { %7488 = vmatprep.subr.mxu1 %v7959_v8 }
 0xe91   : > { %7474 = vmatmul.mubr.msk.bf16.vlgmr.msra.gmra.mxu1 %vm9310_vm8, %v4129_v25  ;;  %vm4109_vm8 = vcmask 781858  }
 0xe92   : > { %7490 = vmatprep.mubr.msk.f32.mxu1 %vm7961_vm11, %v7959_v8 }
 0xf41   : > { %v7227_v44 = vpop.f32.mrf.mxu1 }
 0xf43   : > { %v7228_v46 = vpop.f32.mrf.mxu1 }
 0xf44   : > { %v7229_v48 = vadd.f32 %v7228_v46, %v7227_v44  ;;  %v7012_v44 = vld [vmem:[%s9430_s5] ss:$0 sm:$0xff]  ;;  %s9318_s5 = smov 104  }
 0xf45   : > { %v7230_v49 = vpop.f32.mrf.mxu1 }
 0xf46   : > { %v3989_v50 = vadd.f32 %v7229_v48, %v6991_v45 }
 0xf47   : > { %v7231_v51 = vpop.f32.mrf.mxu1 }
 0xf48   : > { %v4029_v52 = vadd.f32 %v4028_v39, %v3989_v50  ;;  %v4387_v51 = vld [vmem:[%s9431_s3] sm:$0xf]  ;;  %s9439_s3 = sld [smem:[#allocation58_spill]] }
 0xf4a   : > { %4035 = vrot.lane.b32.xlu0 %v4029_v52, %s9422_s6 }
 0xf51   : > { %v4373_v38 = vpop.f32.mrf.mxu1 }
 0xf53   : > { %v7475_v39 = vpop.f32.mrf.mxu1 }
 0xf55   : > { %v4376_v41 = vpop.f32.mrf.mxu1 }
 0xf57   : > { %v7476_v42 = vpop.f32.mrf.mxu1 }
 0xfbc   : > { %v4036_v56 = vpop.permute.xlu0 %4035 }
 0xfbd   : > { %4039 = vst.msk [vmem:[#allocation5] sm:$0xf] %vm4038_vm7, %v4036_v56  ;;  %vm4085_vm7 = vcmask 93185   ;;  %v8832_v56 = vmul.u32 2, %v8318_v6 }
 0xfbf   : > { %v8847_v62 = vadd.s32 1, %v8832_v56 }
 0xfc4   : > { %v4040_v2 = vld [vmem:[#allocation5] sm:$0xf] }
 0xfc5   : > { %v4049_v4 = vmul.f32 %v7010_v61, %v4040_v2 }
 0xfc7   : > { %v4056_v9 = vadd.f32 %v7011_v63, %v4049_v4  ;;  %v8852_v63 = vadd.s32 2, %v8832_v56 }
 0xfc9   : > { %v4057_v11 = vmax.f32 %v4056_v9, 0.0 }
 0xfcb   : > { %4064 = vrot.lane.b32.xlu1 %v4057_v11, %s9426_s7  ;;  %4090 = vrot.lane.b32.xlu0 %v4057_v11, %s9427_s18  ;;  %v4103_v15 = vrot.slane %v4057_v11, 2  ;;  %v4079_v16 = vrot.slane %v4057_v11, 7  ;;  %v4111_v20 = vrot.slane %v4057_v11, 3  ;;  %v4095_v21 = vrot.slane %v4057_v11, 1 }
 0xfcc   : > { %v4071_v26 = vrot.slane %v4057_v11, 6 }
 0xfcf   : > { %4104 = vrot.lane.b32.xlu0 %v4103_v15, %s9305_s8  ;;  %4080 = vrot.lane.b32.xlu1 %v4079_v16, %s9428_s9  ;;  %s9429_s8 = smov 84  }
 0xfd3   : > { %4112 = vrot.lane.b32.xlu0 %v4111_v20, %s9419_s1  ;;  %4096 = vrot.lane.b32.xlu1 %v4095_v21, %s9400_s23  ;;  %v7041_v21 = vld [vmem:[%s9439_s3] ss:$0 sm:$0xff]  ;;  %s9443_s3 = smov 32  }
 0xfd7   : > { %4072 = vrot.lane.b32.xlu1 %v4071_v26, %s9429_s8 }
0x103d   : > { %v4065_v27 = vpop.permute.xlu1 %4064  ;;  %v4091_v28 = vpop.permute.xlu0 %4090 }
0x103e   : > { %4068 = vst.msk [vmem:[#allocation2 + $0x3] sm:$0x1] %vm4067_vm15, %v4065_v27  ;;  %vm4075_vm15 = vcmask 913058  }
0x1041   : > { %v4105_v29 = vpop.permute.xlu0 %4104  ;;  %v4081_v30 = vpop.permute.xlu1 %4080 }
0x1042   : > { %4086 = vst.msk [vmem:[#allocation2 + $0x8] sm:$0xe] %vm4085_vm7, %v4081_v30  ;;  %vm4083_vm7 = vcmask 1044353  }
0x1043   : > { %4094 = vst.msk [vmem:[#allocation2 + $0x8] sm:$0xf] %vm4093_vm1, %v4091_v28  ;;  %vm4747_vm1 = vcmask 253952  }
0x1044   : > { %4102 = vst.msk [vmem:[#allocation2 + $0xb] sm:$0x1] %vm9326_vm10, %v7959_v8  ;;  %vm5135_vm10 = vcmask 259072  }
0x1045   : > { %v4097_v31 = vpop.permute.xlu1 %4096  ;;  %v4113_v32 = vpop.permute.xlu0 %4112 }
0x1046   : > { %4100 = vst.msk [vmem:[#allocation2 + $0x8] sm:$0x7] %vm4099_vm13, %v4097_v31  ;;  %vm4438_vm13 = vcmp.eq.s32.totalorder %v8554_v47, %v8832_v56 }
0x1047   : > { %4108 = vst.msk [vmem:[#allocation2 + $0x8] sm:$0x3] %vm4107_vm6, %v4105_v29  ;;  %vm9433_vm6 = vcmask 64512   ;;  %v8837_v59 = vsel %vm4438_vm13, 1.0, %v7959_v8  ;;  %vm9441_vm13 = vcmask 64512  }
0x1048   : > { %4110 = vst.msk [vmem:[#allocation2 + $0x8] sm:$0xc] %vm4109_vm8, %v7959_v8 }
0x1049   : > { %4116 = vst.msk [vmem:[#allocation2 + $0x8] sm:$0x1] %vm4115_vm5, %v4113_v32  ;;  %v4073_v33 = vpop.permute.xlu1 %4072  ;;  %vm4383_vm5 = vcmask 257248  }
0x104a   : > { %4118 = vst.msk [vmem:[#allocation2 + $0x8] sm:$0xe] %vm4117_vm4, %v7959_v8  ;;  %vm9432_vm4 = vcmask 1043456  }
0x104b   : > { %4120 = vst.msk [vmem:[#allocation2 + $0x8] sm:$0xf] %vm9325_vm3, %v7959_v8  ;;  %v4395_v53 = vsel %vm9432_vm4, %v4387_v51, 0  ;;  %vm9434_vm8 = vmmov %vm9432_vm4  ;;  %vm5133_vm3 = vcmask 1046496  }
0x104c   : > { %4076 = vst.msk [vmem:[#allocation2] sm:$0xc] %vm4075_vm15, %v4073_v33  ;;  %vm4441_vm15 = vcmp.eq.s32.totalorder %v8554_v47, %v8847_v62 }
0x104d   : > { %4084 = vst.msk [vmem:[#allocation2] sm:$0xe] %vm4083_vm7, %v4081_v30  ;;  %v8855_v2 = vsel %vm4441_vm15, 1.0, %v7959_v8  ;;  %vm4597_vm7 = vcmp.eq.s32.totalorder %v8554_v47, %v8852_v63  ;;  %v7042_v30 = vld [vmem:[%s9440_s11] ss:$0 sm:$0xff]  ;;  %vm4733_vm15 = vcmask 780800  }
0x104e   : > { %v8867_v4 = vsel %vm4597_vm7, 1.0, %v7959_v8  ;;  %vm4741_vm7 = vcmask 1042176   ;;  %s9446_s11 = sld [smem:[#allocation49_spill]] }
0x1052   : > { %v4125_v34 = vld [vmem:[#allocation2 + $0x8] sm:$0xf] }
0x1053   : > { %v4128_v35 = vpack.c.bf16 %v4125_v34, %v4125_v34  ;;  %4748 = vst.msk [vmem:[#allocation2 + $0x8] sm:$0x1] %vm4747_vm1, %v7959_v8  ;;  %vm9437_vm1 = vmmov %vm9432_vm4  ;;  %v7043_v34 = vld [vmem:[%s9442_s12] ss:$0 sm:$0xff]  ;;  %s9445_s12 = sld [smem:[#allocation42_spill]] }
0x1054   : > { %v4124_v36 = vld [vmem:[#allocation2] sm:$0xf]  ;;  %vm9438_vm4 = vmmov %vm9437_vm1 }
0x1055   : > { %4331 = vmatprep.mubr.bf16.mxu0 %v4128_v35  ;;  %v4127_v37 = vpack.c.bf16 %v4124_v36, %v4124_v36 }
0x1057   : > { %4332 = vmatmul.mubr.bf16.vlgmr.msra.gmra.mxu0 %v4127_v37 }
0x1058   : > { %7479 = vmatprep.mubr.msk.bf16.mxu0 %vm7961_vm11, %v7959_v8  ;;  %7478 = vmatpush3.bf16.msra.mxu0 %v4395_v53 }
0x1059   : > { %7483 = vmatprep.subr.mxu0 %v7959_v8 }
0x1117   : > { %v7251_v43 = vpop.f32.mrf.mxu0 }
0x1119   : > { %v7252_v45 = vpop.f32.mrf.mxu0 }
0x111a   : > { %v7253_v46 = vadd.f32 %v7252_v45, %v7251_v43 }
0x111b   : > { %v7254_v48 = vpop.f32.mrf.mxu0 }
0x111c   : > { %v4334_v49 = vadd.f32 %v7253_v46, %v7012_v44 }
0x111d   : > { %v7255_v50 = vpop.f32.mrf.mxu0 }
0x111e   : > { %v4374_v52 = vadd.f32 %v4373_v38, %v4334_v49 }
0x1120   : > { %4380 = vrot.lane.b32.xlu0 %v4374_v52, %s9316_s10  ;;  %s9435_s10 = smov 8  }
0x1192   : > { %v4381_v57 = vpop.permute.xlu0 %4380 }
0x1193   : > { %4384 = vst.msk [vmem:[#allocation5] sm:$0xf] %vm4383_vm5, %v4381_v57  ;;  %vm4717_vm5 = vcmask 258048  }
0x1194   : > { %4718 = vst.msk [vmem:[#allocation2] sm:$0x1f] %vm4717_vm5, %v7959_v8 }
0x119a   : > { %v4385_v54 = vld [vmem:[#allocation5] sm:$0xf] }
0x119b   : > { %v4386_v55 = vpack.c.bf16 %v4385_v54, %v4385_v54 }
0x119d   : > { %4389 = vrot.lane.b32.xlu1 %v4386_v55, %s9318_s5  ;;  %s9436_s5 = sld [smem:[#allocation45_spill]] }
0x11a3   : > { %v7767_v9 = vld [vmem:[%s9436_s5 + $0x78] sm:$0xff]   ;;  %v7769_v11 = vld [vmem:[%s9436_s5 + $0x70] sm:$0xff]   ;;  %v7771_v12 = vld [vmem:[%s9436_s5 + $0xa8] sm:$0xff]  }
0x11a4   : > { %v7768_v10 = vld [vmem:[%s9436_s5 + $0x38] sm:$0xff]   ;;  %v7770_v13 = vld [vmem:[%s9436_s5 + $0x30] sm:$0xff]   ;;  %v7774_v14 = vld [vmem:[%s9436_s5 + $0xa0] sm:$0xff]  }
0x11a5   : > { %v7772_v15 = vld [vmem:[%s9436_s5 + $0x68] sm:$0xff]   ;;  %v7775_v26 = vld [vmem:[%s9436_s5 + $0x60] sm:$0xff]   ;;  %v7777_v28 = vld [vmem:[%s9436_s5 + $0x98] sm:$0xff]  }
0x11a6   : > { %v7773_v16 = vld [vmem:[%s9436_s5 + $0x28] sm:$0xff]   ;;  %v7776_v27 = vld [vmem:[%s9436_s5 + $0x20] sm:$0xff]   ;;  %v7778_v29 = vld [vmem:[%s9436_s5 + $0x58] sm:$0xff]  }
0x11a7   : > { %v7779_v31 = vld [vmem:[%s9436_s5 + $0x18] sm:$0xff]   ;;  %v7780_v32 = vld [vmem:[%s9436_s5 + $0x90] sm:$0xff]   ;;  %v7783_v38 = vld [vmem:[%s9436_s5 + $0x88] sm:$0xff]  }
0x11a8   : > { %v7781_v36 = vld [vmem:[%s9436_s5 + $0x50] sm:$0xff]   ;;  %v7784_v42 = vld [vmem:[%s9436_s5 + $0x48] sm:$0xff]   ;;  %v7786_v44 = vld [vmem:[%s9436_s5 + $0x80] sm:$0xff]  }
0x11a9   : > { %v7782_v37 = vld [vmem:[%s9436_s5 + $0x10] sm:$0xff]   ;;  %v7785_v43 = vld [vmem:[%s9436_s5 + $0x8] sm:$0xff]   ;;  %v7787_v50 = vld [vmem:[%s9436_s5 + $0x40] sm:$0xff]  }
0x11aa   : > { %v7788_v51 = vld [vmem:[%s9436_s5] sm:$0xff]   ;;  %s9448_s5 = sld [smem:[#allocation48_spill]] }
0x120f   : > { %v4390_v1 = vpop.permute.xlu1 %4389 }
0x1210   : > { %7480 = vmatmul.mubr.msk.bf16.vlgmr.msra.gmra.mxu0 %vm9433_vm6, %v4390_v1  ;;  %vm4691_vm6 = vcmask 261184  }
0x1211   : > { %7485 = vmatprep.mubr.msk.f32.mxu0 %vm7961_vm11, %v7959_v8 }
0x12d0   : > { %v4431_v58 = vpop.f32.mrf.mxu0 }
0x12d1   : > { %4599 = vrot.lane.b32.xlu1 %v4431_v58, %s9428_s9  ;;  %4444 = vrot.lane.b32.xlu0 %v4431_v58, %s9415_s22 }
0x12d2   : > { %7489 = vmatpush3.msk.msra.mxu1 %vm9434_vm8, %v4431_v58  ;;  %v7481_v60 = vpop.f32.mrf.mxu0  ;;  %vm4725_vm8 = vcmask 519424  }
0x12d3   : > { %7491 = vmatmul.mubr.msk.f32.vlgmr.msra.gmra.mxu1 %vm9320_vm9, %v8837_v59  ;;  %7270 = vmatprep.subr.bf16.mxu1 %v7767_v9  ;;  %4726 = vst.msk [vmem:[#allocation2] sm:$0xf] %vm4725_vm8, %v7959_v8 }
0x12d4   : > { %v4434_v61 = vpop.f32.mrf.mxu0  ;;  %7271 = vmatpush3.bf16.msra.mxu1 %v7768_v10  ;;  %4734 = vst.msk [vmem:[#allocation2] sm:$0x7] %vm4733_vm15, %v7959_v8 }
0x12d5   : > { %4688 = vrot.lane.b32.xlu0 %v8688_v40, %s9435_s10  ;;  %7272 = vmatprep.subr.bf16.mxu1 %v7769_v11  ;;  %4742 = vst.msk [vmem:[#allocation2] sm:$0x3] %vm4741_vm7, %v7959_v8  ;;  %vm4731_vm7 = vcmask 785923  }
0x12d6   : > { %v7482_v6 = vpop.f32.mrf.mxu0 }
0x12d8   : > { %7273 = vmatpush3.bf16.msra.mxu1 %v7770_v13 }
0x12d9   : > { %7274 = vmatprep.subr.bf16.mxu1 %v7772_v15 }
0x12dc   : > { %7275 = vmatpush3.bf16.msra.mxu1 %v7773_v16 }
0x12dd   : > { %7276 = vmatprep.subr.bf16.mxu1 %v7775_v26  ;;  %v7794_v26 = vld [vmem:[%s9446_s11 + $0xb0] sm:$0xff]  }
0x12e0   : > { %7277 = vmatpush3.bf16.msra.mxu1 %v7776_v27  ;;  %v7793_v27 = vld [vmem:[%s9446_s11 + $0x30] sm:$0xff]  }
0x12e1   : > { %7278 = vmatprep.subr.bf16.mxu1 %v7778_v29 }
0x12e4   : > { %7279 = vmatpush3.bf16.msra.mxu1 %v7779_v31  ;;  %v7797_v31 = vld [vmem:[%s9446_s11 + $0xa8] sm:$0xff]  }
0x12e5   : > { %7280 = vmatprep.subr.bf16.mxu1 %v7781_v36 }
0x12e8   : > { %7281 = vmatpush3.bf16.msra.mxu1 %v7782_v37  ;;  %v7069_v37 = vld [vmem:[%s9448_s5] ss:$0 sm:$0xff]  ;;  %s9449_s5 = smov 52  }
0x12e9   : > { %7282 = vmatprep.subr.bf16.mxu1 %v7784_v42 }
0x12ec   : > { %7283 = vmatpush3.bf16.msra.mxu1 %v7785_v43  ;;  %v7803_v43 = vld [vmem:[%s9446_s11 + $0x98] sm:$0xff]  }
0x12ed   : > { %7284 = vmatprep.subr.bf16.mxu1 %v7787_v50 }
0x12f0   : > { %7285 = vmatpush3.bf16.msra.mxu1 %v7788_v51  ;;  %v7807_v51 = vld [vmem:[%s9446_s11 + $0x48] sm:$0xff]  }
0x12f1   : > { %5425 = vmatprep.subr.bf16.mxu1 %v7958_v0 }
0x1343   : > { %v4445_v3 = vpop.permute.xlu0 %4444  ;;  %v4600_v40 = vpop.permute.xlu1 %4599 }
0x1344   : > { %7484 = vmatpush3.msk.msra.mxu0 %vm9437_vm1, %v4445_v3  ;;  %vm4745_vm1 = vcmask 261121  }
0x1345   : > { %7486 = vmatmul.mubr.msk.f32.vlgmr.msra.gmra.mxu0 %vm9320_vm9, %v8855_v2  ;;  %7493 = vmatprep.subr.mxu0 %v7959_v8 }
0x1346   : > { %7494 = vmatpush3.msk.msra.mxu0 %vm9438_vm4, %v4600_v40  ;;  %7495 = vmatprep.mubr.msk.f32.mxu0 %vm7961_vm11, %v7959_v8  ;;  %vm4723_vm4 = vcmask 523524  }
0x1347   : > { %7498 = vmatprep.subr.bf16.mxu0 %v7959_v8  ;;  %v4689_v25 = vpop.permute.xlu0 %4688 }
0x1349   : > { %7496 = vmatmul.mubr.msk.f32.vlgmr.msra.gmra.mxu0 %vm9320_vm9, %v8867_v4  ;;  %vm4766_vm9 = vcmask 1046272  }
0x134a   : > { %7510 = vmatprep.mubr.msk.bf16.mxu0 %vm7961_vm11, %v7959_v8  ;;  %7499 = vmatpush3.bf16.msra.mxu0 %v7771_v12 }
0x134b   : > { %7500 = vmatprep.subr.bf16.mxu0 %v7959_v8 }
0x134e   : > { %7501 = vmatpush3.bf16.msra.mxu0 %v7774_v14  ;;  %v7044_v14 = vld [vmem:[%s9445_s12] ss:$0 sm:$0xff]  ;;  %s9447_s12 = sld [smem:[#allocation47_spill]] }
0x134f   : > { %7502 = vmatprep.subr.bf16.mxu0 %v7959_v8 }
0x1352   : > { %7503 = vmatpush3.bf16.msra.mxu0 %v7777_v28  ;;  %v7795_v28 = vld [vmem:[%s9446_s11 + $0x68] sm:$0xff]  }
0x1353   : > { %7504 = vmatprep.subr.bf16.mxu0 %v7959_v8 }
0x1356   : > { %7505 = vmatpush3.bf16.msra.mxu0 %v7780_v32  ;;  %v7798_v32 = vld [vmem:[%s9446_s11 + $0x60] sm:$0xff]  }
0x1357   : > { %7506 = vmatprep.subr.bf16.mxu0 %v7959_v8 }
0x135a   : > { %7507 = vmatpush3.bf16.msra.mxu0 %v7783_v38  ;;  %v7801_v38 = vld [vmem:[%s9446_s11 + $0x58] sm:$0xff]  }
0x135b   : > { %7508 = vmatprep.subr.bf16.mxu0 %v7959_v8 }
0x135e   : > { %7509 = vmatpush3.bf16.msra.mxu0 %v7786_v44  ;;  %v7804_v44 = vld [vmem:[%s9446_s11 + $0x50] sm:$0xff]  }
0x1393   : > { %v4592_v5 = vpop.f32.mrf.mxu1 }
0x1395   : > { %v7492_v7 = vpop.f32.mrf.mxu1 }
0x1405   : > { %v4517_v17 = vpop.f32.mrf.mxu0 }
0x1406   : > { %v4593_v19 = vadd.f32 %v4592_v5, %v4517_v17 }
0x1407   : > { %v7487_v18 = vpop.f32.mrf.mxu0 }
0x1409   : > { %v4672_v20 = vpop.f32.mrf.mxu0 }
0x140a   : > { %v4676_v22 = vadd.f32 %v4672_v20, %v4593_v19 }
0x140b   : > { %v7497_v23 = vpop.f32.mrf.mxu0 }
0x140c   : > { %v4684_v24 = vadd.f32 %v7041_v21, %v4676_v22  ;;  %v7789_v22 = vld [vmem:[%s9446_s11 + $0x78] sm:$0xff]  }
0x140d   : > { %v7790_v23 = vld [vmem:[%s9446_s11 + $0x38] sm:$0xff]   ;;  %7299 = vmatprep.subr.bf16.mxu0 %v7789_v22 }
0x140e   : > { %4685 = vst.msk [vmem:[#allocation6] sm:$0xff] %vm9441_vm13, %v4684_v24  ;;  %vm4760_vm13 = vcmask 778752   ;;  %v7791_v24 = vld [vmem:[%s9446_s11 + $0xb8] sm:$0xff]  }
0x140f   : > { %4692 = vst.msk [vmem:[#allocation6] sm:$0xff] %vm4691_vm6, %v4689_v25  ;;  %vm9444_vm6 = vcmask 261125   ;;  %v7792_v25 = vld [vmem:[%s9446_s11 + $0x70] sm:$0xff]  }
0x1416   : > { %v4693_v33 = vld [vmem:[#allocation6] sm:$0xff] }
0x1417   : > { %v4702_v35 = vmul.f32 %v7042_v30, %v4693_v33  ;;  %v7796_v30 = vld [vmem:[%s9446_s11 + $0x28] sm:$0xff]   ;;  %v7799_v33 = vld [vmem:[%s9446_s11 + $0x20] sm:$0xff]  }
0x1419   : > { %v4709_v39 = vadd.f32 %v7043_v34, %v4702_v35  ;;  %v7068_v34 = vld [vmem:[%s9447_s12] ss:$0 sm:$0xff]  ;;  %s9450_s12 = smov 108  }
0x141a   : > { %v7800_v35 = vld [vmem:[%s9446_s11 + $0xa0] sm:$0xff]  }
0x141b   : > { %v4710_v41 = vmax.f32 %v4709_v39, 0.0 }
0x141d   : > { %4749 = vrot.lane.b32.xlu1 %v4710_v41, %s9443_s3  ;;  %v4743_v45 = vrot.slane %v4710_v41, 7  ;;  %v4719_v46 = vrot.slane %v4710_v41, 4  ;;  %v4713_v48 = vrot.slane %v4710_v41, 3  ;;  %v4754_v49 = vrot.slane %v4710_v41, 1 }
0x141e   : > { %v4727_v52 = vrot.slane %v4710_v41, 5  ;;  %v4762_v53 = vrot.slane %v4710_v41, 2  ;;  %v4735_v57 = vrot.slane %v4710_v41, 6  ;;  %v7802_v41 = vld [vmem:[%s9446_s11 + $0x18] sm:$0xff]  }
0x141f   : > { %4720 = vrot.lane.b32.xlu0 %v4719_v46, %s9443_s3  ;;  %4746 = vst.msk [vmem:[#allocation2 + $0x8] sm:$0xfe] %vm4745_vm1, %v4743_v45  ;;  %vm4758_vm1 = vcmask 784896   ;;  %v7805_v46 = vld [vmem:[%s9446_s11 + $0x10] sm:$0xff]  }
0x1420   : > { %4716 = vst.msk [vmem:[#allocation2] sm:$0xe0] %vm9444_vm6, %v4713_v48  ;;  %vm4768_vm6 = vcmask 1048326  }
0x1421   : > { %4770 = vst.msk [vmem:[#allocation2 + $0x10] sm:$0x1f] %vm4717_vm5, %v4713_v48  ;;  %4755 = vrot.lane.b32.xlu1 %v4754_v49, %s9418_s0  ;;  %vm4752_vm5 = vcmask 523520   ;;  %v7806_v49 = vld [vmem:[%s9446_s11 + $0x90] sm:$0xff]  }
0x1422   : > { %4773 = vst.msk [vmem:[#allocation2 + $0x10] sm:$0xf0] %vm4723_vm4, %v7959_v8 }
0x1423   : > { %4728 = vrot.lane.b32.xlu0 %v4727_v52, %s9418_s0 }
0x1425   : > { %4763 = vrot.lane.b32.xlu1 %v4762_v53, %s9419_s1  ;;  %v7808_v53 = vld [vmem:[%s9446_s11 + $0x8] sm:$0xff]  }
0x1427   : > { %4736 = vrot.lane.b32.xlu0 %v4735_v57, %s9419_s1 }
0x148f   : > { %v4750_v54 = vpop.permute.xlu1 %4749 }
0x1490   : > { %4753 = vst.msk [vmem:[#allocation2 + $0x8] sm:$0xff] %vm4752_vm5, %v4750_v54  ;;  %vm4739_vm5 = vcmask 1048322   ;;  %v7809_v54 = vld [vmem:[%s9446_s11 + $0x88] sm:$0xff]  }
0x1491   : > { %v4721_v55 = vpop.permute.xlu0 %4720  ;;  %4761 = vst.msk [vmem:[#allocation2 + $0xf] sm:$0x1] %vm4760_vm13, %v7959_v8  ;;  %vm5114_vm13 = vcmask 417920  }
0x1492   : > { %4724 = vst.msk [vmem:[#allocation2] sm:$0xf0] %vm4723_vm4, %v4721_v55  ;;  %vm5106_vm4 = vcmask 123904  }
0x1493   : > { %4772 = vst.msk [vmem:[#allocation2 + $0x10] sm:$0xf] %vm4725_vm8, %v4721_v55  ;;  %v4756_v1 = vpop.permute.xlu1 %4755  ;;  %vm4964_vm8 = vcmask 785408   ;;  %v7810_v55 = vld [vmem:[%s9446_s11 + $0x40] sm:$0xff]  }
0x1494   : > { %4775 = vst.msk [vmem:[#allocation2 + $0x10] sm:$0xf8] %vm4731_vm7, %v7959_v8 }
0x1495   : > { %4759 = vst.msk [vmem:[#allocation2 + $0x8] sm:$0x7f] %vm4758_vm1, %v4756_v1  ;;  %v4729_v58 = vpop.permute.xlu0 %4728  ;;  %vm5094_vm1 = vcmask 879168   ;;  %v7811_v1 = vld [vmem:[%s9446_s11] sm:$0xff]  }
0x1496   : > { %4769 = vst.msk [vmem:[#allocation2 + $0x8] sm:$0xc0] %vm4768_vm6, %v7959_v8  ;;  %vm5104_vm6 = vcmask 1042272  }
0x1497   : > { %4732 = vst.msk [vmem:[#allocation2] sm:$0xf8] %vm4731_vm7, %v4729_v58  ;;  %v4764_v60 = vpop.permute.xlu1 %4763  ;;  %vm5086_vm7 = vcmask 584992  }
0x1498   : > { %4774 = vst.msk [vmem:[#allocation2 + $0x10] sm:$0x7] %vm4733_vm15, %v4729_v58  ;;  %vm5078_vm15 = vcmask 290816  }
0x1499   : > { %4767 = vst.msk [vmem:[#allocation2 + $0x8] sm:$0x3f] %vm4766_vm9, %v4764_v60  ;;  %v4737_v61 = vpop.permute.xlu0 %4736  ;;  %vm5052_vm9 = vcmask 294144  }
0x149a   : > { %4740 = vst.msk [vmem:[#allocation2] sm:$0xfc] %vm4739_vm5, %v4737_v61  ;;  %vm5139_vm5 = vcmask 261126   ;;  %v7812_v61 = vld [vmem:[%s9446_s11 + $0x80] sm:$0xff]  }
0x149f   : > { %v4778_v6 = vld [vmem:[#allocation2 + $0x10] sm:$0xff] }
0x14a0   : > { %v4781_v3 = vpack.c.bf16 %v4778_v6, %v4778_v6  ;;  %v4777_v40 = vld [vmem:[#allocation2 + $0x8] sm:$0xff]  ;;  %5140 = vst.msk [vmem:[#allocation2 + $0x10] sm:$0xc0] %vm5139_vm5, %v7959_v8  ;;  %vm5125_vm5 = vcmask 1014464  }
0x14a1   : > { %5107 = vst.msk [vmem:[#allocation2 + $0x8] sm:$0x3] %vm5106_vm4, %v7959_v8  ;;  %v4780_v5 = vpack.c.bf16 %v4777_v40, %v4777_v40  ;;  %v4776_v7 = vld [vmem:[#allocation2] sm:$0xff]  ;;  %vm5076_vm4 = vcmask 293893  }
0x14a2   : > { %7511 = vmatmul.mubr.msk.bf16.vlgmr.msra.gmra.mxu0 %vm4964_vm8, %v4781_v3  ;;  %5115 = vst.msk [vmem:[#allocation2 + $0x8] sm:$0x1] %vm5114_vm13, %v7959_v8  ;;  %v4779_v9 = vpack.c.bf16 %v4776_v7, %v4776_v7  ;;  %vm5164_vm8 = vcmask 97283   ;;  %v7813_v3 = vld [vmem:[%s9446_s11 + $0xc0] sm:$0x3f]   ;;  %vm9452_vm13 = vcmask 1045504  }
0x14a3   : > { %5000 = vmatprep.mubr.bf16.mxu1 %v4780_v5  ;;  %7300 = vmatpush3.bf16.msra.mxu0 %v7790_v23  ;;  %5079 = vst.msk [vmem:[#allocation2] sm:$0x1f] %vm5078_vm15, %v7959_v8  ;;  %v5383_v40 = vsel %vm9452_vm13, %v7813_v3, 0  ;;  %vm5112_vm15 = vcmask 425089   ;;  %vm5100_vm13 = vcmask 1048418  }
0x14a4   : > { %5001 = vmatmul.mubr.bf16.vlgmr.msra.gmra.mxu1 %v4779_v9  ;;  %7301 = vmatprep.subr.bf16.mxu0 %v7792_v25  ;;  %5087 = vst.msk [vmem:[#allocation2] sm:$0xf] %vm5086_vm7, %v7959_v8  ;;  %vm5084_vm7 = vcmask 589092  }
0x14a5   : > { %5426 = vmatpush1.bf16.msra.mxu1 %v7791_v24  ;;  %5095 = vst.msk [vmem:[#allocation2] sm:$0x7] %vm5094_vm1, %v7959_v8  ;;  %vm5119_vm1 = vcmask 720288  }
0x14a6   : > { %5427 = vmatprep.subr.bf16.mxu1 %v7958_v0  ;;  %5105 = vst.msk [vmem:[#allocation2] sm:$0x3] %vm5104_vm6, %v7959_v8  ;;  %vm5127_vm6 = vcmask 1008320  }
0x14a7   : > { %7302 = vmatpush3.bf16.msra.mxu0 %v7793_v27  ;;  %5165 = vst.msk [vmem:[#allocation2 + $0x18] sm:$0xf8] %vm5164_vm8, %v7959_v8  ;;  %vm5092_vm8 = vcmask 884291  }
0x14a8   : > { %7303 = vmatprep.subr.bf16.mxu0 %v7795_v28 }
0x14a9   : > { %5428 = vmatpush1.bf16.msra.mxu1 %v7794_v26 }
0x14aa   : > { %5429 = vmatprep.subr.bf16.mxu1 %v7958_v0 }
0x14ab   : > { %7304 = vmatpush3.bf16.msra.mxu0 %v7796_v30 }
0x14ac   : > { %7305 = vmatprep.subr.bf16.mxu0 %v7798_v32  ;;  %v5473_v32 = vld [vmem:[%s8280_s17] sm:$0xf] }
0x14ad   : > { %5430 = vmatpush1.bf16.msra.mxu1 %v7797_v31 }
0x14ae   : > { %5431 = vmatprep.subr.bf16.mxu1 %v7958_v0 }
0x14af   : > { %7306 = vmatpush3.bf16.msra.mxu0 %v7799_v33 }
0x14b0   : > { %7307 = vmatprep.subr.bf16.mxu0 %v7801_v38 }
0x14b1   : > { %5432 = vmatpush1.bf16.msra.mxu1 %v7800_v35 }
0x14b2   : > { %5433 = vmatprep.subr.bf16.mxu1 %v7958_v0 }
0x14b3   : > { %7308 = vmatpush3.bf16.msra.mxu0 %v7802_v41 }
0x14b4   : > { %7309 = vmatprep.subr.bf16.mxu0 %v7804_v44 }
0x14b5   : > { %5434 = vmatpush1.bf16.msra.mxu1 %v7803_v43 }
0x14b6   : > { %5435 = vmatprep.subr.bf16.mxu1 %v7958_v0 }
0x14b7   : > { %7310 = vmatpush3.bf16.msra.mxu0 %v7805_v46 }
0x14b8   : > { %7311 = vmatprep.subr.bf16.mxu0 %v7807_v51 }
0x14b9   : > { %5436 = vmatpush1.bf16.msra.mxu1 %v7806_v49  ;;  %v5790_v49 = vld [vmem:[#allocation3] sm:$0xff] }
0x14ba   : > { %5437 = vmatprep.subr.bf16.mxu1 %v7958_v0 }
0x14bb   : > { %7312 = vmatpush3.bf16.msra.mxu0 %v7808_v53 }
0x14bc   : > { %7313 = vmatprep.subr.bf16.mxu0 %v7810_v55  ;;  %v7104_v55 = vld [vmem:[#allocation8] ss:$0 sm:$0xff] }
0x14bd   : > { %5438 = vmatpush1.bf16.msra.mxu1 %v7809_v54 }
0x14be   : > { %5439 = vmatprep.subr.bf16.mxu1 %v7958_v0 }
0x14bf   : > { %7314 = vmatpush3.bf16.msra.mxu0 %v7811_v1 }
0x14c0   : > { %7514 = vmatprep.subr.bf16.mxu0 %v7959_v8 }
0x14c1   : > { %5440 = vmatpush1.bf16.msra.mxu1 %v7812_v61 }
0x14c2   : > { %5455 = vmatprep.subr.bf16.mxu1 %v7958_v0 }
0x14c5   : > { %5456 = vmatpush2.bf16.msra.mxu1 %v5383_v40 }
0x1562   : > { %v5042_v10 = vpop.f32.mrf.mxu0 }
0x1564   : > { %v7512_v11 = vpop.f32.mrf.mxu0  ;;  %v7286_v12 = vpop.f32.mrf.mxu1 }
0x1566   : > { %v5045_v13 = vpop.f32.mrf.mxu0  ;;  %v7287_v15 = vpop.f32.mrf.mxu1 }
0x1567   : > { %v7288_v17 = vadd.f32 %v7287_v15, %v7286_v12 }
0x1568   : > { %v7513_v16 = vpop.f32.mrf.mxu0  ;;  %v7289_v18 = vpop.f32.mrf.mxu1 }
0x1569   : > { %v5003_v19 = vadd.f32 %v7288_v17, %v7044_v14 }
0x156a   : > { %v7290_v20 = vpop.f32.mrf.mxu1 }
0x156b   : > { %v5043_v21 = vadd.f32 %v5042_v10, %v5003_v19 }
0x156d   : > { %5049 = vrot.lane.b32.xlu1 %v5043_v21, %s9443_s3 }
0x15df   : > { %v5050_v29 = vpop.permute.xlu1 %5049 }
0x15e0   : > { %5053 = vst.msk [vmem:[#allocation6] sm:$0xff] %vm5052_vm9, %v5050_v29  ;;  %vm5102_vm9 = vcmask 130050  }
0x15e7   : > { %v5054_v36 = vld [vmem:[#allocation6] sm:$0xff] }
0x15e8   : > { %v5063_v39 = vmul.f32 %v7068_v34, %v5054_v36 }
0x15ea   : > { %v5070_v42 = vadd.f32 %v7069_v37, %v5063_v39 }
0x15ec   : > { %v5071_v45 = vmax.f32 %v5070_v42, 0.0  ;;  %v5523_v42 = vadd.s32 8, %v8554_v47 }
0x15ee   : > { %5116 = vrot.lane.b32.xlu0 %v5071_v45, %s9449_s5  ;;  %v5108_v48 = vrot.slane %v5071_v45, 7  ;;  %v5074_v50 = vrot.slane %v5071_v45, 3  ;;  %v5096_v52 = vrot.slane %v5071_v45, 6  ;;  %v5080_v57 = vrot.slane %v5071_v45, 4  ;;  %s9451_s5 = smov 36  }
0x15ef   : > { %v5121_v58 = vrot.slane %v5071_v45, 1  ;;  %v5088_v60 = vrot.slane %v5071_v45, 5  ;;  %v5129_v6 = vrot.slane %v5071_v45, 2 }
0x15f0   : > { %5109 = vrot.lane.b32.xlu1 %v5108_v48, %s9416_s26  ;;  %5077 = vst.msk [vmem:[#allocation2] sm:$0xe0] %vm5076_vm4, %v5074_v50  ;;  %vm5137_vm4 = vcmask 1048550   ;;  %v5791_v48 = vld [vmem:[#allocation3 + $0x8] sm:$0xff] }
0x15f2   : > { %5097 = vrot.lane.b32.xlu0 %v5096_v52, %s9450_s12  ;;  %s7986_s12 = smov 124  }
0x15f4   : > { %5081 = vrot.lane.b32.xlu1 %v5080_v57, %s9451_s5 }
0x15f6   : > { %5122 = vrot.lane.b32.xlu0 %v5121_v58, %s9323_s13  ;;  %s9453_s13 = smov 68  }
0x15f8   : > { %5089 = vrot.lane.b32.xlu1 %v5088_v60, %s9403_s2 }
0x15fa   : > { %5130 = vrot.lane.b32.xlu0 %v5129_v6, %s7986_s12 }
0x15fc   : > { %5141 = vrot.lane.b32.xlu1 %v5074_v50, %s9443_s3  ;;  %s9464_s3 = sld [smem:[#allocation52_spill]] }
0x15fe   : > { %5148 = vrot.lane.b32.xlu0 %v5080_v57, %s9453_s13 }
0x1600   : > { %5155 = vrot.lane.b32.xlu1 %v5088_v60, %s9454_s14  ;;  %s9455_s14 = sld [smem:[#allocation46_spill]] }
0x1606   : > { %v7070_v26 = vld [vmem:[%s9455_s14] ss:$0 sm:$0xff]  ;;  %s9473_s14 = smov 88  }
0x1660   : > { %v5117_v5 = vpop.permute.xlu0 %5116 }
0x1662   : > { %v5110_v7 = vpop.permute.xlu1 %5109 }
0x1664   : > { %v5098_v9 = vpop.permute.xlu0 %5097 }
0x1665   : > { %5103 = vst.msk [vmem:[#allocation2 + $0x8] sm:$0xfc] %vm5102_vm9, %v5098_v9  ;;  %vm5146_vm9 = vcmask 556293  }
0x1666   : > { %v5082_v0 = vpop.permute.xlu1 %5081  ;;  %5113 = vst.msk [vmem:[#allocation2 + $0x8] sm:$0xfe] %vm5112_vm15, %v5110_v7  ;;  %vm5144_vm15 = vcmask 553216  }
0x1667   : > { %5085 = vst.msk [vmem:[#allocation2] sm:$0xf0] %vm5084_vm7, %v5082_v0  ;;  %vm5153_vm7 = vcmask 851492  }
0x1668   : > { %5120 = vst.msk [vmem:[#allocation2 + $0x8] sm:$0xff] %vm5119_vm1, %v5117_v5  ;;  %v5123_v10 = vpop.permute.xlu0 %5122  ;;  %vm5151_vm1 = vcmask 847392  }
0x1669   : > { %5128 = vst.msk [vmem:[#allocation2 + $0xf] sm:$0x1] %vm5127_vm6, %v7959_v8  ;;  %vm5162_vm6 = vcmask 1048387  }
0x166a   : > { %5126 = vst.msk [vmem:[#allocation2 + $0x8] sm:$0x7f] %vm5125_vm5, %v5123_v10  ;;  %v5090_v11 = vpop.permute.xlu1 %5089  ;;  %vm5158_vm5 = vcmask 1043264  }
0x166b   : > { %5138 = vst.msk [vmem:[#allocation2 + $0x8] sm:$0xc0] %vm5137_vm4, %v7959_v8  ;;  %vm5160_vm4 = vcmask 92160  }
0x166c   : > { %5093 = vst.msk [vmem:[#allocation2] sm:$0xf8] %vm5092_vm8, %v5090_v11  ;;  %v5131_v12 = vpop.permute.xlu0 %5130  ;;  %vm5469_vm8 = vcmask 326944  }
0x166d   : > { %5101 = vst.msk [vmem:[#allocation2] sm:$0xfc] %vm5100_vm13, %v5098_v9  ;;  %v7106_v9 = vld [vmem:[%s9464_s3] ss:$0 sm:$0xff] }
0x166e   : > { %5134 = vst.msk [vmem:[#allocation2 + $0x8] sm:$0x3f] %vm5133_vm3, %v5131_v12  ;;  %v5142_v13 = vpop.permute.xlu1 %5141  ;;  %vm9456_vm3 = vcmask 64512  }
0x166f   : > { %5136 = vst.msk [vmem:[#allocation2 + $0x10] sm:$0x3f] %vm5135_vm10, %v5131_v12  ;;  %vm9457_vm10 = vcmask 1043456   ;;  %vm9458_vm13 = vmmov %vm9456_vm3 }
0x1670   : > { %5147 = vst.msk [vmem:[#allocation2 + $0x10] sm:$0xe0] %vm5146_vm9, %v7959_v8  ;;  %v5149_v14 = vpop.permute.xlu0 %5148  ;;  %v5481_v34 = vsel %vm9457_vm10, %v5473_v32, 0  ;;  %vm9459_vm9 = vmmov %vm9456_vm3  ;;  %vm5800_vm10 = vcmask 195648  }
0x1671   : > { %5145 = vst.msk [vmem:[#allocation2 + $0x10] sm:$0x1f] %vm5144_vm15, %v5142_v13  ;;  %vm5524_vm15 = vcmp.eq.s32.totalorder %v5523_v42, %v8832_v56 }
0x1672   : > { %5154 = vst.msk [vmem:[#allocation2 + $0x10] sm:$0xf0] %vm5153_vm7, %v7959_v8  ;;  %v5156_v15 = vpop.permute.xlu1 %5155  ;;  %v5525_v44 = vsel %vm5524_vm15, 1.0, %v7959_v8  ;;  %vm9460_vm7 = vmmov %vm9456_vm3  ;;  %vm9468_vm15 = vcmask 779840  }
0x1673   : > { %5152 = vst.msk [vmem:[#allocation2 + $0x10] sm:$0xf] %vm5151_vm1, %v5149_v14  ;;  %vm5526_vm1 = vcmp.eq.s32.totalorder %v5523_v42, %v8847_v62 }
0x1674   : > { %5163 = vst.msk [vmem:[#allocation2 + $0x10] sm:$0xf8] %vm5162_vm6, %v7959_v8  ;;  %v5166_v16 = vld [vmem:[#allocation2] sm:$0xff]  ;;  %vm5692_vm6 = vcmp.eq.s32.totalorder %v5523_v42, %v8852_v63 }
0x1675   : > { %5159 = vst.msk [vmem:[#allocation2 + $0x10] sm:$0x7] %vm5158_vm5, %v5156_v15  ;;  %v5167_v17 = vld [vmem:[#allocation2 + $0x8] sm:$0xff]  ;;  %v5170_v19 = vpack.c.bf16 %v5166_v16, %v5166_v16  ;;  %vm9461_vm5 = vmmov %vm9456_vm3  ;;  %v5693_v51 = vsel %vm5692_vm6, 1.0, %v7959_v8  ;;  %vm9474_vm6 = vcmask 1043456  }
0x1676   : > { %5161 = vst.msk [vmem:[#allocation2 + $0x18] sm:$0x7] %vm5160_vm4, %v5156_v15  ;;  %v5171_v18 = vpack.c.bf16 %v5167_v17, %v5167_v17  ;;  %vm9462_vm4 = vmmov %vm9456_vm3 }
0x1678   : > { %5417 = vmatprep.mubr.bf16.mxu0 %v5171_v18 }
0x1679   : > { %5418 = vmatmul.mubr.bf16.vlgmr.msra.gmra.mxu0 %v5170_v19 }
0x167a   : > { %7516 = vmatprep.mubr.msk.bf16.mxu0 %vm7961_vm11, %v7959_v8  ;;  %7515 = vmatpush3.bf16.msra.mxu0 %v5481_v34 }
0x167c   : > { %v5168_v21 = vld [vmem:[#allocation2 + $0x10] sm:$0xff] }
0x167d   : > { %v5169_v20 = vld [vmem:[#allocation2 + $0x18] sm:$0xff]  ;;  %v5172_v23 = vpack.c.bf16 %v5168_v21, %v5168_v21 }
0x167e   : > { %v5173_v22 = vpack.c.bf16 %v5169_v20, %v5169_v20 }
0x1680   : > { %7096 = vmatprep.mubr.msk.bf16.mxu1 %vm2456_vm12, %v5173_v22 }
0x1681   : > { %5458 = vmatmul.mubr.bf16.vlgmr.msra.gmra.mxu1 %v5172_v23 }
0x1682   : > { %7527 = vmatprep.mubr.msk.f32.mxu1 %vm9456_vm3, %v8837_v59 }
0x1739   : > { %v7315_v24 = vpop.f32.mrf.mxu0 }
0x173b   : > { %v7316_v25 = vpop.f32.mrf.mxu0 }
0x173c   : > { %v7317_v27 = vadd.f32 %v7316_v25, %v7315_v24 }
0x173d   : > { %v7318_v28 = vpop.f32.mrf.mxu0 }
0x173e   : > { %v5420_v29 = vadd.f32 %v7317_v27, %v7070_v26 }
0x173f   : > { %v7319_v30 = vpop.f32.mrf.mxu0 }
0x1741   : > { %v5459_v31 = vpop.f32.mrf.mxu1 }
0x1742   : > { %v5460_v33 = vadd.f32 %v5459_v31, %v5420_v29 }
0x1743   : > { %v5461_v35 = vpop.f32.mrf.mxu1 }
0x1744   : > { %5466 = vrot.lane.b32.xlu0 %v5460_v33, %s9451_s5  ;;  %s9467_s5 = sld [smem:[#allocation53_spill]] }
0x1745   : > { %v5462_v36 = vpop.f32.mrf.mxu1 }
0x1747   : > { %v5463_v37 = vpop.f32.mrf.mxu1 }
0x174a   : > { %v7814_v19 = vld [vmem:[%s9467_s5 + $0x78] sm:$0xff]   ;;  %v7816_v24 = vld [vmem:[%s9467_s5 + $0x70] sm:$0xff]   ;;  %v7818_v27 = vld [vmem:[%s9467_s5 + $0x68] sm:$0xff]  }
0x174b   : > { %v7815_v21 = vld [vmem:[%s9467_s5 + $0x38] sm:$0xff]   ;;  %v7817_v26 = vld [vmem:[%s9467_s5 + $0x30] sm:$0xff]   ;;  %v7819_v29 = vld [vmem:[%s9467_s5 + $0x28] sm:$0xff]  }
0x174c   : > { %v7820_v31 = vld [vmem:[%s9467_s5 + $0x60] sm:$0xff]   ;;  %v7822_v36 = vld [vmem:[%s9467_s5 + $0x58] sm:$0xff]   ;;  %v7824_v42 = vld [vmem:[%s9467_s5 + $0x50] sm:$0xff]  }
0x174d   : > { %v7821_v33 = vld [vmem:[%s9467_s5 + $0x20] sm:$0xff]   ;;  %v7823_v37 = vld [vmem:[%s9467_s5 + $0x18] sm:$0xff]  }
0x17b6   : > { %v5467_v59 = vpop.permute.xlu0 %5466 }
0x17b7   : > { %5470 = vst.msk [vmem:[#allocation6] sm:$0xff] %vm5469_vm8, %v5467_v59  ;;  %vm9465_vm8 = vmmov %vm9456_vm3 }
0x17be   : > { %v5471_v38 = vld [vmem:[#allocation6] sm:$0xff] }
0x17bf   : > { %v5472_v39 = vpack.c.bf16 %v5471_v38, %v5471_v38 }
0x17c1   : > { %5475 = vrot.lane.b32.xlu1 %v5472_v39, %s9419_s1 }
0x1833   : > { %v5476_v41 = vpop.permute.xlu1 %5475 }
0x1834   : > { %7517 = vmatmul.mubr.msk.bf16.vlgmr.msra.gmra.mxu0 %vm9458_vm13, %v5476_v41  ;;  %vm9466_vm13 = vmmov %vm9456_vm3 }
0x1835   : > { %7522 = vmatprep.mubr.msk.f32.mxu0 %vm9459_vm9, %v8855_v2  ;;  %v5527_v2 = vsel %vm5526_vm1, 1.0, %v7959_v8  ;;  %vm5836_vm9 = vcmask 192512   ;;  %vm9471_vm1 = vcmask 195584  }
0x1836   : > { %5837 = vst.msk [vmem:[#allocation2] sm:$0x1f] %vm5836_vm9, %v7959_v8  ;;  %vm9481_vm9 = vcmask 130048  }
0x1837   : > { %5851 = vst.msk [vmem:[#allocation2] sm:$0xf] %vm3741_vm2, %v7959_v8  ;;  %vm5833_vm2 = vcmask 195589  }
0x1838   : > { %5865 = vst.msk [vmem:[#allocation2] sm:$0x7] %vm3749_vm0, %v7959_v8  ;;  %vm9470_vm0 = vcmask 1044480  }
0x1839   : > { %5879 = vst.msk [vmem:[#allocation2] sm:$0x3] %vm9468_vm15, %v7959_v8  ;;  %vm5915_vm15 = vcmask 325760  }
0x18f4   : > { %v5517_v43 = vpop.f32.mrf.mxu0 }
0x18f5   : > { %5694 = vrot.lane.b32.xlu1 %v5517_v43, %s9428_s9  ;;  %5529 = vrot.lane.b32.xlu0 %v5517_v43, %s9415_s22 }
0x18f6   : > { %7525 = vmatprep.subr.mxu1 %v5517_v43  ;;  %v7518_v45 = vpop.f32.mrf.mxu0 }
0x18f7   : > { %7526 = vmatpush3.msra.mxu1 %v5517_v43  ;;  %v7825_v43 = vld [vmem:[%s9467_s5 + $0x10] sm:$0xff]  }
0x18f8   : > { %v5520_v46 = vpop.f32.mrf.mxu0  ;;  %7528 = vmatmul.mubr.msk.f32.vlgmr.msra.gmra.mxu1 %vm9460_vm7, %v5525_v44  ;;  %vm9469_vm7 = vcmask 975616   ;;  %7332 = vmatprep.subr.bf16.mxu1 %v7814_v19 }
0x18f9   : > { %5796 = vrot.lane.b32.xlu1 %v5791_v48, %s9435_s10  ;;  %5794 = vrot.lane.b32.xlu0 %v5790_v49, %s9435_s10  ;;  %s9463_s10 = sld [smem:[#allocation51_spill]]  ;;  %5893 = vst.msk [vmem:[#allocation2] sm:$0x1] %vm9469_vm7, %v7959_v8  ;;  %v7826_v46 = vld [vmem:[%s9467_s5 + $0x48] sm:$0xff]   ;;  %v7829_v49 = vld [vmem:[%s9467_s5 + $0x80] ss:$0 sps:$4 sm:$0xff]   ;;  %vm9482_vm7 = vmmov %vm9481_vm9 }
0x18fa   : > { %v7519_v47 = vpop.f32.mrf.mxu0  ;;  %7333 = vmatpush3.bf16.msra.mxu1 %v7815_v21  ;;  %v7827_v48 = vld [vmem:[%s9467_s5 + $0x8] sm:$0xff]  }
0x18fb   : > { %7334 = vmatprep.subr.bf16.mxu1 %v7816_v24 }
0x18fe   : > { %7335 = vmatpush3.bf16.msra.mxu1 %v7817_v26 }
0x18ff   : > { %v7105_v5 = vld [vmem:[%s9463_s10] ss:$0 sm:$0xff]  ;;  %7336 = vmatprep.subr.bf16.mxu1 %v7818_v27  ;;  %s9492_s10 = sld [smem:[#allocation57_spill]] }
0x1902   : > { %7337 = vmatpush3.bf16.msra.mxu1 %v7819_v29 }
0x1903   : > { %7338 = vmatprep.subr.bf16.mxu1 %v7820_v31 }
0x1906   : > { %7339 = vmatpush3.bf16.msra.mxu1 %v7821_v33 }
0x1907   : > { %7340 = vmatprep.subr.bf16.mxu1 %v7822_v36 }
0x190a   : > { %7341 = vmatpush3.bf16.msra.mxu1 %v7823_v37 }
0x190b   : > { %7342 = vmatprep.subr.bf16.mxu1 %v7824_v42 }
0x190e   : > { %7343 = vmatpush3.bf16.msra.mxu1 %v7825_v43 }
0x190f   : > { %7344 = vmatprep.subr.bf16.mxu1 %v7826_v46  ;;  %v7831_v46 = vld [vmem:[%s9492_s10 + $0x78] sm:$0xff]  }
0x1912   : > { %7345 = vmatpush3.bf16.msra.mxu1 %v7827_v48 }
0x1967   : > { %v5530_v56 = vpop.permute.xlu0 %5529  ;;  %v5695_v50 = vpop.permute.xlu1 %5694 }
0x1968   : > { %7520 = vmatprep.subr.mxu0 %v5530_v56 }
0x1969   : > { %7521 = vmatpush3.msra.mxu0 %v5530_v56  ;;  %v7828_v56 = vld [vmem:[%s9467_s5 + $0x40] sm:$0xff]  }
0x196a   : > { %7523 = vmatmul.mubr.msk.f32.vlgmr.msra.gmra.mxu0 %vm9461_vm5, %v5527_v2  ;;  %7530 = vmatprep.subr.mxu0 %v5695_v50  ;;  %vm9475_vm5 = vcmask 1046528  }
0x196b   : > { %7531 = vmatpush3.msra.mxu0 %v5695_v50  ;;  %7532 = vmatprep.mubr.msk.f32.mxu0 %vm9462_vm4, %v8867_v4  ;;  %v5797_v6 = vpop.permute.xlu1 %5796  ;;  %v5795_v40 = vpop.permute.xlu0 %5794  ;;  %vm9476_vm4 = vcmask 1042432  }
0x196c   : > { %7535 = vmatprep.subr.bf16.mxu0 %v7959_v8  ;;  %7346 = vmatprep.subr.bf16.mxu1 %v7828_v56 }
0x196e   : > { %7533 = vmatmul.mubr.msk.f32.vlgmr.msra.gmra.mxu0 %vm9456_vm3, %v5693_v51  ;;  %vm9477_vm3 = vcmask 1045504   ;;  %v7830_v51 = vld [vmem:[%s9467_s5] sm:$0xff]  }
0x196f   : > { %7537 = vmatprep.mubr.msk.bf16.mxu0 %vm7961_vm11, %v7959_v8  ;;  %7347 = vmatpush3.bf16.msra.mxu1 %v7830_v51  ;;  %v7833_v51 = vld [vmem:[%s9492_s10 + $0x70] sm:$0xff]  }
0x1970   : > { %7541 = vmatprep.subr.bf16.mxu1 %v7959_v8 }
0x19b8   : > { %v7529_v62 = vpop.f32.mrf.mxu1 }
0x19ba   : > { %v5683_v53 = vpop.f32.mrf.mxu1 }
0x1a2a   : > { %v7524_v63 = vpop.f32.mrf.mxu0 }
0x1a2b   : > { %v5689_v57 = vadd.f32 %v7529_v62, %v7524_v63 }
0x1a2c   : > { %v5603_v52 = vpop.f32.mrf.mxu0 }
0x1a2d   : > { %v5684_v1 = vadd.f32 %v5683_v53, %v5603_v52 }
0x1a2e   : > { %v7534_v54 = vpop.f32.mrf.mxu0 }
0x1a2f   : > { %v5778_v4 = vadd.f32 %v7534_v54, %v5689_v57 }
0x1a30   : > { %v5768_v58 = vpop.f32.mrf.mxu0 }
0x1a31   : > { %v5787_v60 = vadd.f32 %v7104_v55, %v5778_v4  ;;  %v5777_v61 = vadd.f32 %v5768_v58, %v5684_v1 }
0x1a33   : > { %5789 = vst.msk [vmem:[#allocation7 + $0x8] sm:$0xff] %vm9465_vm8, %v5787_v60  ;;  %v5786_v3 = vadd.f32 %v7104_v55, %v5777_v61  ;;  %vm9479_vm8 = vmmov %vm9474_vm6 }
0x1a34   : > { %5802 = vst.msk [vmem:[#allocation7 + $0x8] sm:$0xff] %vm5800_vm10, %v5797_v6  ;;  %v6124_v2 = vsel %vm9479_vm8, %v7829_v49, 0  ;;  %vm5889_vm8 = vcmask 982785  }
0x1a35   : > { %5788 = vst.msk [vmem:[#allocation7] sm:$0xff] %vm9466_vm13, %v5786_v3  ;;  %7536 = vmatpush3.bf16.msra.mxu0 %v6124_v2  ;;  %vm9480_vm13 = vcmask 1040384   ;;  %v7832_v2 = vld [vmem:[%s9492_s10 + $0x38] sm:$0xff]  }
0x1a36   : > { %5801 = vst.msk [vmem:[#allocation7] sm:$0xff] %vm5800_vm10, %v5795_v40  ;;  %vm9478_vm10 = vcmask 1041408   ;;  %7356 = vmatprep.subr.bf16.mxu0 %v7831_v46 }
0x1a3b   : > { %v5804_v7 = vld [vmem:[#allocation7 + $0x8] sm:$0xff] }
0x1a3c   : > { %v5814_v0 = vmul.f32 %v7105_v5, %v5804_v7 }
0x1a3d   : > { %v5803_v10 = vld [vmem:[#allocation7] sm:$0xff] }
0x1a3e   : > { %v5822_v11 = vadd.f32 %v7106_v9, %v5814_v0  ;;  %v5813_v12 = vmul.f32 %v7105_v5, %v5803_v10 }
0x1a40   : > { %v9036_v13 = vmax.f32 %v5822_v11, 0.0  ;;  %v5821_v14 = vadd.f32 %v7106_v9, %v5813_v12 }
0x1a42   : > { %5896 = vrot.lane.b32.xlu1 %v9036_v13, %s9415_s22  ;;  %v9040_v15 = vmax.f32 %v5821_v14, 0.0  ;;  %v5905_v16 = vrot.slane %v9036_v13, 1  ;;  %v5829_v17 = vrot.slane %v9036_v13, 3  ;;  %v5919_v23 = vrot.slane %v9036_v13, 2 }
0x1a43   : > { %v5839_v30 = vrot.slane %v9036_v13, 4  ;;  %v5853_v38 = vrot.slane %v9036_v13, 5  ;;  %v5867_v45 = vrot.slane %v9036_v13, 6  ;;  %v5881_v50 = vrot.slane %v9036_v13, 7 }
0x1a44   : > { %5894 = vrot.lane.b32.xlu0 %v9040_v15, %s9415_s22  ;;  %v5828_v18 = vrot.slane %v9040_v15, 3  ;;  %v5838_v20 = vrot.slane %v9040_v15, 4  ;;  %v5852_v25 = vrot.slane %v9040_v15, 5  ;;  %s9472_s22 = smov 48   ;;  %v5866_v28 = vrot.slane %v9040_v15, 6 }
0x1a45   : > { %v5880_v32 = vrot.slane %v9040_v15, 7  ;;  %v5904_v34 = vrot.slane %v9040_v15, 1  ;;  %v5918_v39 = vrot.slane %v9040_v15, 2 }
0x1a46   : > { %5909 = vrot.lane.b32.xlu1 %v5905_v16, %s9416_s26  ;;  %v5830_v22 = vsel %vm9470_vm0, %v5828_v18, %v5829_v17  ;;  %5834 = vst.msk [vmem:[#allocation2] sm:$0xe0] %vm5833_vm2, %v5828_v18  ;;  %v5840_v35 = vsel %vm9474_vm6, %v5838_v20, %v5839_v30  ;;  %v5854_v41 = vsel %vm9476_vm4, %v5852_v25, %v5853_v38  ;;  %vm5931_vm2 = vcmask 523590  }
0x1a47   : > { %5835 = vst.msk [vmem:[#allocation2 + $0x20] sm:$0xff] %vm9471_vm1, %v5830_v22  ;;  %v5906_v59 = vsel %vm9475_vm5, %v5904_v34, %v5905_v16  ;;  %v5920_v44 = vsel %vm9477_vm3, %v5918_v39, %v5919_v23  ;;  %v5868_v47 = vsel %vm9478_vm10, %v5866_v28, %v5867_v45  ;;  %v5882_v62 = vsel %vm9480_vm13, %v5880_v32, %v5881_v50 }
0x1a48   : > { %5841 = vrot.lane.b32.xlu0 %v5838_v20, %s9422_s6  ;;  %vm5847_vm0 = vcmask 392388   ;;  %vm5929_vm1 = vcmask 521536   ;;  %vm5943_vm6 = vcmask 720389   ;;  %vm5861_vm5 = vcmask 589187  }
0x1a49   : > { %vm5954_vm4 = vcmask 917188   ;;  %vm5875_vm3 = vcmask 785986   ;;  %vm5969_vm10 = vcmask 1048451   ;;  %vm9483_vm13 = vcmask 913088  }
0x1a4a   : > { %5923 = vrot.lane.b32.xlu1 %v5919_v23, %s9400_s23 }
0x1a4c   : > { %5855 = vrot.lane.b32.xlu0 %v5852_v25, %s9472_s22 }
0x1a4e   : > { %5935 = vrot.lane.b32.xlu1 %v5829_v17, %s9418_s0 }
0x1a50   : > { %5869 = vrot.lane.b32.xlu0 %v5866_v28, %s9403_s2 }
0x1a52   : > { %5947 = vrot.lane.b32.xlu1 %v5839_v30, %s9473_s14 }
0x1a54   : > { %5883 = vrot.lane.b32.xlu0 %v5880_v32, %s9419_s1 }
0x1a56   : > { %5843 = vrot.lane.b32.xlu1 %v5840_v35, %s9422_s6 }
0x1a58   : > { %5907 = vrot.lane.b32.xlu0 %v5906_v59, %s9416_s26  ;;  %s9490_s26 = sld [smem:[#allocation55_spill]] }
0x1a5a   : > { %5857 = vrot.lane.b32.xlu1 %v5854_v41, %s9472_s22 }
0x1a5c   : > { %5921 = vrot.lane.b32.xlu0 %v5920_v44, %s9400_s23 }
0x1a5e   : > { %5871 = vrot.lane.b32.xlu1 %v5868_v47, %s9403_s2  ;;  %s9487_s2 = sld [smem:[#allocation50_spill]]  ;;  %v7126_v59 = vld [vmem:[%s9490_s26] ss:$0 sm:$0xff] }
0x1a60   : > { %5933 = vrot.lane.b32.xlu0 %v5830_v22, %s9418_s0  ;;  %s9491_s0 = sld [smem:[#allocation56_spill]] }
0x1a62   : > { %5885 = vrot.lane.b32.xlu1 %v5882_v62, %s9419_s1 }
0x1a64   : > { %5945 = vrot.lane.b32.xlu0 %v5840_v35, %s9473_s14  ;;  %v7107_v24 = vld [vmem:[%s9487_s2] ss:$0 sm:$0xff] }
0x1a66   : > { %5958 = vrot.lane.b32.xlu1 %v5853_v38, %s9428_s9  ;;  %v7127_v39 = vld [vmem:[%s9491_s0] ss:$0 sm:$0xff] }
0x1a68   : > { %5956 = vrot.lane.b32.xlu0 %v5854_v41, %s9428_s9 }
0x1ab4   : > { %v5897_v63 = vpop.permute.xlu1 %5896 }
0x1ab5   : > { %5903 = vst.msk [vmem:[#allocation2 + $0x28] sm:$0xff] %vm9481_vm9, %v5897_v63  ;;  %vm5849_vm9 = vcmask 392384  }
0x1ab6   : > { %v5895_v52 = vpop.permute.xlu0 %5894  ;;  %5917 = vst.msk [vmem:[#allocation2 + $0x2f] sm:$0x1] %vm3780_vm14, %v7959_v8  ;;  %vm5941_vm14 = vcmask 717312  }
0x1ab7   : > { %5901 = vst.msk [vmem:[#allocation2 + $0x8] sm:$0xff] %vm9482_vm7, %v5895_v52  ;;  %vm5913_vm7 = vcmask 326784  }
0x1ab8   : > { %v5910_v53 = vpop.permute.xlu1 %5909 }
0x1ab9   : > { %5916 = vst.msk [vmem:[#allocation2 + $0x28] sm:$0x7f] %vm5915_vm15, %v5910_v53  ;;  %vm9484_vm15 = vcmask 1048512   ;;  %v7834_v53 = vld [vmem:[%s9492_s10 + $0x30] sm:$0xff]  }
0x1aba   : > { %5932 = vst.msk [vmem:[#allocation2 + $0x28] sm:$0xc0] %vm5931_vm2, %v7959_v8  ;;  %v5842_v57 = vpop.permute.xlu0 %5841  ;;  %vm5863_vm2 = vcmask 589184  }
0x1abb   : > { %5848 = vst.msk [vmem:[#allocation2] sm:$0xf0] %vm5847_vm0, %v5842_v57  ;;  %vm5927_vm0 = vcmask 523584   ;;  %v7835_v57 = vld [vmem:[%s9492_s10 + $0x68] sm:$0xff]  }
0x1abc   : > { %v5924_v54 = vpop.permute.xlu1 %5923 }
0x1abd   : > { %5930 = vst.msk [vmem:[#allocation2 + $0x28] sm:$0x3f] %vm5929_vm1, %v5924_v54  ;;  %vm5877_vm1 = vcmask 785984  }
0x1abe   : > { %5944 = vst.msk [vmem:[#allocation2 + $0x28] sm:$0xe0] %vm5943_vm6, %v7959_v8  ;;  %v5856_v55 = vpop.permute.xlu0 %5855  ;;  %vm5939_vm6 = vcmask 720384  }
0x1abf   : > { %5862 = vst.msk [vmem:[#allocation2] sm:$0xf8] %vm5861_vm5, %v5856_v55  ;;  %vm5891_vm5 = vcmask 982784  }
0x1ac0   : > { %v5936_v1 = vpop.permute.xlu1 %5935 }
0x1ac1   : > { %5942 = vst.msk [vmem:[#allocation2 + $0x28] sm:$0x1f] %vm5941_vm14, %v5936_v1  ;;  %vm5951_vm14 = vcmask 917184   ;;  %v7836_v1 = vld [vmem:[%s9492_s10 + $0x28] sm:$0xff]  }
0x1ac2   : > { %5955 = vst.msk [vmem:[#allocation2 + $0x28] sm:$0xf0] %vm5954_vm4, %v7959_v8  ;;  %v5870_v4 = vpop.permute.xlu0 %5869  ;;  %vm9485_vm4 = vmmov %vm9484_vm15 }
0x1ac3   : > { %5876 = vst.msk [vmem:[#allocation2] sm:$0xfc] %vm5875_vm3, %v5870_v4  ;;  %vm5965_vm3 = vcmask 1043328   ;;  %v7837_v4 = vld [vmem:[%s9492_s10 + $0x60] sm:$0xff]  }
0x1ac4   : > { %v5948_v58 = vpop.permute.xlu1 %5947 }
0x1ac5   : > { %5953 = vst.msk [vmem:[#allocation2 + $0x28] sm:$0xf] %vm9483_vm13, %v5948_v58  ;;  %vm9486_vm13 = vcmask 64512  }
0x1ac6   : > { %5970 = vst.msk [vmem:[#allocation2 + $0x28] sm:$0xf8] %vm5969_vm10, %v7959_v8  ;;  %v5884_v60 = vpop.permute.xlu0 %5883  ;;  %vm5967_vm10 = vcmask 59392  }
0x1ac7   : > { %5890 = vst.msk [vmem:[#allocation2] sm:$0xfe] %vm5889_vm8, %v5884_v60  ;;  %vm5962_vm8 = vcmask 1048448   ;;  %v7838_v60 = vld [vmem:[%s9492_s10 + $0x20] sm:$0xff]  }
0x1ac8   : > { %5900 = vst.msk [vmem:[#allocation2] sm:$0xff] %vm9484_vm15, %v5895_v52  ;;  %v5844_v61 = vpop.permute.xlu1 %5843  ;;  %vm9488_vm15 = vcmask 90112  }
0x1ac9   : > { %5850 = vst.msk [vmem:[#allocation2 + $0x20] sm:$0xff] %vm5849_vm9, %v5844_v61  ;;  %vm6377_vm9 = vcmask 195588  }
0x1aca   : > { %v5908_v6 = vpop.permute.xlu0 %5907 }
0x1acb   : > { %5914 = vst.msk [vmem:[#allocation2 + $0x8] sm:$0xff] %vm5913_vm7, %v5908_v6  ;;  %vm9489_vm7 = vmmov %vm9486_vm13  ;;  %v7839_v6 = vld [vmem:[%s9492_s10 + $0x58] sm:$0xff]  }
0x1acc   : > { %v5858_v3 = vpop.permute.xlu1 %5857 }
0x1acd   : > { %5864 = vst.msk [vmem:[#allocation2 + $0x20] sm:$0xff] %vm5863_vm2, %v5858_v3  ;;  %vm6216_vm2 = vcmask 228544  }
0x1ace   : > { %v5922_v40 = vpop.permute.xlu0 %5921 }
0x1acf   : > { %5928 = vst.msk [vmem:[#allocation2 + $0x8] sm:$0xff] %vm5927_vm0, %v5922_v40  ;;  %v5973_v19 = vld [vmem:[#allocation2] sm:$0xff]  ;;  %vm6253_vm0 = vcmask 225280   ;;  %v7840_v40 = vld [vmem:[%s9492_s10 + $0x18] sm:$0xff]  }
0x1ad0   : > { %v5872_v5 = vpop.permute.xlu1 %5871  ;;  %6254 = vst.msk [vmem:[#allocation2] sm:$0x1f] %vm6253_vm0, %v7959_v8  ;;  %vm9504_vm0 = vcmask 1042432  }
0x1ad1   : > { %5878 = vst.msk [vmem:[#allocation2 + $0x20] sm:$0xff] %vm5877_vm1, %v5872_v5  ;;  %vm9493_vm1 = vcmask 453856  }
0x1ad2   : > { %v5934_v7 = vpop.permute.xlu0 %5933  ;;  %6268 = vst.msk [vmem:[#allocation2] sm:$0xf] %vm9493_vm1, %v7959_v8 }
0x1ad3   : > { %5940 = vst.msk [vmem:[#allocation2 + $0x8] sm:$0xff] %vm5939_vm6, %v5934_v7  ;;  %vm9494_vm6 = vcmask 682432  }
0x1ad4   : > { %v5886_v9 = vpop.permute.xlu1 %5885  ;;  %6282 = vst.msk [vmem:[#allocation2] sm:$0x7] %vm9494_vm6, %v7959_v8  ;;  %vm6308_vm6 = vcmask 97281  }
0x1ad5   : > { %5892 = vst.msk [vmem:[#allocation2 + $0x20] sm:$0xff] %vm5891_vm5, %v5886_v9  ;;  %vm9495_vm5 = vcmask 911008  }
0x1ad6   : > { %5902 = vst.msk [vmem:[#allocation2 + $0x20] sm:$0xff] %vm9485_vm4, %v5897_v63  ;;  %v5946_v0 = vpop.permute.xlu0 %5945  ;;  %vm6249_vm4 = vcmask 228357  }
0x1ad7   : > { %5952 = vst.msk [vmem:[#allocation2 + $0x8] sm:$0xff] %vm5951_vm14, %v5946_v0  ;;  %vm9496_vm14 = vcmask 1041280   ;;  %v7841_v0 = vld [vmem:[%s9492_s10 + $0x50] sm:$0xff]  }
0x1ad8   : > { %v5959_v10 = vpop.permute.xlu1 %5958  ;;  %6296 = vst.msk [vmem:[#allocation2] sm:$0x3] %vm9495_vm5, %v7959_v8  ;;  %vm6320_vm5 = vcmask 326752  }
0x1ad9   : > { %5966 = vst.msk [vmem:[#allocation2 + $0x28] sm:$0x7] %vm5965_vm3, %v5959_v10  ;;  %vm6251_vm3 = vcmask 228352  }
0x1ada   : > { %5968 = vst.msk [vmem:[#allocation2 + $0x30] sm:$0x7] %vm5967_vm10, %v5959_v10  ;;  %v5957_v11 = vpop.permute.xlu0 %5956  ;;  %vm9497_vm10 = vcmask 1044480   ;;  %v7842_v10 = vld [vmem:[%s9492_s10 + $0x98] ss:$0 sps:$4 sm:$0x33]  }
0x1adb   : > { %5963 = vst.msk [vmem:[#allocation2 + $0x8] sm:$0xff] %vm5962_vm8, %v5957_v11 }
0x1adc   : > { %5964 = vst.msk [vmem:[#allocation2 + $0x10] sm:$0xff] %vm9486_vm13, %v5957_v11  ;;  %vm9499_vm13 = vcmask 1040384  }
0x1add   : > { %v5976_v13 = vld [vmem:[#allocation2 + $0x20] sm:$0xff]  ;;  %6312 = vst.msk [vmem:[#allocation2] sm:$0x1] %vm9496_vm14, %v7959_v8  ;;  %vm6264_vm14 = vcmask 457956  }
0x1ade   : > { %v5979_v20 = vpack.c.bf16 %v5976_v13, %v5973_v19  ;;  %v7843_v13 = vld [vmem:[%s9492_s10 + $0x10] sm:$0xff]   ;;  %v7846_v19 = vld [vmem:[%s9492_s10 + $0x8] sm:$0xff]  }
0x1ae0   : > { %v5977_v15 = vld [vmem:[#allocation2 + $0x28] sm:$0xff] }
0x1ae1   : > { %v5978_v12 = vld [vmem:[#allocation2 + $0x30] sm:$0xff] }
0x1ae2   : > { %6378 = vst.msk [vmem:[#allocation2 + $0x30] sm:$0xf0] %vm6377_vm9, %v7959_v8  ;;  %v5974_v14 = vld [vmem:[#allocation2 + $0x8] sm:$0xff]  ;;  %vm9500_vm9 = vcmask 1046528  }
0x1ae3   : > { %v5975_v16 = vld [vmem:[#allocation2 + $0x10] sm:$0xff]  ;;  %v5980_v17 = vpack.c.bf16 %v5977_v15, %v5974_v14  ;;  %6313 = vst.msk [vmem:[#allocation2 + $0x8] sm:$0x1] %vm9488_vm15, %v7959_v8  ;;  %vm9501_vm15 = vcmask 1041408  }
0x1ae4   : > { %v5981_v18 = vpack.c.bf16 %v5978_v12, %v5975_v16  ;;  %v6566_v12 = vsel %vm9501_vm15, %v7842_v10, 0  ;;  %vm9505_vm1 = vmmov %vm9501_vm15  ;;  %vm6348_vm15 = vcmask 783904  }
0x1ae5   : > { %6158 = vmatprep.mubr.bf16.mxu1 %v5980_v17  ;;  %v7844_v17 = vld [vmem:[%s9492_s10 + $0x48] sm:$0xff]  }
0x1ae6   : > { %7538 = vmatmul.mubr.msk.bf16.vlgmr.msra.gmra.mxu0 %vm9489_vm7, %v5981_v18  ;;  %6159 = vmatmul.mubr.bf16.vlgmr.msra.gmra.mxu1 %v5979_v20  ;;  %vm9502_vm7 = vcmask 1045504   ;;  %v7845_v18 = vld [vmem:[%s9492_s10 + $0x90] sm:$0xff]  }
0x1ae7   : > { %7549 = vmatprep.mubr.msk.bf16.mxu1 %vm7961_vm11, %v7959_v8  ;;  %7357 = vmatpush3.bf16.msra.mxu0 %v7832_v2 }
0x1ae8   : > { %7358 = vmatprep.subr.bf16.mxu0 %v7833_v51  ;;  %7542 = vmatpush3.bf16.msra.mxu1 %v6566_v12 }
0x1ae9   : > { %7543 = vmatprep.subr.bf16.mxu1 %v7959_v8 }
0x1aeb   : > { %7359 = vmatpush3.bf16.msra.mxu0 %v7834_v53 }
0x1aec   : > { %7360 = vmatprep.subr.bf16.mxu0 %v7835_v57  ;;  %7544 = vmatpush3.bf16.msra.mxu1 %v7845_v18 }
0x1aed   : > { %7545 = vmatprep.subr.bf16.mxu1 %v7959_v8 }
0x1aef   : > { %7361 = vmatpush3.bf16.msra.mxu0 %v7836_v1 }
0x1af0   : > { %7362 = vmatprep.subr.bf16.mxu0 %v7837_v4 }
0x1af3   : > { %7363 = vmatpush3.bf16.msra.mxu0 %v7838_v60 }
0x1af4   : > { %7364 = vmatprep.subr.bf16.mxu0 %v7839_v6 }
0x1af7   : > { %7365 = vmatpush3.bf16.msra.mxu0 %v7840_v40 }
0x1af8   : > { %7366 = vmatprep.subr.bf16.mxu0 %v7841_v0 }
0x1afb   : > { %7367 = vmatpush3.bf16.msra.mxu0 %v7843_v13 }
0x1afc   : > { %7368 = vmatprep.subr.bf16.mxu0 %v7844_v17 }
0x1aff   : > { %7369 = vmatpush3.bf16.msra.mxu0 %v7846_v19 }
0x1ba6   : > { %v6201_v21 = vpop.f32.mrf.mxu0  ;;  %v7348_v22 = vpop.f32.mrf.mxu1 }
0x1ba8   : > { %v7539_v23 = vpop.f32.mrf.mxu0  ;;  %v7349_v25 = vpop.f32.mrf.mxu1 }
0x1ba9   : > { %v7350_v26 = vadd.f32 %v7349_v25, %v7348_v22  ;;  %v7847_v22 = vld [vmem:[%s9492_s10 + $0x40] sm:$0xff]   ;;  %v7848_v23 = vld [vmem:[%s9492_s10 + $0x88] sm:$0xff]  }
0x1baa   : > { %v6204_v27 = vpop.f32.mrf.mxu0  ;;  %v7351_v28 = vpop.f32.mrf.mxu1  ;;  %7370 = vmatprep.subr.bf16.mxu0 %v7847_v22  ;;  %7546 = vmatpush3.bf16.msra.mxu1 %v7848_v23 }
0x1bab   : > { %v6161_v29 = vadd.f32 %v7350_v26, %v7107_v24  ;;  %7547 = vmatprep.subr.bf16.mxu1 %v7959_v8  ;;  %v7850_v26 = vld [vmem:[%s9492_s10 + $0x80] sm:$0xff]  }
0x1bac   : > { %v7540_v30 = vpop.f32.mrf.mxu0  ;;  %v7352_v31 = vpop.f32.mrf.mxu1 }
0x1bad   : > { %v6202_v32 = vadd.f32 %v6201_v21, %v6161_v29  ;;  %v7353_v33 = vadd.f32 %v7352_v31, %v7351_v28 }
0x1bae   : > { %7548 = vmatpush3.bf16.msra.mxu1 %v7850_v26 }
0x1baf   : > { %v6164_v34 = vadd.f32 %v7353_v33, %v7107_v24  ;;  %6210 = vrot.lane.b32.xlu0 %v6202_v32, %s9422_s6  ;;  %v7849_v24 = vld [vmem:[%s9492_s10] sm:$0xff]  }
0x1bb0   : > { %7371 = vmatpush3.bf16.msra.mxu0 %v7849_v24 }
0x1bb1   : > { %v6205_v35 = vadd.f32 %v6204_v27, %v6164_v34  ;;  %7553 = vmatprep.subr.bf16.mxu0 %v7959_v8 }
0x1bb3   : > { %6212 = vrot.lane.b32.xlu1 %v6205_v35, %s9422_s6 }
0x1c21   : > { %v6211_v36 = vpop.permute.xlu0 %6210 }
0x1c22   : > { %6217 = vst.msk [vmem:[#allocation7] sm:$0xff] %vm6216_vm2, %v6211_v36 }
0x1c25   : > { %v6213_v37 = vpop.permute.xlu1 %6212 }
0x1c26   : > { %6218 = vst.msk [vmem:[#allocation7 + $0x8] sm:$0xff] %vm6216_vm2, %v6213_v37  ;;  %vm9503_vm2 = vcmask 1043456  }
0x1c29   : > { %v6219_v38 = vld [vmem:[#allocation7] sm:$0xff] }
0x1c2a   : > { %v6229_v41 = vmul.f32 %v7126_v59, %v6219_v38 }
0x1c2c   : > { %v6237_v42 = vadd.f32 %v7127_v39, %v6229_v41 }
0x1c2d   : > { %v6220_v43 = vld [vmem:[#allocation7 + $0x8] sm:$0xff] }
0x1c2e   : > { %v9132_v44 = vmax.f32 %v6237_v42, 0.0  ;;  %v6230_v45 = vmul.f32 %v7126_v59, %v6220_v43 }
0x1c30   : > { %6314 = vrot.lane.b32.xlu0 %v9132_v44, %s9427_s18  ;;  %v6238_v48 = vadd.f32 %v7127_v39, %v6230_v45  ;;  %v6244_v49 = vrot.slane %v9132_v44, 3  ;;  %v6297_v56 = vrot.slane %v9132_v44, 7  ;;  %v6255_v63 = vrot.slane %v9132_v44, 4 }
0x1c31   : > { %v6269_v55 = vrot.slane %v9132_v44, 5  ;;  %v6283_v58 = vrot.slane %v9132_v44, 6  ;;  %v6323_v3 = vrot.slane %v9132_v44, 1  ;;  %v6337_v11 = vrot.slane %v9132_v44, 2 }
0x1c32   : > { %v9142_v47 = vmax.f32 %v6238_v48, 0.0  ;;  %6250 = vst.msk [vmem:[#allocation2] sm:$0xe0] %vm6249_vm4, %v6244_v49  ;;  %vm6278_vm4 = vcmask 687555  }
0x1c34   : > { %6316 = vrot.lane.b32.xlu1 %v9142_v47, %s9427_s18  ;;  %6300 = vrot.lane.b32.xlu0 %v6297_v56, %s9428_s9  ;;  %v6245_v50 = vrot.slane %v9142_v47, 3  ;;  %v6324_v62 = vrot.slane %v9142_v47, 1  ;;  %s9498_s18 = smov 28   ;;  %v6338_v54 = vrot.slane %v9142_v47, 2  ;;  %v6298_v61 = vrot.slane %v9142_v47, 7 }
0x1c35   : > { %v6256_v9 = vrot.slane %v9142_v47, 4  ;;  %v6270_v16 = vrot.slane %v9142_v47, 5  ;;  %v6284_v21 = vrot.slane %v9142_v47, 6 }
0x1c36   : > { %v6246_v52 = vsel %vm9497_vm10, %v6244_v49, %v6245_v50  ;;  %v6299_v5 = vsel %vm9499_vm13, %v6297_v56, %v6298_v61  ;;  %v6325_v7 = vsel %vm9500_vm9, %v6323_v3, %v6324_v62  ;;  %v6339_v14 = vsel %vm9502_vm7, %v6337_v11, %v6338_v54 }
0x1c37   : > { %6252 = vst.msk [vmem:[#allocation2 + $0x20] sm:$0xff] %vm6251_vm3, %v6246_v52  ;;  %v6257_v15 = vsel %vm9503_vm2, %v6255_v63, %v6256_v9  ;;  %v6271_v20 = vsel %vm9504_vm0, %v6269_v55, %v6270_v16  ;;  %v6285_v25 = vsel %vm9505_vm1, %v6283_v58, %v6284_v21  ;;  %vm6292_vm3 = vcmask 917154  }
0x1c38   : > { %6328 = vrot.lane.b32.xlu1 %v6324_v62, %s9400_s23  ;;  %6258 = vrot.lane.b32.xlu0 %v6255_v63, %s9498_s18  ;;  %vm6306_vm10 = vcmask 1048449   ;;  %vm6332_vm13 = vcmask 556352   ;;  %vm6334_vm9 = vcmask 555328   ;;  %vm6350_vm7 = vcmask 785958  }
0x1c39   : > { %vm6346_vm2 = vcmask 785952   ;;  %vm6266_vm0 = vcmask 457952   ;;  %vm6360_vm1 = vcmask 1012480  }
0x1c3c   : > { %6342 = vrot.lane.b32.xlu1 %v6338_v54, %s9453_s13  ;;  %6272 = vrot.lane.b32.xlu0 %v6269_v55, %s9426_s7 }
0x1c40   : > { %6354 = vrot.lane.b32.xlu1 %v6245_v50, %s9419_s1  ;;  %6286 = vrot.lane.b32.xlu0 %v6283_v58, %s9429_s8 }
0x1c44   : > { %6302 = vrot.lane.b32.xlu1 %v6299_v5, %s9428_s9  ;;  %6326 = vrot.lane.b32.xlu0 %v6325_v7, %s9400_s23  ;;  %s9510_s9 = sld [smem:[#allocation41_spill]] }
0x1c48   : > { %6340 = vrot.lane.b32.xlu0 %v6339_v14, %s9453_s13  ;;  %6260 = vrot.lane.b32.xlu1 %v6257_v15, %s9498_s18  ;;  %s9511_s13 = sld [smem:[#allocation54_spill]] }
0x1c4a   : > { %v7851_v53 = vld [vmem:[%s9510_s9 + $0x8] sm:$0xff]   ;;  %v7852_v55 = vld [vmem:[%s9510_s9] sm:$0xff]  }
0x1c4c   : > { %6274 = vrot.lane.b32.xlu1 %v6271_v20, %s9426_s7  ;;  %6352 = vrot.lane.b32.xlu0 %v6246_v52, %s9419_s1 }
0x1c4e   : > { %v7128_v54 = vld [vmem:[%s9511_s13] ss:$0 sm:$0xff] }
0x1c50   : > { %6288 = vrot.lane.b32.xlu1 %v6285_v25, %s9429_s8  ;;  %6364 = vrot.lane.b32.xlu0 %v6257_v15, %s7986_s12  ;;  %s9513_s8 = sld [smem:[#allocation40_spill]] }
0x1c54   : > { %6366 = vrot.lane.b32.xlu1 %v6256_v9, %s7986_s12  ;;  %6379 = vrot.lane.b32.xlu0 %v6271_v20, %s9422_s6 }
0x1c56   : > { %v7150_v14 = vld [vmem:[%s9513_s8] ss:$0 sm:$0xff] }
0x1c58   : > { %6381 = vrot.lane.b32.xlu1 %v6270_v16, %s9422_s6  ;;  %s9518_s6 = sshll.u32 %s9522_s16, 4 }
0x1c59   : > { %s1727_s23 = scalar_lea.vmem %s8285_s4, %s9518_s6 }
0x1ca2   : > { %v6315_v27 = vpop.permute.xlu0 %6314 }
0x1ca6   : > { %v6317_v28 = vpop.permute.xlu1 %6316  ;;  %v6301_v29 = vpop.permute.xlu0 %6300 }
0x1ca7   : > { %6309 = vst.msk [vmem:[#allocation2 + $0x8] sm:$0xfe] %vm6308_vm6, %v6301_v29  ;;  %vm6362_vm6 = vcmask 1015557  }
0x1ca8   : > { %6321 = vst.msk [vmem:[#allocation2 + $0x8] sm:$0xff] %vm6320_vm5, %v6315_v27 }
0x1caa   : > { %v6329_v30 = vpop.permute.xlu1 %6328  ;;  %v6259_v31 = vpop.permute.xlu0 %6258 }
0x1cab   : > { %6265 = vst.msk [vmem:[#allocation2] sm:$0xf0] %vm6264_vm14, %v6259_v31  ;;  %vm9506_vm14 = vcmask 549184  }
0x1cae   : > { %v6343_v32 = vpop.permute.xlu1 %6342  ;;  %v6273_v33 = vpop.permute.xlu0 %6272 }
0x1caf   : > { %6279 = vst.msk [vmem:[#allocation2] sm:$0xf8] %vm6278_vm4, %v6273_v33  ;;  %vm6375_vm4 = vcmask 1048548  }
0x1cb2   : > { %v6355_v34 = vpop.permute.xlu1 %6354  ;;  %v6287_v35 = vpop.permute.xlu0 %6286 }
0x1cb3   : > { %6293 = vst.msk [vmem:[#allocation2] sm:$0xfc] %vm6292_vm3, %v6287_v35  ;;  %vm6294_vm3 = vcmask 917152  }
0x1cb4   : > { %6307 = vst.msk [vmem:[#allocation2] sm:$0xfe] %vm6306_vm10, %v6301_v29  ;;  %vm6370_vm10 = vcmask 1048544  }
0x1cb6   : > { %v6303_v36 = vpop.permute.xlu1 %6302  ;;  %v6327_v37 = vpop.permute.xlu0 %6326 }
0x1cb7   : > { %6311 = vst.msk [vmem:[#allocation2 + $0x28] sm:$0xff] %vm2456_vm12, %v6303_v36  ;;  %vm6280_vm12 = vcmask 687552  }
0x1cb8   : > { %6333 = vst.msk [vmem:[#allocation2 + $0x8] sm:$0xff] %vm6332_vm13, %v6327_v37  ;;  %vm9507_vm13 = vcmask 195584  }
0x1cb9   : > { %6322 = vst.msk [vmem:[#allocation2 + $0x28] sm:$0xff] %vm6320_vm5, %v6317_v28  ;;  %vm6358_vm5 = vcmask 1015552  }
0x1cba   : > { %6336 = vst.msk [vmem:[#allocation2 + $0x2f] sm:$0x1] %vm9506_vm14, %v7959_v8  ;;  %v6341_v59 = vpop.permute.xlu0 %6340  ;;  %v6261_v38 = vpop.permute.xlu1 %6260 }
0x1cbb   : > { %6335 = vst.msk [vmem:[#allocation2 + $0x28] sm:$0x7f] %vm6334_vm9, %v6329_v30  ;;  %vm6385_vm9 = vcmask 425152   ;;  %v6391_v2 = vld [vmem:[#allocation2] sm:$0xff] }
0x1cbc   : > { %6349 = vst.msk [vmem:[#allocation2 + $0x28] sm:$0x3f] %vm6348_vm15, %v6343_v32  ;;  %vm6389_vm15 = vcmask 425155  }
0x1cbd   : > { %6351 = vst.msk [vmem:[#allocation2 + $0x28] sm:$0xc0] %vm6350_vm7, %v7959_v8  ;;  %vm9508_vm7 = vcmask 1044448  }
0x1cbe   : > { %6347 = vst.msk [vmem:[#allocation2 + $0x8] sm:$0xff] %vm6346_vm2, %v6341_v59  ;;  %v6275_v39 = vpop.permute.xlu1 %6274  ;;  %v6353_v41 = vpop.permute.xlu0 %6352  ;;  %vm9509_vm2 = vcmask 191488  }
0x1cbf   : > { %6267 = vst.msk [vmem:[#allocation2 + $0x20] sm:$0xff] %vm6266_vm0, %v6261_v38  ;;  %vm6387_vm0 = vcmask 420032  }
0x1cc0   : > { %6361 = vst.msk [vmem:[#allocation2 + $0x28] sm:$0x1f] %vm6360_vm1, %v6355_v34  ;;  %vm6687_vm1 = vcmask 261120  }
0x1cc1   : > { %6363 = vst.msk [vmem:[#allocation2 + $0x28] sm:$0xe0] %vm6362_vm6, %v7959_v8  ;;  %vm9514_vm6 = vcmask 31744  }
0x1cc2   : > { %6376 = vst.msk [vmem:[#allocation2 + $0x28] sm:$0xf0] %vm6375_vm4, %v7959_v8  ;;  %v6289_v42 = vpop.permute.xlu1 %6288  ;;  %v6365_v43 = vpop.permute.xlu0 %6364  ;;  %vm9515_vm14 = vmmov %vm9514_vm6 }
0x1cc3   : > { %6281 = vst.msk [vmem:[#allocation2 + $0x20] sm:$0xff] %vm6280_vm12, %v6275_v39  ;;  %vm9516_vm4 = vmmov %vm9514_vm6 }
0x1cc4   : > { %6359 = vst.msk [vmem:[#allocation2 + $0x8] sm:$0xff] %vm6358_vm5, %v6353_v41  ;;  %vm9517_vm12 = vmmov %vm9516_vm4 }
0x1cc5   : > { %6295 = vst.msk [vmem:[#allocation2 + $0x20] sm:$0xff] %vm6294_vm3, %v6289_v42  ;;  %vm9519_vm5 = vmmov %vm9516_vm4 }
0x1cc6   : > { %6371 = vst.msk [vmem:[#allocation2 + $0x8] sm:$0xff] %vm6370_vm10, %v6365_v43  ;;  %v6367_v44 = vpop.permute.xlu1 %6366  ;;  %v6380_v45 = vpop.permute.xlu0 %6379  ;;  %vm9520_vm3 = vmmov %vm9516_vm4 }
0x1cc7   : > { %6372 = vst.msk [vmem:[#allocation2 + $0x10] sm:$0xff] %vm9507_vm13, %v6365_v43 }
0x1cc8   : > { %6310 = vst.msk [vmem:[#allocation2 + $0x20] sm:$0xff] %vm5962_vm8, %v6303_v36  ;;  %vm9512_vm8 = vcmask 424960  }
0x1cc9   : > { %6373 = vst.msk [vmem:[#allocation2 + $0x28] sm:$0xf] %vm9508_vm7, %v6367_v44 }
0x1cca   : > { %6374 = vst.msk [vmem:[#allocation2 + $0x30] sm:$0xf] %vm9509_vm2, %v6367_v44  ;;  %v6382_v46 = vpop.permute.xlu1 %6381 }
0x1ccb   : > { %6386 = vst.msk [vmem:[#allocation2 + $0x10] sm:$0xff] %vm6385_vm9, %v6380_v45 }
0x1ccc   : > { %6390 = vst.msk [vmem:[#allocation2 + $0x30] sm:$0xf8] %vm6389_vm15, %v7959_v8 }
0x1ccd   : > { %6388 = vst.msk [vmem:[#allocation2 + $0x30] sm:$0x7] %vm6387_vm0, %v6382_v46  ;;  %v6392_v49 = vld [vmem:[#allocation2 + $0x8] sm:$0xff] }
0x1ccf   : > { %v6394_v48 = vld [vmem:[#allocation2 + $0x20] sm:$0xff] }
0x1cd0   : > { %v6395_v47 = vld [vmem:[#allocation2 + $0x28] sm:$0xff]  ;;  %v6397_v50 = vpack.c.bf16 %v6394_v48, %v6391_v2 }
0x1cd1   : > { %v6398_v56 = vpack.c.bf16 %v6395_v47, %v6392_v49 }
0x1cd2   : > { %v6393_v51 = vld [vmem:[#allocation2 + $0x10] sm:$0xff] }
0x1cd3   : > { %6600 = vmatprep.mubr.bf16.mxu0 %v6398_v56 }
0x1cd4   : > { %6601 = vmatmul.mubr.bf16.vlgmr.msra.gmra.mxu0 %v6397_v50  ;;  %v6396_v62 = vld [vmem:[#allocation2 + $0x30] sm:$0xff] }
0x1cd5   : > { %v6399_v63 = vpack.c.bf16 %v6396_v62, %v6393_v51  ;;  %7557 = vmatprep.mubr.msk.bf16.mxu0 %vm7961_vm11, %v7959_v8  ;;  %7554 = vmatpush3.bf16.msra.mxu0 %v7851_v53  ;;  %vm6658_vm11 = vcmask 261344  }
0x1cd6   : > { %7555 = vmatprep.subr.bf16.mxu0 %v7959_v8 }
0x1cd7   : > { %7550 = vmatmul.mubr.msk.bf16.vlgmr.msra.gmra.mxu1 %vm9512_vm8, %v6399_v63 }
0x1cd9   : > { %7556 = vmatpush3.bf16.msra.mxu0 %v7852_v55 }
0x1d94   : > { %v7372_v52 = vpop.f32.mrf.mxu0 }
0x1d96   : > { %v7373_v57 = vpop.f32.mrf.mxu0 }
0x1d97   : > { %v7374_v1 = vadd.f32 %v7373_v57, %v7372_v52  ;;  %v6643_v4 = vpop.f32.mrf.mxu1 }
0x1d98   : > { %v7375_v58 = vpop.f32.mrf.mxu0 }
0x1d99   : > { %v6603_v60 = vadd.f32 %v7374_v1, %v7128_v54  ;;  %v7551_v61 = vpop.f32.mrf.mxu1 }
0x1d9a   : > { %v7376_v6 = vpop.f32.mrf.mxu0 }
0x1d9b   : > { %v6644_v3 = vadd.f32 %v6643_v4, %v6603_v60  ;;  %v7377_v40 = vadd.f32 %v7376_v6, %v7375_v58  ;;  %v6646_v5 = vpop.f32.mrf.mxu1 }
0x1d9d   : > { %v6606_v7 = vadd.f32 %v7377_v40, %v7128_v54  ;;  %v7552_v9 = vpop.f32.mrf.mxu1  ;;  %6652 = vrot.lane.b32.xlu0 %v6644_v3, %s9498_s18 }
0x1d9f   : > { %v6647_v0 = vadd.f32 %v6646_v5, %v6606_v7 }
0x1da1   : > { %6654 = vrot.lane.b32.xlu1 %v6647_v0, %s9498_s18 }
0x1e0f   : > { %v6653_v10 = vpop.permute.xlu0 %6652 }
0x1e10   : > { %6659 = vst.msk [vmem:[#allocation7] sm:$0xff] %vm6658_vm11, %v6653_v10 }
0x1e13   : > { %v6655_v8 = vpop.permute.xlu1 %6654 }
0x1e14   : > { %6660 = vst.msk [vmem:[#allocation7 + $0x8] sm:$0xff] %vm6658_vm11, %v6655_v8 }
0x1e17   : > { %v6661_v11 = vld [vmem:[#allocation7] sm:$0xff] }
0x1e1b   : > { %v6662_v12 = vld [vmem:[#allocation7 + $0x8] sm:$0xff] }
0x1e1c   : > { %v6664_v13 = vpack.c.bf16 %v6662_v12, %v6661_v11 }
0x1e1e   : > { %7558 = vmatmul.mubr.msk.bf16.vlgmr.msra.gmra.mxu0 %vm6687_vm1, %v6664_v13 }
0x1ede   : > { %v6725_v15 = vpop.f32.mrf.mxu0 }
0x1edf   : > { %v6726_v16 = vadd.f32 %v7150_v14, %v6725_v15 }
0x1ee0   : > { %v7559_v17 = vpop.f32.mrf.mxu0 }
0x1ee1   : > { %v6732_v18 = vsel %vm9514_vm6, %v6726_v16, -inf }
0x1ee2   : > { %6733 = vmax.xlane.f32.xlu0 %v6732_v18  ;;  %v6728_v19 = vpop.f32.mrf.mxu0 }
0x1ee3   : > { %v6729_v20 = vadd.f32 %v7150_v14, %v6728_v19 }
0x1ee4   : > { %v7560_v21 = vpop.f32.mrf.mxu0 }
0x1ee5   : > { %v6735_v22 = vsel %vm9515_vm14, %v6729_v20, -inf }
0x1ee6   : > { %6736 = vmax.xlane.f32.xlu1 %v6735_v22 }
0x1f6b   : > { %v6734_v23 = vpop.xlane.xlu0 %6733 }
0x1f6c   : > { %v6738_v24 = vsub.f32 %v6726_v16, %v6734_v23 }
0x1f6e   : > { %v6740_v25 = vmul.f32 1.442695, %v6738_v24 }
0x1f6f   : > { %v6737_v26 = vpop.xlane.xlu1 %6736 }
0x1f70   : > { %7853 = vpow2.f32 %v6740_v25  ;;  %v6739_v27 = vsub.f32 %v6729_v20, %v6737_v26 }
0x1f72   : > { %v6742_v28 = vmul.f32 1.442695, %v6739_v27 }
0x1f74   : > { %7855 = vpow2.f32 %v6742_v28 }
0x1f7d   : > { %v7854_v29 = vpop.eup %7853 }
0x1f7e   : > { %v6744_v30 = vsel %vm9516_vm4, %v7854_v29, 0.0 }
0x1f7f   : > { %6745 = vadd.xlane.f32.xlu0 %v6744_v30 }
0x1f81   : > { %v7856_v31 = vpop.eup %7855 }
0x1f82   : > { %v6747_v32 = vsel %vm9517_vm12, %v7856_v31, 0.0 }
0x1f83   : > { %6748 = vadd.xlane.f32.xlu0 %v6747_v32 }
0x2008   : > { %v6746_v33 = vpop.xlane.xlu0 %6745 }
0x2009   : > { %7857 = vlog2.f32 %v6746_v33 }
0x200c   : > { %v6749_v34 = vpop.xlane.xlu0 %6748 }
0x200d   : > { %7859 = vlog2.f32 %v6749_v34 }
0x2016   : > { %v7858_v35 = vpop.eup %7857 }
0x2017   : > { %v6751_v36 = vmul.f32 0.6931472, %v7858_v35 }
0x2019   : > { %v6754_v37 = vsub.f32 %v6738_v24, %v6751_v36 }
0x201a   : > { %v7860_v59 = vpop.eup %7859 }
0x201b   : > { %6756 = vst.msk [vmem:[%s1727_s23] sm:$0xff] %vm9519_vm5, %v6754_v37  ;;  %v6753_v38 = vmul.f32 0.6931472, %v7860_v59 }
0x201d   : > { %v6755_v39 = vsub.f32 %v6739_v27, %v6753_v38 }
0x201f   : > { %6757 = vst.msk [vmem:[%s1727_s23 + $0x8] sm:$0xff] %vm9520_vm3, %v6755_v39 }
0x2020 PF: > { %s128_s15 = sadd.s32 1, %s7897_s15  }
0x2021   : > { %p125_p1 = scmp.ge.s32.totalorder %s128_s15, 4  }
0x2023   :  { %127 = sbr.rel (!%p125_p1) target bundleno = 114 (0x72), region = 345 }
0x2028   :  { %6779 = vsyncpa [#allocation9], 1 }
0x2029   :  { %6781 = vsyncpa [#allocation9 + $0x1], 1 }

</bundles_post_ra>
